<compile_context>
chip_gen: v7x
topology: tpu7x:2x2x1
jax: 0.10.0
libtpu: 0.0.40
codegen_flags: <defaults>
</compile_context>

<pallas_src>
import functools

import numpy as np
import jax
import jax.numpy as jnp
from jax import lax
from jax.experimental import pallas as pl
from jax.experimental.pallas import tpu as pltpu

NEG_SLOPE = 0.01   # PyTorch LeakyReLU default
BN_EPS = 1e-5      # PyTorch BatchNorm2d default


# ---------------------------------------------------------------------------
# Host-side tiny constants.
# ---------------------------------------------------------------------------
def _make_masks_np(h, w):
    """(9, h*w) in-bounds mask for 3x3 stride-1 pad-1 conv taps (row-major)."""
    m = np.zeros((9, h * w), np.float32)
    for kh in range(3):
        for kw in range(3):
            s = kh * 3 + kw
            for ho in range(h):
                ih = ho + kh - 1
                if ih < 0 or ih >= h:
                    continue
                for wo in range(w):
                    iw = wo + kw - 1
                    if iw < 0 or iw >= w:
                        continue
                    m[s, ho * w + wo] = 1.0
    return m


def _make_subsample_np(h, w):
    """(h*w, (h//2)*(w//2)) 0/1 selection: keep even rows / even cols."""
    ho2, wo2 = h // 2, w // 2
    s = np.zeros((h * w, ho2 * wo2), np.float32)
    for ho in range(ho2):
        for wo in range(wo2):
            s[(2 * ho) * w + (2 * wo), ho * wo2 + wo] = 1.0
    return s


def _make_upsample_np(h, w):
    """(h*w, (2h)*(2w)) 0/1 nearest-neighbor 2x upsample (coarse -> fine)."""
    h2, w2 = 2 * h, 2 * w
    u = np.zeros((h * w, h2 * w2), np.float32)
    for ho in range(h2):
        for wo in range(w2):
            u[(ho // 2) * w + (wo // 2), ho * w2 + wo] = 1.0
    return u


# ---------------------------------------------------------------------------
# Fused Pallas kernel: whole UNet1 forward for one batch element.
# refs = (*inputs_in_`names`_order, out_ref); activations are (C, H*W) f32.
# ---------------------------------------------------------------------------
def _unet1_kernel(*refs, names, sizes):
    d = dict(zip(names, refs))
    o_ref = refs[len(names)]
    f32, bf16 = jnp.float32, jnp.bfloat16
    H, W = sizes
    h1, w1 = H // 2, W // 2
    h2, w2 = H // 4, W // 4

    def conv3x3_acc(a, lname, h, w):
        """Fused 3x3 stride-1 pad-1 conv (BN scale folded into weight).

        a: (Cin, h*w) f32.  Returns (acc (Cout, h*w) f32, bias (Cout, 1) f32).
        """
        hw = h * w
        cin = a.shape[0]
        mask = d["mask_%dx%d" % (h, w)][...]          # (9, hw) f32 0/1
        wt = d[lname + "_w"][...]                     # (Cout, 9*Cin) bf16
        b = d[lname + "_b"][...]                      # (Cout, 1) f32

        # Zero-pad the flat token axis by W+1 on each side: every tap becomes a
        # static lane slice; row OOB reads the zero pad, column wrap is killed
        # by the per-tap mask (only needed for kw != 1).
        pad = jnp.zeros((cin, w + 1), f32)
        a_pad = jnp.concatenate([pad, a, pad], axis=1)   # (Cin, hw + 2w + 2)

        taps = []
        for kh in range(3):
            for kw in range(3):
                s = kh * 3 + kw
                if s == 4:                               # center tap: identity
                    t = a
                else:
                    off = (w + 1) + (kh - 1) * w + (kw - 1)
                    t = a_pad[:, off:off + hw]
                    if kw != 1:                          # mask column wraparound
                        t = t * mask[s:s + 1, :]
                taps.append(t)
        a_all = jnp.concatenate(taps, axis=0).astype(bf16)   # (9*Cin, hw)
        acc = jnp.dot(wt, a_all, preferred_element_type=f32)  # (Cout, hw) f32
        return acc, b

    def leaky(y):
        return jnp.where(y >= 0.0, y, NEG_SLOPE * y)

    def cbl(a, lname, h, w):
        acc, b = conv3x3_acc(a, lname, h, w)
        return leaky(acc + b)

    def cbl_pool(a, lname, h, w, sel_name):
        # stride-2 conv == stride-1 conv then exact 0/1 subsample (f32, exact).
        acc, b = conv3x3_acc(a, lname, h, w)
        acc = jnp.dot(acc, d[sel_name][...], preferred_element_type=f32)
        return leaky(acc + b)

    x = d["x"][...]                                   # (Cin, H*W) f32

    c1 = cbl(x, "conv1", H, W)
    c2 = cbl(c1, "conv2", H, W)
    p1 = cbl_pool(c2, "pool1", H, W, "sub0")
    c3 = cbl(p1, "conv3", h1, w1)
    c4 = cbl(c3, "conv4", h1, w1)
    p2 = cbl_pool(c4, "pool2", h1, w1, "sub1")
    c5 = cbl(p2, "conv5", h2, w2)
    c6 = cbl(c5, "conv6", h2, w2)
    c7 = cbl(c6, "conv7", h2, w2)
    c8 = cbl(c7, "conv8", h2, w2)
    c9 = cbl(c8, "conv9", h2, w2)
    c10 = cbl(c9, "conv10", h2, w2)

    # concat(upsample(conv10), conv4): exact nearest 2x via one 0/1 matmul.
    up1 = jnp.dot(c10, d["up1"][...], preferred_element_type=f32)   # (32, h1*w1)
    c11 = cbl(jnp.concatenate([up1, c4], axis=0), "conv11", h1, w1)
    c12 = cbl(c11, "conv12", h1, w1)

    up0 = jnp.dot(c12, d["up0"][...], preferred_element_type=f32)   # (16, H*W)
    c13 = cbl(jnp.concatenate([up0, c2], axis=0), "conv13", H, W)
    c14 = cbl(c13, "conv14", H, W)

    # final 1x1 conv (f32) + numerically-stable sigmoid; (nc, H*W) lane-dense.
    logits = jnp.dot(d["final_w"][...], c14,
                     preferred_element_type=f32) + d["final_b"][...]
    o_ref[...] = 0.5 * (jnp.tanh(0.5 * logits) + 1.0)


# ---------------------------------------------------------------------------
# Wrapper: pack constants, one fused pallas_call over the batch.
# ---------------------------------------------------------------------------
_LAYER_NAMES = ["conv1", "conv2", "pool1", "conv3", "conv4", "pool2",
                "conv5", "conv6", "conv7", "conv8", "conv9", "conv10",
                "conv11", "conv12", "conv13", "conv14"]


@jax.jit
def unet1_forward(x_nchw, params):
    N, Cin, H, W = x_nchw.shape
    assert H % 4 == 0 and W % 4 == 0
    HW = H * W
    h1, w1 = H // 2, W // 2
    h2, w2 = H // 4, W // 4
    nc = params["final_w"].shape[1]

    x_tok = x_nchw.reshape(N, Cin, HW).astype(jnp.float32)   # NCHW -> (N, C, HW)

    names = ["x"]
    arrays = [x_tok]
    specs = [pl.BlockSpec((None, Cin, HW), lambda n: (n, 0, 0))]

    def add_const(name, arr, dtype):
        arr = jnp.asarray(arr, dtype)
        names.append(name)
        arrays.append(arr)
        zeros = (0,) * arr.ndim
        specs.append(pl.BlockSpec(arr.shape, lambda n, _z=zeros: _z))

    # tiny per-level boundary masks + subsample / upsample selection matrices
    add_const("mask_%dx%d" % (H, W), _make_masks_np(H, W), jnp.float32)
    add_const("mask_%dx%d" % (h1, w1), _make_masks_np(h1, w1), jnp.float32)
    add_const("mask_%dx%d" % (h2, w2), _make_masks_np(h2, w2), jnp.float32)
    add_const("sub0", _make_subsample_np(H, W), jnp.float32)
    add_const("sub1", _make_subsample_np(h1, w1), jnp.float32)
    add_const("up1", _make_upsample_np(h2, w2), jnp.float32)
    add_const("up0", _make_upsample_np(h1, w1), jnp.float32)

    # pack conv weights: fold BN scale, (9, cin, cout) -> (cout, 9*cin) bf16
    for lname in _LAYER_NAMES:
        w9, scale, bias = params[lname]
        cin, cout = w9.shape[1], w9.shape[2]
        w_fold = w9 * scale.reshape(1, 1, cout)
        w_pack = jnp.transpose(w_fold, (2, 0, 1)).reshape(cout, 9 * cin)
        add_const(lname + "_w", w_pack, jnp.bfloat16)
        add_const(lname + "_b", bias.reshape(cout, 1), jnp.float32)

    add_const("final_w", params["final_w"].T, jnp.float32)            # (nc, 8)
    add_const("final_b", params["final_b"].reshape(nc, 1), jnp.float32)

    kernel = functools.partial(_unet1_kernel, names=tuple(names), sizes=(H, W))
    out_tok = pl.pallas_call(
        kernel,
        out_shape=jax.ShapeDtypeStruct((N, nc, HW), jnp.float32),
        grid=(N,),
        in_specs=specs,
        out_specs=pl.BlockSpec((None, nc, HW), lambda n: (n, 0, 0)),
        compiler_params=pltpu.CompilerParams(
            dimension_semantics=("parallel",),
            vmem_limit_bytes=64 * 1024 * 1024),
    )(*arrays)

    return out_tok.reshape(N, nc, H, W)                               # NCHW


# ---------------------------------------------------------------------------
# Parameters (deterministic, synthetic); eval-mode BN folded into scale/bias.
# ---------------------------------------------------------------------------
_LAYER_DEFS = [
    ("conv1", None, 8), ("conv2", 8, 8), ("pool1", 8, 8),
    ("conv3", 8, 16), ("conv4", 16, 16), ("pool2", 16, 16),
    ("conv5", 16, 32), ("conv6", 32, 32), ("conv7", 32, 32),
    ("conv8", 32, 32), ("conv9", 32, 32), ("conv10", 32, 32),
    ("conv11", 48, 16), ("conv12", 16, 16),
    ("conv13", 24, 8), ("conv14", 8, 8),
]


def init_params(key, number_of_channels, number_of_classes):
    params = {}
    for name, cin, cout in _LAYER_DEFS:
        if cin is None:
            cin = number_of_channels
        key, k1, k2, k3, k4 = jax.random.split(key, 5)
        w = 0.1 * jax.random.normal(k1, (3, 3, cin, cout), jnp.float32)
        conv_b = 0.1 * jax.random.normal(k2, (cout,), jnp.float32)
        gamma = 1.0 + 0.1 * jax.random.normal(k3, (cout,), jnp.float32)
        beta = 0.1 * jax.random.normal(k4, (cout,), jnp.float32)
        running_mean = jnp.zeros((cout,), jnp.float32)
        running_var = jnp.ones((cout,), jnp.float32)
        scale = gamma / jnp.sqrt(running_var + BN_EPS)
        bias = (conv_b - running_mean) * scale + beta
        params[name] = (w.reshape(9, cin, cout),
                        scale.reshape(1, cout),
                        bias.reshape(1, cout))
    key, k1, k2 = jax.random.split(key, 3)
    params["final_w"] = 0.1 * jax.random.normal(
        k1, (8, number_of_classes), jnp.float32)
    params["final_b"] = 0.1 * jax.random.normal(
        k2, (number_of_classes,), jnp.float32)
    return params


# ---------------------------------------------------------------------------
# Pure-JAX reference (f32) for validation.
# ---------------------------------------------------------------------------
def _conv_ref(x, p, stride=1):
    w9, scale, bias = p
    cin, cout = w9.shape[1], w9.shape[2]
    w = w9.reshape(3, 3, cin, cout)
    y = lax.conv_general_dilated(
        x, w, window_strides=(stride, stride), padding=((1, 1), (1, 1)),
        dimension_numbers=("NHWC", "HWIO", "NHWC"))
    y = y * scale.reshape(1, 1, 1, cout) + bias.reshape(1, 1, 1, cout)
    return jnp.where(y >= 0.0, y, NEG_SLOPE * y)


def _up2_ref(x):
    return jnp.repeat(jnp.repeat(x, 2, axis=1), 2, axis=2)


def unet1_reference(x_nchw, params):
    x = jnp.transpose(x_nchw, (0, 2, 3, 1)).astype(jnp.float32)
    c1 = _conv_ref(x, params["conv1"])
    c2 = _conv_ref(c1, params["conv2"])
    p1 = _conv_ref(c2, params["pool1"], stride=2)
    c3 = _conv_ref(p1, params["conv3"])
    c4 = _conv_ref(c3, params["conv4"])
    p2 = _conv_ref(c4, params["pool2"], stride=2)
    c5 = _conv_ref(p2, params["conv5"])
    c6 = _conv_ref(c5, params["conv6"])
    c7 = _conv_ref(c6, params["conv7"])
    c8 = _conv_ref(c7, params["conv8"])
    c9 = _conv_ref(c8, params["conv9"])
    c10 = _conv_ref(c9, params["conv10"])
    c11 = _conv_ref(jnp.concatenate([_up2_ref(c10), c4], -1), params["conv11"])
    c12 = _conv_ref(c11, params["conv12"])
    c13 = _conv_ref(jnp.concatenate([_up2_ref(c12), c2], -1), params["conv13"])
    c14 = _conv_ref(c13, params["conv14"])
    logits = jnp.einsum("nhwc,co->nhwo", c14, params["final_w"]) + params["final_b"]
    out = jax.nn.sigmoid(logits)
    return jnp.transpose(out, (0, 3, 1, 2))


# ---------------------------------------------------------------------------
if __name__ == "__main__":
    number_of_channels = 4
    number_of_classes = 3
    batch, spatial = 2, 16

    key = jax.random.PRNGKey(0)
    k_in, k_par = jax.random.split(key)
    x = jax.random.normal(
        k_in, (batch, number_of_channels, spatial, spatial), jnp.float32)
    params = init_params(k_par, number_of_channels, number_of_classes)

    y = unet1_forward(x, params)
    y = jax.block_until_ready(y)

    assert y.shape == (batch, number_of_classes, spatial, spatial), y.shape
    assert bool(jnp.all(jnp.isfinite(y)))
    assert bool(jnp.all((y >= 0.0) & (y <= 1.0)))   # sigmoid range

    y_ref = unet1_reference(x, params)
    max_err = float(jnp.max(jnp.abs(y - y_ref)))
    assert max_err < 0.05, f"max abs diff vs f32 reference: {max_err}"

    print("KERNEL_OK")
</pallas_src>

<mosaic_0001>
module attributes {stable_mosaic.version = 11 : i64} {
  func.func @_unet1_kernel(%arg0: i32, %arg1: memref<1x4x256xf32, #tpu.memory_space<vmem>>, %arg2: memref<9x256xf32, #tpu.memory_space<vmem>>, %arg3: memref<9x64xf32, #tpu.memory_space<vmem>>, %arg4: memref<9x16xf32, #tpu.memory_space<vmem>>, %arg5: memref<256x64xf32, #tpu.memory_space<vmem>>, %arg6: memref<64x16xf32, #tpu.memory_space<vmem>>, %arg7: memref<16x64xf32, #tpu.memory_space<vmem>>, %arg8: memref<64x256xf32, #tpu.memory_space<vmem>>, %arg9: memref<8x36xbf16, #tpu.memory_space<vmem>>, %arg10: memref<8x1xf32, #tpu.memory_space<vmem>>, %arg11: memref<8x72xbf16, #tpu.memory_space<vmem>>, %arg12: memref<8x1xf32, #tpu.memory_space<vmem>>, %arg13: memref<8x72xbf16, #tpu.memory_space<vmem>>, %arg14: memref<8x1xf32, #tpu.memory_space<vmem>>, %arg15: memref<16x72xbf16, #tpu.memory_space<vmem>>, %arg16: memref<16x1xf32, #tpu.memory_space<vmem>>, %arg17: memref<16x144xbf16, #tpu.memory_space<vmem>>, %arg18: memref<16x1xf32, #tpu.memory_space<vmem>>, %arg19: memref<16x144xbf16, #tpu.memory_space<vmem>>, %arg20: memref<16x1xf32, #tpu.memory_space<vmem>>, %arg21: memref<32x144xbf16, #tpu.memory_space<vmem>>, %arg22: memref<32x1xf32, #tpu.memory_space<vmem>>, %arg23: memref<32x288xbf16, #tpu.memory_space<vmem>>, %arg24: memref<32x1xf32, #tpu.memory_space<vmem>>, %arg25: memref<32x288xbf16, #tpu.memory_space<vmem>>, %arg26: memref<32x1xf32, #tpu.memory_space<vmem>>, %arg27: memref<32x288xbf16, #tpu.memory_space<vmem>>, %arg28: memref<32x1xf32, #tpu.memory_space<vmem>>, %arg29: memref<32x288xbf16, #tpu.memory_space<vmem>>, %arg30: memref<32x1xf32, #tpu.memory_space<vmem>>, %arg31: memref<32x288xbf16, #tpu.memory_space<vmem>>, %arg32: memref<32x1xf32, #tpu.memory_space<vmem>>, %arg33: memref<16x432xbf16, #tpu.memory_space<vmem>>, %arg34: memref<16x1xf32, #tpu.memory_space<vmem>>, %arg35: memref<16x144xbf16, #tpu.memory_space<vmem>>, %arg36: memref<16x1xf32, #tpu.memory_space<vmem>>, %arg37: memref<8x216xbf16, #tpu.memory_space<vmem>>, %arg38: memref<8x1xf32, #tpu.memory_space<vmem>>, %arg39: memref<8x72xbf16, #tpu.memory_space<vmem>>, %arg40: memref<8x1xf32, #tpu.memory_space<vmem>>, %arg41: memref<3x8xf32, #tpu.memory_space<vmem>>, %arg42: memref<3x1xf32, #tpu.memory_space<vmem>>, %arg43: memref<1x3x256xf32, #tpu.memory_space<vmem>>) attributes {dimension_semantics = [#tpu.dimension_semantics<parallel>], iteration_bounds = array<i64: 2>, scalar_prefetch = 0 : i64, scratch_operands = 0 : i64, tpu.core_type = #tpu.core_type<tc>, window_params = [{transform_indices = @transform_0, window_bounds = array<i64: 1, 4, 256>}, {pipeline_mode = #tpu.pipeline_mode<synchronous>, transform_indices = @transform_1, window_bounds = array<i64: 9, 256>}, {pipeline_mode = #tpu.pipeline_mode<synchronous>, transform_indices = @transform_2, window_bounds = array<i64: 9, 64>}, {pipeline_mode = #tpu.pipeline_mode<synchronous>, transform_indices = @transform_3, window_bounds = array<i64: 9, 16>}, {pipeline_mode = #tpu.pipeline_mode<synchronous>, transform_indices = @transform_4, window_bounds = array<i64: 256, 64>}, {pipeline_mode = #tpu.pipeline_mode<synchronous>, transform_indices = @transform_5, window_bounds = array<i64: 64, 16>}, {pipeline_mode = #tpu.pipeline_mode<synchronous>, transform_indices = @transform_6, window_bounds = array<i64: 16, 64>}, {pipeline_mode = #tpu.pipeline_mode<synchronous>, transform_indices = @transform_7, window_bounds = array<i64: 64, 256>}, {pipeline_mode = #tpu.pipeline_mode<synchronous>, transform_indices = @transform_8, window_bounds = array<i64: 8, 36>}, {pipeline_mode = #tpu.pipeline_mode<synchronous>, transform_indices = @transform_9, window_bounds = array<i64: 8, 1>}, {pipeline_mode = #tpu.pipeline_mode<synchronous>, transform_indices = @transform_10, window_bounds = array<i64: 8, 72>}, {pipeline_mode = #tpu.pipeline_mode<synchronous>, transform_indices = @transform_11, window_bounds = array<i64: 8, 1>}, {pipeline_mode = #tpu.pipeline_mode<synchronous>, transform_indices = @transform_12, window_bounds = array<i64: 8, 72>}, {pipeline_mode = #tpu.pipeline_mode<synchronous>, transform_indices = @transform_13, window_bounds = array<i64: 8, 1>}, {pipeline_mode = #tpu.pipeline_mode<synchronous>, transform_indices = @transform_14, window_bounds = array<i64: 16, 72>}, {pipeline_mode = #tpu.pipeline_mode<synchronous>, transform_indices = @transform_15, window_bounds = array<i64: 16, 1>}, {pipeline_mode = #tpu.pipeline_mode<synchronous>, transform_indices = @transform_16, window_bounds = array<i64: 16, 144>}, {pipeline_mode = #tpu.pipeline_mode<synchronous>, transform_indices = @transform_17, window_bounds = array<i64: 16, 1>}, {pipeline_mode = #tpu.pipeline_mode<synchronous>, transform_indices = @transform_18, window_bounds = array<i64: 16, 144>}, {pipeline_mode = #tpu.pipeline_mode<synchronous>, transform_indices = @transform_19, window_bounds = array<i64: 16, 1>}, {pipeline_mode = #tpu.pipeline_mode<synchronous>, transform_indices = @transform_20, window_bounds = array<i64: 32, 144>}, {pipeline_mode = #tpu.pipeline_mode<synchronous>, transform_indices = @transform_21, window_bounds = array<i64: 32, 1>}, {pipeline_mode = #tpu.pipeline_mode<synchronous>, transform_indices = @transform_22, window_bounds = array<i64: 32, 288>}, {pipeline_mode = #tpu.pipeline_mode<synchronous>, transform_indices = @transform_23, window_bounds = array<i64: 32, 1>}, {pipeline_mode = #tpu.pipeline_mode<synchronous>, transform_indices = @transform_24, window_bounds = array<i64: 32, 288>}, {pipeline_mode = #tpu.pipeline_mode<synchronous>, transform_indices = @transform_25, window_bounds = array<i64: 32, 1>}, {pipeline_mode = #tpu.pipeline_mode<synchronous>, transform_indices = @transform_26, window_bounds = array<i64: 32, 288>}, {pipeline_mode = #tpu.pipeline_mode<synchronous>, transform_indices = @transform_27, window_bounds = array<i64: 32, 1>}, {pipeline_mode = #tpu.pipeline_mode<synchronous>, transform_indices = @transform_28, window_bounds = array<i64: 32, 288>}, {pipeline_mode = #tpu.pipeline_mode<synchronous>, transform_indices = @transform_29, window_bounds = array<i64: 32, 1>}, {pipeline_mode = #tpu.pipeline_mode<synchronous>, transform_indices = @transform_30, window_bounds = array<i64: 32, 288>}, {pipeline_mode = #tpu.pipeline_mode<synchronous>, transform_indices = @transform_31, window_bounds = array<i64: 32, 1>}, {pipeline_mode = #tpu.pipeline_mode<synchronous>, transform_indices = @transform_32, window_bounds = array<i64: 16, 432>}, {pipeline_mode = #tpu.pipeline_mode<synchronous>, transform_indices = @transform_33, window_bounds = array<i64: 16, 1>}, {pipeline_mode = #tpu.pipeline_mode<synchronous>, transform_indices = @transform_34, window_bounds = array<i64: 16, 144>}, {pipeline_mode = #tpu.pipeline_mode<synchronous>, transform_indices = @transform_35, window_bounds = array<i64: 16, 1>}, {pipeline_mode = #tpu.pipeline_mode<synchronous>, transform_indices = @transform_36, window_bounds = array<i64: 8, 216>}, {pipeline_mode = #tpu.pipeline_mode<synchronous>, transform_indices = @transform_37, window_bounds = array<i64: 8, 1>}, {pipeline_mode = #tpu.pipeline_mode<synchronous>, transform_indices = @transform_38, window_bounds = array<i64: 8, 72>}, {pipeline_mode = #tpu.pipeline_mode<synchronous>, transform_indices = @transform_39, window_bounds = array<i64: 8, 1>}, {pipeline_mode = #tpu.pipeline_mode<synchronous>, transform_indices = @transform_40, window_bounds = array<i64: 3, 8>}, {pipeline_mode = #tpu.pipeline_mode<synchronous>, transform_indices = @transform_41, window_bounds = array<i64: 3, 1>}, {transform_indices = @transform_42, window_bounds = array<i64: 1, 3, 256>}]} {
    %c0 = arith.constant 0 : index
    %c0_0 = arith.constant 0 : index
    %c0_1 = arith.constant 0 : index
    %0 = vector.load %arg1[%c0, %c0_0, %c0_1] : memref<1x4x256xf32, #tpu.memory_space<vmem>>, vector<1x4x256xf32>
    %1 = vector.shape_cast %0 : vector<1x4x256xf32> to vector<4x256xf32>
    %c0_2 = arith.constant 0 : index
    %c0_3 = arith.constant 0 : index
    %2 = vector.load %arg2[%c0_2, %c0_3] : memref<9x256xf32, #tpu.memory_space<vmem>>, vector<9x256xf32>
    %c0_4 = arith.constant 0 : index
    %c0_5 = arith.constant 0 : index
    %3 = vector.load %arg9[%c0_4, %c0_5] : memref<8x36xbf16, #tpu.memory_space<vmem>>, vector<8x36xbf16>
    %c0_6 = arith.constant 0 : index
    %c0_7 = arith.constant 0 : index
    %4 = vector.load %arg10[%c0_6, %c0_7] : memref<8x1xf32, #tpu.memory_space<vmem>>, vector<8x1xf32>
    %cst = arith.constant 0.000000e+00 : f32
    %5 = vector.broadcast %cst : f32 to vector<4x17xf32>
    %6 = tpu.concatenate %5, %1, %5 in 1 : vector<4x17xf32>, vector<4x256xf32>, vector<4x17xf32> -> vector<4x290xf32>
    %7 = vector.extract_strided_slice %6 {offsets = [0, 0], sizes = [4, 256], strides = [1, 1]} : vector<4x290xf32> to vector<4x256xf32>
    %8 = vector.extract_strided_slice %2 {offsets = [0, 0], sizes = [1, 256], strides = [1, 1]} : vector<9x256xf32> to vector<1x256xf32>
    %9 = vector.broadcast %8 : vector<1x256xf32> to vector<4x256xf32>
    %10 = arith.mulf %7, %9 : vector<4x256xf32>
    %11 = vector.extract_strided_slice %6 {offsets = [0, 1], sizes = [4, 256], strides = [1, 1]} : vector<4x290xf32> to vector<4x256xf32>
    %12 = vector.extract_strided_slice %6 {offsets = [0, 2], sizes = [4, 256], strides = [1, 1]} : vector<4x290xf32> to vector<4x256xf32>
    %13 = vector.extract_strided_slice %2 {offsets = [2, 0], sizes = [1, 256], strides = [1, 1]} : vector<9x256xf32> to vector<1x256xf32>
    %14 = vector.broadcast %13 : vector<1x256xf32> to vector<4x256xf32>
    %15 = arith.mulf %12, %14 : vector<4x256xf32>
    %16 = vector.extract_strided_slice %6 {offsets = [0, 16], sizes = [4, 256], strides = [1, 1]} : vector<4x290xf32> to vector<4x256xf32>
    %17 = vector.extract_strided_slice %2 {offsets = [3, 0], sizes = [1, 256], strides = [1, 1]} : vector<9x256xf32> to vector<1x256xf32>
    %18 = vector.broadcast %17 : vector<1x256xf32> to vector<4x256xf32>
    %19 = arith.mulf %16, %18 : vector<4x256xf32>
    %20 = vector.extract_strided_slice %6 {offsets = [0, 18], sizes = [4, 256], strides = [1, 1]} : vector<4x290xf32> to vector<4x256xf32>
    %21 = vector.extract_strided_slice %2 {offsets = [5, 0], sizes = [1, 256], strides = [1, 1]} : vector<9x256xf32> to vector<1x256xf32>
    %22 = vector.broadcast %21 : vector<1x256xf32> to vector<4x256xf32>
    %23 = arith.mulf %20, %22 : vector<4x256xf32>
    %24 = vector.extract_strided_slice %6 {offsets = [0, 32], sizes = [4, 256], strides = [1, 1]} : vector<4x290xf32> to vector<4x256xf32>
    %25 = vector.extract_strided_slice %2 {offsets = [6, 0], sizes = [1, 256], strides = [1, 1]} : vector<9x256xf32> to vector<1x256xf32>
    %26 = vector.broadcast %25 : vector<1x256xf32> to vector<4x256xf32>
    %27 = arith.mulf %24, %26 : vector<4x256xf32>
    %28 = vector.extract_strided_slice %6 {offsets = [0, 33], sizes = [4, 256], strides = [1, 1]} : vector<4x290xf32> to vector<4x256xf32>
    %29 = vector.extract_strided_slice %6 {offsets = [0, 34], sizes = [4, 256], strides = [1, 1]} : vector<4x290xf32> to vector<4x256xf32>
    %30 = vector.extract_strided_slice %2 {offsets = [8, 0], sizes = [1, 256], strides = [1, 1]} : vector<9x256xf32> to vector<1x256xf32>
    %31 = vector.broadcast %30 : vector<1x256xf32> to vector<4x256xf32>
    %32 = arith.mulf %29, %31 : vector<4x256xf32>
    %33 = tpu.concatenate %10, %11, %15, %19, %1, %23, %27, %28, %32 in 0 : vector<4x256xf32>, vector<4x256xf32>, vector<4x256xf32>, vector<4x256xf32>, vector<4x256xf32>, vector<4x256xf32>, vector<4x256xf32>, vector<4x256xf32>, vector<4x256xf32> -> vector<36x256xf32>
    %34 = arith.truncf %33 : vector<36x256xf32> to vector<36x256xbf16>
    %cst_8 = arith.constant dense<0.000000e+00> : vector<8x256xf32>
    %35 = tpu.matmul %3, %34, %cst_8 {dimension_numbers = #tpu.dot_dimension_numbers<[1], [0], [0], [1], [0, 0, 1, 1], [], []>} : vector<8x36xbf16>, vector<36x256xbf16>, vector<8x256xf32> -> vector<8x256xf32>
    %36 = vector.broadcast %4 : vector<8x1xf32> to vector<8x256xf32>
    %37 = arith.addf %35, %36 : vector<8x256xf32>
    %cst_9 = arith.constant 0.000000e+00 : f32
    %38 = vector.broadcast %cst_9 : f32 to vector<8x256xf32>
    %39 = arith.cmpf oge, %37, %38 : vector<8x256xf32>
    %cst_10 = arith.constant 0.00999999977 : f32
    %40 = vector.broadcast %cst_10 : f32 to vector<8x256xf32>
    %41 = arith.mulf %40, %37 : vector<8x256xf32>
    %42 = arith.select %39, %37, %41 : vector<8x256xi1>, vector<8x256xf32>
    %c0_11 = arith.constant 0 : index
    %c0_12 = arith.constant 0 : index
    %43 = vector.load %arg2[%c0_11, %c0_12] : memref<9x256xf32, #tpu.memory_space<vmem>>, vector<9x256xf32>
    %c0_13 = arith.constant 0 : index
    %c0_14 = arith.constant 0 : index
    %44 = vector.load %arg11[%c0_13, %c0_14] : memref<8x72xbf16, #tpu.memory_space<vmem>>, vector<8x72xbf16>
    %c0_15 = arith.constant 0 : index
    %c0_16 = arith.constant 0 : index
    %45 = vector.load %arg12[%c0_15, %c0_16] : memref<8x1xf32, #tpu.memory_space<vmem>>, vector<8x1xf32>
    %cst_17 = arith.constant 0.000000e+00 : f32
    %46 = vector.broadcast %cst_17 : f32 to vector<8x17xf32>
    %47 = tpu.concatenate %46, %42, %46 in 1 : vector<8x17xf32>, vector<8x256xf32>, vector<8x17xf32> -> vector<8x290xf32>
    %48 = vector.extract_strided_slice %47 {offsets = [0, 0], sizes = [8, 256], strides = [1, 1]} : vector<8x290xf32> to vector<8x256xf32>
    %49 = vector.extract_strided_slice %43 {offsets = [0, 0], sizes = [1, 256], strides = [1, 1]} : vector<9x256xf32> to vector<1x256xf32>
    %50 = vector.broadcast %49 : vector<1x256xf32> to vector<8x256xf32>
    %51 = arith.mulf %48, %50 : vector<8x256xf32>
    %52 = vector.extract_strided_slice %47 {offsets = [0, 1], sizes = [8, 256], strides = [1, 1]} : vector<8x290xf32> to vector<8x256xf32>
    %53 = vector.extract_strided_slice %47 {offsets = [0, 2], sizes = [8, 256], strides = [1, 1]} : vector<8x290xf32> to vector<8x256xf32>
    %54 = vector.extract_strided_slice %43 {offsets = [2, 0], sizes = [1, 256], strides = [1, 1]} : vector<9x256xf32> to vector<1x256xf32>
    %55 = vector.broadcast %54 : vector<1x256xf32> to vector<8x256xf32>
    %56 = arith.mulf %53, %55 : vector<8x256xf32>
    %57 = vector.extract_strided_slice %47 {offsets = [0, 16], sizes = [8, 256], strides = [1, 1]} : vector<8x290xf32> to vector<8x256xf32>
    %58 = vector.extract_strided_slice %43 {offsets = [3, 0], sizes = [1, 256], strides = [1, 1]} : vector<9x256xf32> to vector<1x256xf32>
    %59 = vector.broadcast %58 : vector<1x256xf32> to vector<8x256xf32>
    %60 = arith.mulf %57, %59 : vector<8x256xf32>
    %61 = vector.extract_strided_slice %47 {offsets = [0, 18], sizes = [8, 256], strides = [1, 1]} : vector<8x290xf32> to vector<8x256xf32>
    %62 = vector.extract_strided_slice %43 {offsets = [5, 0], sizes = [1, 256], strides = [1, 1]} : vector<9x256xf32> to vector<1x256xf32>
    %63 = vector.broadcast %62 : vector<1x256xf32> to vector<8x256xf32>
    %64 = arith.mulf %61, %63 : vector<8x256xf32>
    %65 = vector.extract_strided_slice %47 {offsets = [0, 32], sizes = [8, 256], strides = [1, 1]} : vector<8x290xf32> to vector<8x256xf32>
    %66 = vector.extract_strided_slice %43 {offsets = [6, 0], sizes = [1, 256], strides = [1, 1]} : vector<9x256xf32> to vector<1x256xf32>
    %67 = vector.broadcast %66 : vector<1x256xf32> to vector<8x256xf32>
    %68 = arith.mulf %65, %67 : vector<8x256xf32>
    %69 = vector.extract_strided_slice %47 {offsets = [0, 33], sizes = [8, 256], strides = [1, 1]} : vector<8x290xf32> to vector<8x256xf32>
    %70 = vector.extract_strided_slice %47 {offsets = [0, 34], sizes = [8, 256], strides = [1, 1]} : vector<8x290xf32> to vector<8x256xf32>
    %71 = vector.extract_strided_slice %43 {offsets = [8, 0], sizes = [1, 256], strides = [1, 1]} : vector<9x256xf32> to vector<1x256xf32>
    %72 = vector.broadcast %71 : vector<1x256xf32> to vector<8x256xf32>
    %73 = arith.mulf %70, %72 : vector<8x256xf32>
    %74 = tpu.concatenate %51, %52, %56, %60, %42, %64, %68, %69, %73 in 0 : vector<8x256xf32>, vector<8x256xf32>, vector<8x256xf32>, vector<8x256xf32>, vector<8x256xf32>, vector<8x256xf32>, vector<8x256xf32>, vector<8x256xf32>, vector<8x256xf32> -> vector<72x256xf32>
    %75 = arith.truncf %74 : vector<72x256xf32> to vector<72x256xbf16>
    %cst_18 = arith.constant dense<0.000000e+00> : vector<8x256xf32>
    %76 = tpu.matmul %44, %75, %cst_18 {dimension_numbers = #tpu.dot_dimension_numbers<[1], [0], [0], [1], [0, 0, 1, 1], [], []>} : vector<8x72xbf16>, vector<72x256xbf16>, vector<8x256xf32> -> vector<8x256xf32>
    %77 = vector.broadcast %45 : vector<8x1xf32> to vector<8x256xf32>
    %78 = arith.addf %76, %77 : vector<8x256xf32>
    %cst_19 = arith.constant 0.000000e+00 : f32
    %79 = vector.broadcast %cst_19 : f32 to vector<8x256xf32>
    %80 = arith.cmpf oge, %78, %79 : vector<8x256xf32>
    %cst_20 = arith.constant 0.00999999977 : f32
    %81 = vector.broadcast %cst_20 : f32 to vector<8x256xf32>
    %82 = arith.mulf %81, %78 : vector<8x256xf32>
    %83 = arith.select %80, %78, %82 : vector<8x256xi1>, vector<8x256xf32>
    %c0_21 = arith.constant 0 : index
    %c0_22 = arith.constant 0 : index
    %84 = vector.load %arg2[%c0_21, %c0_22] : memref<9x256xf32, #tpu.memory_space<vmem>>, vector<9x256xf32>
    %c0_23 = arith.constant 0 : index
    %c0_24 = arith.constant 0 : index
    %85 = vector.load %arg13[%c0_23, %c0_24] : memref<8x72xbf16, #tpu.memory_space<vmem>>, vector<8x72xbf16>
    %c0_25 = arith.constant 0 : index
    %c0_26 = arith.constant 0 : index
    %86 = vector.load %arg14[%c0_25, %c0_26] : memref<8x1xf32, #tpu.memory_space<vmem>>, vector<8x1xf32>
    %cst_27 = arith.constant 0.000000e+00 : f32
    %87 = vector.broadcast %cst_27 : f32 to vector<8x17xf32>
    %88 = tpu.concatenate %87, %83, %87 in 1 : vector<8x17xf32>, vector<8x256xf32>, vector<8x17xf32> -> vector<8x290xf32>
    %89 = vector.extract_strided_slice %88 {offsets = [0, 0], sizes = [8, 256], strides = [1, 1]} : vector<8x290xf32> to vector<8x256xf32>
    %90 = vector.extract_strided_slice %84 {offsets = [0, 0], sizes = [1, 256], strides = [1, 1]} : vector<9x256xf32> to vector<1x256xf32>
    %91 = vector.broadcast %90 : vector<1x256xf32> to vector<8x256xf32>
    %92 = arith.mulf %89, %91 : vector<8x256xf32>
    %93 = vector.extract_strided_slice %88 {offsets = [0, 1], sizes = [8, 256], strides = [1, 1]} : vector<8x290xf32> to vector<8x256xf32>
    %94 = vector.extract_strided_slice %88 {offsets = [0, 2], sizes = [8, 256], strides = [1, 1]} : vector<8x290xf32> to vector<8x256xf32>
    %95 = vector.extract_strided_slice %84 {offsets = [2, 0], sizes = [1, 256], strides = [1, 1]} : vector<9x256xf32> to vector<1x256xf32>
    %96 = vector.broadcast %95 : vector<1x256xf32> to vector<8x256xf32>
    %97 = arith.mulf %94, %96 : vector<8x256xf32>
    %98 = vector.extract_strided_slice %88 {offsets = [0, 16], sizes = [8, 256], strides = [1, 1]} : vector<8x290xf32> to vector<8x256xf32>
    %99 = vector.extract_strided_slice %84 {offsets = [3, 0], sizes = [1, 256], strides = [1, 1]} : vector<9x256xf32> to vector<1x256xf32>
    %100 = vector.broadcast %99 : vector<1x256xf32> to vector<8x256xf32>
    %101 = arith.mulf %98, %100 : vector<8x256xf32>
    %102 = vector.extract_strided_slice %88 {offsets = [0, 18], sizes = [8, 256], strides = [1, 1]} : vector<8x290xf32> to vector<8x256xf32>
    %103 = vector.extract_strided_slice %84 {offsets = [5, 0], sizes = [1, 256], strides = [1, 1]} : vector<9x256xf32> to vector<1x256xf32>
    %104 = vector.broadcast %103 : vector<1x256xf32> to vector<8x256xf32>
    %105 = arith.mulf %102, %104 : vector<8x256xf32>
    %106 = vector.extract_strided_slice %88 {offsets = [0, 32], sizes = [8, 256], strides = [1, 1]} : vector<8x290xf32> to vector<8x256xf32>
    %107 = vector.extract_strided_slice %84 {offsets = [6, 0], sizes = [1, 256], strides = [1, 1]} : vector<9x256xf32> to vector<1x256xf32>
    %108 = vector.broadcast %107 : vector<1x256xf32> to vector<8x256xf32>
    %109 = arith.mulf %106, %108 : vector<8x256xf32>
    %110 = vector.extract_strided_slice %88 {offsets = [0, 33], sizes = [8, 256], strides = [1, 1]} : vector<8x290xf32> to vector<8x256xf32>
    %111 = vector.extract_strided_slice %88 {offsets = [0, 34], sizes = [8, 256], strides = [1, 1]} : vector<8x290xf32> to vector<8x256xf32>
    %112 = vector.extract_strided_slice %84 {offsets = [8, 0], sizes = [1, 256], strides = [1, 1]} : vector<9x256xf32> to vector<1x256xf32>
    %113 = vector.broadcast %112 : vector<1x256xf32> to vector<8x256xf32>
    %114 = arith.mulf %111, %113 : vector<8x256xf32>
    %115 = tpu.concatenate %92, %93, %97, %101, %83, %105, %109, %110, %114 in 0 : vector<8x256xf32>, vector<8x256xf32>, vector<8x256xf32>, vector<8x256xf32>, vector<8x256xf32>, vector<8x256xf32>, vector<8x256xf32>, vector<8x256xf32>, vector<8x256xf32> -> vector<72x256xf32>
    %116 = arith.truncf %115 : vector<72x256xf32> to vector<72x256xbf16>
    %cst_28 = arith.constant dense<0.000000e+00> : vector<8x256xf32>
    %117 = tpu.matmul %85, %116, %cst_28 {dimension_numbers = #tpu.dot_dimension_numbers<[1], [0], [0], [1], [0, 0, 1, 1], [], []>} : vector<8x72xbf16>, vector<72x256xbf16>, vector<8x256xf32> -> vector<8x256xf32>
    %c0_29 = arith.constant 0 : index
    %c0_30 = arith.constant 0 : index
    %118 = vector.load %arg5[%c0_29, %c0_30] : memref<256x64xf32, #tpu.memory_space<vmem>>, vector<256x64xf32>
    %cst_31 = arith.constant dense<0.000000e+00> : vector<8x64xf32>
    %119 = tpu.matmul %117, %118, %cst_31 {dimension_numbers = #tpu.dot_dimension_numbers<[1], [0], [0], [1], [0, 0, 1, 1], [], []>} : vector<8x256xf32>, vector<256x64xf32>, vector<8x64xf32> -> vector<8x64xf32>
    %120 = vector.broadcast %86 : vector<8x1xf32> to vector<8x64xf32>
    %121 = arith.addf %119, %120 : vector<8x64xf32>
    %cst_32 = arith.constant 0.000000e+00 : f32
    %122 = vector.broadcast %cst_32 : f32 to vector<8x64xf32>
    %123 = arith.cmpf oge, %121, %122 : vector<8x64xf32>
    %cst_33 = arith.constant 0.00999999977 : f32
    %124 = vector.broadcast %cst_33 : f32 to vector<8x64xf32>
    %125 = arith.mulf %124, %121 : vector<8x64xf32>
    %126 = arith.select %123, %121, %125 : vector<8x64xi1>, vector<8x64xf32>
    %c0_34 = arith.constant 0 : index
    %c0_35 = arith.constant 0 : index
    %127 = vector.load %arg3[%c0_34, %c0_35] : memref<9x64xf32, #tpu.memory_space<vmem>>, vector<9x64xf32>
    %c0_36 = arith.constant 0 : index
    %c0_37 = arith.constant 0 : index
    %128 = vector.load %arg15[%c0_36, %c0_37] : memref<16x72xbf16, #tpu.memory_space<vmem>>, vector<16x72xbf16>
    %c0_38 = arith.constant 0 : index
    %c0_39 = arith.constant 0 : index
    %129 = vector.load %arg16[%c0_38, %c0_39] : memref<16x1xf32, #tpu.memory_space<vmem>>, vector<16x1xf32>
    %cst_40 = arith.constant 0.000000e+00 : f32
    %130 = vector.broadcast %cst_40 : f32 to vector<8x9xf32>
    %131 = tpu.concatenate %130, %126, %130 in 1 : vector<8x9xf32>, vector<8x64xf32>, vector<8x9xf32> -> vector<8x82xf32>
    %132 = vector.extract_strided_slice %131 {offsets = [0, 0], sizes = [8, 64], strides = [1, 1]} : vector<8x82xf32> to vector<8x64xf32>
    %133 = vector.extract_strided_slice %127 {offsets = [0, 0], sizes = [1, 64], strides = [1, 1]} : vector<9x64xf32> to vector<1x64xf32>
    %134 = vector.broadcast %133 : vector<1x64xf32> to vector<8x64xf32>
    %135 = arith.mulf %132, %134 : vector<8x64xf32>
    %136 = vector.extract_strided_slice %131 {offsets = [0, 1], sizes = [8, 64], strides = [1, 1]} : vector<8x82xf32> to vector<8x64xf32>
    %137 = vector.extract_strided_slice %131 {offsets = [0, 2], sizes = [8, 64], strides = [1, 1]} : vector<8x82xf32> to vector<8x64xf32>
    %138 = vector.extract_strided_slice %127 {offsets = [2, 0], sizes = [1, 64], strides = [1, 1]} : vector<9x64xf32> to vector<1x64xf32>
    %139 = vector.broadcast %138 : vector<1x64xf32> to vector<8x64xf32>
    %140 = arith.mulf %137, %139 : vector<8x64xf32>
    %141 = vector.extract_strided_slice %131 {offsets = [0, 8], sizes = [8, 64], strides = [1, 1]} : vector<8x82xf32> to vector<8x64xf32>
    %142 = vector.extract_strided_slice %127 {offsets = [3, 0], sizes = [1, 64], strides = [1, 1]} : vector<9x64xf32> to vector<1x64xf32>
    %143 = vector.broadcast %142 : vector<1x64xf32> to vector<8x64xf32>
    %144 = arith.mulf %141, %143 : vector<8x64xf32>
    %145 = vector.extract_strided_slice %131 {offsets = [0, 10], sizes = [8, 64], strides = [1, 1]} : vector<8x82xf32> to vector<8x64xf32>
    %146 = vector.extract_strided_slice %127 {offsets = [5, 0], sizes = [1, 64], strides = [1, 1]} : vector<9x64xf32> to vector<1x64xf32>
    %147 = vector.broadcast %146 : vector<1x64xf32> to vector<8x64xf32>
    %148 = arith.mulf %145, %147 : vector<8x64xf32>
    %149 = vector.extract_strided_slice %131 {offsets = [0, 16], sizes = [8, 64], strides = [1, 1]} : vector<8x82xf32> to vector<8x64xf32>
    %150 = vector.extract_strided_slice %127 {offsets = [6, 0], sizes = [1, 64], strides = [1, 1]} : vector<9x64xf32> to vector<1x64xf32>
    %151 = vector.broadcast %150 : vector<1x64xf32> to vector<8x64xf32>
    %152 = arith.mulf %149, %151 : vector<8x64xf32>
    %153 = vector.extract_strided_slice %131 {offsets = [0, 17], sizes = [8, 64], strides = [1, 1]} : vector<8x82xf32> to vector<8x64xf32>
    %154 = vector.extract_strided_slice %131 {offsets = [0, 18], sizes = [8, 64], strides = [1, 1]} : vector<8x82xf32> to vector<8x64xf32>
    %155 = vector.extract_strided_slice %127 {offsets = [8, 0], sizes = [1, 64], strides = [1, 1]} : vector<9x64xf32> to vector<1x64xf32>
    %156 = vector.broadcast %155 : vector<1x64xf32> to vector<8x64xf32>
    %157 = arith.mulf %154, %156 : vector<8x64xf32>
    %158 = tpu.concatenate %135, %136, %140, %144, %126, %148, %152, %153, %157 in 0 : vector<8x64xf32>, vector<8x64xf32>, vector<8x64xf32>, vector<8x64xf32>, vector<8x64xf32>, vector<8x64xf32>, vector<8x64xf32>, vector<8x64xf32>, vector<8x64xf32> -> vector<72x64xf32>
    %159 = arith.truncf %158 : vector<72x64xf32> to vector<72x64xbf16>
    %cst_41 = arith.constant dense<0.000000e+00> : vector<16x64xf32>
    %160 = tpu.matmul %128, %159, %cst_41 {dimension_numbers = #tpu.dot_dimension_numbers<[1], [0], [0], [1], [0, 0, 1, 1], [], []>} : vector<16x72xbf16>, vector<72x64xbf16>, vector<16x64xf32> -> vector<16x64xf32>
    %161 = vector.broadcast %129 : vector<16x1xf32> to vector<16x64xf32>
    %162 = arith.addf %160, %161 : vector<16x64xf32>
    %cst_42 = arith.constant 0.000000e+00 : f32
    %163 = vector.broadcast %cst_42 : f32 to vector<16x64xf32>
    %164 = arith.cmpf oge, %162, %163 : vector<16x64xf32>
    %cst_43 = arith.constant 0.00999999977 : f32
    %165 = vector.broadcast %cst_43 : f32 to vector<16x64xf32>
    %166 = arith.mulf %165, %162 : vector<16x64xf32>
    %167 = arith.select %164, %162, %166 : vector<16x64xi1>, vector<16x64xf32>
    %c0_44 = arith.constant 0 : index
    %c0_45 = arith.constant 0 : index
    %168 = vector.load %arg3[%c0_44, %c0_45] : memref<9x64xf32, #tpu.memory_space<vmem>>, vector<9x64xf32>
    %c0_46 = arith.constant 0 : index
    %c0_47 = arith.constant 0 : index
    %169 = vector.load %arg17[%c0_46, %c0_47] : memref<16x144xbf16, #tpu.memory_space<vmem>>, vector<16x144xbf16>
    %c0_48 = arith.constant 0 : index
    %c0_49 = arith.constant 0 : index
    %170 = vector.load %arg18[%c0_48, %c0_49] : memref<16x1xf32, #tpu.memory_space<vmem>>, vector<16x1xf32>
    %cst_50 = arith.constant 0.000000e+00 : f32
    %171 = vector.broadcast %cst_50 : f32 to vector<16x9xf32>
    %172 = tpu.concatenate %171, %167, %171 in 1 : vector<16x9xf32>, vector<16x64xf32>, vector<16x9xf32> -> vector<16x82xf32>
    %173 = vector.extract_strided_slice %172 {offsets = [0, 0], sizes = [16, 64], strides = [1, 1]} : vector<16x82xf32> to vector<16x64xf32>
    %174 = vector.extract_strided_slice %168 {offsets = [0, 0], sizes = [1, 64], strides = [1, 1]} : vector<9x64xf32> to vector<1x64xf32>
    %175 = vector.broadcast %174 : vector<1x64xf32> to vector<16x64xf32>
    %176 = arith.mulf %173, %175 : vector<16x64xf32>
    %177 = vector.extract_strided_slice %172 {offsets = [0, 1], sizes = [16, 64], strides = [1, 1]} : vector<16x82xf32> to vector<16x64xf32>
    %178 = vector.extract_strided_slice %172 {offsets = [0, 2], sizes = [16, 64], strides = [1, 1]} : vector<16x82xf32> to vector<16x64xf32>
    %179 = vector.extract_strided_slice %168 {offsets = [2, 0], sizes = [1, 64], strides = [1, 1]} : vector<9x64xf32> to vector<1x64xf32>
    %180 = vector.broadcast %179 : vector<1x64xf32> to vector<16x64xf32>
    %181 = arith.mulf %178, %180 : vector<16x64xf32>
    %182 = vector.extract_strided_slice %172 {offsets = [0, 8], sizes = [16, 64], strides = [1, 1]} : vector<16x82xf32> to vector<16x64xf32>
    %183 = vector.extract_strided_slice %168 {offsets = [3, 0], sizes = [1, 64], strides = [1, 1]} : vector<9x64xf32> to vector<1x64xf32>
    %184 = vector.broadcast %183 : vector<1x64xf32> to vector<16x64xf32>
    %185 = arith.mulf %182, %184 : vector<16x64xf32>
    %186 = vector.extract_strided_slice %172 {offsets = [0, 10], sizes = [16, 64], strides = [1, 1]} : vector<16x82xf32> to vector<16x64xf32>
    %187 = vector.extract_strided_slice %168 {offsets = [5, 0], sizes = [1, 64], strides = [1, 1]} : vector<9x64xf32> to vector<1x64xf32>
    %188 = vector.broadcast %187 : vector<1x64xf32> to vector<16x64xf32>
    %189 = arith.mulf %186, %188 : vector<16x64xf32>
    %190 = vector.extract_strided_slice %172 {offsets = [0, 16], sizes = [16, 64], strides = [1, 1]} : vector<16x82xf32> to vector<16x64xf32>
    %191 = vector.extract_strided_slice %168 {offsets = [6, 0], sizes = [1, 64], strides = [1, 1]} : vector<9x64xf32> to vector<1x64xf32>
    %192 = vector.broadcast %191 : vector<1x64xf32> to vector<16x64xf32>
    %193 = arith.mulf %190, %192 : vector<16x64xf32>
    %194 = vector.extract_strided_slice %172 {offsets = [0, 17], sizes = [16, 64], strides = [1, 1]} : vector<16x82xf32> to vector<16x64xf32>
    %195 = vector.extract_strided_slice %172 {offsets = [0, 18], sizes = [16, 64], strides = [1, 1]} : vector<16x82xf32> to vector<16x64xf32>
    %196 = vector.extract_strided_slice %168 {offsets = [8, 0], sizes = [1, 64], strides = [1, 1]} : vector<9x64xf32> to vector<1x64xf32>
    %197 = vector.broadcast %196 : vector<1x64xf32> to vector<16x64xf32>
    %198 = arith.mulf %195, %197 : vector<16x64xf32>
    %199 = tpu.concatenate %176, %177, %181, %185, %167, %189, %193, %194, %198 in 0 : vector<16x64xf32>, vector<16x64xf32>, vector<16x64xf32>, vector<16x64xf32>, vector<16x64xf32>, vector<16x64xf32>, vector<16x64xf32>, vector<16x64xf32>, vector<16x64xf32> -> vector<144x64xf32>
    %200 = arith.truncf %199 : vector<144x64xf32> to vector<144x64xbf16>
    %cst_51 = arith.constant dense<0.000000e+00> : vector<16x64xf32>
    %201 = tpu.matmul %169, %200, %cst_51 {dimension_numbers = #tpu.dot_dimension_numbers<[1], [0], [0], [1], [0, 0, 1, 1], [], []>} : vector<16x144xbf16>, vector<144x64xbf16>, vector<16x64xf32> -> vector<16x64xf32>
    %202 = vector.broadcast %170 : vector<16x1xf32> to vector<16x64xf32>
    %203 = arith.addf %201, %202 : vector<16x64xf32>
    %cst_52 = arith.constant 0.000000e+00 : f32
    %204 = vector.broadcast %cst_52 : f32 to vector<16x64xf32>
    %205 = arith.cmpf oge, %203, %204 : vector<16x64xf32>
    %cst_53 = arith.constant 0.00999999977 : f32
    %206 = vector.broadcast %cst_53 : f32 to vector<16x64xf32>
    %207 = arith.mulf %206, %203 : vector<16x64xf32>
    %208 = arith.select %205, %203, %207 : vector<16x64xi1>, vector<16x64xf32>
    %c0_54 = arith.constant 0 : index
    %c0_55 = arith.constant 0 : index
    %209 = vector.load %arg3[%c0_54, %c0_55] : memref<9x64xf32, #tpu.memory_space<vmem>>, vector<9x64xf32>
    %c0_56 = arith.constant 0 : index
    %c0_57 = arith.constant 0 : index
    %210 = vector.load %arg19[%c0_56, %c0_57] : memref<16x144xbf16, #tpu.memory_space<vmem>>, vector<16x144xbf16>
    %c0_58 = arith.constant 0 : index
    %c0_59 = arith.constant 0 : index
    %211 = vector.load %arg20[%c0_58, %c0_59] : memref<16x1xf32, #tpu.memory_space<vmem>>, vector<16x1xf32>
    %cst_60 = arith.constant 0.000000e+00 : f32
    %212 = vector.broadcast %cst_60 : f32 to vector<16x9xf32>
    %213 = tpu.concatenate %212, %208, %212 in 1 : vector<16x9xf32>, vector<16x64xf32>, vector<16x9xf32> -> vector<16x82xf32>
    %214 = vector.extract_strided_slice %213 {offsets = [0, 0], sizes = [16, 64], strides = [1, 1]} : vector<16x82xf32> to vector<16x64xf32>
    %215 = vector.extract_strided_slice %209 {offsets = [0, 0], sizes = [1, 64], strides = [1, 1]} : vector<9x64xf32> to vector<1x64xf32>
    %216 = vector.broadcast %215 : vector<1x64xf32> to vector<16x64xf32>
    %217 = arith.mulf %214, %216 : vector<16x64xf32>
    %218 = vector.extract_strided_slice %213 {offsets = [0, 1], sizes = [16, 64], strides = [1, 1]} : vector<16x82xf32> to vector<16x64xf32>
    %219 = vector.extract_strided_slice %213 {offsets = [0, 2], sizes = [16, 64], strides = [1, 1]} : vector<16x82xf32> to vector<16x64xf32>
    %220 = vector.extract_strided_slice %209 {offsets = [2, 0], sizes = [1, 64], strides = [1, 1]} : vector<9x64xf32> to vector<1x64xf32>
    %221 = vector.broadcast %220 : vector<1x64xf32> to vector<16x64xf32>
    %222 = arith.mulf %219, %221 : vector<16x64xf32>
    %223 = vector.extract_strided_slice %213 {offsets = [0, 8], sizes = [16, 64], strides = [1, 1]} : vector<16x82xf32> to vector<16x64xf32>
    %224 = vector.extract_strided_slice %209 {offsets = [3, 0], sizes = [1, 64], strides = [1, 1]} : vector<9x64xf32> to vector<1x64xf32>
    %225 = vector.broadcast %224 : vector<1x64xf32> to vector<16x64xf32>
    %226 = arith.mulf %223, %225 : vector<16x64xf32>
    %227 = vector.extract_strided_slice %213 {offsets = [0, 10], sizes = [16, 64], strides = [1, 1]} : vector<16x82xf32> to vector<16x64xf32>
    %228 = vector.extract_strided_slice %209 {offsets = [5, 0], sizes = [1, 64], strides = [1, 1]} : vector<9x64xf32> to vector<1x64xf32>
    %229 = vector.broadcast %228 : vector<1x64xf32> to vector<16x64xf32>
    %230 = arith.mulf %227, %229 : vector<16x64xf32>
    %231 = vector.extract_strided_slice %213 {offsets = [0, 16], sizes = [16, 64], strides = [1, 1]} : vector<16x82xf32> to vector<16x64xf32>
    %232 = vector.extract_strided_slice %209 {offsets = [6, 0], sizes = [1, 64], strides = [1, 1]} : vector<9x64xf32> to vector<1x64xf32>
    %233 = vector.broadcast %232 : vector<1x64xf32> to vector<16x64xf32>
    %234 = arith.mulf %231, %233 : vector<16x64xf32>
    %235 = vector.extract_strided_slice %213 {offsets = [0, 17], sizes = [16, 64], strides = [1, 1]} : vector<16x82xf32> to vector<16x64xf32>
    %236 = vector.extract_strided_slice %213 {offsets = [0, 18], sizes = [16, 64], strides = [1, 1]} : vector<16x82xf32> to vector<16x64xf32>
    %237 = vector.extract_strided_slice %209 {offsets = [8, 0], sizes = [1, 64], strides = [1, 1]} : vector<9x64xf32> to vector<1x64xf32>
    %238 = vector.broadcast %237 : vector<1x64xf32> to vector<16x64xf32>
    %239 = arith.mulf %236, %238 : vector<16x64xf32>
    %240 = tpu.concatenate %217, %218, %222, %226, %208, %230, %234, %235, %239 in 0 : vector<16x64xf32>, vector<16x64xf32>, vector<16x64xf32>, vector<16x64xf32>, vector<16x64xf32>, vector<16x64xf32>, vector<16x64xf32>, vector<16x64xf32>, vector<16x64xf32> -> vector<144x64xf32>
    %241 = arith.truncf %240 : vector<144x64xf32> to vector<144x64xbf16>
    %cst_61 = arith.constant dense<0.000000e+00> : vector<16x64xf32>
    %242 = tpu.matmul %210, %241, %cst_61 {dimension_numbers = #tpu.dot_dimension_numbers<[1], [0], [0], [1], [0, 0, 1, 1], [], []>} : vector<16x144xbf16>, vector<144x64xbf16>, vector<16x64xf32> -> vector<16x64xf32>
    %c0_62 = arith.constant 0 : index
    %c0_63 = arith.constant 0 : index
    %243 = vector.load %arg6[%c0_62, %c0_63] : memref<64x16xf32, #tpu.memory_space<vmem>>, vector<64x16xf32>
    %cst_64 = arith.constant dense<0.000000e+00> : vector<16x16xf32>
    %244 = tpu.matmul %242, %243, %cst_64 {dimension_numbers = #tpu.dot_dimension_numbers<[1], [0], [0], [1], [0, 0, 1, 1], [], []>} : vector<16x64xf32>, vector<64x16xf32>, vector<16x16xf32> -> vector<16x16xf32>
    %245 = vector.broadcast %211 : vector<16x1xf32> to vector<16x16xf32>
    %246 = arith.addf %244, %245 : vector<16x16xf32>
    %cst_65 = arith.constant 0.000000e+00 : f32
    %247 = vector.broadcast %cst_65 : f32 to vector<16x16xf32>
    %248 = arith.cmpf oge, %246, %247 : vector<16x16xf32>
    %cst_66 = arith.constant 0.00999999977 : f32
    %249 = vector.broadcast %cst_66 : f32 to vector<16x16xf32>
    %250 = arith.mulf %249, %246 : vector<16x16xf32>
    %251 = arith.select %248, %246, %250 : vector<16x16xi1>, vector<16x16xf32>
    %c0_67 = arith.constant 0 : index
    %c0_68 = arith.constant 0 : index
    %252 = vector.load %arg4[%c0_67, %c0_68] : memref<9x16xf32, #tpu.memory_space<vmem>>, vector<9x16xf32>
    %c0_69 = arith.constant 0 : index
    %c0_70 = arith.constant 0 : index
    %253 = vector.load %arg21[%c0_69, %c0_70] : memref<32x144xbf16, #tpu.memory_space<vmem>>, vector<32x144xbf16>
    %c0_71 = arith.constant 0 : index
    %c0_72 = arith.constant 0 : index
    %254 = vector.load %arg22[%c0_71, %c0_72] : memref<32x1xf32, #tpu.memory_space<vmem>>, vector<32x1xf32>
    %cst_73 = arith.constant 0.000000e+00 : f32
    %255 = vector.broadcast %cst_73 : f32 to vector<16x5xf32>
    %256 = tpu.concatenate %255, %251, %255 in 1 : vector<16x5xf32>, vector<16x16xf32>, vector<16x5xf32> -> vector<16x26xf32>
    %257 = vector.extract_strided_slice %256 {offsets = [0, 0], sizes = [16, 16], strides = [1, 1]} : vector<16x26xf32> to vector<16x16xf32>
    %258 = vector.extract_strided_slice %252 {offsets = [0, 0], sizes = [1, 16], strides = [1, 1]} : vector<9x16xf32> to vector<1x16xf32>
    %259 = vector.broadcast %258 : vector<1x16xf32> to vector<16x16xf32>
    %260 = arith.mulf %257, %259 : vector<16x16xf32>
    %261 = vector.extract_strided_slice %256 {offsets = [0, 1], sizes = [16, 16], strides = [1, 1]} : vector<16x26xf32> to vector<16x16xf32>
    %262 = vector.extract_strided_slice %256 {offsets = [0, 2], sizes = [16, 16], strides = [1, 1]} : vector<16x26xf32> to vector<16x16xf32>
    %263 = vector.extract_strided_slice %252 {offsets = [2, 0], sizes = [1, 16], strides = [1, 1]} : vector<9x16xf32> to vector<1x16xf32>
    %264 = vector.broadcast %263 : vector<1x16xf32> to vector<16x16xf32>
    %265 = arith.mulf %262, %264 : vector<16x16xf32>
    %266 = vector.extract_strided_slice %256 {offsets = [0, 4], sizes = [16, 16], strides = [1, 1]} : vector<16x26xf32> to vector<16x16xf32>
    %267 = vector.extract_strided_slice %252 {offsets = [3, 0], sizes = [1, 16], strides = [1, 1]} : vector<9x16xf32> to vector<1x16xf32>
    %268 = vector.broadcast %267 : vector<1x16xf32> to vector<16x16xf32>
    %269 = arith.mulf %266, %268 : vector<16x16xf32>
    %270 = vector.extract_strided_slice %256 {offsets = [0, 6], sizes = [16, 16], strides = [1, 1]} : vector<16x26xf32> to vector<16x16xf32>
    %271 = vector.extract_strided_slice %252 {offsets = [5, 0], sizes = [1, 16], strides = [1, 1]} : vector<9x16xf32> to vector<1x16xf32>
    %272 = vector.broadcast %271 : vector<1x16xf32> to vector<16x16xf32>
    %273 = arith.mulf %270, %272 : vector<16x16xf32>
    %274 = vector.extract_strided_slice %256 {offsets = [0, 8], sizes = [16, 16], strides = [1, 1]} : vector<16x26xf32> to vector<16x16xf32>
    %275 = vector.extract_strided_slice %252 {offsets = [6, 0], sizes = [1, 16], strides = [1, 1]} : vector<9x16xf32> to vector<1x16xf32>
    %276 = vector.broadcast %275 : vector<1x16xf32> to vector<16x16xf32>
    %277 = arith.mulf %274, %276 : vector<16x16xf32>
    %278 = vector.extract_strided_slice %256 {offsets = [0, 9], sizes = [16, 16], strides = [1, 1]} : vector<16x26xf32> to vector<16x16xf32>
    %279 = vector.extract_strided_slice %256 {offsets = [0, 10], sizes = [16, 16], strides = [1, 1]} : vector<16x26xf32> to vector<16x16xf32>
    %280 = vector.extract_strided_slice %252 {offsets = [8, 0], sizes = [1, 16], strides = [1, 1]} : vector<9x16xf32> to vector<1x16xf32>
    %281 = vector.broadcast %280 : vector<1x16xf32> to vector<16x16xf32>
    %282 = arith.mulf %279, %281 : vector<16x16xf32>
    %283 = tpu.concatenate %260, %261, %265, %269, %251, %273, %277, %278, %282 in 0 : vector<16x16xf32>, vector<16x16xf32>, vector<16x16xf32>, vector<16x16xf32>, vector<16x16xf32>, vector<16x16xf32>, vector<16x16xf32>, vector<16x16xf32>, vector<16x16xf32> -> vector<144x16xf32>
    %284 = arith.truncf %283 : vector<144x16xf32> to vector<144x16xbf16>
    %cst_74 = arith.constant dense<0.000000e+00> : vector<32x16xf32>
    %285 = tpu.matmul %253, %284, %cst_74 {dimension_numbers = #tpu.dot_dimension_numbers<[1], [0], [0], [1], [0, 0, 1, 1], [], []>} : vector<32x144xbf16>, vector<144x16xbf16>, vector<32x16xf32> -> vector<32x16xf32>
    %286 = vector.broadcast %254 : vector<32x1xf32> to vector<32x16xf32>
    %287 = arith.addf %285, %286 : vector<32x16xf32>
    %cst_75 = arith.constant 0.000000e+00 : f32
    %288 = vector.broadcast %cst_75 : f32 to vector<32x16xf32>
    %289 = arith.cmpf oge, %287, %288 : vector<32x16xf32>
    %cst_76 = arith.constant 0.00999999977 : f32
    %290 = vector.broadcast %cst_76 : f32 to vector<32x16xf32>
    %291 = arith.mulf %290, %287 : vector<32x16xf32>
    %292 = arith.select %289, %287, %291 : vector<32x16xi1>, vector<32x16xf32>
    %c0_77 = arith.constant 0 : index
    %c0_78 = arith.constant 0 : index
    %293 = vector.load %arg4[%c0_77, %c0_78] : memref<9x16xf32, #tpu.memory_space<vmem>>, vector<9x16xf32>
    %c0_79 = arith.constant 0 : index
    %c0_80 = arith.constant 0 : index
    %294 = vector.load %arg23[%c0_79, %c0_80] : memref<32x288xbf16, #tpu.memory_space<vmem>>, vector<32x288xbf16>
    %c0_81 = arith.constant 0 : index
    %c0_82 = arith.constant 0 : index
    %295 = vector.load %arg24[%c0_81, %c0_82] : memref<32x1xf32, #tpu.memory_space<vmem>>, vector<32x1xf32>
    %cst_83 = arith.constant 0.000000e+00 : f32
    %296 = vector.broadcast %cst_83 : f32 to vector<32x5xf32>
    %297 = tpu.concatenate %296, %292, %296 in 1 : vector<32x5xf32>, vector<32x16xf32>, vector<32x5xf32> -> vector<32x26xf32>
    %298 = vector.extract_strided_slice %297 {offsets = [0, 0], sizes = [32, 16], strides = [1, 1]} : vector<32x26xf32> to vector<32x16xf32>
    %299 = vector.extract_strided_slice %293 {offsets = [0, 0], sizes = [1, 16], strides = [1, 1]} : vector<9x16xf32> to vector<1x16xf32>
    %300 = vector.broadcast %299 : vector<1x16xf32> to vector<32x16xf32>
    %301 = arith.mulf %298, %300 : vector<32x16xf32>
    %302 = vector.extract_strided_slice %297 {offsets = [0, 1], sizes = [32, 16], strides = [1, 1]} : vector<32x26xf32> to vector<32x16xf32>
    %303 = vector.extract_strided_slice %297 {offsets = [0, 2], sizes = [32, 16], strides = [1, 1]} : vector<32x26xf32> to vector<32x16xf32>
    %304 = vector.extract_strided_slice %293 {offsets = [2, 0], sizes = [1, 16], strides = [1, 1]} : vector<9x16xf32> to vector<1x16xf32>
    %305 = vector.broadcast %304 : vector<1x16xf32> to vector<32x16xf32>
    %306 = arith.mulf %303, %305 : vector<32x16xf32>
    %307 = vector.extract_strided_slice %297 {offsets = [0, 4], sizes = [32, 16], strides = [1, 1]} : vector<32x26xf32> to vector<32x16xf32>
    %308 = vector.extract_strided_slice %293 {offsets = [3, 0], sizes = [1, 16], strides = [1, 1]} : vector<9x16xf32> to vector<1x16xf32>
    %309 = vector.broadcast %308 : vector<1x16xf32> to vector<32x16xf32>
    %310 = arith.mulf %307, %309 : vector<32x16xf32>
    %311 = vector.extract_strided_slice %297 {offsets = [0, 6], sizes = [32, 16], strides = [1, 1]} : vector<32x26xf32> to vector<32x16xf32>
    %312 = vector.extract_strided_slice %293 {offsets = [5, 0], sizes = [1, 16], strides = [1, 1]} : vector<9x16xf32> to vector<1x16xf32>
    %313 = vector.broadcast %312 : vector<1x16xf32> to vector<32x16xf32>
    %314 = arith.mulf %311, %313 : vector<32x16xf32>
    %315 = vector.extract_strided_slice %297 {offsets = [0, 8], sizes = [32, 16], strides = [1, 1]} : vector<32x26xf32> to vector<32x16xf32>
    %316 = vector.extract_strided_slice %293 {offsets = [6, 0], sizes = [1, 16], strides = [1, 1]} : vector<9x16xf32> to vector<1x16xf32>
    %317 = vector.broadcast %316 : vector<1x16xf32> to vector<32x16xf32>
    %318 = arith.mulf %315, %317 : vector<32x16xf32>
    %319 = vector.extract_strided_slice %297 {offsets = [0, 9], sizes = [32, 16], strides = [1, 1]} : vector<32x26xf32> to vector<32x16xf32>
    %320 = vector.extract_strided_slice %297 {offsets = [0, 10], sizes = [32, 16], strides = [1, 1]} : vector<32x26xf32> to vector<32x16xf32>
    %321 = vector.extract_strided_slice %293 {offsets = [8, 0], sizes = [1, 16], strides = [1, 1]} : vector<9x16xf32> to vector<1x16xf32>
    %322 = vector.broadcast %321 : vector<1x16xf32> to vector<32x16xf32>
    %323 = arith.mulf %320, %322 : vector<32x16xf32>
    %324 = tpu.concatenate %301, %302, %306, %310, %292, %314, %318, %319, %323 in 0 : vector<32x16xf32>, vector<32x16xf32>, vector<32x16xf32>, vector<32x16xf32>, vector<32x16xf32>, vector<32x16xf32>, vector<32x16xf32>, vector<32x16xf32>, vector<32x16xf32> -> vector<288x16xf32>
    %325 = arith.truncf %324 : vector<288x16xf32> to vector<288x16xbf16>
    %cst_84 = arith.constant dense<0.000000e+00> : vector<32x16xf32>
    %326 = tpu.matmul %294, %325, %cst_84 {dimension_numbers = #tpu.dot_dimension_numbers<[1], [0], [0], [1], [0, 0, 1, 1], [], []>} : vector<32x288xbf16>, vector<288x16xbf16>, vector<32x16xf32> -> vector<32x16xf32>
    %327 = vector.broadcast %295 : vector<32x1xf32> to vector<32x16xf32>
    %328 = arith.addf %326, %327 : vector<32x16xf32>
    %cst_85 = arith.constant 0.000000e+00 : f32
    %329 = vector.broadcast %cst_85 : f32 to vector<32x16xf32>
    %330 = arith.cmpf oge, %328, %329 : vector<32x16xf32>
    %cst_86 = arith.constant 0.00999999977 : f32
    %331 = vector.broadcast %cst_86 : f32 to vector<32x16xf32>
    %332 = arith.mulf %331, %328 : vector<32x16xf32>
    %333 = arith.select %330, %328, %332 : vector<32x16xi1>, vector<32x16xf32>
    %c0_87 = arith.constant 0 : index
    %c0_88 = arith.constant 0 : index
    %334 = vector.load %arg4[%c0_87, %c0_88] : memref<9x16xf32, #tpu.memory_space<vmem>>, vector<9x16xf32>
    %c0_89 = arith.constant 0 : index
    %c0_90 = arith.constant 0 : index
    %335 = vector.load %arg25[%c0_89, %c0_90] : memref<32x288xbf16, #tpu.memory_space<vmem>>, vector<32x288xbf16>
    %c0_91 = arith.constant 0 : index
    %c0_92 = arith.constant 0 : index
    %336 = vector.load %arg26[%c0_91, %c0_92] : memref<32x1xf32, #tpu.memory_space<vmem>>, vector<32x1xf32>
    %cst_93 = arith.constant 0.000000e+00 : f32
    %337 = vector.broadcast %cst_93 : f32 to vector<32x5xf32>
    %338 = tpu.concatenate %337, %333, %337 in 1 : vector<32x5xf32>, vector<32x16xf32>, vector<32x5xf32> -> vector<32x26xf32>
    %339 = vector.extract_strided_slice %338 {offsets = [0, 0], sizes = [32, 16], strides = [1, 1]} : vector<32x26xf32> to vector<32x16xf32>
    %340 = vector.extract_strided_slice %334 {offsets = [0, 0], sizes = [1, 16], strides = [1, 1]} : vector<9x16xf32> to vector<1x16xf32>
    %341 = vector.broadcast %340 : vector<1x16xf32> to vector<32x16xf32>
    %342 = arith.mulf %339, %341 : vector<32x16xf32>
    %343 = vector.extract_strided_slice %338 {offsets = [0, 1], sizes = [32, 16], strides = [1, 1]} : vector<32x26xf32> to vector<32x16xf32>
    %344 = vector.extract_strided_slice %338 {offsets = [0, 2], sizes = [32, 16], strides = [1, 1]} : vector<32x26xf32> to vector<32x16xf32>
    %345 = vector.extract_strided_slice %334 {offsets = [2, 0], sizes = [1, 16], strides = [1, 1]} : vector<9x16xf32> to vector<1x16xf32>
    %346 = vector.broadcast %345 : vector<1x16xf32> to vector<32x16xf32>
    %347 = arith.mulf %344, %346 : vector<32x16xf32>
    %348 = vector.extract_strided_slice %338 {offsets = [0, 4], sizes = [32, 16], strides = [1, 1]} : vector<32x26xf32> to vector<32x16xf32>
    %349 = vector.extract_strided_slice %334 {offsets = [3, 0], sizes = [1, 16], strides = [1, 1]} : vector<9x16xf32> to vector<1x16xf32>
    %350 = vector.broadcast %349 : vector<1x16xf32> to vector<32x16xf32>
    %351 = arith.mulf %348, %350 : vector<32x16xf32>
    %352 = vector.extract_strided_slice %338 {offsets = [0, 6], sizes = [32, 16], strides = [1, 1]} : vector<32x26xf32> to vector<32x16xf32>
    %353 = vector.extract_strided_slice %334 {offsets = [5, 0], sizes = [1, 16], strides = [1, 1]} : vector<9x16xf32> to vector<1x16xf32>
    %354 = vector.broadcast %353 : vector<1x16xf32> to vector<32x16xf32>
    %355 = arith.mulf %352, %354 : vector<32x16xf32>
    %356 = vector.extract_strided_slice %338 {offsets = [0, 8], sizes = [32, 16], strides = [1, 1]} : vector<32x26xf32> to vector<32x16xf32>
    %357 = vector.extract_strided_slice %334 {offsets = [6, 0], sizes = [1, 16], strides = [1, 1]} : vector<9x16xf32> to vector<1x16xf32>
    %358 = vector.broadcast %357 : vector<1x16xf32> to vector<32x16xf32>
    %359 = arith.mulf %356, %358 : vector<32x16xf32>
    %360 = vector.extract_strided_slice %338 {offsets = [0, 9], sizes = [32, 16], strides = [1, 1]} : vector<32x26xf32> to vector<32x16xf32>
    %361 = vector.extract_strided_slice %338 {offsets = [0, 10], sizes = [32, 16], strides = [1, 1]} : vector<32x26xf32> to vector<32x16xf32>
    %362 = vector.extract_strided_slice %334 {offsets = [8, 0], sizes = [1, 16], strides = [1, 1]} : vector<9x16xf32> to vector<1x16xf32>
    %363 = vector.broadcast %362 : vector<1x16xf32> to vector<32x16xf32>
    %364 = arith.mulf %361, %363 : vector<32x16xf32>
    %365 = tpu.concatenate %342, %343, %347, %351, %333, %355, %359, %360, %364 in 0 : vector<32x16xf32>, vector<32x16xf32>, vector<32x16xf32>, vector<32x16xf32>, vector<32x16xf32>, vector<32x16xf32>, vector<32x16xf32>, vector<32x16xf32>, vector<32x16xf32> -> vector<288x16xf32>
    %366 = arith.truncf %365 : vector<288x16xf32> to vector<288x16xbf16>
    %cst_94 = arith.constant dense<0.000000e+00> : vector<32x16xf32>
    %367 = tpu.matmul %335, %366, %cst_94 {dimension_numbers = #tpu.dot_dimension_numbers<[1], [0], [0], [1], [0, 0, 1, 1], [], []>} : vector<32x288xbf16>, vector<288x16xbf16>, vector<32x16xf32> -> vector<32x16xf32>
    %368 = vector.broadcast %336 : vector<32x1xf32> to vector<32x16xf32>
    %369 = arith.addf %367, %368 : vector<32x16xf32>
    %cst_95 = arith.constant 0.000000e+00 : f32
    %370 = vector.broadcast %cst_95 : f32 to vector<32x16xf32>
    %371 = arith.cmpf oge, %369, %370 : vector<32x16xf32>
    %cst_96 = arith.constant 0.00999999977 : f32
    %372 = vector.broadcast %cst_96 : f32 to vector<32x16xf32>
    %373 = arith.mulf %372, %369 : vector<32x16xf32>
    %374 = arith.select %371, %369, %373 : vector<32x16xi1>, vector<32x16xf32>
    %c0_97 = arith.constant 0 : index
    %c0_98 = arith.constant 0 : index
    %375 = vector.load %arg4[%c0_97, %c0_98] : memref<9x16xf32, #tpu.memory_space<vmem>>, vector<9x16xf32>
    %c0_99 = arith.constant 0 : index
    %c0_100 = arith.constant 0 : index
    %376 = vector.load %arg27[%c0_99, %c0_100] : memref<32x288xbf16, #tpu.memory_space<vmem>>, vector<32x288xbf16>
    %c0_101 = arith.constant 0 : index
    %c0_102 = arith.constant 0 : index
    %377 = vector.load %arg28[%c0_101, %c0_102] : memref<32x1xf32, #tpu.memory_space<vmem>>, vector<32x1xf32>
    %cst_103 = arith.constant 0.000000e+00 : f32
    %378 = vector.broadcast %cst_103 : f32 to vector<32x5xf32>
    %379 = tpu.concatenate %378, %374, %378 in 1 : vector<32x5xf32>, vector<32x16xf32>, vector<32x5xf32> -> vector<32x26xf32>
    %380 = vector.extract_strided_slice %379 {offsets = [0, 0], sizes = [32, 16], strides = [1, 1]} : vector<32x26xf32> to vector<32x16xf32>
    %381 = vector.extract_strided_slice %375 {offsets = [0, 0], sizes = [1, 16], strides = [1, 1]} : vector<9x16xf32> to vector<1x16xf32>
    %382 = vector.broadcast %381 : vector<1x16xf32> to vector<32x16xf32>
    %383 = arith.mulf %380, %382 : vector<32x16xf32>
    %384 = vector.extract_strided_slice %379 {offsets = [0, 1], sizes = [32, 16], strides = [1, 1]} : vector<32x26xf32> to vector<32x16xf32>
    %385 = vector.extract_strided_slice %379 {offsets = [0, 2], sizes = [32, 16], strides = [1, 1]} : vector<32x26xf32> to vector<32x16xf32>
    %386 = vector.extract_strided_slice %375 {offsets = [2, 0], sizes = [1, 16], strides = [1, 1]} : vector<9x16xf32> to vector<1x16xf32>
    %387 = vector.broadcast %386 : vector<1x16xf32> to vector<32x16xf32>
    %388 = arith.mulf %385, %387 : vector<32x16xf32>
    %389 = vector.extract_strided_slice %379 {offsets = [0, 4], sizes = [32, 16], strides = [1, 1]} : vector<32x26xf32> to vector<32x16xf32>
    %390 = vector.extract_strided_slice %375 {offsets = [3, 0], sizes = [1, 16], strides = [1, 1]} : vector<9x16xf32> to vector<1x16xf32>
    %391 = vector.broadcast %390 : vector<1x16xf32> to vector<32x16xf32>
    %392 = arith.mulf %389, %391 : vector<32x16xf32>
    %393 = vector.extract_strided_slice %379 {offsets = [0, 6], sizes = [32, 16], strides = [1, 1]} : vector<32x26xf32> to vector<32x16xf32>
    %394 = vector.extract_strided_slice %375 {offsets = [5, 0], sizes = [1, 16], strides = [1, 1]} : vector<9x16xf32> to vector<1x16xf32>
    %395 = vector.broadcast %394 : vector<1x16xf32> to vector<32x16xf32>
    %396 = arith.mulf %393, %395 : vector<32x16xf32>
    %397 = vector.extract_strided_slice %379 {offsets = [0, 8], sizes = [32, 16], strides = [1, 1]} : vector<32x26xf32> to vector<32x16xf32>
    %398 = vector.extract_strided_slice %375 {offsets = [6, 0], sizes = [1, 16], strides = [1, 1]} : vector<9x16xf32> to vector<1x16xf32>
    %399 = vector.broadcast %398 : vector<1x16xf32> to vector<32x16xf32>
    %400 = arith.mulf %397, %399 : vector<32x16xf32>
    %401 = vector.extract_strided_slice %379 {offsets = [0, 9], sizes = [32, 16], strides = [1, 1]} : vector<32x26xf32> to vector<32x16xf32>
    %402 = vector.extract_strided_slice %379 {offsets = [0, 10], sizes = [32, 16], strides = [1, 1]} : vector<32x26xf32> to vector<32x16xf32>
    %403 = vector.extract_strided_slice %375 {offsets = [8, 0], sizes = [1, 16], strides = [1, 1]} : vector<9x16xf32> to vector<1x16xf32>
    %404 = vector.broadcast %403 : vector<1x16xf32> to vector<32x16xf32>
    %405 = arith.mulf %402, %404 : vector<32x16xf32>
    %406 = tpu.concatenate %383, %384, %388, %392, %374, %396, %400, %401, %405 in 0 : vector<32x16xf32>, vector<32x16xf32>, vector<32x16xf32>, vector<32x16xf32>, vector<32x16xf32>, vector<32x16xf32>, vector<32x16xf32>, vector<32x16xf32>, vector<32x16xf32> -> vector<288x16xf32>
    %407 = arith.truncf %406 : vector<288x16xf32> to vector<288x16xbf16>
    %cst_104 = arith.constant dense<0.000000e+00> : vector<32x16xf32>
    %408 = tpu.matmul %376, %407, %cst_104 {dimension_numbers = #tpu.dot_dimension_numbers<[1], [0], [0], [1], [0, 0, 1, 1], [], []>} : vector<32x288xbf16>, vector<288x16xbf16>, vector<32x16xf32> -> vector<32x16xf32>
    %409 = vector.broadcast %377 : vector<32x1xf32> to vector<32x16xf32>
    %410 = arith.addf %408, %409 : vector<32x16xf32>
    %cst_105 = arith.constant 0.000000e+00 : f32
    %411 = vector.broadcast %cst_105 : f32 to vector<32x16xf32>
    %412 = arith.cmpf oge, %410, %411 : vector<32x16xf32>
    %cst_106 = arith.constant 0.00999999977 : f32
    %413 = vector.broadcast %cst_106 : f32 to vector<32x16xf32>
    %414 = arith.mulf %413, %410 : vector<32x16xf32>
    %415 = arith.select %412, %410, %414 : vector<32x16xi1>, vector<32x16xf32>
    %c0_107 = arith.constant 0 : index
    %c0_108 = arith.constant 0 : index
    %416 = vector.load %arg4[%c0_107, %c0_108] : memref<9x16xf32, #tpu.memory_space<vmem>>, vector<9x16xf32>
    %c0_109 = arith.constant 0 : index
    %c0_110 = arith.constant 0 : index
    %417 = vector.load %arg29[%c0_109, %c0_110] : memref<32x288xbf16, #tpu.memory_space<vmem>>, vector<32x288xbf16>
    %c0_111 = arith.constant 0 : index
    %c0_112 = arith.constant 0 : index
    %418 = vector.load %arg30[%c0_111, %c0_112] : memref<32x1xf32, #tpu.memory_space<vmem>>, vector<32x1xf32>
    %cst_113 = arith.constant 0.000000e+00 : f32
    %419 = vector.broadcast %cst_113 : f32 to vector<32x5xf32>
    %420 = tpu.concatenate %419, %415, %419 in 1 : vector<32x5xf32>, vector<32x16xf32>, vector<32x5xf32> -> vector<32x26xf32>
    %421 = vector.extract_strided_slice %420 {offsets = [0, 0], sizes = [32, 16], strides = [1, 1]} : vector<32x26xf32> to vector<32x16xf32>
    %422 = vector.extract_strided_slice %416 {offsets = [0, 0], sizes = [1, 16], strides = [1, 1]} : vector<9x16xf32> to vector<1x16xf32>
    %423 = vector.broadcast %422 : vector<1x16xf32> to vector<32x16xf32>
    %424 = arith.mulf %421, %423 : vector<32x16xf32>
    %425 = vector.extract_strided_slice %420 {offsets = [0, 1], sizes = [32, 16], strides = [1, 1]} : vector<32x26xf32> to vector<32x16xf32>
    %426 = vector.extract_strided_slice %420 {offsets = [0, 2], sizes = [32, 16], strides = [1, 1]} : vector<32x26xf32> to vector<32x16xf32>
    %427 = vector.extract_strided_slice %416 {offsets = [2, 0], sizes = [1, 16], strides = [1, 1]} : vector<9x16xf32> to vector<1x16xf32>
    %428 = vector.broadcast %427 : vector<1x16xf32> to vector<32x16xf32>
    %429 = arith.mulf %426, %428 : vector<32x16xf32>
    %430 = vector.extract_strided_slice %420 {offsets = [0, 4], sizes = [32, 16], strides = [1, 1]} : vector<32x26xf32> to vector<32x16xf32>
    %431 = vector.extract_strided_slice %416 {offsets = [3, 0], sizes = [1, 16], strides = [1, 1]} : vector<9x16xf32> to vector<1x16xf32>
    %432 = vector.broadcast %431 : vector<1x16xf32> to vector<32x16xf32>
    %433 = arith.mulf %430, %432 : vector<32x16xf32>
    %434 = vector.extract_strided_slice %420 {offsets = [0, 6], sizes = [32, 16], strides = [1, 1]} : vector<32x26xf32> to vector<32x16xf32>
    %435 = vector.extract_strided_slice %416 {offsets = [5, 0], sizes = [1, 16], strides = [1, 1]} : vector<9x16xf32> to vector<1x16xf32>
    %436 = vector.broadcast %435 : vector<1x16xf32> to vector<32x16xf32>
    %437 = arith.mulf %434, %436 : vector<32x16xf32>
    %438 = vector.extract_strided_slice %420 {offsets = [0, 8], sizes = [32, 16], strides = [1, 1]} : vector<32x26xf32> to vector<32x16xf32>
    %439 = vector.extract_strided_slice %416 {offsets = [6, 0], sizes = [1, 16], strides = [1, 1]} : vector<9x16xf32> to vector<1x16xf32>
    %440 = vector.broadcast %439 : vector<1x16xf32> to vector<32x16xf32>
    %441 = arith.mulf %438, %440 : vector<32x16xf32>
    %442 = vector.extract_strided_slice %420 {offsets = [0, 9], sizes = [32, 16], strides = [1, 1]} : vector<32x26xf32> to vector<32x16xf32>
    %443 = vector.extract_strided_slice %420 {offsets = [0, 10], sizes = [32, 16], strides = [1, 1]} : vector<32x26xf32> to vector<32x16xf32>
    %444 = vector.extract_strided_slice %416 {offsets = [8, 0], sizes = [1, 16], strides = [1, 1]} : vector<9x16xf32> to vector<1x16xf32>
    %445 = vector.broadcast %444 : vector<1x16xf32> to vector<32x16xf32>
    %446 = arith.mulf %443, %445 : vector<32x16xf32>
    %447 = tpu.concatenate %424, %425, %429, %433, %415, %437, %441, %442, %446 in 0 : vector<32x16xf32>, vector<32x16xf32>, vector<32x16xf32>, vector<32x16xf32>, vector<32x16xf32>, vector<32x16xf32>, vector<32x16xf32>, vector<32x16xf32>, vector<32x16xf32> -> vector<288x16xf32>
    %448 = arith.truncf %447 : vector<288x16xf32> to vector<288x16xbf16>
    %cst_114 = arith.constant dense<0.000000e+00> : vector<32x16xf32>
    %449 = tpu.matmul %417, %448, %cst_114 {dimension_numbers = #tpu.dot_dimension_numbers<[1], [0], [0], [1], [0, 0, 1, 1], [], []>} : vector<32x288xbf16>, vector<288x16xbf16>, vector<32x16xf32> -> vector<32x16xf32>
    %450 = vector.broadcast %418 : vector<32x1xf32> to vector<32x16xf32>
    %451 = arith.addf %449, %450 : vector<32x16xf32>
    %cst_115 = arith.constant 0.000000e+00 : f32
    %452 = vector.broadcast %cst_115 : f32 to vector<32x16xf32>
    %453 = arith.cmpf oge, %451, %452 : vector<32x16xf32>
    %cst_116 = arith.constant 0.00999999977 : f32
    %454 = vector.broadcast %cst_116 : f32 to vector<32x16xf32>
    %455 = arith.mulf %454, %451 : vector<32x16xf32>
    %456 = arith.select %453, %451, %455 : vector<32x16xi1>, vector<32x16xf32>
    %c0_117 = arith.constant 0 : index
    %c0_118 = arith.constant 0 : index
    %457 = vector.load %arg4[%c0_117, %c0_118] : memref<9x16xf32, #tpu.memory_space<vmem>>, vector<9x16xf32>
    %c0_119 = arith.constant 0 : index
    %c0_120 = arith.constant 0 : index
    %458 = vector.load %arg31[%c0_119, %c0_120] : memref<32x288xbf16, #tpu.memory_space<vmem>>, vector<32x288xbf16>
    %c0_121 = arith.constant 0 : index
    %c0_122 = arith.constant 0 : index
    %459 = vector.load %arg32[%c0_121, %c0_122] : memref<32x1xf32, #tpu.memory_space<vmem>>, vector<32x1xf32>
    %cst_123 = arith.constant 0.000000e+00 : f32
    %460 = vector.broadcast %cst_123 : f32 to vector<32x5xf32>
    %461 = tpu.concatenate %460, %456, %460 in 1 : vector<32x5xf32>, vector<32x16xf32>, vector<32x5xf32> -> vector<32x26xf32>
    %462 = vector.extract_strided_slice %461 {offsets = [0, 0], sizes = [32, 16], strides = [1, 1]} : vector<32x26xf32> to vector<32x16xf32>
    %463 = vector.extract_strided_slice %457 {offsets = [0, 0], sizes = [1, 16], strides = [1, 1]} : vector<9x16xf32> to vector<1x16xf32>
    %464 = vector.broadcast %463 : vector<1x16xf32> to vector<32x16xf32>
    %465 = arith.mulf %462, %464 : vector<32x16xf32>
    %466 = vector.extract_strided_slice %461 {offsets = [0, 1], sizes = [32, 16], strides = [1, 1]} : vector<32x26xf32> to vector<32x16xf32>
    %467 = vector.extract_strided_slice %461 {offsets = [0, 2], sizes = [32, 16], strides = [1, 1]} : vector<32x26xf32> to vector<32x16xf32>
    %468 = vector.extract_strided_slice %457 {offsets = [2, 0], sizes = [1, 16], strides = [1, 1]} : vector<9x16xf32> to vector<1x16xf32>
    %469 = vector.broadcast %468 : vector<1x16xf32> to vector<32x16xf32>
    %470 = arith.mulf %467, %469 : vector<32x16xf32>
    %471 = vector.extract_strided_slice %461 {offsets = [0, 4], sizes = [32, 16], strides = [1, 1]} : vector<32x26xf32> to vector<32x16xf32>
    %472 = vector.extract_strided_slice %457 {offsets = [3, 0], sizes = [1, 16], strides = [1, 1]} : vector<9x16xf32> to vector<1x16xf32>
    %473 = vector.broadcast %472 : vector<1x16xf32> to vector<32x16xf32>
    %474 = arith.mulf %471, %473 : vector<32x16xf32>
    %475 = vector.extract_strided_slice %461 {offsets = [0, 6], sizes = [32, 16], strides = [1, 1]} : vector<32x26xf32> to vector<32x16xf32>
    %476 = vector.extract_strided_slice %457 {offsets = [5, 0], sizes = [1, 16], strides = [1, 1]} : vector<9x16xf32> to vector<1x16xf32>
    %477 = vector.broadcast %476 : vector<1x16xf32> to vector<32x16xf32>
    %478 = arith.mulf %475, %477 : vector<32x16xf32>
    %479 = vector.extract_strided_slice %461 {offsets = [0, 8], sizes = [32, 16], strides = [1, 1]} : vector<32x26xf32> to vector<32x16xf32>
    %480 = vector.extract_strided_slice %457 {offsets = [6, 0], sizes = [1, 16], strides = [1, 1]} : vector<9x16xf32> to vector<1x16xf32>
    %481 = vector.broadcast %480 : vector<1x16xf32> to vector<32x16xf32>
    %482 = arith.mulf %479, %481 : vector<32x16xf32>
    %483 = vector.extract_strided_slice %461 {offsets = [0, 9], sizes = [32, 16], strides = [1, 1]} : vector<32x26xf32> to vector<32x16xf32>
    %484 = vector.extract_strided_slice %461 {offsets = [0, 10], sizes = [32, 16], strides = [1, 1]} : vector<32x26xf32> to vector<32x16xf32>
    %485 = vector.extract_strided_slice %457 {offsets = [8, 0], sizes = [1, 16], strides = [1, 1]} : vector<9x16xf32> to vector<1x16xf32>
    %486 = vector.broadcast %485 : vector<1x16xf32> to vector<32x16xf32>
    %487 = arith.mulf %484, %486 : vector<32x16xf32>
    %488 = tpu.concatenate %465, %466, %470, %474, %456, %478, %482, %483, %487 in 0 : vector<32x16xf32>, vector<32x16xf32>, vector<32x16xf32>, vector<32x16xf32>, vector<32x16xf32>, vector<32x16xf32>, vector<32x16xf32>, vector<32x16xf32>, vector<32x16xf32> -> vector<288x16xf32>
    %489 = arith.truncf %488 : vector<288x16xf32> to vector<288x16xbf16>
    %cst_124 = arith.constant dense<0.000000e+00> : vector<32x16xf32>
    %490 = tpu.matmul %458, %489, %cst_124 {dimension_numbers = #tpu.dot_dimension_numbers<[1], [0], [0], [1], [0, 0, 1, 1], [], []>} : vector<32x288xbf16>, vector<288x16xbf16>, vector<32x16xf32> -> vector<32x16xf32>
    %491 = vector.broadcast %459 : vector<32x1xf32> to vector<32x16xf32>
    %492 = arith.addf %490, %491 : vector<32x16xf32>
    %cst_125 = arith.constant 0.000000e+00 : f32
    %493 = vector.broadcast %cst_125 : f32 to vector<32x16xf32>
    %494 = arith.cmpf oge, %492, %493 : vector<32x16xf32>
    %cst_126 = arith.constant 0.00999999977 : f32
    %495 = vector.broadcast %cst_126 : f32 to vector<32x16xf32>
    %496 = arith.mulf %495, %492 : vector<32x16xf32>
    %497 = arith.select %494, %492, %496 : vector<32x16xi1>, vector<32x16xf32>
    %c0_127 = arith.constant 0 : index
    %c0_128 = arith.constant 0 : index
    %498 = vector.load %arg7[%c0_127, %c0_128] : memref<16x64xf32, #tpu.memory_space<vmem>>, vector<16x64xf32>
    %cst_129 = arith.constant dense<0.000000e+00> : vector<32x64xf32>
    %499 = tpu.matmul %497, %498, %cst_129 {dimension_numbers = #tpu.dot_dimension_numbers<[1], [0], [0], [1], [0, 0, 1, 1], [], []>} : vector<32x16xf32>, vector<16x64xf32>, vector<32x64xf32> -> vector<32x64xf32>
    %500 = tpu.concatenate %499, %208 in 0 : vector<32x64xf32>, vector<16x64xf32> -> vector<48x64xf32>
    %c0_130 = arith.constant 0 : index
    %c0_131 = arith.constant 0 : index
    %501 = vector.load %arg3[%c0_130, %c0_131] : memref<9x64xf32, #tpu.memory_space<vmem>>, vector<9x64xf32>
    %c0_132 = arith.constant 0 : index
    %c0_133 = arith.constant 0 : index
    %502 = vector.load %arg33[%c0_132, %c0_133] : memref<16x432xbf16, #tpu.memory_space<vmem>>, vector<16x432xbf16>
    %c0_134 = arith.constant 0 : index
    %c0_135 = arith.constant 0 : index
    %503 = vector.load %arg34[%c0_134, %c0_135] : memref<16x1xf32, #tpu.memory_space<vmem>>, vector<16x1xf32>
    %cst_136 = arith.constant 0.000000e+00 : f32
    %504 = vector.broadcast %cst_136 : f32 to vector<48x9xf32>
    %505 = tpu.concatenate %504, %500, %504 in 1 : vector<48x9xf32>, vector<48x64xf32>, vector<48x9xf32> -> vector<48x82xf32>
    %506 = vector.extract_strided_slice %505 {offsets = [0, 0], sizes = [48, 64], strides = [1, 1]} : vector<48x82xf32> to vector<48x64xf32>
    %507 = vector.extract_strided_slice %501 {offsets = [0, 0], sizes = [1, 64], strides = [1, 1]} : vector<9x64xf32> to vector<1x64xf32>
    %508 = vector.broadcast %507 : vector<1x64xf32> to vector<48x64xf32>
    %509 = arith.mulf %506, %508 : vector<48x64xf32>
    %510 = vector.extract_strided_slice %505 {offsets = [0, 1], sizes = [48, 64], strides = [1, 1]} : vector<48x82xf32> to vector<48x64xf32>
    %511 = vector.extract_strided_slice %505 {offsets = [0, 2], sizes = [48, 64], strides = [1, 1]} : vector<48x82xf32> to vector<48x64xf32>
    %512 = vector.extract_strided_slice %501 {offsets = [2, 0], sizes = [1, 64], strides = [1, 1]} : vector<9x64xf32> to vector<1x64xf32>
    %513 = vector.broadcast %512 : vector<1x64xf32> to vector<48x64xf32>
    %514 = arith.mulf %511, %513 : vector<48x64xf32>
    %515 = vector.extract_strided_slice %505 {offsets = [0, 8], sizes = [48, 64], strides = [1, 1]} : vector<48x82xf32> to vector<48x64xf32>
    %516 = vector.extract_strided_slice %501 {offsets = [3, 0], sizes = [1, 64], strides = [1, 1]} : vector<9x64xf32> to vector<1x64xf32>
    %517 = vector.broadcast %516 : vector<1x64xf32> to vector<48x64xf32>
    %518 = arith.mulf %515, %517 : vector<48x64xf32>
    %519 = vector.extract_strided_slice %505 {offsets = [0, 10], sizes = [48, 64], strides = [1, 1]} : vector<48x82xf32> to vector<48x64xf32>
    %520 = vector.extract_strided_slice %501 {offsets = [5, 0], sizes = [1, 64], strides = [1, 1]} : vector<9x64xf32> to vector<1x64xf32>
    %521 = vector.broadcast %520 : vector<1x64xf32> to vector<48x64xf32>
    %522 = arith.mulf %519, %521 : vector<48x64xf32>
    %523 = vector.extract_strided_slice %505 {offsets = [0, 16], sizes = [48, 64], strides = [1, 1]} : vector<48x82xf32> to vector<48x64xf32>
    %524 = vector.extract_strided_slice %501 {offsets = [6, 0], sizes = [1, 64], strides = [1, 1]} : vector<9x64xf32> to vector<1x64xf32>
    %525 = vector.broadcast %524 : vector<1x64xf32> to vector<48x64xf32>
    %526 = arith.mulf %523, %525 : vector<48x64xf32>
    %527 = vector.extract_strided_slice %505 {offsets = [0, 17], sizes = [48, 64], strides = [1, 1]} : vector<48x82xf32> to vector<48x64xf32>
    %528 = vector.extract_strided_slice %505 {offsets = [0, 18], sizes = [48, 64], strides = [1, 1]} : vector<48x82xf32> to vector<48x64xf32>
    %529 = vector.extract_strided_slice %501 {offsets = [8, 0], sizes = [1, 64], strides = [1, 1]} : vector<9x64xf32> to vector<1x64xf32>
    %530 = vector.broadcast %529 : vector<1x64xf32> to vector<48x64xf32>
    %531 = arith.mulf %528, %530 : vector<48x64xf32>
    %532 = tpu.concatenate %509, %510, %514, %518, %500, %522, %526, %527, %531 in 0 : vector<48x64xf32>, vector<48x64xf32>, vector<48x64xf32>, vector<48x64xf32>, vector<48x64xf32>, vector<48x64xf32>, vector<48x64xf32>, vector<48x64xf32>, vector<48x64xf32> -> vector<432x64xf32>
    %533 = arith.truncf %532 : vector<432x64xf32> to vector<432x64xbf16>
    %cst_137 = arith.constant dense<0.000000e+00> : vector<16x64xf32>
    %534 = tpu.matmul %502, %533, %cst_137 {dimension_numbers = #tpu.dot_dimension_numbers<[1], [0], [0], [1], [0, 0, 1, 1], [], []>} : vector<16x432xbf16>, vector<432x64xbf16>, vector<16x64xf32> -> vector<16x64xf32>
    %535 = vector.broadcast %503 : vector<16x1xf32> to vector<16x64xf32>
    %536 = arith.addf %534, %535 : vector<16x64xf32>
    %cst_138 = arith.constant 0.000000e+00 : f32
    %537 = vector.broadcast %cst_138 : f32 to vector<16x64xf32>
    %538 = arith.cmpf oge, %536, %537 : vector<16x64xf32>
    %cst_139 = arith.constant 0.00999999977 : f32
    %539 = vector.broadcast %cst_139 : f32 to vector<16x64xf32>
    %540 = arith.mulf %539, %536 : vector<16x64xf32>
    %541 = arith.select %538, %536, %540 : vector<16x64xi1>, vector<16x64xf32>
    %c0_140 = arith.constant 0 : index
    %c0_141 = arith.constant 0 : index
    %542 = vector.load %arg3[%c0_140, %c0_141] : memref<9x64xf32, #tpu.memory_space<vmem>>, vector<9x64xf32>
    %c0_142 = arith.constant 0 : index
    %c0_143 = arith.constant 0 : index
    %543 = vector.load %arg35[%c0_142, %c0_143] : memref<16x144xbf16, #tpu.memory_space<vmem>>, vector<16x144xbf16>
    %c0_144 = arith.constant 0 : index
    %c0_145 = arith.constant 0 : index
    %544 = vector.load %arg36[%c0_144, %c0_145] : memref<16x1xf32, #tpu.memory_space<vmem>>, vector<16x1xf32>
    %cst_146 = arith.constant 0.000000e+00 : f32
    %545 = vector.broadcast %cst_146 : f32 to vector<16x9xf32>
    %546 = tpu.concatenate %545, %541, %545 in 1 : vector<16x9xf32>, vector<16x64xf32>, vector<16x9xf32> -> vector<16x82xf32>
    %547 = vector.extract_strided_slice %546 {offsets = [0, 0], sizes = [16, 64], strides = [1, 1]} : vector<16x82xf32> to vector<16x64xf32>
    %548 = vector.extract_strided_slice %542 {offsets = [0, 0], sizes = [1, 64], strides = [1, 1]} : vector<9x64xf32> to vector<1x64xf32>
    %549 = vector.broadcast %548 : vector<1x64xf32> to vector<16x64xf32>
    %550 = arith.mulf %547, %549 : vector<16x64xf32>
    %551 = vector.extract_strided_slice %546 {offsets = [0, 1], sizes = [16, 64], strides = [1, 1]} : vector<16x82xf32> to vector<16x64xf32>
    %552 = vector.extract_strided_slice %546 {offsets = [0, 2], sizes = [16, 64], strides = [1, 1]} : vector<16x82xf32> to vector<16x64xf32>
    %553 = vector.extract_strided_slice %542 {offsets = [2, 0], sizes = [1, 64], strides = [1, 1]} : vector<9x64xf32> to vector<1x64xf32>
    %554 = vector.broadcast %553 : vector<1x64xf32> to vector<16x64xf32>
    %555 = arith.mulf %552, %554 : vector<16x64xf32>
    %556 = vector.extract_strided_slice %546 {offsets = [0, 8], sizes = [16, 64], strides = [1, 1]} : vector<16x82xf32> to vector<16x64xf32>
    %557 = vector.extract_strided_slice %542 {offsets = [3, 0], sizes = [1, 64], strides = [1, 1]} : vector<9x64xf32> to vector<1x64xf32>
    %558 = vector.broadcast %557 : vector<1x64xf32> to vector<16x64xf32>
    %559 = arith.mulf %556, %558 : vector<16x64xf32>
    %560 = vector.extract_strided_slice %546 {offsets = [0, 10], sizes = [16, 64], strides = [1, 1]} : vector<16x82xf32> to vector<16x64xf32>
    %561 = vector.extract_strided_slice %542 {offsets = [5, 0], sizes = [1, 64], strides = [1, 1]} : vector<9x64xf32> to vector<1x64xf32>
    %562 = vector.broadcast %561 : vector<1x64xf32> to vector<16x64xf32>
    %563 = arith.mulf %560, %562 : vector<16x64xf32>
    %564 = vector.extract_strided_slice %546 {offsets = [0, 16], sizes = [16, 64], strides = [1, 1]} : vector<16x82xf32> to vector<16x64xf32>
    %565 = vector.extract_strided_slice %542 {offsets = [6, 0], sizes = [1, 64], strides = [1, 1]} : vector<9x64xf32> to vector<1x64xf32>
    %566 = vector.broadcast %565 : vector<1x64xf32> to vector<16x64xf32>
    %567 = arith.mulf %564, %566 : vector<16x64xf32>
    %568 = vector.extract_strided_slice %546 {offsets = [0, 17], sizes = [16, 64], strides = [1, 1]} : vector<16x82xf32> to vector<16x64xf32>
    %569 = vector.extract_strided_slice %546 {offsets = [0, 18], sizes = [16, 64], strides = [1, 1]} : vector<16x82xf32> to vector<16x64xf32>
    %570 = vector.extract_strided_slice %542 {offsets = [8, 0], sizes = [1, 64], strides = [1, 1]} : vector<9x64xf32> to vector<1x64xf32>
    %571 = vector.broadcast %570 : vector<1x64xf32> to vector<16x64xf32>
    %572 = arith.mulf %569, %571 : vector<16x64xf32>
    %573 = tpu.concatenate %550, %551, %555, %559, %541, %563, %567, %568, %572 in 0 : vector<16x64xf32>, vector<16x64xf32>, vector<16x64xf32>, vector<16x64xf32>, vector<16x64xf32>, vector<16x64xf32>, vector<16x64xf32>, vector<16x64xf32>, vector<16x64xf32> -> vector<144x64xf32>
    %574 = arith.truncf %573 : vector<144x64xf32> to vector<144x64xbf16>
    %cst_147 = arith.constant dense<0.000000e+00> : vector<16x64xf32>
    %575 = tpu.matmul %543, %574, %cst_147 {dimension_numbers = #tpu.dot_dimension_numbers<[1], [0], [0], [1], [0, 0, 1, 1], [], []>} : vector<16x144xbf16>, vector<144x64xbf16>, vector<16x64xf32> -> vector<16x64xf32>
    %576 = vector.broadcast %544 : vector<16x1xf32> to vector<16x64xf32>
    %577 = arith.addf %575, %576 : vector<16x64xf32>
    %cst_148 = arith.constant 0.000000e+00 : f32
    %578 = vector.broadcast %cst_148 : f32 to vector<16x64xf32>
    %579 = arith.cmpf oge, %577, %578 : vector<16x64xf32>
    %cst_149 = arith.constant 0.00999999977 : f32
    %580 = vector.broadcast %cst_149 : f32 to vector<16x64xf32>
    %581 = arith.mulf %580, %577 : vector<16x64xf32>
    %582 = arith.select %579, %577, %581 : vector<16x64xi1>, vector<16x64xf32>
    %c0_150 = arith.constant 0 : index
    %c0_151 = arith.constant 0 : index
    %583 = vector.load %arg8[%c0_150, %c0_151] : memref<64x256xf32, #tpu.memory_space<vmem>>, vector<64x256xf32>
    %cst_152 = arith.constant dense<0.000000e+00> : vector<16x256xf32>
    %584 = tpu.matmul %582, %583, %cst_152 {dimension_numbers = #tpu.dot_dimension_numbers<[1], [0], [0], [1], [0, 0, 1, 1], [], []>} : vector<16x64xf32>, vector<64x256xf32>, vector<16x256xf32> -> vector<16x256xf32>
    %585 = tpu.concatenate %584, %83 in 0 : vector<16x256xf32>, vector<8x256xf32> -> vector<24x256xf32>
    %c0_153 = arith.constant 0 : index
    %c0_154 = arith.constant 0 : index
    %586 = vector.load %arg2[%c0_153, %c0_154] : memref<9x256xf32, #tpu.memory_space<vmem>>, vector<9x256xf32>
    %c0_155 = arith.constant 0 : index
    %c0_156 = arith.constant 0 : index
    %587 = vector.load %arg37[%c0_155, %c0_156] : memref<8x216xbf16, #tpu.memory_space<vmem>>, vector<8x216xbf16>
    %c0_157 = arith.constant 0 : index
    %c0_158 = arith.constant 0 : index
    %588 = vector.load %arg38[%c0_157, %c0_158] : memref<8x1xf32, #tpu.memory_space<vmem>>, vector<8x1xf32>
    %cst_159 = arith.constant 0.000000e+00 : f32
    %589 = vector.broadcast %cst_159 : f32 to vector<24x17xf32>
    %590 = tpu.concatenate %589, %585, %589 in 1 : vector<24x17xf32>, vector<24x256xf32>, vector<24x17xf32> -> vector<24x290xf32>
    %591 = vector.extract_strided_slice %590 {offsets = [0, 0], sizes = [24, 256], strides = [1, 1]} : vector<24x290xf32> to vector<24x256xf32>
    %592 = vector.extract_strided_slice %586 {offsets = [0, 0], sizes = [1, 256], strides = [1, 1]} : vector<9x256xf32> to vector<1x256xf32>
    %593 = vector.broadcast %592 : vector<1x256xf32> to vector<24x256xf32>
    %594 = arith.mulf %591, %593 : vector<24x256xf32>
    %595 = vector.extract_strided_slice %590 {offsets = [0, 1], sizes = [24, 256], strides = [1, 1]} : vector<24x290xf32> to vector<24x256xf32>
    %596 = vector.extract_strided_slice %590 {offsets = [0, 2], sizes = [24, 256], strides = [1, 1]} : vector<24x290xf32> to vector<24x256xf32>
    %597 = vector.extract_strided_slice %586 {offsets = [2, 0], sizes = [1, 256], strides = [1, 1]} : vector<9x256xf32> to vector<1x256xf32>
    %598 = vector.broadcast %597 : vector<1x256xf32> to vector<24x256xf32>
    %599 = arith.mulf %596, %598 : vector<24x256xf32>
    %600 = vector.extract_strided_slice %590 {offsets = [0, 16], sizes = [24, 256], strides = [1, 1]} : vector<24x290xf32> to vector<24x256xf32>
    %601 = vector.extract_strided_slice %586 {offsets = [3, 0], sizes = [1, 256], strides = [1, 1]} : vector<9x256xf32> to vector<1x256xf32>
    %602 = vector.broadcast %601 : vector<1x256xf32> to vector<24x256xf32>
    %603 = arith.mulf %600, %602 : vector<24x256xf32>
    %604 = vector.extract_strided_slice %590 {offsets = [0, 18], sizes = [24, 256], strides = [1, 1]} : vector<24x290xf32> to vector<24x256xf32>
    %605 = vector.extract_strided_slice %586 {offsets = [5, 0], sizes = [1, 256], strides = [1, 1]} : vector<9x256xf32> to vector<1x256xf32>
    %606 = vector.broadcast %605 : vector<1x256xf32> to vector<24x256xf32>
    %607 = arith.mulf %604, %606 : vector<24x256xf32>
    %608 = vector.extract_strided_slice %590 {offsets = [0, 32], sizes = [24, 256], strides = [1, 1]} : vector<24x290xf32> to vector<24x256xf32>
    %609 = vector.extract_strided_slice %586 {offsets = [6, 0], sizes = [1, 256], strides = [1, 1]} : vector<9x256xf32> to vector<1x256xf32>
    %610 = vector.broadcast %609 : vector<1x256xf32> to vector<24x256xf32>
    %611 = arith.mulf %608, %610 : vector<24x256xf32>
    %612 = vector.extract_strided_slice %590 {offsets = [0, 33], sizes = [24, 256], strides = [1, 1]} : vector<24x290xf32> to vector<24x256xf32>
    %613 = vector.extract_strided_slice %590 {offsets = [0, 34], sizes = [24, 256], strides = [1, 1]} : vector<24x290xf32> to vector<24x256xf32>
    %614 = vector.extract_strided_slice %586 {offsets = [8, 0], sizes = [1, 256], strides = [1, 1]} : vector<9x256xf32> to vector<1x256xf32>
    %615 = vector.broadcast %614 : vector<1x256xf32> to vector<24x256xf32>
    %616 = arith.mulf %613, %615 : vector<24x256xf32>
    %617 = tpu.concatenate %594, %595, %599, %603, %585, %607, %611, %612, %616 in 0 : vector<24x256xf32>, vector<24x256xf32>, vector<24x256xf32>, vector<24x256xf32>, vector<24x256xf32>, vector<24x256xf32>, vector<24x256xf32>, vector<24x256xf32>, vector<24x256xf32> -> vector<216x256xf32>
    %618 = arith.truncf %617 : vector<216x256xf32> to vector<216x256xbf16>
    %cst_160 = arith.constant dense<0.000000e+00> : vector<8x256xf32>
    %619 = tpu.matmul %587, %618, %cst_160 {dimension_numbers = #tpu.dot_dimension_numbers<[1], [0], [0], [1], [0, 0, 1, 1], [], []>} : vector<8x216xbf16>, vector<216x256xbf16>, vector<8x256xf32> -> vector<8x256xf32>
    %620 = vector.broadcast %588 : vector<8x1xf32> to vector<8x256xf32>
    %621 = arith.addf %619, %620 : vector<8x256xf32>
    %cst_161 = arith.constant 0.000000e+00 : f32
    %622 = vector.broadcast %cst_161 : f32 to vector<8x256xf32>
    %623 = arith.cmpf oge, %621, %622 : vector<8x256xf32>
    %cst_162 = arith.constant 0.00999999977 : f32
    %624 = vector.broadcast %cst_162 : f32 to vector<8x256xf32>
    %625 = arith.mulf %624, %621 : vector<8x256xf32>
    %626 = arith.select %623, %621, %625 : vector<8x256xi1>, vector<8x256xf32>
    %c0_163 = arith.constant 0 : index
    %c0_164 = arith.constant 0 : index
    %627 = vector.load %arg2[%c0_163, %c0_164] : memref<9x256xf32, #tpu.memory_space<vmem>>, vector<9x256xf32>
    %c0_165 = arith.constant 0 : index
    %c0_166 = arith.constant 0 : index
    %628 = vector.load %arg39[%c0_165, %c0_166] : memref<8x72xbf16, #tpu.memory_space<vmem>>, vector<8x72xbf16>
    %c0_167 = arith.constant 0 : index
    %c0_168 = arith.constant 0 : index
    %629 = vector.load %arg40[%c0_167, %c0_168] : memref<8x1xf32, #tpu.memory_space<vmem>>, vector<8x1xf32>
    %cst_169 = arith.constant 0.000000e+00 : f32
    %630 = vector.broadcast %cst_169 : f32 to vector<8x17xf32>
    %631 = tpu.concatenate %630, %626, %630 in 1 : vector<8x17xf32>, vector<8x256xf32>, vector<8x17xf32> -> vector<8x290xf32>
    %632 = vector.extract_strided_slice %631 {offsets = [0, 0], sizes = [8, 256], strides = [1, 1]} : vector<8x290xf32> to vector<8x256xf32>
    %633 = vector.extract_strided_slice %627 {offsets = [0, 0], sizes = [1, 256], strides = [1, 1]} : vector<9x256xf32> to vector<1x256xf32>
    %634 = vector.broadcast %633 : vector<1x256xf32> to vector<8x256xf32>
    %635 = arith.mulf %632, %634 : vector<8x256xf32>
    %636 = vector.extract_strided_slice %631 {offsets = [0, 1], sizes = [8, 256], strides = [1, 1]} : vector<8x290xf32> to vector<8x256xf32>
    %637 = vector.extract_strided_slice %631 {offsets = [0, 2], sizes = [8, 256], strides = [1, 1]} : vector<8x290xf32> to vector<8x256xf32>
    %638 = vector.extract_strided_slice %627 {offsets = [2, 0], sizes = [1, 256], strides = [1, 1]} : vector<9x256xf32> to vector<1x256xf32>
    %639 = vector.broadcast %638 : vector<1x256xf32> to vector<8x256xf32>
    %640 = arith.mulf %637, %639 : vector<8x256xf32>
    %641 = vector.extract_strided_slice %631 {offsets = [0, 16], sizes = [8, 256], strides = [1, 1]} : vector<8x290xf32> to vector<8x256xf32>
    %642 = vector.extract_strided_slice %627 {offsets = [3, 0], sizes = [1, 256], strides = [1, 1]} : vector<9x256xf32> to vector<1x256xf32>
    %643 = vector.broadcast %642 : vector<1x256xf32> to vector<8x256xf32>
    %644 = arith.mulf %641, %643 : vector<8x256xf32>
    %645 = vector.extract_strided_slice %631 {offsets = [0, 18], sizes = [8, 256], strides = [1, 1]} : vector<8x290xf32> to vector<8x256xf32>
    %646 = vector.extract_strided_slice %627 {offsets = [5, 0], sizes = [1, 256], strides = [1, 1]} : vector<9x256xf32> to vector<1x256xf32>
    %647 = vector.broadcast %646 : vector<1x256xf32> to vector<8x256xf32>
    %648 = arith.mulf %645, %647 : vector<8x256xf32>
    %649 = vector.extract_strided_slice %631 {offsets = [0, 32], sizes = [8, 256], strides = [1, 1]} : vector<8x290xf32> to vector<8x256xf32>
    %650 = vector.extract_strided_slice %627 {offsets = [6, 0], sizes = [1, 256], strides = [1, 1]} : vector<9x256xf32> to vector<1x256xf32>
    %651 = vector.broadcast %650 : vector<1x256xf32> to vector<8x256xf32>
    %652 = arith.mulf %649, %651 : vector<8x256xf32>
    %653 = vector.extract_strided_slice %631 {offsets = [0, 33], sizes = [8, 256], strides = [1, 1]} : vector<8x290xf32> to vector<8x256xf32>
    %654 = vector.extract_strided_slice %631 {offsets = [0, 34], sizes = [8, 256], strides = [1, 1]} : vector<8x290xf32> to vector<8x256xf32>
    %655 = vector.extract_strided_slice %627 {offsets = [8, 0], sizes = [1, 256], strides = [1, 1]} : vector<9x256xf32> to vector<1x256xf32>
    %656 = vector.broadcast %655 : vector<1x256xf32> to vector<8x256xf32>
    %657 = arith.mulf %654, %656 : vector<8x256xf32>
    %658 = tpu.concatenate %635, %636, %640, %644, %626, %648, %652, %653, %657 in 0 : vector<8x256xf32>, vector<8x256xf32>, vector<8x256xf32>, vector<8x256xf32>, vector<8x256xf32>, vector<8x256xf32>, vector<8x256xf32>, vector<8x256xf32>, vector<8x256xf32> -> vector<72x256xf32>
    %659 = arith.truncf %658 : vector<72x256xf32> to vector<72x256xbf16>
    %cst_170 = arith.constant dense<0.000000e+00> : vector<8x256xf32>
    %660 = tpu.matmul %628, %659, %cst_170 {dimension_numbers = #tpu.dot_dimension_numbers<[1], [0], [0], [1], [0, 0, 1, 1], [], []>} : vector<8x72xbf16>, vector<72x256xbf16>, vector<8x256xf32> -> vector<8x256xf32>
    %661 = vector.broadcast %629 : vector<8x1xf32> to vector<8x256xf32>
    %662 = arith.addf %660, %661 : vector<8x256xf32>
    %cst_171 = arith.constant 0.000000e+00 : f32
    %663 = vector.broadcast %cst_171 : f32 to vector<8x256xf32>
    %664 = arith.cmpf oge, %662, %663 : vector<8x256xf32>
    %cst_172 = arith.constant 0.00999999977 : f32
    %665 = vector.broadcast %cst_172 : f32 to vector<8x256xf32>
    %666 = arith.mulf %665, %662 : vector<8x256xf32>
    %667 = arith.select %664, %662, %666 : vector<8x256xi1>, vector<8x256xf32>
    %c0_173 = arith.constant 0 : index
    %c0_174 = arith.constant 0 : index
    %668 = vector.load %arg41[%c0_173, %c0_174] : memref<3x8xf32, #tpu.memory_space<vmem>>, vector<3x8xf32>
    %cst_175 = arith.constant dense<0.000000e+00> : vector<3x256xf32>
    %669 = tpu.matmul %668, %667, %cst_175 {dimension_numbers = #tpu.dot_dimension_numbers<[1], [0], [0], [1], [0, 0, 1, 1], [], []>} : vector<3x8xf32>, vector<8x256xf32>, vector<3x256xf32> -> vector<3x256xf32>
    %c0_176 = arith.constant 0 : index
    %c0_177 = arith.constant 0 : index
    %670 = vector.load %arg42[%c0_176, %c0_177] : memref<3x1xf32, #tpu.memory_space<vmem>>, vector<3x1xf32>
    %671 = vector.broadcast %670 : vector<3x1xf32> to vector<3x256xf32>
    %672 = arith.addf %669, %671 : vector<3x256xf32>
    %cst_178 = arith.constant 5.000000e-01 : f32
    %673 = vector.broadcast %cst_178 : f32 to vector<3x256xf32>
    %674 = arith.mulf %673, %672 : vector<3x256xf32>
    %675 = math.tanh %674 : vector<3x256xf32>
    %cst_179 = arith.constant 1.000000e+00 : f32
    %676 = vector.broadcast %cst_179 : f32 to vector<3x256xf32>
    %677 = arith.addf %675, %676 : vector<3x256xf32>
    %cst_180 = arith.constant 5.000000e-01 : f32
    %678 = vector.broadcast %cst_180 : f32 to vector<3x256xf32>
    %679 = arith.mulf %678, %677 : vector<3x256xf32>
    %c0_181 = arith.constant 0 : index
    %c0_182 = arith.constant 0 : index
    %c0_183 = arith.constant 0 : index
    %680 = vector.load %arg43[%c0_181, %c0_182, %c0_183] : memref<1x3x256xf32, #tpu.memory_space<vmem>>, vector<1x3x256xf32>
    %681 = vector.shape_cast %680 : vector<1x3x256xf32> to vector<3x256xf32>
    %682 = vector.shape_cast %679 : vector<3x256xf32> to vector<1x3x256xf32>
    tpu.vector_store %arg43[%c0_181, %c0_182, %c0_183], %682 {strides = array<i32>} : memref<1x3x256xf32, #tpu.memory_space<vmem>>, vector<1x3x256xf32>,
    return
  }
  func.func @transform_0(%arg0: i32) -> (i32, i32, i32) {
    %c0_i32 = arith.constant 0 : i32
    %c0_i32_0 = arith.constant 0 : i32
    %c0_i32_1 = arith.constant 0 : i32
    return %arg0, %c0_i32, %c0_i32_0 : i32, i32, i32
  }
  func.func @transform_1(%arg0: i32) -> (i32, i32) {
    %c0_i32 = arith.constant 0 : i32
    %c0_i32_0 = arith.constant 0 : i32
    %c0_i32_1 = arith.constant 0 : i32
    return %c0_i32, %c0_i32_0 : i32, i32
  }
  func.func @transform_2(%arg0: i32) -> (i32, i32) {
    %c0_i32 = arith.constant 0 : i32
    %c0_i32_0 = arith.constant 0 : i32
    %c0_i32_1 = arith.constant 0 : i32
    return %c0_i32, %c0_i32_0 : i32, i32
  }
  func.func @transform_3(%arg0: i32) -> (i32, i32) {
    %c0_i32 = arith.constant 0 : i32
    %c0_i32_0 = arith.constant 0 : i32
    %c0_i32_1 = arith.constant 0 : i32
    return %c0_i32, %c0_i32_0 : i32, i32
  }
  func.func @transform_4(%arg0: i32) -> (i32, i32) {
    %c0_i32 = arith.constant 0 : i32
    %c0_i32_0 = arith.constant 0 : i32
    %c0_i32_1 = arith.constant 0 : i32
    return %c0_i32, %c0_i32_0 : i32, i32
  }
  func.func @transform_5(%arg0: i32) -> (i32, i32) {
    %c0_i32 = arith.constant 0 : i32
    %c0_i32_0 = arith.constant 0 : i32
    %c0_i32_1 = arith.constant 0 : i32
    return %c0_i32, %c0_i32_0 : i32, i32
  }
  func.func @transform_6(%arg0: i32) -> (i32, i32) {
    %c0_i32 = arith.constant 0 : i32
    %c0_i32_0 = arith.constant 0 : i32
    %c0_i32_1 = arith.constant 0 : i32
    return %c0_i32, %c0_i32_0 : i32, i32
  }
  func.func @transform_7(%arg0: i32) -> (i32, i32) {
    %c0_i32 = arith.constant 0 : i32
    %c0_i32_0 = arith.constant 0 : i32
    %c0_i32_1 = arith.constant 0 : i32
    return %c0_i32, %c0_i32_0 : i32, i32
  }
  func.func @transform_8(%arg0: i32) -> (i32, i32) {
    %c0_i32 = arith.constant 0 : i32
    %c0_i32_0 = arith.constant 0 : i32
    %c0_i32_1 = arith.constant 0 : i32
    return %c0_i32, %c0_i32_0 : i32, i32
  }
  func.func @transform_9(%arg0: i32) -> (i32, i32) {
    %c0_i32 = arith.constant 0 : i32
    %c0_i32_0 = arith.constant 0 : i32
    %c0_i32_1 = arith.constant 0 : i32
    return %c0_i32, %c0_i32_0 : i32, i32
  }
  func.func @transform_10(%arg0: i32) -> (i32, i32) {
    %c0_i32 = arith.constant 0 : i32
    %c0_i32_0 = arith.constant 0 : i32
    %c0_i32_1 = arith.constant 0 : i32
    return %c0_i32, %c0_i32_0 : i32, i32
  }
  func.func @transform_11(%arg0: i32) -> (i32, i32) {
    %c0_i32 = arith.constant 0 : i32
    %c0_i32_0 = arith.constant 0 : i32
    %c0_i32_1 = arith.constant 0 : i32
    return %c0_i32, %c0_i32_0 : i32, i32
  }
  func.func @transform_12(%arg0: i32) -> (i32, i32) {
    %c0_i32 = arith.constant 0 : i32
    %c0_i32_0 = arith.constant 0 : i32
    %c0_i32_1 = arith.constant 0 : i32
    return %c0_i32, %c0_i32_0 : i32, i32
  }
  func.func @transform_13(%arg0: i32) -> (i32, i32) {
    %c0_i32 = arith.constant 0 : i32
    %c0_i32_0 = arith.constant 0 : i32
    %c0_i32_1 = arith.constant 0 : i32
    return %c0_i32, %c0_i32_0 : i32, i32
  }
  func.func @transform_14(%arg0: i32) -> (i32, i32) {
    %c0_i32 = arith.constant 0 : i32
    %c0_i32_0 = arith.constant 0 : i32
    %c0_i32_1 = arith.constant 0 : i32
    return %c0_i32, %c0_i32_0 : i32, i32
  }
  func.func @transform_15(%arg0: i32) -> (i32, i32) {
    %c0_i32 = arith.constant 0 : i32
    %c0_i32_0 = arith.constant 0 : i32
    %c0_i32_1 = arith.constant 0 : i32
    return %c0_i32, %c0_i32_0 : i32, i32
  }
  func.func @transform_16(%arg0: i32) -> (i32, i32) {
    %c0_i32 = arith.constant 0 : i32
    %c0_i32_0 = arith.constant 0 : i32
    %c0_i32_1 = arith.constant 0 : i32
    return %c0_i32, %c0_i32_0 : i32, i32
  }
  func.func @transform_17(%arg0: i32) -> (i32, i32) {
    %c0_i32 = arith.constant 0 : i32
    %c0_i32_0 = arith.constant 0 : i32
    %c0_i32_1 = arith.constant 0 : i32
    return %c0_i32, %c0_i32_0 : i32, i32
  }
  func.func @transform_18(%arg0: i32) -> (i32, i32) {
    %c0_i32 = arith.constant 0 : i32
    %c0_i32_0 = arith.constant 0 : i32
    %c0_i32_1 = arith.constant 0 : i32
    return %c0_i32, %c0_i32_0 : i32, i32
  }
  func.func @transform_19(%arg0: i32) -> (i32, i32) {
    %c0_i32 = arith.constant 0 : i32
    %c0_i32_0 = arith.constant 0 : i32
    %c0_i32_1 = arith.constant 0 : i32
    return %c0_i32, %c0_i32_0 : i32, i32
  }
  func.func @transform_20(%arg0: i32) -> (i32, i32) {
    %c0_i32 = arith.constant 0 : i32
    %c0_i32_0 = arith.constant 0 : i32
    %c0_i32_1 = arith.constant 0 : i32
    return %c0_i32, %c0_i32_0 : i32, i32
  }
  func.func @transform_21(%arg0: i32) -> (i32, i32) {
    %c0_i32 = arith.constant 0 : i32
    %c0_i32_0 = arith.constant 0 : i32
    %c0_i32_1 = arith.constant 0 : i32
    return %c0_i32, %c0_i32_0 : i32, i32
  }
  func.func @transform_22(%arg0: i32) -> (i32, i32) {
    %c0_i32 = arith.constant 0 : i32
    %c0_i32_0 = arith.constant 0 : i32
    %c0_i32_1 = arith.constant 0 : i32
    return %c0_i32, %c0_i32_0 : i32, i32
  }
  func.func @transform_23(%arg0: i32) -> (i32, i32) {
    %c0_i32 = arith.constant 0 : i32
    %c0_i32_0 = arith.constant 0 : i32
    %c0_i32_1 = arith.constant 0 : i32
    return %c0_i32, %c0_i32_0 : i32, i32
  }
  func.func @transform_24(%arg0: i32) -> (i32, i32) {
    %c0_i32 = arith.constant 0 : i32
    %c0_i32_0 = arith.constant 0 : i32
    %c0_i32_1 = arith.constant 0 : i32
    return %c0_i32, %c0_i32_0 : i32, i32
  }
  func.func @transform_25(%arg0: i32) -> (i32, i32) {
    %c0_i32 = arith.constant 0 : i32
    %c0_i32_0 = arith.constant 0 : i32
    %c0_i32_1 = arith.constant 0 : i32
    return %c0_i32, %c0_i32_0 : i32, i32
  }
  func.func @transform_26(%arg0: i32) -> (i32, i32) {
    %c0_i32 = arith.constant 0 : i32
    %c0_i32_0 = arith.constant 0 : i32
    %c0_i32_1 = arith.constant 0 : i32
    return %c0_i32, %c0_i32_0 : i32, i32
  }
  func.func @transform_27(%arg0: i32) -> (i32, i32) {
    %c0_i32 = arith.constant 0 : i32
    %c0_i32_0 = arith.constant 0 : i32
    %c0_i32_1 = arith.constant 0 : i32
    return %c0_i32, %c0_i32_0 : i32, i32
  }
  func.func @transform_28(%arg0: i32) -> (i32, i32) {
    %c0_i32 = arith.constant 0 : i32
    %c0_i32_0 = arith.constant 0 : i32
    %c0_i32_1 = arith.constant 0 : i32
    return %c0_i32, %c0_i32_0 : i32, i32
  }
  func.func @transform_29(%arg0: i32) -> (i32, i32) {
    %c0_i32 = arith.constant 0 : i32
    %c0_i32_0 = arith.constant 0 : i32
    %c0_i32_1 = arith.constant 0 : i32
    return %c0_i32, %c0_i32_0 : i32, i32
  }
  func.func @transform_30(%arg0: i32) -> (i32, i32) {
    %c0_i32 = arith.constant 0 : i32
    %c0_i32_0 = arith.constant 0 : i32
    %c0_i32_1 = arith.constant 0 : i32
    return %c0_i32, %c0_i32_0 : i32, i32
  }
  func.func @transform_31(%arg0: i32) -> (i32, i32) {
    %c0_i32 = arith.constant 0 : i32
    %c0_i32_0 = arith.constant 0 : i32
    %c0_i32_1 = arith.constant 0 : i32
    return %c0_i32, %c0_i32_0 : i32, i32
  }
  func.func @transform_32(%arg0: i32) -> (i32, i32) {
    %c0_i32 = arith.constant 0 : i32
    %c0_i32_0 = arith.constant 0 : i32
    %c0_i32_1 = arith.constant 0 : i32
    return %c0_i32, %c0_i32_0 : i32, i32
  }
  func.func @transform_33(%arg0: i32) -> (i32, i32) {
    %c0_i32 = arith.constant 0 : i32
    %c0_i32_0 = arith.constant 0 : i32
    %c0_i32_1 = arith.constant 0 : i32
    return %c0_i32, %c0_i32_0 : i32, i32
  }
  func.func @transform_34(%arg0: i32) -> (i32, i32) {
    %c0_i32 = arith.constant 0 : i32
    %c0_i32_0 = arith.constant 0 : i32
    %c0_i32_1 = arith.constant 0 : i32
    return %c0_i32, %c0_i32_0 : i32, i32
  }
  func.func @transform_35(%arg0: i32) -> (i32, i32) {
    %c0_i32 = arith.constant 0 : i32
    %c0_i32_0 = arith.constant 0 : i32
    %c0_i32_1 = arith.constant 0 : i32
    return %c0_i32, %c0_i32_0 : i32, i32
  }
  func.func @transform_36(%arg0: i32) -> (i32, i32) {
    %c0_i32 = arith.constant 0 : i32
    %c0_i32_0 = arith.constant 0 : i32
    %c0_i32_1 = arith.constant 0 : i32
    return %c0_i32, %c0_i32_0 : i32, i32
  }
  func.func @transform_37(%arg0: i32) -> (i32, i32) {
    %c0_i32 = arith.constant 0 : i32
    %c0_i32_0 = arith.constant 0 : i32
    %c0_i32_1 = arith.constant 0 : i32
    return %c0_i32, %c0_i32_0 : i32, i32
  }
  func.func @transform_38(%arg0: i32) -> (i32, i32) {
    %c0_i32 = arith.constant 0 : i32
    %c0_i32_0 = arith.constant 0 : i32
    %c0_i32_1 = arith.constant 0 : i32
    return %c0_i32, %c0_i32_0 : i32, i32
  }
  func.func @transform_39(%arg0: i32) -> (i32, i32) {
    %c0_i32 = arith.constant 0 : i32
    %c0_i32_0 = arith.constant 0 : i32
    %c0_i32_1 = arith.constant 0 : i32
    return %c0_i32, %c0_i32_0 : i32, i32
  }
  func.func @transform_40(%arg0: i32) -> (i32, i32) {
    %c0_i32 = arith.constant 0 : i32
    %c0_i32_0 = arith.constant 0 : i32
    %c0_i32_1 = arith.constant 0 : i32
    return %c0_i32, %c0_i32_0 : i32, i32
  }
  func.func @transform_41(%arg0: i32) -> (i32, i32) {
    %c0_i32 = arith.constant 0 : i32
    %c0_i32_0 = arith.constant 0 : i32
    %c0_i32_1 = arith.constant 0 : i32
    return %c0_i32, %c0_i32_0 : i32, i32
  }
  func.func @transform_42(%arg0: i32) -> (i32, i32, i32) {
    %c0_i32 = arith.constant 0 : i32
    %c0_i32_0 = arith.constant 0 : i32
    %c0_i32_1 = arith.constant 0 : i32
    return %arg0, %c0_i32, %c0_i32_0 : i32, i32, i32
  }
}

</mosaic_0001>

<bundles_post_ra>
// kernel: unet1_forward.1
= control target key start
LH: loop header
LB: loop body
LE: loop exit
PB: predicated region body
PF: predicated region fallthrough
CT: control target
= control target key end

     0   :  { %s10129_s6 = smov 1   ;;  %s10130_s10 = smov 2   ;;  %s12669_s0 = inlined_call_operand.smem [shape: u32[43], index: -1, kind: input, shape index: {}] }
   0x1   :  { %s10258_s5 = sld [smem:[%s12669_s0]]   ;;  %s10131_s14 = smov 3  }
   0x2   :  { %s10263_s9 = sld [smem:[%s12669_s0 + %s10129_s6]]   ;;  %s10132_s18 = smov 4  }
   0x3   :  { %s10268_s13 = sld [smem:[%s12669_s0 + %s10130_s10]]   ;;  %s10133_s22 = smov 5  }
   0x4   :  { %s10273_s17 = sld [smem:[%s12669_s0 + %s10131_s14]]   ;;  %s10134_s26 = smov 6  }
   0x5   :  { %s10278_s21 = sld [smem:[%s12669_s0 + %s10132_s18]]   ;;  %s10135_s30 = smov 7  }
   0x6   :  { %s10283_s25 = sld [smem:[%s12669_s0 + %s10133_s22]]   ;;  %s10136_s4 = smov 8  }
   0x7   :  { %12785 = sst [smem:[#allocation91_spill]] %s10258_s5  ;;  %s10137_s10 = smov 9  }
   0x8   :  { %12786 = sst [smem:[#allocation92_spill]] %s10263_s9  ;;  %s10138_s15 = smov 10  }
   0x9   :  { %12787 = sst [smem:[#allocation93_spill]] %s10268_s13  ;;  %s10139_s20 = smov 11  }
   0xa   :  { %s10288_s29 = sld [smem:[%s12669_s0 + %s10134_s26]]   ;;  %s10140_s26 = smov 12  }
   0xb   :  { %12788 = sst [smem:[#allocation94_spill]] %s10278_s21  ;;  %s10141_s1 = smov 13  }
   0xc   :  { %s10293_s3 = sld [smem:[%s12669_s0 + %s10135_s30]]   ;;  %s10142_s7 = smov 14  }
   0xd   :  { %s10298_s8 = sld [smem:[%s12669_s0 + %s10136_s4]]   ;;  %s10144_s22 = smov 16  }
   0xe   :  { %s10303_s14 = sld [smem:[%s12669_s0 + %s10137_s10]]   ;;  %s10145_s28 = smov 17  }
   0xf   :  { %s10308_s19 = sld [smem:[%s12669_s0 + %s10138_s15]]   ;;  %s10143_s15 = smov 15  }
  0x10   :  { %12789 = sst [smem:[#allocation95_spill]] %s10288_s29 }
  0x11   :  { %s10313_s24 = sld [smem:[%s12669_s0 + %s10139_s20]]  }
  0x12   :  { %12790 = sst [smem:[#allocation96_spill]] %s10293_s3 }
  0x13   :  { %12791 = sst [smem:[#allocation97_spill]] %s10298_s8 }
  0x14   :  { %12792 = sst [smem:[#allocation98_spill]] %s10303_s14 }
  0x15   :  { %12793 = sst [smem:[#allocation99_spill]] %s10308_s19 }
  0x16   :  { %s10318_s30 = sld [smem:[%s12669_s0 + %s10140_s26]]  }
  0x17   :  { %s10323_s6 = sld [smem:[%s12669_s0 + %s10141_s1]]  }
  0x18   :  { %s10328_s12 = sld [smem:[%s12669_s0 + %s10142_s7]]   ;;  %s10146_s7 = smov 18  }
  0x19   :  { %s10333_s20 = sld [smem:[%s12669_s0 + %s10143_s15]]   ;;  %s10147_s15 = smov 19  }
  0x1a   :  { %s10338_s27 = sld [smem:[%s12669_s0 + %s10144_s22]]   ;;  %s10148_s22 = smov 20  }
  0x1b   :  { %s10343_s4 = sld [smem:[%s12669_s0 + %s10145_s28]]   ;;  %s10149_s28 = smov 21  }
  0x1c   :  { %12794 = sst [smem:[#allocation100_spill]] %s10318_s30 }
  0x1d   :  { %12795 = sst [smem:[#allocation101_spill]] %s10323_s6 }
  0x1e   :  { %12796 = sst [smem:[#allocation102_spill]] %s10328_s12 }
  0x1f   :  { %s10348_s5 = sld [smem:[%s12669_s0 + %s10146_s7]]   ;;  %s10150_s7 = smov 22  }
  0x20   :  { %12797 = sst [smem:[#allocation103_spill]] %s10338_s27 }
  0x21   :  { %12798 = sst [smem:[#allocation104_spill]] %s10343_s4 }
  0x22   :  { %s10353_s12 = sld [smem:[%s12669_s0 + %s10147_s15]]   ;;  %s10151_s15 = smov 23  }
  0x23   :  { %s10358_s27 = sld [smem:[%s12669_s0 + %s10148_s22]]   ;;  %s10152_s22 = smov 24  }
  0x24   :  { %s10363_s30 = sld [smem:[%s12669_s0 + %s10149_s28]]   ;;  %s10153_s28 = smov 25  }
  0x25   :  { %12799 = sst [smem:[#allocation105_spill]] %s10348_s5 }
  0x26   :  { %s10368_s5 = sld [smem:[%s12669_s0 + %s10150_s7]]   ;;  %s10154_s7 = smov 26  }
  0x27   :  { %s10373_s19 = sld [smem:[%s12669_s0 + %s10151_s15]]   ;;  %s10155_s15 = smov 27  }
  0x28   :  { %12800 = sst [smem:[#allocation106_spill]] %s10353_s12 }
  0x29   :  { %12801 = sst [smem:[#allocation107_spill]] %s10358_s27 }
  0x2a   :  { %s10378_s27 = sld [smem:[%s12669_s0 + %s10152_s22]]   ;;  %s10156_s22 = smov 28  }
  0x2b   :  { %s10383_s8 = sld [smem:[%s12669_s0 + %s10153_s28]]   ;;  %s10157_s28 = smov 29  }
  0x2c   :  { %12802 = sst [smem:[#allocation108_spill]] %s10368_s5 }
  0x2d   :  { %s10388_s5 = sld [smem:[%s12669_s0 + %s10154_s7]]   ;;  %s10158_s7 = smov 30  }
  0x2e   :  { %s10393_s29 = sld [smem:[%s12669_s0 + %s10155_s15]]   ;;  %s10159_s15 = smov 31  }
  0x2f   :  { %s10403_s21 = sld [smem:[%s12669_s0 + %s10157_s28]]   ;;  %s10161_s28 = smov 33  }
  0x30   :  { %12803 = sst [smem:[#allocation109_spill]] %s10378_s27 }
  0x31   :  { %12804 = sst [smem:[#allocation110_spill]] %s10383_s8 }
  0x32   :  { %s10398_s27 = sld [smem:[%s12669_s0 + %s10156_s22]]   ;;  %s10160_s22 = smov 32  }
  0x33   :  { %12805 = sst [smem:[#allocation111_spill]] %s10388_s5 }
  0x34   :  { %s10408_s5 = sld [smem:[%s12669_s0 + %s10158_s7]]   ;;  %s10162_s7 = smov 34  }
  0x35   :  { %12807 = sst [smem:[#allocation113_spill]] %s10403_s21 }
  0x36   :  { %s10413_s13 = sld [smem:[%s12669_s0 + %s10159_s15]]   ;;  %s10163_s15 = smov 35  }
  0x37   :  { %s10423_s21 = sld [smem:[%s12669_s0 + %s10161_s28]]   ;;  %s10165_s28 = smov 37  }
  0x38   :  { %12806 = sst [smem:[#allocation112_spill]] %s10398_s27 }
  0x39   :  { %s10418_s27 = sld [smem:[%s12669_s0 + %s10160_s22]]   ;;  %s10164_s22 = smov 36  }
  0x3a   :  { %12808 = sst [smem:[#allocation114_spill]] %s10408_s5 }
  0x3b   :  { %s10428_s5 = sld [smem:[%s12669_s0 + %s10162_s7]]   ;;  %s10166_s7 = smov 38  }
  0x3c   :  { %12809 = sst [smem:[#allocation115_spill]] %s10413_s13 }
  0x3d   :  { %12811 = sst [smem:[#allocation117_spill]] %s10423_s21 }
  0x3e   :  { %s10433_s13 = sld [smem:[%s12669_s0 + %s10163_s15]]   ;;  %s10167_s15 = smov 39  }
  0x3f   :  { %12810 = sst [smem:[#allocation116_spill]] %s10418_s27 }
  0x40   :  { %s10438_s27 = sld [smem:[%s12669_s0 + %s10164_s22]]   ;;  %s10168_s22 = smov 40  }
  0x41   :  { %12812 = sst [smem:[#allocation118_spill]] %s10428_s5 }
  0x42   :  { %s10443_s21 = sld [smem:[%s12669_s0 + %s10165_s28]]   ;;  %s10169_s28 = smov 41  }
  0x43   :  { %s10448_s5 = sld [smem:[%s12669_s0 + %s10166_s7]]   ;;  %s10170_s7 = smov 42  }
  0x44   :  { %12813 = sst [smem:[#allocation119_spill]] %s10433_s13 }
  0x45   :  { %s10453_s13 = sld [smem:[%s12669_s0 + %s10167_s15]]  }
  0x46   :  { %12814 = sst [smem:[#allocation120_spill]] %s10438_s27 }
  0x47   :  { %s10458_s27 = sld [smem:[%s12669_s0 + %s10168_s22]]  }
  0x48   :  { %12815 = sst [smem:[#allocation121_spill]] %s10443_s21 }
  0x49   :  { %12816 = sst [smem:[#allocation122_spill]] %s10448_s5 }
  0x4a   :  { %s10463_s21 = sld [smem:[%s12669_s0 + %s10169_s28]]  }
  0x4b   :  { %12817 = sst [smem:[#allocation123_spill]] %s10453_s13 }
  0x4c   :  { %s10468_s5 = sld [smem:[%s12669_s0 + %s10170_s7]]  }
  0x52   :  { %12818 = sst [smem:[#allocation124_spill]] %s10468_s5 }
  0x53   :  { %90 = vsyncpa [#allocation3], 0 }
  0x54   :  { %92 = vsyncpa [#allocation3 + $0x1], 0 }
  0x55   :  { %93 = vsyncpa [#allocation6], 0 }
  0x56   :  { %94 = vsyncpa [#allocation9], 0 }
  0x57   :  { %95 = vsyncpa [#allocation12], 0 }
  0x58   :  { %96 = vsyncpa [#allocation15], 0 }
  0x59   :  { %97 = vsyncpa [#allocation18], 0 }
  0x5a   :  { %98 = vsyncpa [#allocation21], 0 }
  0x5b   :  { %99 = vsyncpa [#allocation24], 0 }
  0x5c   :  { %100 = vsyncpa [#allocation27], 0 }
  0x5d   :  { %101 = vsyncpa [#allocation30], 0 }
  0x5e   :  { %102 = vsyncpa [#allocation33], 0 }
  0x5f   :  { %103 = vsyncpa [#allocation36], 0 }
  0x60   :  { %104 = vsyncpa [#allocation39], 0 }
  0x61   :  { %105 = vsyncpa [#allocation42], 0 }
  0x62   :  { %106 = vsyncpa [#allocation45], 0 }
  0x63   :  { %107 = vsyncpa [#allocation48], 0 }
  0x64   :  { %108 = vsyncpa [#allocation51], 0 }
  0x65   :  { %109 = vsyncpa [#allocation54], 0 }
  0x66   :  { %110 = vsyncpa [#allocation57], 0 }
  0x67   :  { %111 = vsyncpa [#allocation60], 0 }
  0x68   :  { %112 = vsyncpa [#allocation63], 0 }
  0x69   :  { %113 = vsyncpa [#allocation66], 0 }
  0x6a   :  { %114 = vsyncpa [#allocation4], 0 }
  0x6b   :  { %116 = vsyncpa [#allocation4 + $0x1], 0  ;;  %s10470_s0 = smov 0   ;;  %s10472_s15 = smov 0  }
  0x6c   :  { %s10474_s16 = smov 0   ;;  %s10476_s18 = smov 0  }
  0x6d LB: > { %s12819_s14 = sld [smem:[#allocation98_spill]]  ;;  %s12820_s13 = sld [smem:[#allocation123_spill]]  ;;  %s10127_s18 = sphi %s10476_s18, %s12995_s18   ;;  %s10123_s16 = sphi %s10474_s16, %s12999_s16   ;;  %s10119_s15 = sphi %s10472_s15, %s12998_s15   ;;  %s10115_s0 = sphi %s10470_s0, %s12996_s0  }
  0x6e   : > { %s12821_s12 = sld [smem:[#allocation106_spill]]  ;;  %s12822_s9 = sld [smem:[#allocation92_spill]] }
  0x6f   : > { %s12823_s8 = sld [smem:[#allocation110_spill]]  ;;  %s12824_s4 = sld [smem:[#allocation104_spill]] }
  0x70   : > { %s12825_s6 = sld [smem:[#allocation101_spill]]  ;;  %s12826_s3 = sld [smem:[#allocation96_spill]] }
  0x71   : > { %12827 = sst [smem:[#allocation125_spill]] %s10115_s0  ;;  %s10491_s22 = sadd.s32 4294967295, %s10127_s18  }
  0x72   : > { %12828 = sst [smem:[#allocation126_spill]] %s10119_s15  ;;  %s7019_s23 = sadd.s32 4294967294, %s10127_s18  }
  0x73   : > { %s10495_s26 = sadd.s32 1, %s10127_s18   ;;  %s129_s28 = sadd.s32 1, %s10123_s16 }
  0x74   : > { %12829 = sst [smem:[#allocation127_spill]] %s10495_s26  ;;  %s126_s1 = ssub.s32 %s10127_s18, %s10495_s26 }
  0x75   : > { %p136_p0 = scmp.ne.s32.totalorder %s10123_s16, %s10119_s15  ;;  %p127_p1 = scmp.eq.s32.totalorder %s126_s1, 0 }
  0x76   : > { %p137_p2 = scmp.eq.s32.totalorder %s10127_s18, 0  ;;  %p142_p3 = scmp.ne.s32.totalorder %s10119_s15, %s10115_s0 }
  0x77   : > { %p12742_p4 = scmp.eq.s32.totalorder %s10491_s22, 0  ;;  %p1027_p7 = scmp.eq.s32.totalorder %s10491_s22, 1 }
  0x78   : > { %s10507_s2 = scalar_select %p127_p1, %s10123_s16, %s129_s28  }
  0x79   : > { %p10509_p5 = por %p137_p2, %p136_p0  ;;  %p10515_p6 = por %p12742_p4, %p142_p3 }
  0x7a   : > { %12830 = sst [smem:[#allocation128_spill]] %s10507_s2  ;;  %p1033_p8 = scmp.eq.s32.totalorder %s7019_s23, 1 }
  0x7b   : > { %s12832_s10 = scalar_select %p10515_p6, 1, 0 }
  0x7c   : > { %p7020_p9 = scmp.ge.s32.totalorder %s10127_s18, 1  ;;  %p1040_p10 = scmp.lt.s32.totalorder %s10127_s18, 3 }
  0x7d   : > { %12833 = sst [smem:[#allocation129_spill]] %s12832_s10  ;;  %p10522_p11 = por %p1027_p7, %p136_p0 }
  0x7e   : > { %p10526_p12 = por %p1033_p8, %p142_p3  ;;  %p10530_p13 = pnand %p7020_p9, %p1040_p10 }
  0x7f   : > { %s12834_s11 = scalar_select %p10522_p11, 1, 0 }
  0x80   : > { %s12836_s28 = scalar_select %p10526_p12, 1, 0 }
  0x81   : > { %12835 = sst [smem:[#allocation130_spill]] %s12834_s11  ;;  %1044 = sbr.rel (%p10530_p13) target bundleno = 1135 (0x46f), region = 12 }
  0x82   : > { %12837 = sst [smem:[#allocation131_spill]] %s12836_s28  ;;  %s10171_s2 = smov (!%p10530_p13), [#allocation5]  }
  0x83   : > { %s12838_s1 = scalar_select %p10530_p13, 1, 0 }
  0x84   : > { %s1052_s23 = sshll.u32 (!%p10530_p13), %s10171_s2, 4  ;;  %s8881_s26 = scalar_lea.hbm (!%p10530_p13), %s12822_s9, 512  ;;  %s1053_s23 = int_to_ptr.vmem [resolvable:$true] %s1052_s23 }
  0x85   : > { %p8882_p0 = scmp.ne.s32.totalorder (!%p10530_p13), %s12822_s9, %s8881_s26  ;;  %p8887_p3 = scmp.lt.u32.totalorder (!%p10530_p13), %s8881_s26, %s12822_s9 }
  0x87   : > { %p8883_p1 = pnand (!%p10530_p13), %p8882_p0, %p12742_p4 }
  0x89   : > { %p8884_p2 = pneg %p8883_p1 }
  0x8b   : > { %p8889_p7 = pnand %p8887_p3, %p8884_p2 }
  0x8d   : > { %8892 = shalt.err (!%p8889_p7)
}
  0x8e   : > { %s8893_s28 = scalar_lea.vmem %s1053_s23, 512  ;;  %p8900_p12 = scmp.lt.s32.totalorder %s1053_s23, %s1053_s23 }
  0x8f   : > { %p8894_p8 = scmp.ne.s32.totalorder %s1053_s23, %s8893_s28  ;;  %p8901_p11 = scmp.lt.s32.totalorder %s8893_s28, %s8893_s28 }
  0x91   : > { %p8895_p9 = pnand %p8894_p8, %p12742_p4  ;;  %p8902_p6 = por %p8901_p11, %p8900_p12 }
  0x93   : > { %p8896_p10 = pneg %p8895_p9 }
  0x95   : > { %p8903_p13 = pnand %p8902_p6, %p8896_p10 }
  0x97   : > { %8906 = shalt.err (!%p8903_p13)
}
  0x98   : > { %s12708_s2 = smov 256   ;;  %s12710_s26 = smov 16  }
  0x99   : > { %7595 = dma.hbm_to_vmem [thread:$0]  (%p12742_p4), %s12822_s9, 512, %s1053_s23, [#allocation6], %s12708_s2, %s12708_s2, %s12710_s26  }
  0x9a   : > { %s10174_s0 = smov [#allocation8]   ;;  %s10175_s5 = smov [#allocation11]  }
  0x9b   : > { %s1078_s11 = sshll.u32 %s10174_s0, 4  ;;  %s1104_s28 = sshll.u32 %s10175_s5, 4  ;;  %s1079_s11 = int_to_ptr.vmem [resolvable:$true] %s1078_s11  ;;  %s10549_s28 = int_to_ptr.vmem [resolvable:$true] %s1104_s28 }
  0x9c   : > { %s8907_s10 = scalar_lea.hbm %s10273_s17, 256 }
  0x9d   : > { %p8908_p6 = scmp.ne.s32.totalorder %s10273_s17, %s8907_s10  ;;  %p8913_p13 = scmp.lt.u32.totalorder %s8907_s10, %s10273_s17 }
  0x9f   : > { %p8909_p11 = pnand %p8908_p6, %p12742_p4 }
  0xa1   : > { %p8910_p12 = pneg %p8909_p11 }
  0xa3   : > { %p8915_p0 = pnand %p8913_p13, %p8910_p12 }
  0xa5   : > { %8918 = shalt.err (!%p8915_p0)
}
  0xa6   : > { %s8919_s15 = scalar_lea.vmem %s1079_s11, 256  ;;  %p8926_p7 = scmp.lt.s32.totalorder %s1079_s11, %s1079_s11 }
  0xa7   : > { %p8920_p1 = scmp.ne.s32.totalorder %s1079_s11, %s8919_s15  ;;  %p8927_p8 = scmp.lt.s32.totalorder %s8919_s15, %s8919_s15 }
  0xa9   : > { %p8921_p2 = pnand %p8920_p1, %p12742_p4  ;;  %p8928_p9 = por %p8927_p8, %p8926_p7 }
  0xab   : > { %p8922_p3 = pneg %p8921_p2 }
  0xad   : > { %p8929_p10 = pnand %p8928_p9, %p8922_p3 }
  0xaf   : > { %8932 = shalt.err (!%p8929_p10)
}
  0xb0   : > { %s12712_s5 = smov 128   ;;  %s12714_s0 = smov 8  }
  0xb1   : > { %7599 = dma.hbm_to_vmem [thread:$0]  (%p12742_p4), %s10273_s17, 256, %s1079_s11, [#allocation9], %s12712_s5, %s12712_s5, %s12714_s0  }
  0xb2   : > { %s8933_s10 = scalar_lea.hbm %s10283_s25, 1024 }
  0xb3   : > { %p8934_p6 = scmp.ne.s32.totalorder %s10283_s25, %s8933_s10  ;;  %p8939_p13 = scmp.lt.u32.totalorder %s8933_s10, %s10283_s25 }
  0xb5   : > { %p8935_p11 = pnand %p8934_p6, %p12742_p4 }
  0xb7   : > { %p8936_p12 = pneg %p8935_p11 }
  0xb9   : > { %p8941_p0 = pnand %p8939_p13, %p8936_p12 }
  0xbb   : > { %8944 = shalt.err (!%p8941_p0)
}
  0xbc   : > { %s8945_s15 = scalar_lea.vmem %s10549_s28, 1024  ;;  %p8952_p7 = scmp.lt.s32.totalorder %s10549_s28, %s10549_s28 }
  0xbd   : > { %p8946_p1 = scmp.ne.s32.totalorder %s10549_s28, %s8945_s15  ;;  %p8953_p8 = scmp.lt.s32.totalorder %s8945_s15, %s8945_s15 }
  0xbf   : > { %p8947_p2 = pnand %p8946_p1, %p12742_p4  ;;  %p8954_p9 = por %p8953_p8, %p8952_p7 }
  0xc1   : > { %p8948_p3 = pneg %p8947_p2 }
  0xc3   : > { %p8955_p10 = pnand %p8954_p9, %p8948_p3 }
  0xc5   : > { %8958 = shalt.err (!%p8955_p10)
}
  0xc6   : > { %7603 = dma.hbm_to_vmem [thread:$0]  (%p12742_p4), %s10283_s25, 1024, %s10549_s28, [#allocation12], %s12712_s5, %s12712_s5, %s12714_s0  }
  0xc7   : > { %s10178_s11 = smov [#allocation14]   ;;  %s10179_s10 = smov [#allocation17]  }
  0xc8   : > { %s1130_s23 = sshll.u32 %s10178_s11, 4  ;;  %s1155_s2 = sshll.u32 %s10179_s10, 4  ;;  %s1131_s23 = int_to_ptr.vmem [resolvable:$true] %s1130_s23  ;;  %s10582_s2 = int_to_ptr.vmem [resolvable:$true] %s1155_s2 }
  0xc9   : > { %s8959_s15 = scalar_lea.hbm %s12826_s3, 2048 }
  0xca   : > { %p8960_p6 = scmp.ne.s32.totalorder %s12826_s3, %s8959_s15  ;;  %p8965_p13 = scmp.lt.u32.totalorder %s8959_s15, %s12826_s3 }
  0xcc   : > { %p8961_p11 = pnand %p8960_p6, %p12742_p4 }
  0xce   : > { %p8962_p12 = pneg %p8961_p11 }
  0xd0   : > { %p8967_p0 = pnand %p8965_p13, %p8962_p12 }
  0xd2   : > { %8970 = shalt.err (!%p8967_p0)
}
  0xd3   : > { %s8971_s26 = scalar_lea.vmem %s1131_s23, 2048  ;;  %p8978_p7 = scmp.lt.s32.totalorder %s1131_s23, %s1131_s23 }
  0xd4   : > { %p8972_p1 = scmp.ne.s32.totalorder %s1131_s23, %s8971_s26  ;;  %p8979_p8 = scmp.lt.s32.totalorder %s8971_s26, %s8971_s26 }
  0xd6   : > { %p8973_p2 = pnand %p8972_p1, %p12742_p4  ;;  %p8980_p9 = por %p8979_p8, %p8978_p7 }
  0xd8   : > { %p8974_p3 = pneg %p8973_p2 }
  0xda   : > { %p8981_p10 = pnand %p8980_p9, %p8974_p3 }
  0xdc   : > { %8984 = shalt.err (!%p8981_p10)
}
  0xdd   : > { %s12839_s28 = smov 16   ;;  %s12840_s11 = smov 256  }
  0xde   : > { %7607 = dma.hbm_to_vmem [thread:$0]  (%p12742_p4), %s12826_s3, 2048, %s1131_s23, [#allocation15], %s12840_s11, %s12840_s11, %s12839_s28  }
  0xdf   : > { %s8985_s10 = scalar_lea.hbm %s12819_s14, 128 }
  0xe0   : > { %p8986_p6 = scmp.ne.s32.totalorder %s12819_s14, %s8985_s10  ;;  %p8991_p13 = scmp.lt.u32.totalorder %s8985_s10, %s12819_s14 }
  0xe2   : > { %p8987_p11 = pnand %p8986_p6, %p12742_p4 }
  0xe4   : > { %p8988_p12 = pneg %p8987_p11 }
  0xe6   : > { %p8993_p0 = pnand %p8991_p13, %p8988_p12 }
  0xe8   : > { %8996 = shalt.err (!%p8993_p0)
}
  0xe9   : > { %s8997_s26 = scalar_lea.vmem %s10582_s2, 128  ;;  %p9004_p7 = scmp.lt.s32.totalorder %s10582_s2, %s10582_s2 }
  0xea   : > { %p8998_p1 = scmp.ne.s32.totalorder %s10582_s2, %s8997_s26  ;;  %p9005_p8 = scmp.lt.s32.totalorder %s8997_s26, %s8997_s26 }
  0xec   : > { %p8999_p2 = pnand %p8998_p1, %p12742_p4  ;;  %p9006_p9 = por %p9005_p8, %p9004_p7 }
  0xee   : > { %p9000_p3 = pneg %p8999_p2 }
  0xf0   : > { %p9007_p10 = pnand %p9006_p9, %p9000_p3 }
  0xf2   : > { %9010 = shalt.err (!%p9007_p10)
}
  0xf3   : > { %7611 = dma.hbm_to_vmem [thread:$0]  (%p12742_p4), %s12819_s14, 128, %s10582_s2, [#allocation18]  }
  0xf4   : > { %s10180_s23 = smov [#allocation20]   ;;  %s10181_s10 = smov [#allocation23]  }
  0xf5   : > { %s1177_s15 = sshll.u32 %s10180_s23, 4  ;;  %s1199_s5 = sshll.u32 %s10181_s10, 4  ;;  %s1178_s15 = int_to_ptr.vmem [resolvable:$true] %s1177_s15  ;;  %s10612_s5 = int_to_ptr.vmem [resolvable:$true] %s1199_s5 }
  0xf6   : > { %s9011_s26 = scalar_lea.hbm %s10313_s24, 128 }
  0xf7   : > { %p9012_p6 = scmp.ne.s32.totalorder %s10313_s24, %s9011_s26  ;;  %p9017_p13 = scmp.lt.u32.totalorder %s9011_s26, %s10313_s24 }
  0xf9   : > { %p9013_p11 = pnand %p9012_p6, %p12742_p4 }
  0xfb   : > { %p9014_p12 = pneg %p9013_p11 }
  0xfd   : > { %p9019_p0 = pnand %p9017_p13, %p9014_p12 }
  0xff   : > { %9022 = shalt.err (!%p9019_p0)
}
 0x100   : > { %s9023_s0 = scalar_lea.vmem %s1178_s15, 128  ;;  %p9030_p7 = scmp.lt.s32.totalorder %s1178_s15, %s1178_s15 }
 0x101   : > { %p9024_p1 = scmp.ne.s32.totalorder %s1178_s15, %s9023_s0  ;;  %p9031_p8 = scmp.lt.s32.totalorder %s9023_s0, %s9023_s0 }
 0x103   : > { %p9025_p2 = pnand %p9024_p1, %p12742_p4  ;;  %p9032_p9 = por %p9031_p8, %p9030_p7 }
 0x105   : > { %p9026_p3 = pneg %p9025_p2 }
 0x107   : > { %p9033_p10 = pnand %p9032_p9, %p9026_p3 }
 0x109   : > { %9036 = shalt.err (!%p9033_p10)
}
 0x10a   : > { %7615 = dma.hbm_to_vmem [thread:$0]  (%p12742_p4), %s10313_s24, 128, %s1178_s15, [#allocation21]  }
 0x10b   : > { %s9037_s2 = scalar_lea.hbm %s12825_s6, 128 }
 0x10c   : > { %p9038_p6 = scmp.ne.s32.totalorder %s12825_s6, %s9037_s2  ;;  %p9043_p13 = scmp.lt.u32.totalorder %s9037_s2, %s12825_s6 }
 0x10e   : > { %p9039_p11 = pnand %p9038_p6, %p12742_p4 }
 0x110   : > { %p9040_p12 = pneg %p9039_p11 }
 0x112   : > { %p9045_p0 = pnand %p9043_p13, %p9040_p12 }
 0x114   : > { %9048 = shalt.err (!%p9045_p0)
}
 0x115   : > { %s9049_s0 = scalar_lea.vmem %s10612_s5, 128  ;;  %p9056_p7 = scmp.lt.s32.totalorder %s10612_s5, %s10612_s5 }
 0x116   : > { %p9050_p1 = scmp.ne.s32.totalorder %s10612_s5, %s9049_s0  ;;  %p9057_p8 = scmp.lt.s32.totalorder %s9049_s0, %s9049_s0 }
 0x118   : > { %p9051_p2 = pnand %p9050_p1, %p12742_p4  ;;  %p9058_p9 = por %p9057_p8, %p9056_p7 }
 0x11a   : > { %p9052_p3 = pneg %p9051_p2 }
 0x11c   : > { %p9059_p10 = pnand %p9058_p9, %p9052_p3 }
 0x11e   : > { %9062 = shalt.err (!%p9059_p10)
}
 0x11f   : > { %7619 = dma.hbm_to_vmem [thread:$0]  (%p12742_p4), %s12825_s6, 128, %s10612_s5, [#allocation24]  }
 0x120   : > { %s10182_s23 = smov [#allocation26]   ;;  %s10183_s10 = smov [#allocation29]  }
 0x121   : > { %s1222_s15 = sshll.u32 %s10182_s23, 4  ;;  %s1248_s26 = sshll.u32 %s10183_s10, 4  ;;  %s1223_s15 = int_to_ptr.vmem [resolvable:$true] %s1222_s15  ;;  %s10639_s26 = int_to_ptr.vmem [resolvable:$true] %s1248_s26 }
 0x122   : > { %s9063_s2 = scalar_lea.hbm %s10333_s20, 256 }
 0x123   : > { %p9064_p6 = scmp.ne.s32.totalorder %s10333_s20, %s9063_s2  ;;  %p9069_p13 = scmp.lt.u32.totalorder %s9063_s2, %s10333_s20 }
 0x125   : > { %p9065_p11 = pnand %p9064_p6, %p12742_p4 }
 0x127   : > { %p9066_p12 = pneg %p9065_p11 }
 0x129   : > { %p9071_p0 = pnand %p9069_p13, %p9066_p12 }
 0x12b   : > { %9074 = shalt.err (!%p9071_p0)
}
 0x12c   : > { %s9075_s0 = scalar_lea.vmem %s1223_s15, 256  ;;  %p9082_p7 = scmp.lt.s32.totalorder %s1223_s15, %s1223_s15 }
 0x12d   : > { %p9076_p1 = scmp.ne.s32.totalorder %s1223_s15, %s9075_s0  ;;  %p9083_p8 = scmp.lt.s32.totalorder %s9075_s0, %s9075_s0 }
 0x12f   : > { %p9077_p2 = pnand %p9076_p1, %p12742_p4  ;;  %p9084_p9 = por %p9083_p8, %p9082_p7 }
 0x131   : > { %p9078_p3 = pneg %p9077_p2 }
 0x133   : > { %p9085_p10 = pnand %p9084_p9, %p9078_p3 }
 0x135   : > { %9088 = shalt.err (!%p9085_p10)
}
 0x136   : > { %s12841_s5 = smov 8   ;;  %s12842_s23 = smov 128  }
 0x137   : > { %7623 = dma.hbm_to_vmem [thread:$0]  (%p12742_p4), %s10333_s20, 256, %s1223_s15, [#allocation27], %s12842_s23, %s12842_s23, %s12841_s5  }
 0x138   : > { %s9089_s10 = scalar_lea.hbm %s12824_s4, 256 }
 0x139   : > { %p9090_p6 = scmp.ne.s32.totalorder %s12824_s4, %s9089_s10  ;;  %p9095_p13 = scmp.lt.u32.totalorder %s9089_s10, %s12824_s4 }
 0x13b   : > { %p9091_p11 = pnand %p9090_p6, %p12742_p4 }
 0x13d   : > { %p9092_p12 = pneg %p9091_p11 }
 0x13f   : > { %p9097_p0 = pnand %p9095_p13, %p9092_p12 }
 0x141   : > { %9100 = shalt.err (!%p9097_p0)
}
 0x142   : > { %s9101_s2 = scalar_lea.vmem %s10639_s26, 256  ;;  %p9108_p7 = scmp.lt.s32.totalorder %s10639_s26, %s10639_s26 }
 0x143   : > { %p9102_p1 = scmp.ne.s32.totalorder %s10639_s26, %s9101_s2  ;;  %p9109_p8 = scmp.lt.s32.totalorder %s9101_s2, %s9101_s2 }
 0x145   : > { %p9103_p2 = pnand %p9102_p1, %p12742_p4  ;;  %p9110_p9 = por %p9109_p8, %p9108_p7 }
 0x147   : > { %p9104_p3 = pneg %p9103_p2 }
 0x149   : > { %p9111_p10 = pnand %p9110_p9, %p9104_p3 }
 0x14b   : > { %9114 = shalt.err (!%p9111_p10)
}
 0x14c   : > { %7627 = dma.hbm_to_vmem [thread:$0]  (%p12742_p4), %s12824_s4, 256, %s10639_s26, [#allocation30], %s12842_s23, %s12842_s23, %s12841_s5  }
 0x14d   : > { %s10184_s15 = smov [#allocation32]   ;;  %s10185_s10 = smov [#allocation35]  }
 0x14e   : > { %s1274_s0 = sshll.u32 %s10184_s15, 4  ;;  %s1300_s3 = sshll.u32 %s10185_s10, 4  ;;  %s1275_s0 = int_to_ptr.vmem [resolvable:$true] %s1274_s0  ;;  %s10672_s3 = int_to_ptr.vmem [resolvable:$true] %s1300_s3 }
 0x14f   : > { %s9115_s2 = scalar_lea.hbm %s12821_s12, 256 }
 0x150   : > { %p9116_p6 = scmp.ne.s32.totalorder %s12821_s12, %s9115_s2  ;;  %p9121_p13 = scmp.lt.u32.totalorder %s9115_s2, %s12821_s12 }
 0x152   : > { %p9117_p11 = pnand %p9116_p6, %p12742_p4 }
 0x154   : > { %p9118_p12 = pneg %p9117_p11 }
 0x156   : > { %p9123_p0 = pnand %p9121_p13, %p9118_p12 }
 0x158   : > { %9126 = shalt.err (!%p9123_p0)
}
 0x159   : > { %s9127_s6 = scalar_lea.vmem %s1275_s0, 256  ;;  %p9134_p7 = scmp.lt.s32.totalorder %s1275_s0, %s1275_s0 }
 0x15a   : > { %p9128_p1 = scmp.ne.s32.totalorder %s1275_s0, %s9127_s6  ;;  %p9135_p8 = scmp.lt.s32.totalorder %s9127_s6, %s9127_s6 }
 0x15c   : > { %p9129_p2 = pnand %p9128_p1, %p12742_p4  ;;  %p9136_p9 = por %p9135_p8, %p9134_p7 }
 0x15e   : > { %p9130_p3 = pneg %p9129_p2 }
 0x160   : > { %p9137_p10 = pnand %p9136_p9, %p9130_p3 }
 0x162   : > { %9140 = shalt.err (!%p9137_p10)
}
 0x163   : > { %7631 = dma.hbm_to_vmem [thread:$0]  (%p12742_p4), %s12821_s12, 256, %s1275_s0, [#allocation33], %s12842_s23, %s12842_s23, %s12841_s5  }
 0x164   : > { %s9141_s26 = scalar_lea.hbm %s10363_s30, 512 }
 0x165   : > { %p9142_p6 = scmp.ne.s32.totalorder %s10363_s30, %s9141_s26  ;;  %p9147_p13 = scmp.lt.u32.totalorder %s9141_s26, %s10363_s30 }
 0x167   : > { %p9143_p11 = pnand %p9142_p6, %p12742_p4 }
 0x169   : > { %p9144_p12 = pneg %p9143_p11 }
 0x16b   : > { %p9149_p0 = pnand %p9147_p13, %p9144_p12 }
 0x16d   : > { %9152 = shalt.err (!%p9149_p0)
}
 0x16e   : > { %s9153_s6 = scalar_lea.vmem %s10672_s3, 512  ;;  %p9160_p7 = scmp.lt.s32.totalorder %s10672_s3, %s10672_s3 }
 0x16f   : > { %p9154_p1 = scmp.ne.s32.totalorder %s10672_s3, %s9153_s6  ;;  %p9161_p8 = scmp.lt.s32.totalorder %s9153_s6, %s9153_s6 }
 0x171   : > { %p9155_p2 = pnand %p9154_p1, %p12742_p4  ;;  %p9162_p9 = por %p9161_p8, %p9160_p7 }
 0x173   : > { %p9156_p3 = pneg %p9155_p2 }
 0x175   : > { %p9163_p10 = pnand %p9162_p9, %p9156_p3 }
 0x177   : > { %9166 = shalt.err (!%p9163_p10)
}
 0x178   : > { %7635 = dma.hbm_to_vmem [thread:$0]  (%p12742_p4), %s10363_s30, 512, %s10672_s3, [#allocation36], %s12842_s23, %s12842_s23, %s12841_s5  }
 0x179   : > { %s10186_s15 = smov [#allocation38]   ;;  %s10187_s10 = smov [#allocation41]  }
 0x17a   : > { %s1326_s0 = sshll.u32 %s10186_s15, 4  ;;  %s1352_s2 = sshll.u32 %s10187_s10, 4  ;;  %s1327_s0 = int_to_ptr.vmem [resolvable:$true] %s1326_s0  ;;  %s10705_s2 = int_to_ptr.vmem [resolvable:$true] %s1352_s2 }
 0x17b   : > { %s9167_s26 = scalar_lea.hbm %s10373_s19, 512 }
 0x17c   : > { %p9168_p6 = scmp.ne.s32.totalorder %s10373_s19, %s9167_s26  ;;  %p9173_p13 = scmp.lt.u32.totalorder %s9167_s26, %s10373_s19 }
 0x17e   : > { %p9169_p11 = pnand %p9168_p6, %p12742_p4 }
 0x180   : > { %p9170_p12 = pneg %p9169_p11 }
 0x182   : > { %p9175_p0 = pnand %p9173_p13, %p9170_p12 }
 0x184   : > { %9178 = shalt.err (!%p9175_p0)
}
 0x185   : > { %s9179_s6 = scalar_lea.vmem %s1327_s0, 512  ;;  %p9186_p7 = scmp.lt.s32.totalorder %s1327_s0, %s1327_s0 }
 0x186   : > { %p9180_p1 = scmp.ne.s32.totalorder %s1327_s0, %s9179_s6  ;;  %p9187_p8 = scmp.lt.s32.totalorder %s9179_s6, %s9179_s6 }
 0x188   : > { %p9181_p2 = pnand %p9180_p1, %p12742_p4  ;;  %p9188_p9 = por %p9187_p8, %p9186_p7 }
 0x18a   : > { %p9182_p3 = pneg %p9181_p2 }
 0x18c   : > { %p9189_p10 = pnand %p9188_p9, %p9182_p3 }
 0x18e   : > { %9192 = shalt.err (!%p9189_p10)
}
 0x18f   : > { %7639 = dma.hbm_to_vmem [thread:$0]  (%p12742_p4), %s10373_s19, 512, %s1327_s0, [#allocation39], %s12842_s23, %s12842_s23, %s12841_s5  }
 0x190   : > { %s9193_s3 = scalar_lea.hbm %s12823_s8, 512 }
 0x191   : > { %p9194_p6 = scmp.ne.s32.totalorder %s12823_s8, %s9193_s3  ;;  %p9199_p13 = scmp.lt.u32.totalorder %s9193_s3, %s12823_s8 }
 0x193   : > { %p9195_p11 = pnand %p9194_p6, %p12742_p4 }
 0x195   : > { %p9196_p12 = pneg %p9195_p11 }
 0x197   : > { %p9201_p0 = pnand %p9199_p13, %p9196_p12 }
 0x199   : > { %9204 = shalt.err (!%p9201_p0)
}
 0x19a   : > { %s9205_s15 = scalar_lea.vmem %s10705_s2, 512  ;;  %p9212_p7 = scmp.lt.s32.totalorder %s10705_s2, %s10705_s2 }
 0x19b   : > { %p9206_p1 = scmp.ne.s32.totalorder %s10705_s2, %s9205_s15  ;;  %p9213_p8 = scmp.lt.s32.totalorder %s9205_s15, %s9205_s15 }
 0x19d   : > { %p9207_p2 = pnand %p9206_p1, %p12742_p4  ;;  %p9214_p9 = por %p9213_p8, %p9212_p7 }
 0x19f   : > { %p9208_p3 = pneg %p9207_p2 }
 0x1a1   : > { %p9215_p10 = pnand %p9214_p9, %p9208_p3 }
 0x1a3   : > { %9218 = shalt.err (!%p9215_p10)
}
 0x1a4   : > { %7643 = dma.hbm_to_vmem [thread:$0]  (%p12742_p4), %s12823_s8, 512, %s10705_s2, [#allocation42], %s12842_s23, %s12842_s23, %s12841_s5  }
 0x1a5   : > { %s10188_s0 = smov [#allocation44]   ;;  %s10189_s26 = smov [#allocation47]  }
 0x1a6   : > { %s1378_s10 = sshll.u32 %s10188_s0, 4  ;;  %s1404_s6 = sshll.u32 %s10189_s26, 4  ;;  %s1379_s10 = int_to_ptr.vmem [resolvable:$true] %s1378_s10  ;;  %s10738_s6 = int_to_ptr.vmem [resolvable:$true] %s1404_s6 }
 0x1a7   : > { %s9219_s3 = scalar_lea.hbm %s10393_s29, 512 }
 0x1a8   : > { %p9220_p6 = scmp.ne.s32.totalorder %s10393_s29, %s9219_s3  ;;  %p9225_p13 = scmp.lt.u32.totalorder %s9219_s3, %s10393_s29 }
 0x1aa   : > { %p9221_p11 = pnand %p9220_p6, %p12742_p4 }
 0x1ac   : > { %p9222_p12 = pneg %p9221_p11 }
 0x1ae   : > { %p9227_p0 = pnand %p9225_p13, %p9222_p12 }
 0x1b0   : > { %9230 = shalt.err (!%p9227_p0)
}
 0x1b1   : > { %s9231_s15 = scalar_lea.vmem %s1379_s10, 512  ;;  %p9238_p7 = scmp.lt.s32.totalorder %s1379_s10, %s1379_s10 }
 0x1b2   : > { %p9232_p1 = scmp.ne.s32.totalorder %s1379_s10, %s9231_s15  ;;  %p9239_p8 = scmp.lt.s32.totalorder %s9231_s15, %s9231_s15 }
 0x1b4   : > { %p9233_p2 = pnand %p9232_p1, %p12742_p4  ;;  %p9240_p9 = por %p9239_p8, %p9238_p7 }
 0x1b6   : > { %p9234_p3 = pneg %p9233_p2 }
 0x1b8   : > { %p9241_p10 = pnand %p9240_p9, %p9234_p3 }
 0x1ba   : > { %9244 = shalt.err (!%p9241_p10)
}
 0x1bb   : > { %s12843_s2 = sld [smem:[#allocation113_spill]] }
 0x1bc   : > { %7647 = dma.hbm_to_vmem [thread:$0]  (%p12742_p4), %s10393_s29, 512, %s1379_s10, [#allocation45], %s12842_s23, %s12842_s23, %s12841_s5  }
 0x1c1   : > { %s9245_s0 = scalar_lea.hbm %s12843_s2, 512 }
 0x1c2   : > { %p9246_p6 = scmp.ne.s32.totalorder %s12843_s2, %s9245_s0  ;;  %p9251_p13 = scmp.lt.u32.totalorder %s9245_s0, %s12843_s2 }
 0x1c4   : > { %p9247_p11 = pnand %p9246_p6, %p12742_p4 }
 0x1c6   : > { %p9248_p12 = pneg %p9247_p11 }
 0x1c8   : > { %p9253_p0 = pnand %p9251_p13, %p9248_p12 }
 0x1ca   : > { %9256 = shalt.err (!%p9253_p0)
}
 0x1cb   : > { %s9257_s26 = scalar_lea.vmem %s10738_s6, 512  ;;  %p9264_p7 = scmp.lt.s32.totalorder %s10738_s6, %s10738_s6 }
 0x1cc   : > { %p9258_p1 = scmp.ne.s32.totalorder %s10738_s6, %s9257_s26  ;;  %p9265_p8 = scmp.lt.s32.totalorder %s9257_s26, %s9257_s26 }
 0x1ce   : > { %p9259_p2 = pnand %p9258_p1, %p12742_p4  ;;  %p9266_p9 = por %p9265_p8, %p9264_p7 }
 0x1d0   : > { %p9260_p3 = pneg %p9259_p2 }
 0x1d2   : > { %p9267_p10 = pnand %p9266_p9, %p9260_p3 }
 0x1d4   : > { %9270 = shalt.err (!%p9267_p10)
}
 0x1d5   : > { %s12844_s10 = sld [smem:[#allocation115_spill]]  ;;  %s10190_s3 = smov [#allocation50]  }
 0x1d6   : > { %7651 = dma.hbm_to_vmem [thread:$0]  (%p12742_p4), %s12843_s2, 512, %s10738_s6, [#allocation48], %s12842_s23, %s12842_s23, %s12841_s5  }
 0x1d7   : > { %s1430_s15 = sshll.u32 %s10190_s3, 4  ;;  %s10191_s0 = smov [#allocation53]   ;;  %s1431_s15 = int_to_ptr.vmem [resolvable:$true] %s1430_s15 }
 0x1d8   : > { %s1456_s4 = sshll.u32 %s10191_s0, 4  ;;  %s10771_s4 = int_to_ptr.vmem [resolvable:$true] %s1456_s4 }
 0x1db   : > { %s9271_s26 = scalar_lea.hbm %s12844_s10, 512 }
 0x1dc   : > { %p9272_p6 = scmp.ne.s32.totalorder %s12844_s10, %s9271_s26  ;;  %p9277_p13 = scmp.lt.u32.totalorder %s9271_s26, %s12844_s10 }
 0x1de   : > { %p9273_p11 = pnand %p9272_p6, %p12742_p4 }
 0x1e0   : > { %p9274_p12 = pneg %p9273_p11 }
 0x1e2   : > { %p9279_p0 = pnand %p9277_p13, %p9274_p12 }
 0x1e4   : > { %9282 = shalt.err (!%p9279_p0)
}
 0x1e5   : > { %s9283_s8 = scalar_lea.vmem %s1431_s15, 512  ;;  %p9290_p7 = scmp.lt.s32.totalorder %s1431_s15, %s1431_s15 }
 0x1e6   : > { %p9284_p1 = scmp.ne.s32.totalorder %s1431_s15, %s9283_s8  ;;  %p9291_p8 = scmp.lt.s32.totalorder %s9283_s8, %s9283_s8 }
 0x1e8   : > { %p9285_p2 = pnand %p9284_p1, %p12742_p4  ;;  %p9292_p9 = por %p9291_p8, %p9290_p7 }
 0x1ea   : > { %p9286_p3 = pneg %p9285_p2 }
 0x1ec   : > { %p9293_p10 = pnand %p9292_p9, %p9286_p3 }
 0x1ee   : > { %9296 = shalt.err (!%p9293_p10)
}
 0x1ef   : > { %s12845_s6 = sld [smem:[#allocation117_spill]] }
 0x1f0   : > { %7655 = dma.hbm_to_vmem [thread:$0]  (%p12742_p4), %s12844_s10, 512, %s1431_s15, [#allocation51], %s12842_s23, %s12842_s23, %s12841_s5  }
 0x1f5   : > { %s9297_s3 = scalar_lea.hbm %s12845_s6, 256 }
 0x1f6   : > { %p9298_p6 = scmp.ne.s32.totalorder %s12845_s6, %s9297_s3  ;;  %p9303_p13 = scmp.lt.u32.totalorder %s9297_s3, %s12845_s6 }
 0x1f8   : > { %p9299_p11 = pnand %p9298_p6, %p12742_p4 }
 0x1fa   : > { %p9300_p12 = pneg %p9299_p11 }
 0x1fc   : > { %p9305_p0 = pnand %p9303_p13, %p9300_p12 }
 0x1fe   : > { %9308 = shalt.err (!%p9305_p0)
}
 0x1ff   : > { %s9309_s8 = scalar_lea.vmem %s10771_s4, 256  ;;  %p9316_p7 = scmp.lt.s32.totalorder %s10771_s4, %s10771_s4 }
 0x200   : > { %p9310_p1 = scmp.ne.s32.totalorder %s10771_s4, %s9309_s8  ;;  %p9317_p8 = scmp.lt.s32.totalorder %s9309_s8, %s9309_s8 }
 0x202   : > { %p9311_p2 = pnand %p9310_p1, %p12742_p4  ;;  %p9318_p9 = por %p9317_p8, %p9316_p7 }
 0x204   : > { %p9312_p3 = pneg %p9311_p2 }
 0x206   : > { %p9319_p10 = pnand %p9318_p9, %p9312_p3 }
 0x208   : > { %9322 = shalt.err (!%p9319_p10)
}
 0x209   : > { %s12846_s15 = sld [smem:[#allocation119_spill]]  ;;  %s10192_s0 = smov [#allocation56]  }
 0x20a   : > { %7659 = dma.hbm_to_vmem [thread:$0]  (%p12742_p4), %s12845_s6, 256, %s10771_s4, [#allocation54], %s12842_s23, %s12842_s23, %s12841_s5  }
 0x20b   : > { %s1482_s3 = sshll.u32 %s10192_s0, 4  ;;  %s10193_s2 = smov [#allocation59]   ;;  %s1483_s3 = int_to_ptr.vmem [resolvable:$true] %s1482_s3 }
 0x20c   : > { %s1507_s9 = sshll.u32 %s10193_s2, 4  ;;  %s10804_s9 = int_to_ptr.vmem [resolvable:$true] %s1507_s9 }
 0x20f   : > { %s12847_s26 = smov %s12846_s15  ;;  %s9323_s8 = scalar_lea.hbm %s12846_s15, 256 }
 0x210   : > { %p9324_p6 = scmp.ne.s32.totalorder %s12847_s26, %s9323_s8  ;;  %p9329_p13 = scmp.lt.u32.totalorder %s9323_s8, %s12847_s26 }
 0x212   : > { %p9325_p11 = pnand %p9324_p6, %p12742_p4 }
 0x214   : > { %p9326_p12 = pneg %p9325_p11 }
 0x216   : > { %p9331_p0 = pnand %p9329_p13, %p9326_p12 }
 0x218   : > { %9334 = shalt.err (!%p9331_p0)
}
 0x219   : > { %s9335_s10 = scalar_lea.vmem %s1483_s3, 256  ;;  %p9342_p7 = scmp.lt.s32.totalorder %s1483_s3, %s1483_s3 }
 0x21a   : > { %p9336_p1 = scmp.ne.s32.totalorder %s1483_s3, %s9335_s10  ;;  %p9343_p8 = scmp.lt.s32.totalorder %s9335_s10, %s9335_s10 }
 0x21c   : > { %p9337_p2 = pnand %p9336_p1, %p12742_p4  ;;  %p9344_p9 = por %p9343_p8, %p9342_p7 }
 0x21e   : > { %p9338_p3 = pneg %p9337_p2 }
 0x220   : > { %p9345_p10 = pnand %p9344_p9, %p9338_p3 }
 0x222   : > { %9348 = shalt.err (!%p9345_p10)
}
 0x223   : > { %s12848_s4 = sld [smem:[#allocation121_spill]] }
 0x224   : > { %7663 = dma.hbm_to_vmem [thread:$0]  (%p12742_p4), %s12847_s26, 256, %s1483_s3, [#allocation57], %s12842_s23, %s12842_s23, %s12841_s5  }
 0x229   : > { %s9349_s2 = scalar_lea.hbm %s12848_s4, 128 }
 0x22a   : > { %p9350_p6 = scmp.ne.s32.totalorder %s12848_s4, %s9349_s2  ;;  %p9355_p13 = scmp.lt.u32.totalorder %s9349_s2, %s12848_s4 }
 0x22c   : > { %p9351_p11 = pnand %p9350_p6, %p12742_p4 }
 0x22e   : > { %p9352_p12 = pneg %p9351_p11 }
 0x230   : > { %p9357_p0 = pnand %p9355_p13, %p9352_p12 }
 0x232   : > { %9360 = shalt.err (!%p9357_p0)
}
 0x233   : > { %s9361_s10 = scalar_lea.vmem %s10804_s9, 128  ;;  %p9368_p7 = scmp.lt.s32.totalorder %s10804_s9, %s10804_s9 }
 0x234   : > { %p9362_p1 = scmp.ne.s32.totalorder %s10804_s9, %s9361_s10  ;;  %p9369_p8 = scmp.lt.s32.totalorder %s9361_s10, %s9361_s10 }
 0x236   : > { %p9363_p2 = pnand %p9362_p1, %p12742_p4  ;;  %p9370_p9 = por %p9369_p8, %p9368_p7 }
 0x238   : > { %p9364_p3 = pneg %p9363_p2 }
 0x23a   : > { %p9371_p10 = pnand %p9370_p9, %p9364_p3 }
 0x23c   : > { %9374 = shalt.err (!%p9371_p10)
}
 0x23d   : > { %7667 = dma.hbm_to_vmem [thread:$0]  (%p12742_p4), %s12848_s4, 128, %s10804_s9, [#allocation60]  }
 0x23e   : > { %s10194_s15 = smov [#allocation62]   ;;  %s10195_s3 = smov [#allocation7]  }
 0x23f   : > { %s1529_s0 = sshll.u32 %s10194_s15, 4  ;;  %s1065_s8 = sshll.u32 %s10195_s3, 4  ;;  %s1530_s0 = int_to_ptr.vmem [resolvable:$true] %s1529_s0  ;;  %s10834_s8 = int_to_ptr.vmem [resolvable:$true] %s1065_s8 }
 0x240   : > { %s9375_s2 = scalar_lea.hbm %s12820_s13, 128 }
 0x241   : > { %p9376_p6 = scmp.ne.s32.totalorder %s12820_s13, %s9375_s2  ;;  %p9381_p13 = scmp.lt.u32.totalorder %s9375_s2, %s12820_s13 }
 0x243   : > { %p9377_p11 = pnand %p9376_p6, %p12742_p4 }
 0x245   : > { %p9378_p12 = pneg %p9377_p11 }
 0x247   : > { %p9383_p0 = pnand %p9381_p13, %p9378_p12 }
 0x249   : > { %9386 = shalt.err (!%p9383_p0)
}
 0x24a   : > { %s9387_s10 = scalar_lea.vmem %s1530_s0, 128  ;;  %p9394_p7 = scmp.lt.s32.totalorder %s1530_s0, %s1530_s0 }
 0x24b   : > { %p9388_p1 = scmp.ne.s32.totalorder %s1530_s0, %s9387_s10  ;;  %p9395_p8 = scmp.lt.s32.totalorder %s9387_s10, %s9387_s10 }
 0x24d   : > { %p9389_p2 = pnand %p9388_p1, %p12742_p4  ;;  %p9396_p9 = por %p9395_p8, %p9394_p7 }
 0x24f   : > { %p9390_p3 = pneg %p9389_p2 }
 0x251   : > { %p9397_p10 = pnand %p9396_p9, %p9390_p3 }
 0x253   : > { %9400 = shalt.err (!%p9397_p10)
}
 0x254   : > { %s12849_s9 = sld [smem:[#allocation93_spill]] }
 0x255   : > { %7671 = dma.hbm_to_vmem [thread:$0]  (%p12742_p4), %s12820_s13, 128, %s1530_s0, [#allocation63]  }
 0x25a   : > { %s9401_s15 = scalar_lea.hbm %s12849_s9, 256 }
 0x25b   : > { %p9402_p6 = scmp.ne.s32.totalorder %s12849_s9, %s9401_s15  ;;  %p9407_p13 = scmp.lt.u32.totalorder %s9401_s15, %s12849_s9 }
 0x25d   : > { %p9403_p11 = pnand %p9402_p6, %p12742_p4 }
 0x25f   : > { %p9404_p12 = pneg %p9403_p11 }
 0x261   : > { %p9409_p0 = pnand %p9407_p13, %p9404_p12 }
 0x263   : > { %9412 = shalt.err (!%p9409_p0)
}
 0x264   : > { %s9413_s3 = scalar_lea.vmem %s10834_s8, 256  ;;  %p9420_p7 = scmp.lt.s32.totalorder %s10834_s8, %s10834_s8 }
 0x265   : > { %p9414_p1 = scmp.ne.s32.totalorder %s10834_s8, %s9413_s3  ;;  %p9421_p8 = scmp.lt.s32.totalorder %s9413_s3, %s9413_s3 }
 0x267   : > { %p9415_p2 = pnand %p9414_p1, %p12742_p4  ;;  %p9422_p9 = por %p9421_p8, %p9420_p7 }
 0x269   : > { %p9416_p3 = pneg %p9415_p2 }
 0x26b   : > { %p9423_p10 = pnand %p9422_p9, %p9416_p3 }
 0x26d   : > { %9426 = shalt.err (!%p9423_p10)
}
 0x26e   : > { %s12850_s0 = sld [smem:[#allocation94_spill]]  ;;  %s10196_s10 = smov [#allocation10]  }
 0x26f   : > { %7597 = dma.hbm_to_vmem [thread:$0]  (%p12742_p4), %s12849_s9, 256, %s10834_s8, [#allocation6], %s12842_s23, %s12842_s23, %s12841_s5  }
 0x270   : > { %s1091_s15 = sshll.u32 %s10196_s10, 4  ;;  %s10197_s4 = smov [#allocation13]   ;;  %s1092_s15 = int_to_ptr.vmem [resolvable:$true] %s1091_s15 }
 0x271   : > { %s1117_s6 = sshll.u32 %s10197_s4, 4  ;;  %s10864_s6 = int_to_ptr.vmem [resolvable:$true] %s1117_s6 }
 0x274   : > { %s12851_s2 = smov %s12850_s0  ;;  %s9427_s3 = scalar_lea.hbm %s12850_s0, 4096 }
 0x275   : > { %p9428_p6 = scmp.ne.s32.totalorder %s12851_s2, %s9427_s3  ;;  %p9433_p13 = scmp.lt.u32.totalorder %s9427_s3, %s12851_s2 }
 0x277   : > { %p9429_p11 = pnand %p9428_p6, %p12742_p4 }
 0x279   : > { %p9430_p12 = pneg %p9429_p11 }
 0x27b   : > { %p9435_p0 = pnand %p9433_p13, %p9430_p12 }
 0x27d   : > { %9438 = shalt.err (!%p9435_p0)
}
 0x27e   : > { %s9439_s12 = scalar_lea.vmem %s1092_s15, 4096  ;;  %p9446_p7 = scmp.lt.s32.totalorder %s1092_s15, %s1092_s15 }
 0x27f   : > { %p9440_p1 = scmp.ne.s32.totalorder %s1092_s15, %s9439_s12  ;;  %p9447_p8 = scmp.lt.s32.totalorder %s9439_s12, %s9439_s12 }
 0x281   : > { %p9441_p2 = pnand %p9440_p1, %p12742_p4  ;;  %p9448_p9 = por %p9447_p8, %p9446_p7 }
 0x283   : > { %p9442_p3 = pneg %p9441_p2 }
 0x285   : > { %p9449_p10 = pnand %p9448_p9, %p9442_p3 }
 0x287   : > { %9452 = shalt.err (!%p9449_p10)
}
 0x288   : > { %s12852_s4 = sld [smem:[#allocation95_spill]] }
 0x289   : > { %7601 = dma.hbm_to_vmem [thread:$0]  (%p12742_p4), %s12851_s2, 4096, %s1092_s15, [#allocation9], %s12842_s23, %s12842_s23, %s12841_s5  }
 0x28e   : > { %s9453_s8 = scalar_lea.hbm %s12852_s4, 256 }
 0x28f   : > { %p9454_p6 = scmp.ne.s32.totalorder %s12852_s4, %s9453_s8  ;;  %p9459_p13 = scmp.lt.u32.totalorder %s9453_s8, %s12852_s4 }
 0x291   : > { %p9455_p11 = pnand %p9454_p6, %p12742_p4 }
 0x293   : > { %p9456_p12 = pneg %p9455_p11 }
 0x295   : > { %p9461_p0 = pnand %p9459_p13, %p9456_p12 }
 0x297   : > { %9464 = shalt.err (!%p9461_p0)
}
 0x298   : > { %s9465_s12 = scalar_lea.vmem %s10864_s6, 256  ;;  %p9472_p7 = scmp.lt.s32.totalorder %s10864_s6, %s10864_s6 }
 0x299   : > { %p9466_p1 = scmp.ne.s32.totalorder %s10864_s6, %s9465_s12  ;;  %p9473_p8 = scmp.lt.s32.totalorder %s9465_s12, %s9465_s12 }
 0x29b   : > { %p9467_p2 = pnand %p9466_p1, %p12742_p4  ;;  %p9474_p9 = por %p9473_p8, %p9472_p7 }
 0x29d   : > { %p9468_p3 = pneg %p9467_p2 }
 0x29f   : > { %p9475_p10 = pnand %p9474_p9, %p9468_p3 }
 0x2a1   : > { %9478 = shalt.err (!%p9475_p10)
}
 0x2a2   : > { %s12853_s0 = sld [smem:[#allocation97_spill]]  ;;  %s10198_s15 = smov [#allocation16]  }
 0x2a3   : > { %7605 = dma.hbm_to_vmem [thread:$0]  (%p12742_p4), %s12852_s4, 256, %s10864_s6, [#allocation12], %s12842_s23, %s12842_s23, %s12841_s5  }
 0x2a4   : > { %s1144_s3 = sshll.u32 %s10198_s15, 4  ;;  %s10199_s8 = smov [#allocation19]   ;;  %s1145_s3 = int_to_ptr.vmem [resolvable:$true] %s1144_s3 }
 0x2a5   : > { %s1166_s2 = sshll.u32 %s10199_s8, 4  ;;  %s10897_s2 = int_to_ptr.vmem [resolvable:$true] %s1166_s2 }
 0x2a8   : > { %s12854_s10 = smov %s12853_s0  ;;  %s9479_s12 = scalar_lea.hbm %s12853_s0, 64 }
 0x2a9   : > { %p9480_p6 = scmp.ne.s32.totalorder %s12854_s10, %s9479_s12  ;;  %p9485_p13 = scmp.lt.u32.totalorder %s9479_s12, %s12854_s10 }
 0x2ab   : > { %p9481_p11 = pnand %p9480_p6, %p12742_p4 }
 0x2ad   : > { %p9482_p12 = pneg %p9481_p11 }
 0x2af   : > { %p9487_p0 = pnand %p9485_p13, %p9482_p12 }
 0x2b1   : > { %9490 = shalt.err (!%p9487_p0)
}
 0x2b2   : > { %s9491_s9 = scalar_lea.vmem %s1145_s3, 64  ;;  %p9498_p7 = scmp.lt.s32.totalorder %s1145_s3, %s1145_s3 }
 0x2b3   : > { %p9492_p1 = scmp.ne.s32.totalorder %s1145_s3, %s9491_s9  ;;  %p9499_p8 = scmp.lt.s32.totalorder %s9491_s9, %s9491_s9 }
 0x2b5   : > { %p9493_p2 = pnand %p9492_p1, %p12742_p4  ;;  %p9500_p9 = por %p9499_p8, %p9498_p7 }
 0x2b7   : > { %p9494_p3 = pneg %p9493_p2 }
 0x2b9   : > { %p9501_p10 = pnand %p9500_p9, %p9494_p3 }
 0x2bb   : > { %9504 = shalt.err (!%p9501_p10)
}
 0x2bc   : > { %s12855_s6 = sld [smem:[#allocation99_spill]] }
 0x2bd   : > { %7609 = dma.hbm_to_vmem [thread:$0]  (%p12742_p4), %s12854_s10, 64, %s1145_s3, [#allocation15]  }
 0x2c2   : > { %s9505_s0 = scalar_lea.hbm %s12855_s6, 64 }
 0x2c3   : > { %p9506_p6 = scmp.ne.s32.totalorder %s12855_s6, %s9505_s0  ;;  %p9511_p13 = scmp.lt.u32.totalorder %s9505_s0, %s12855_s6 }
 0x2c5   : > { %p9507_p11 = pnand %p9506_p6, %p12742_p4 }
 0x2c7   : > { %p9508_p12 = pneg %p9507_p11 }
 0x2c9   : > { %p9513_p0 = pnand %p9511_p13, %p9508_p12 }
 0x2cb   : > { %9516 = shalt.err (!%p9513_p0)
}
 0x2cc   : > { %s9517_s9 = scalar_lea.vmem %s10897_s2, 64  ;;  %p9524_p7 = scmp.lt.s32.totalorder %s10897_s2, %s10897_s2 }
 0x2cd   : > { %p9518_p1 = scmp.ne.s32.totalorder %s10897_s2, %s9517_s9  ;;  %p9525_p8 = scmp.lt.s32.totalorder %s9517_s9, %s9517_s9 }
 0x2cf   : > { %p9519_p2 = pnand %p9518_p1, %p12742_p4  ;;  %p9526_p9 = por %p9525_p8, %p9524_p7 }
 0x2d1   : > { %p9520_p3 = pneg %p9519_p2 }
 0x2d3   : > { %p9527_p10 = pnand %p9526_p9, %p9520_p3 }
 0x2d5   : > { %9530 = shalt.err (!%p9527_p10)
}
 0x2d6   : > { %s12856_s15 = sld [smem:[#allocation100_spill]]  ;;  %s10200_s8 = smov [#allocation22]  }
 0x2d7   : > { %7613 = dma.hbm_to_vmem [thread:$0]  (%p12742_p4), %s12855_s6, 64, %s10897_s2, [#allocation18]  }
 0x2d8   : > { %s1188_s12 = sshll.u32 %s10200_s8, 4  ;;  %s10201_s0 = smov [#allocation25]   ;;  %s1189_s12 = int_to_ptr.vmem [resolvable:$true] %s1188_s12 }
 0x2d9   : > { %s1209_s4 = sshll.u32 %s10201_s0, 4  ;;  %s10924_s4 = int_to_ptr.vmem [resolvable:$true] %s1209_s4 }
 0x2dc   : > { %s12857_s3 = smov %s12856_s15  ;;  %s9531_s9 = scalar_lea.hbm %s12856_s15, 64 }
 0x2dd   : > { %p9532_p6 = scmp.ne.s32.totalorder %s12857_s3, %s9531_s9  ;;  %p9537_p13 = scmp.lt.u32.totalorder %s9531_s9, %s12857_s3 }
 0x2df   : > { %p9533_p11 = pnand %p9532_p6, %p12742_p4 }
 0x2e1   : > { %p9534_p12 = pneg %p9533_p11 }
 0x2e3   : > { %p9539_p0 = pnand %p9537_p13, %p9534_p12 }
 0x2e5   : > { %9542 = shalt.err (!%p9539_p0)
}
 0x2e6   : > { %s9543_s10 = scalar_lea.vmem %s1189_s12, 64  ;;  %p9550_p7 = scmp.lt.s32.totalorder %s1189_s12, %s1189_s12 }
 0x2e7   : > { %p9544_p1 = scmp.ne.s32.totalorder %s1189_s12, %s9543_s10  ;;  %p9551_p8 = scmp.lt.s32.totalorder %s9543_s10, %s9543_s10 }
 0x2e9   : > { %p9545_p2 = pnand %p9544_p1, %p12742_p4  ;;  %p9552_p9 = por %p9551_p8, %p9550_p7 }
 0x2eb   : > { %p9546_p3 = pneg %p9545_p2 }
 0x2ed   : > { %p9553_p10 = pnand %p9552_p9, %p9546_p3 }
 0x2ef   : > { %9556 = shalt.err (!%p9553_p10)
}
 0x2f0   : > { %s12858_s2 = sld [smem:[#allocation102_spill]] }
 0x2f1   : > { %7617 = dma.hbm_to_vmem [thread:$0]  (%p12742_p4), %s12857_s3, 64, %s1189_s12, [#allocation21]  }
 0x2f6   : > { %s9557_s15 = scalar_lea.hbm %s12858_s2, 128 }
 0x2f7   : > { %p9558_p6 = scmp.ne.s32.totalorder %s12858_s2, %s9557_s15  ;;  %p9563_p13 = scmp.lt.u32.totalorder %s9557_s15, %s12858_s2 }
 0x2f9   : > { %p9559_p11 = pnand %p9558_p6, %p12742_p4 }
 0x2fb   : > { %p9560_p12 = pneg %p9559_p11 }
 0x2fd   : > { %p9565_p0 = pnand %p9563_p13, %p9560_p12 }
 0x2ff   : > { %9568 = shalt.err (!%p9565_p0)
}
 0x300   : > { %s9569_s10 = scalar_lea.vmem %s10924_s4, 128  ;;  %p9576_p7 = scmp.lt.s32.totalorder %s10924_s4, %s10924_s4 }
 0x301   : > { %p9570_p1 = scmp.ne.s32.totalorder %s10924_s4, %s9569_s10  ;;  %p9577_p8 = scmp.lt.s32.totalorder %s9569_s10, %s9569_s10 }
 0x303   : > { %p9571_p2 = pnand %p9570_p1, %p12742_p4  ;;  %p9578_p9 = por %p9577_p8, %p9576_p7 }
 0x305   : > { %p9572_p3 = pneg %p9571_p2 }
 0x307   : > { %p9579_p10 = pnand %p9578_p9, %p9572_p3 }
 0x309   : > { %9582 = shalt.err (!%p9579_p10)
}
 0x30a   : > { %s10202_s8 = smov 64   ;;  %s12859_s12 = sld [smem:[#allocation103_spill]] }
 0x30b   : > { %s10203_s0 = smov 4   ;;  %s10204_s9 = smov [#allocation28]  }
 0x30c   : > { %7621 = dma.hbm_to_vmem [thread:$0]  (%p12742_p4), %s12858_s2, 128, %s10924_s4, [#allocation24], %s10202_s8, %s10202_s8, %s10203_s0  }
 0x30d   : > { %s1235_s15 = sshll.u32 %s10204_s9, 4  ;;  %s10205_s3 = smov [#allocation31]   ;;  %s1236_s15 = int_to_ptr.vmem [resolvable:$true] %s1235_s15 }
 0x30e   : > { %s1261_s6 = sshll.u32 %s10205_s3, 4  ;;  %s10951_s6 = int_to_ptr.vmem [resolvable:$true] %s1261_s6 }
 0x310   : > { %s9583_s10 = scalar_lea.hbm %s12859_s12, 256 }
 0x311   : > { %p9584_p6 = scmp.ne.s32.totalorder %s12859_s12, %s9583_s10  ;;  %p9589_p13 = scmp.lt.u32.totalorder %s9583_s10, %s12859_s12 }
 0x313   : > { %p9585_p11 = pnand %p9584_p6, %p12742_p4 }
 0x315   : > { %p9586_p12 = pneg %p9585_p11 }
 0x317   : > { %p9591_p0 = pnand %p9589_p13, %p9586_p12 }
 0x319   : > { %9594 = shalt.err (!%p9591_p0)
}
 0x31a   : > { %s9595_s13 = scalar_lea.vmem %s1236_s15, 256  ;;  %p9602_p7 = scmp.lt.s32.totalorder %s1236_s15, %s1236_s15 }
 0x31b   : > { %p9596_p1 = scmp.ne.s32.totalorder %s1236_s15, %s9595_s13  ;;  %p9603_p8 = scmp.lt.s32.totalorder %s9595_s13, %s9595_s13 }
 0x31d   : > { %p9597_p2 = pnand %p9596_p1, %p12742_p4  ;;  %p9604_p9 = por %p9603_p8, %p9602_p7 }
 0x31f   : > { %p9598_p3 = pneg %p9597_p2 }
 0x321   : > { %p9605_p10 = pnand %p9604_p9, %p9598_p3 }
 0x323   : > { %9608 = shalt.err (!%p9605_p10)
}
 0x324   : > { %s12860_s4 = sld [smem:[#allocation105_spill]] }
 0x325   : > { %7625 = dma.hbm_to_vmem [thread:$0]  (%p12742_p4), %s12859_s12, 256, %s1236_s15, [#allocation27], %s12842_s23, %s12842_s23, %s12841_s5  }
 0x32a   : > { %s9609_s3 = scalar_lea.hbm %s12860_s4, 256 }
 0x32b   : > { %p9610_p6 = scmp.ne.s32.totalorder %s12860_s4, %s9609_s3  ;;  %p9615_p13 = scmp.lt.u32.totalorder %s9609_s3, %s12860_s4 }
 0x32d   : > { %p9611_p11 = pnand %p9610_p6, %p12742_p4 }
 0x32f   : > { %p9612_p12 = pneg %p9611_p11 }
 0x331   : > { %p9617_p0 = pnand %p9615_p13, %p9612_p12 }
 0x333   : > { %9620 = shalt.err (!%p9617_p0)
}
 0x334   : > { %s9621_s13 = scalar_lea.vmem %s10951_s6, 256  ;;  %p9628_p7 = scmp.lt.s32.totalorder %s10951_s6, %s10951_s6 }
 0x335   : > { %p9622_p1 = scmp.ne.s32.totalorder %s10951_s6, %s9621_s13  ;;  %p9629_p8 = scmp.lt.s32.totalorder %s9621_s13, %s9621_s13 }
 0x337   : > { %p9623_p2 = pnand %p9622_p1, %p12742_p4  ;;  %p9630_p9 = por %p9629_p8, %p9628_p7 }
 0x339   : > { %p9624_p3 = pneg %p9623_p2 }
 0x33b   : > { %p9631_p10 = pnand %p9630_p9, %p9624_p3 }
 0x33d   : > { %9634 = shalt.err (!%p9631_p10)
}
 0x33e   : > { %s12861_s8 = sld [smem:[#allocation107_spill]]  ;;  %s10206_s0 = smov [#allocation34]  }
 0x33f   : > { %7629 = dma.hbm_to_vmem [thread:$0]  (%p12742_p4), %s12860_s4, 256, %s10951_s6, [#allocation30], %s12842_s23, %s12842_s23, %s12841_s5  }
 0x340   : > { %s1287_s9 = sshll.u32 %s10206_s0, 4  ;;  %s10207_s15 = smov [#allocation37]   ;;  %s1288_s9 = int_to_ptr.vmem [resolvable:$true] %s1287_s9 }
 0x341   : > { %s1313_s10 = sshll.u32 %s10207_s15, 4  ;;  %s10984_s10 = int_to_ptr.vmem [resolvable:$true] %s1313_s10 }
 0x344   : > { %s9635_s3 = scalar_lea.hbm %s12861_s8, 512 }
 0x345   : > { %p9636_p6 = scmp.ne.s32.totalorder %s12861_s8, %s9635_s3  ;;  %p9641_p13 = scmp.lt.u32.totalorder %s9635_s3, %s12861_s8 }
 0x347   : > { %p9637_p11 = pnand %p9636_p6, %p12742_p4 }
 0x349   : > { %p9638_p12 = pneg %p9637_p11 }
 0x34b   : > { %p9643_p0 = pnand %p9641_p13, %p9638_p12 }
 0x34d   : > { %9646 = shalt.err (!%p9643_p0)
}
 0x34e   : > { %s9647_s13 = scalar_lea.vmem %s1288_s9, 512  ;;  %p9654_p7 = scmp.lt.s32.totalorder %s1288_s9, %s1288_s9 }
 0x34f   : > { %p9648_p1 = scmp.ne.s32.totalorder %s1288_s9, %s9647_s13  ;;  %p9655_p8 = scmp.lt.s32.totalorder %s9647_s13, %s9647_s13 }
 0x351   : > { %p9649_p2 = pnand %p9648_p1, %p12742_p4  ;;  %p9656_p9 = por %p9655_p8, %p9654_p7 }
 0x353   : > { %p9650_p3 = pneg %p9649_p2 }
 0x355   : > { %p9657_p10 = pnand %p9656_p9, %p9650_p3 }
 0x357   : > { %9660 = shalt.err (!%p9657_p10)
}
 0x358   : > { %s12862_s6 = sld [smem:[#allocation108_spill]] }
 0x359   : > { %7633 = dma.hbm_to_vmem [thread:$0]  (%p12742_p4), %s12861_s8, 512, %s1288_s9, [#allocation33], %s12842_s23, %s12842_s23, %s12841_s5  }
 0x35e   : > { %s9661_s0 = scalar_lea.hbm %s12862_s6, 768 }
 0x35f   : > { %p9662_p6 = scmp.ne.s32.totalorder %s12862_s6, %s9661_s0  ;;  %p9667_p13 = scmp.lt.u32.totalorder %s9661_s0, %s12862_s6 }
 0x361   : > { %p9663_p11 = pnand %p9662_p6, %p12742_p4 }
 0x363   : > { %p9664_p12 = pneg %p9663_p11 }
 0x365   : > { %p9669_p0 = pnand %p9667_p13, %p9664_p12 }
 0x367   : > { %9672 = shalt.err (!%p9669_p0)
}
 0x368   : > { %s9673_s15 = scalar_lea.vmem %s10984_s10, 768  ;;  %p9680_p7 = scmp.lt.s32.totalorder %s10984_s10, %s10984_s10 }
 0x369   : > { %p9674_p1 = scmp.ne.s32.totalorder %s10984_s10, %s9673_s15  ;;  %p9681_p8 = scmp.lt.s32.totalorder %s9673_s15, %s9673_s15 }
 0x36b   : > { %p9675_p2 = pnand %p9674_p1, %p12742_p4  ;;  %p9682_p9 = por %p9681_p8, %p9680_p7 }
 0x36d   : > { %p9676_p3 = pneg %p9675_p2 }
 0x36f   : > { %p9683_p10 = pnand %p9682_p9, %p9676_p3 }
 0x371   : > { %9686 = shalt.err (!%p9683_p10)
}
 0x372   : > { %s10208_s9 = smov 192   ;;  %s12863_s3 = sld [smem:[#allocation109_spill]] }
 0x373   : > { %s10209_s13 = smov 12   ;;  %s10210_s0 = smov [#allocation40]  }
 0x374   : > { %7637 = dma.hbm_to_vmem [thread:$0]  (%p12742_p4), %s12862_s6, 768, %s10984_s10, [#allocation36], %s10208_s9, %s10208_s9, %s10209_s13  }
 0x375   : > { %s1339_s2 = sshll.u32 %s10210_s0, 4  ;;  %s10211_s15 = smov [#allocation43]   ;;  %s1340_s2 = int_to_ptr.vmem [resolvable:$true] %s1339_s2 }
 0x376   : > { %s1365_s4 = sshll.u32 %s10211_s15, 4  ;;  %s11017_s4 = int_to_ptr.vmem [resolvable:$true] %s1365_s4 }
 0x378   : > { %s9687_s8 = scalar_lea.hbm %s12863_s3, 768 }
 0x379   : > { %p9688_p6 = scmp.ne.s32.totalorder %s12863_s3, %s9687_s8  ;;  %p9693_p13 = scmp.lt.u32.totalorder %s9687_s8, %s12863_s3 }
 0x37b   : > { %p9689_p11 = pnand %p9688_p6, %p12742_p4 }
 0x37d   : > { %p9690_p12 = pneg %p9689_p11 }
 0x37f   : > { %p9695_p0 = pnand %p9693_p13, %p9690_p12 }
 0x381   : > { %9698 = shalt.err (!%p9695_p0)
}
 0x382   : > { %s9699_s12 = scalar_lea.vmem %s1340_s2, 768  ;;  %p9706_p7 = scmp.lt.s32.totalorder %s1340_s2, %s1340_s2 }
 0x383   : > { %p9700_p1 = scmp.ne.s32.totalorder %s1340_s2, %s9699_s12  ;;  %p9707_p8 = scmp.lt.s32.totalorder %s9699_s12, %s9699_s12 }
 0x385   : > { %p9701_p2 = pnand %p9700_p1, %p12742_p4  ;;  %p9708_p9 = por %p9707_p8, %p9706_p7 }
 0x387   : > { %p9702_p3 = pneg %p9701_p2 }
 0x389   : > { %p9709_p10 = pnand %p9708_p9, %p9702_p3 }
 0x38b   : > { %9712 = shalt.err (!%p9709_p10)
}
 0x38c   : > { %s12864_s8 = sld [smem:[#allocation111_spill]] }
 0x38d   : > { %7641 = dma.hbm_to_vmem [thread:$0]  (%p12742_p4), %s12863_s3, 768, %s1340_s2, [#allocation39], %s10208_s9, %s10208_s9, %s10209_s13  }
 0x392   : > { %s9713_s10 = scalar_lea.hbm %s12864_s8, 768 }
 0x393   : > { %p9714_p6 = scmp.ne.s32.totalorder %s12864_s8, %s9713_s10  ;;  %p9719_p13 = scmp.lt.u32.totalorder %s9713_s10, %s12864_s8 }
 0x395   : > { %p9715_p11 = pnand %p9714_p6, %p12742_p4 }
 0x397   : > { %p9716_p12 = pneg %p9715_p11 }
 0x399   : > { %p9721_p0 = pnand %p9719_p13, %p9716_p12 }
 0x39b   : > { %9724 = shalt.err (!%p9721_p0)
}
 0x39c   : > { %s9725_s12 = scalar_lea.vmem %s11017_s4, 768  ;;  %p9732_p7 = scmp.lt.s32.totalorder %s11017_s4, %s11017_s4 }
 0x39d   : > { %p9726_p1 = scmp.ne.s32.totalorder %s11017_s4, %s9725_s12  ;;  %p9733_p8 = scmp.lt.s32.totalorder %s9725_s12, %s9725_s12 }
 0x39f   : > { %p9727_p2 = pnand %p9726_p1, %p12742_p4  ;;  %p9734_p9 = por %p9733_p8, %p9732_p7 }
 0x3a1   : > { %p9728_p3 = pneg %p9727_p2 }
 0x3a3   : > { %p9735_p10 = pnand %p9734_p9, %p9728_p3 }
 0x3a5   : > { %9738 = shalt.err (!%p9735_p10)
}
 0x3a6   : > { %s12865_s2 = sld [smem:[#allocation112_spill]]  ;;  %s10212_s0 = smov [#allocation46]  }
 0x3a7   : > { %7645 = dma.hbm_to_vmem [thread:$0]  (%p12742_p4), %s12864_s8, 768, %s11017_s4, [#allocation42], %s10208_s9, %s10208_s9, %s10209_s13  }
 0x3a8   : > { %s1391_s15 = sshll.u32 %s10212_s0, 4  ;;  %s10213_s10 = smov [#allocation49]   ;;  %s1392_s15 = int_to_ptr.vmem [resolvable:$true] %s1391_s15 }
 0x3a9   : > { %s1417_s3 = sshll.u32 %s10213_s10, 4  ;;  %s11050_s3 = int_to_ptr.vmem [resolvable:$true] %s1417_s3 }
 0x3ac   : > { %s9739_s12 = scalar_lea.hbm %s12865_s2, 768 }
 0x3ad   : > { %p9740_p6 = scmp.ne.s32.totalorder %s12865_s2, %s9739_s12  ;;  %p9745_p13 = scmp.lt.u32.totalorder %s9739_s12, %s12865_s2 }
 0x3af   : > { %p9741_p11 = pnand %p9740_p6, %p12742_p4 }
 0x3b1   : > { %p9742_p12 = pneg %p9741_p11 }
 0x3b3   : > { %p9747_p0 = pnand %p9745_p13, %p9742_p12 }
 0x3b5   : > { %9750 = shalt.err (!%p9747_p0)
}
 0x3b6   : > { %s9751_s6 = scalar_lea.vmem %s1392_s15, 768  ;;  %p9758_p7 = scmp.lt.s32.totalorder %s1392_s15, %s1392_s15 }
 0x3b7   : > { %p9752_p1 = scmp.ne.s32.totalorder %s1392_s15, %s9751_s6  ;;  %p9759_p8 = scmp.lt.s32.totalorder %s9751_s6, %s9751_s6 }
 0x3b9   : > { %p9753_p2 = pnand %p9752_p1, %p12742_p4  ;;  %p9760_p9 = por %p9759_p8, %p9758_p7 }
 0x3bb   : > { %p9754_p3 = pneg %p9753_p2 }
 0x3bd   : > { %p9761_p10 = pnand %p9760_p9, %p9754_p3 }
 0x3bf   : > { %9764 = shalt.err (!%p9761_p10)
}
 0x3c0   : > { %s12866_s4 = sld [smem:[#allocation114_spill]] }
 0x3c1   : > { %7649 = dma.hbm_to_vmem [thread:$0]  (%p12742_p4), %s12865_s2, 768, %s1392_s15, [#allocation45], %s10208_s9, %s10208_s9, %s10209_s13  }
 0x3c6   : > { %s9765_s0 = scalar_lea.hbm %s12866_s4, 768 }
 0x3c7   : > { %p9766_p6 = scmp.ne.s32.totalorder %s12866_s4, %s9765_s0  ;;  %p9771_p13 = scmp.lt.u32.totalorder %s9765_s0, %s12866_s4 }
 0x3c9   : > { %p9767_p11 = pnand %p9766_p6, %p12742_p4 }
 0x3cb   : > { %p9768_p12 = pneg %p9767_p11 }
 0x3cd   : > { %p9773_p0 = pnand %p9771_p13, %p9768_p12 }
 0x3cf   : > { %9776 = shalt.err (!%p9773_p0)
}
 0x3d0   : > { %s9777_s6 = scalar_lea.vmem %s11050_s3, 768  ;;  %p9784_p7 = scmp.lt.s32.totalorder %s11050_s3, %s11050_s3 }
 0x3d1   : > { %p9778_p1 = scmp.ne.s32.totalorder %s11050_s3, %s9777_s6  ;;  %p9785_p8 = scmp.lt.s32.totalorder %s9777_s6, %s9777_s6 }
 0x3d3   : > { %p9779_p2 = pnand %p9778_p1, %p12742_p4  ;;  %p9786_p9 = por %p9785_p8, %p9784_p7 }
 0x3d5   : > { %p9780_p3 = pneg %p9779_p2 }
 0x3d7   : > { %p9787_p10 = pnand %p9786_p9, %p9780_p3 }
 0x3d9   : > { %9790 = shalt.err (!%p9787_p10)
}
 0x3da   : > { %s12867_s15 = sld [smem:[#allocation116_spill]]  ;;  %s10214_s12 = smov [#allocation52]  }
 0x3db   : > { %7653 = dma.hbm_to_vmem [thread:$0]  (%p12742_p4), %s12866_s4, 768, %s11050_s3, [#allocation48], %s10208_s9, %s10208_s9, %s10209_s13  }
 0x3dc   : > { %s1443_s0 = sshll.u32 %s10214_s12, 4  ;;  %s10215_s2 = smov [#allocation55]   ;;  %s1444_s0 = int_to_ptr.vmem [resolvable:$true] %s1443_s0 }
 0x3dd   : > { %s1469_s8 = sshll.u32 %s10215_s2, 4  ;;  %s11083_s8 = int_to_ptr.vmem [resolvable:$true] %s1469_s8 }
 0x3e0   : > { %s12868_s10 = smov %s12867_s15  ;;  %s9791_s6 = scalar_lea.hbm %s12867_s15, 512 }
 0x3e1   : > { %p9792_p6 = scmp.ne.s32.totalorder %s12868_s10, %s9791_s6  ;;  %p9797_p13 = scmp.lt.u32.totalorder %s9791_s6, %s12868_s10 }
 0x3e3   : > { %p9793_p11 = pnand %p9792_p6, %p12742_p4 }
 0x3e5   : > { %p9794_p12 = pneg %p9793_p11 }
 0x3e7   : > { %p9799_p0 = pnand %p9797_p13, %p9794_p12 }
 0x3e9   : > { %9802 = shalt.err (!%p9799_p0)
}
 0x3ea   : > { %s9803_s14 = scalar_lea.vmem %s1444_s0, 512  ;;  %p9810_p7 = scmp.lt.s32.totalorder %s1444_s0, %s1444_s0 }
 0x3eb   : > { %p9804_p1 = scmp.ne.s32.totalorder %s1444_s0, %s9803_s14  ;;  %p9811_p8 = scmp.lt.s32.totalorder %s9803_s14, %s9803_s14 }
 0x3ed   : > { %p9805_p2 = pnand %p9804_p1, %p12742_p4  ;;  %p9812_p9 = por %p9811_p8, %p9810_p7 }
 0x3ef   : > { %p9806_p3 = pneg %p9805_p2 }
 0x3f1   : > { %p9813_p10 = pnand %p9812_p9, %p9806_p3 }
 0x3f3   : > { %9816 = shalt.err (!%p9813_p10)
}
 0x3f4   : > { %s12869_s9 = sld [smem:[#allocation118_spill]] }
 0x3f5   : > { %7657 = dma.hbm_to_vmem [thread:$0]  (%p12742_p4), %s12868_s10, 512, %s1444_s0, [#allocation51], %s12840_s11, %s12840_s11, %s12839_s28  }
 0x3fa   : > { %s9817_s3 = scalar_lea.hbm %s12869_s9, 256 }
 0x3fb   : > { %p9818_p6 = scmp.ne.s32.totalorder %s12869_s9, %s9817_s3  ;;  %p9823_p13 = scmp.lt.u32.totalorder %s9817_s3, %s12869_s9 }
 0x3fd   : > { %p9819_p11 = pnand %p9818_p6, %p12742_p4 }
 0x3ff   : > { %p9820_p12 = pneg %p9819_p11 }
 0x401   : > { %p9825_p0 = pnand %p9823_p13, %p9820_p12 }
 0x403   : > { %9828 = shalt.err (!%p9825_p0)
}
 0x404   : > { %s9829_s14 = scalar_lea.vmem %s11083_s8, 256  ;;  %p9836_p7 = scmp.lt.s32.totalorder %s11083_s8, %s11083_s8 }
 0x405   : > { %p9830_p1 = scmp.ne.s32.totalorder %s11083_s8, %s9829_s14  ;;  %p9837_p8 = scmp.lt.s32.totalorder %s9829_s14, %s9829_s14 }
 0x407   : > { %p9831_p2 = pnand %p9830_p1, %p12742_p4  ;;  %p9838_p9 = por %p9837_p8, %p9836_p7 }
 0x409   : > { %p9832_p3 = pneg %p9831_p2 }
 0x40b   : > { %p9839_p10 = pnand %p9838_p9, %p9832_p3 }
 0x40d   : > { %9842 = shalt.err (!%p9839_p10)
}
 0x40e   : > { %s12870_s28 = sld [smem:[#allocation120_spill]]  ;;  %s10216_s11 = smov [#allocation58]  }
 0x40f   : > { %7661 = dma.hbm_to_vmem [thread:$0]  (%p12742_p4), %s12869_s9, 256, %s11083_s8, [#allocation54], %s12842_s23, %s12842_s23, %s12841_s5  }
 0x410   : > { %s1496_s13 = sshll.u32 %s10216_s11, 4  ;;  %s10217_s2 = smov [#allocation61]   ;;  %s1497_s13 = int_to_ptr.vmem [resolvable:$true] %s1496_s13 }
 0x411   : > { %s1518_s15 = sshll.u32 %s10217_s2, 4  ;;  %s11116_s15 = int_to_ptr.vmem [resolvable:$true] %s1518_s15 }
 0x414   : > { %s9843_s12 = scalar_lea.hbm %s12870_s28, 128 }
 0x415   : > { %p9844_p6 = scmp.ne.s32.totalorder %s12870_s28, %s9843_s12  ;;  %p9849_p13 = scmp.lt.u32.totalorder %s9843_s12, %s12870_s28 }
 0x417   : > { %p9845_p11 = pnand %p9844_p6, %p12742_p4 }
 0x419   : > { %p9846_p12 = pneg %p9845_p11 }
 0x41b   : > { %p9851_p0 = pnand %p9849_p13, %p9846_p12 }
 0x41d   : > { %9854 = shalt.err (!%p9851_p0)
}
 0x41e   : > { %s9855_s0 = scalar_lea.vmem %s1497_s13, 128  ;;  %p9862_p7 = scmp.lt.s32.totalorder %s1497_s13, %s1497_s13 }
 0x41f   : > { %p9856_p1 = scmp.ne.s32.totalorder %s1497_s13, %s9855_s0  ;;  %p9863_p8 = scmp.lt.s32.totalorder %s9855_s0, %s9855_s0 }
 0x421   : > { %p9857_p2 = pnand %p9856_p1, %p12742_p4  ;;  %p9864_p9 = por %p9863_p8, %p9862_p7 }
 0x423   : > { %p9858_p3 = pneg %p9857_p2 }
 0x425   : > { %p9865_p10 = pnand %p9864_p9, %p9858_p3 }
 0x427   : > { %9868 = shalt.err (!%p9865_p10)
}
 0x428   : > { %s12871_s5 = sld [smem:[#allocation122_spill]] }
 0x429   : > { %7665 = dma.hbm_to_vmem [thread:$0]  (%p12742_p4), %s12870_s28, 128, %s1497_s13, [#allocation57]  }
 0x42e   : > { %s9869_s23 = scalar_lea.hbm %s12871_s5, 64 }
 0x42f   : > { %p9870_p6 = scmp.ne.s32.totalorder %s12871_s5, %s9869_s23  ;;  %p9875_p13 = scmp.lt.u32.totalorder %s9869_s23, %s12871_s5 }
 0x431   : > { %p9871_p11 = pnand %p9870_p6, %p12742_p4 }
 0x433   : > { %p9872_p12 = pneg %p9871_p11 }
 0x435   : > { %p9877_p0 = pnand %p9875_p13, %p9872_p12 }
 0x437   : > { %9880 = shalt.err (!%p9877_p0)
}
 0x438   : > { %s9881_s8 = scalar_lea.vmem %s11116_s15, 64  ;;  %p9888_p7 = scmp.lt.s32.totalorder %s11116_s15, %s11116_s15 }
 0x439   : > { %p9882_p1 = scmp.ne.s32.totalorder %s11116_s15, %s9881_s8  ;;  %p9889_p8 = scmp.lt.s32.totalorder %s9881_s8, %s9881_s8 }
 0x43b   : > { %p9883_p2 = pnand %p9882_p1, %p12742_p4  ;;  %p9890_p9 = por %p9889_p8, %p9888_p7 }
 0x43d   : > { %p9884_p3 = pneg %p9883_p2 }
 0x43f   : > { %p9891_p10 = pnand %p9890_p9, %p9884_p3 }
 0x441   : > { %9894 = shalt.err (!%p9891_p10)
}
 0x442   : > { %7669 = dma.hbm_to_vmem [thread:$0]  (%p12742_p4), %s12871_s5, 64, %s11116_s15, [#allocation60]  }
 0x443   : > { %s10218_s6 = smov [#allocation64]   ;;  %s10219_s14 = smov [#allocation65]  }
 0x444   : > { %s1540_s3 = sshll.u32 %s10218_s6, 4  ;;  %s1551_s11 = sshll.u32 %s10219_s14, 4  ;;  %s1541_s3 = int_to_ptr.vmem [resolvable:$true] %s1540_s3  ;;  %s11143_s11 = int_to_ptr.vmem [resolvable:$true] %s1551_s11 }
 0x445   : > { %s9895_s13 = scalar_lea.hbm %s10458_s27, 64 }
 0x446   : > { %p9896_p6 = scmp.ne.s32.totalorder %s10458_s27, %s9895_s13  ;;  %p9901_p13 = scmp.lt.u32.totalorder %s9895_s13, %s10458_s27 }
 0x448   : > { %p9897_p11 = pnand %p9896_p6, %p12742_p4 }
 0x44a   : > { %p9898_p12 = pneg %p9897_p11 }
 0x44c   : > { %p9903_p0 = pnand %p9901_p13, %p9898_p12 }
 0x44e   : > { %9906 = shalt.err (!%p9903_p0)
}
 0x44f   : > { %s9907_s2 = scalar_lea.vmem %s1541_s3, 64  ;;  %p9914_p7 = scmp.lt.s32.totalorder %s1541_s3, %s1541_s3 }
 0x450   : > { %p9908_p1 = scmp.ne.s32.totalorder %s1541_s3, %s9907_s2  ;;  %p9915_p8 = scmp.lt.s32.totalorder %s9907_s2, %s9907_s2 }
 0x452   : > { %p9909_p2 = pnand %p9908_p1, %p12742_p4  ;;  %p9916_p9 = por %p9915_p8, %p9914_p7 }
 0x454   : > { %p9910_p3 = pneg %p9909_p2 }
 0x456   : > { %p9917_p10 = pnand %p9916_p9, %p9910_p3 }
 0x458   : > { %9920 = shalt.err (!%p9917_p10)
}
 0x459   : > { %7673 = dma.hbm_to_vmem [thread:$0]  (%p12742_p4), %s10458_s27, 64, %s1541_s3, [#allocation63]  }
 0x45a   : > { %s9921_s15 = scalar_lea.hbm %s10463_s21, 64 }
 0x45b   : > { %p9922_p6 = scmp.ne.s32.totalorder %s10463_s21, %s9921_s15  ;;  %p9927_p13 = scmp.lt.u32.totalorder %s9921_s15, %s10463_s21 }
 0x45d   : > { %p9923_p11 = pnand %p9922_p6, %p12742_p4 }
 0x45f   : > { %p9924_p12 = pneg %p9923_p11 }
 0x461   : > { %p9929_p0 = pnand %p9927_p13, %p9924_p12 }
 0x463   : > { %9932 = shalt.err (!%p9929_p0)
}
 0x464   : > { %s9933_s12 = scalar_lea.vmem %s11143_s11, 64  ;;  %p9940_p7 = scmp.lt.s32.totalorder %s11143_s11, %s11143_s11 }
 0x465   : > { %p9934_p1 = scmp.ne.s32.totalorder %s11143_s11, %s9933_s12  ;;  %p9941_p8 = scmp.lt.s32.totalorder %s9933_s12, %s9933_s12 }
 0x467   : > { %p9935_p2 = pnand %p9934_p1, %p12742_p4  ;;  %p9942_p9 = por %p9941_p8, %p9940_p7 }
 0x469   : > { %p9936_p3 = pneg %p9935_p2 }
 0x46b   : > { %p9943_p10 = pnand %p9942_p9, %p9936_p3 }
 0x46d   : > { %9946 = shalt.err (!%p9943_p10)
}
 0x46e   : > { %7675 = dma.hbm_to_vmem [thread:$0]  (%p12742_p4), %s10463_s21, 64, %s11143_s11, [#allocation66]  }
 0x46f PF: > { %s12872_s0 = sld [smem:[#allocation91_spill]]  ;;  %p7811_p11 = scmp.lt.s32.totalorder %s10127_s18, 2 }
 0x470   : > { %s1562_s8 = sand.u32 1, %s10123_s16   ;;  %s7202_s6 = sshll.u32 %s10127_s18, 7 }
 0x471   : > { %s7063_s3 = sshll.u32 %s1562_s8, 3  ;;  %p11179_p12 = pnand %p7811_p11, %p10509_p5 }
 0x472   : > { %s1566_s11 = scalar_lea.vmem [#allocation2], %s7063_s3  ;;  %s1563_s15 = scalar_lea.sflag [#allocation3], %s1562_s8 }
 0x473   : > { %s1574_s13 = sshll.u32 %s1566_s11, 4  ;;  %p9949_p0 = pneg %p11179_p12  ;;  %s11183_s13 = int_to_ptr.vmem [resolvable:$true] %s1574_s13 }
 0x475   : > { %s12873_s23 = smov %s12872_s0  ;;  %s11175_s14 = scalar_lea.hbm %s12872_s0, %s7202_s6 }
 0x476   : > { %s9947_s12 = scalar_lea.hbm %s11175_s14, 128  ;;  %s9952_s0 = scalar_lea.hbm %s12873_s23, 256 }
 0x477   : > { %p9948_p13 = scmp.ne.s32.totalorder %s11175_s14, %s9947_s12  ;;  %p9953_p3 = scmp.lt.u32.totalorder %s11175_s14, %s12873_s23 }
 0x478   : > { %p9954_p7 = scmp.lt.u32.totalorder %s9952_s0, %s9947_s12  ;;  %p9956_p8 = scmp.lt.u32.totalorder %s9947_s12, %s11175_s14 }
 0x479   : > { %p9950_p1 = pnand %p9949_p0, %p9948_p13 }
 0x47a   : > { %p9955_p5 = por %p9954_p7, %p9953_p3 }
 0x47b   : > { %p9951_p2 = pneg %p9950_p1 }
 0x47c   : > { %p9957_p9 = por %p9956_p8, %p9955_p5 }
 0x47e   : > { %p9958_p10 = pnand %p9957_p9, %p9951_p2 }
 0x480   : > { %9961 = shalt.err (!%p9958_p10)
}
 0x481   : > { %s9962_s7 = scalar_lea.vmem %s11183_s13, 128  ;;  %s10220_s8 = smov [#allocation2]  }
 0x482   : > { %p9963_p11 = scmp.ne.s32.totalorder %s11183_s13, %s9962_s7  ;;  %s9967_s6 = sshll.u32 %s10220_s8, 4  ;;  %s9968_s6 = int_to_ptr.vmem [resolvable:$false] %s9967_s6 }
 0x483   : > { %s9969_s3 = scalar_lea.vmem %s9968_s6, 256  ;;  %p9970_p13 = scmp.lt.s32.totalorder %s11183_s13, %s9968_s6 }
 0x484   : > { %p9965_p6 = pnand %p9963_p11, %p9949_p0  ;;  %p9971_p1 = scmp.lt.s32.totalorder %s9969_s3, %s9962_s7 }
 0x486   : > { %p9966_p4 = pneg %p9965_p6  ;;  %p9972_p3 = por %p9971_p1, %p9970_p13 }
 0x488   : > { %p9973_p7 = pnand %p9972_p3, %p9966_p4 }
 0x48a   : > { %9976 = shalt.err (!%p9973_p7)
}
 0x48b   : > { %7765 = dma.hbm_to_vmem [thread:$0]  (!%p11179_p12), %s11175_s14, 128, %s11183_s13, %s1563_s15  }
 0x48c   : > { %p12875_p2 = scmp.ne.s32.totalorder %s12838_s1, 0 }
 0x48e   : > { %1583 = sbr.rel (%p12875_p2) target bundleno = 10214 (0x27e6), region = 188 }
 0x495   : > { %s12876_s11 = sld [smem:[#allocation126_spill]]  ;;  %s12877_s12 = sld [smem:[#allocation129_spill]] }
 0x49b   : > { %s11209_s0 = sand.u32 1, %s12876_s11   ;;  %p12878_p4 = scmp.ne.s32.totalorder %s12877_s12, 0 }
 0x49c   : > { %s12743_s8 = sshll.u32 %s11209_s0, 3  ;;  %s1586_s7 = scalar_lea.sflag [#allocation3], %s11209_s0 }
 0x49d   : > { %s11215_s6 = scalar_lea.vmem [#allocation2], %s12743_s8 }
 0x49e   : > { %10022 = dma.done.wait (%p12878_p4), %s1586_s7, 128  }
 0x49f   : > { %10024 = vsyncadd (%p12878_p4), %s1586_s7, 4294967168  ;;  %p12879_p6 = scmp.eq.s32.totalorder %s10491_s22, 0 }
 0x4a1   : > { %10026 = dma.done.wait (%p12879_p6), [#allocation6], 768   ;;  %p12880_p12 = pmov %p12879_p6 }
 0x4a2   : > { %p12881_p0 = pmov %p12879_p6 }
 0x4a3   : > { %10028 = vsyncadd (%p12880_p12), [#allocation6], 4294966528 }
 0x4a4   : > { %10030 = dma.done.wait (%p12881_p0), [#allocation9], 4352   ;;  %p12882_p5 = pmov %p12881_p0 }
 0x4a5   : > { %p12883_p8 = pmov %p12881_p0 }
 0x4a6   : > { %10032 = vsyncadd (%p12882_p5), [#allocation9], 4294962944 }
 0x4a7   : > { %10034 = dma.done.wait (%p12883_p8), [#allocation12], 1280   ;;  %p12884_p9 = pmov %p12881_p0 }
 0x4a8   : > { %p12885_p10 = pmov %p12881_p0 }
 0x4a9   : > { %10036 = vsyncadd (%p12884_p9), [#allocation12], 4294966016 }
 0x4aa   : > { %10038 = dma.done.wait (%p12885_p10), [#allocation15], 2112   ;;  %p12886_p11 = pmov %p12881_p0 }
 0x4ab   : > { %p12887_p13 = pmov %p12881_p0 }
 0x4ac   : > { %10040 = vsyncadd (%p12886_p11), [#allocation15], 4294965184 }
 0x4ad   : > { %10042 = dma.done.wait (%p12887_p13), [#allocation18], 192   ;;  %p12888_p1 = pmov %p12881_p0 }
 0x4ae   : > { %p12889_p3 = pmov %p12881_p0 }
 0x4af   : > { %10044 = vsyncadd (%p12888_p1), [#allocation18], 4294967104 }
 0x4b0   : > { %10046 = dma.done.wait (%p12889_p3), [#allocation21], 192   ;;  %p12890_p7 = pmov %p12881_p0 }
 0x4b1   : > { %p12891_p2 = pmov %p12881_p0 }
 0x4b2   : > { %10048 = vsyncadd (%p12890_p7), [#allocation21], 4294967104 }
 0x4b3   : > { %10050 = dma.done.wait (%p12891_p2), [#allocation24], 256   ;;  %p12892_p4 = pmov %p12881_p0 }
 0x4b4   : > { %p12893_p6 = pmov %p12881_p0 }
 0x4b5   : > { %10052 = vsyncadd (%p12892_p4), [#allocation24], 4294967040 }
 0x4b6   : > { %10054 = dma.done.wait (%p12893_p6), [#allocation27], 512   ;;  %p12894_p12 = pmov %p12881_p0 }
 0x4b8   : > { %10056 = vsyncadd (%p12894_p12), [#allocation27], 4294966784 }
 0x4b9   : > { %10058 = dma.done.wait (%p12881_p0), [#allocation30], 512   ;;  %p12895_p5 = pmov %p12881_p0 }
 0x4ba   : > { %p12896_p8 = pmov %p12881_p0 }
 0x4bb   : > { %10060 = vsyncadd (%p12895_p5), [#allocation30], 4294966784 }
 0x4bc   : > { %10062 = dma.done.wait (%p12896_p8), [#allocation33], 768   ;;  %p12897_p9 = pmov %p12881_p0 }
 0x4bd   : > { %p12898_p10 = pmov %p12881_p0 }
 0x4be   : > { %10064 = vsyncadd (%p12897_p9), [#allocation33], 4294966528 }
 0x4bf   : > { %10066 = dma.done.wait (%p12898_p10), [#allocation36], 1280   ;;  %p12899_p11 = pmov %p12881_p0 }
 0x4c0   : > { %p12900_p13 = pmov %p12881_p0 }
 0x4c1   : > { %10068 = vsyncadd (%p12899_p11), [#allocation36], 4294966016 }
 0x4c2   : > { %10070 = dma.done.wait (%p12900_p13), [#allocation39], 1280   ;;  %p12901_p1 = pmov %p12881_p0 }
 0x4c3   : > { %p12902_p3 = pmov %p12881_p0 }
 0x4c4   : > { %10072 = vsyncadd (%p12901_p1), [#allocation39], 4294966016 }
 0x4c5   : > { %10074 = dma.done.wait (%p12902_p3), [#allocation42], 1280   ;;  %p12903_p7 = pmov %p12881_p0 }
 0x4c6   : > { %p12904_p2 = pmov %p12881_p0 }
 0x4c7   : > { %10076 = vsyncadd (%p12903_p7), [#allocation42], 4294966016 }
 0x4c8   : > { %10078 = dma.done.wait (%p12904_p2), [#allocation45], 1280   ;;  %p12905_p4 = pmov %p12881_p0 }
 0x4c9   : > { %p12906_p6 = pmov %p12881_p0 }
 0x4ca   : > { %10080 = vsyncadd (%p12905_p4), [#allocation45], 4294966016 }
 0x4cb   : > { %10082 = dma.done.wait (%p12906_p6), [#allocation48], 1280   ;;  %p12907_p12 = pmov %p12881_p0 }
 0x4cd   : > { %10084 = vsyncadd (%p12907_p12), [#allocation48], 4294966016 }
 0x4ce   : > { %10086 = dma.done.wait (%p12881_p0), [#allocation51], 1024   ;;  %p12908_p5 = pmov %p12881_p0 }
 0x4cf   : > { %p12909_p8 = pmov %p12881_p0 }
 0x4d0   : > { %10088 = vsyncadd (%p12908_p5), [#allocation51], 4294966272 }
 0x4d1   : > { %10090 = dma.done.wait (%p12909_p8), [#allocation54], 512   ;;  %p12910_p9 = pmov %p12881_p0 }
 0x4d2   : > { %p12911_p10 = pmov %p12881_p0 }
 0x4d3   : > { %10092 = vsyncadd (%p12910_p9), [#allocation54], 4294966784 }
 0x4d4   : > { %10094 = dma.done.wait (%p12911_p10), [#allocation57], 384   ;;  %p12912_p11 = pmov %p12881_p0 }
 0x4d5   : > { %p12913_p13 = pmov %p12881_p0 }
 0x4d6   : > { %10096 = vsyncadd (%p12912_p11), [#allocation57], 4294966912 }
 0x4d7   : > { %10098 = dma.done.wait (%p12913_p13), [#allocation60], 192   ;;  %p12914_p1 = pmov %p12881_p0 }
 0x4d8   : > { %p12915_p3 = pmov %p12881_p0 }
 0x4d9   : > { %10100 = vsyncadd (%p12914_p1), [#allocation60], 4294967104 }
 0x4da   : > { %10102 = dma.done.wait (%p12915_p3), [#allocation63], 192   ;;  %p12916_p7 = pmov %p12881_p0 }
 0x4db   : > { %p12917_p2 = pmov %p12881_p0 }
 0x4dc   : > { %10104 = vsyncadd (%p12916_p7), [#allocation63], 4294967104 }
 0x4dd   : > { %10106 = dma.done.wait (%p12917_p2), [#allocation66], 64   ;;  %p12918_p4 = pmov %p12881_p0 }
 0x4de   : > { %v1875_v0 = vlaneseq  ;;  %v11311_v3 = vld [vmem:[%s11215_s6] sm:$0xff]  ;;  %v11313_v4 = vld [vmem:[#allocation5] sm:$0xff]  ;;  %v11315_v5 = vld [vmem:[#allocation5 + $0x8] sm:$0xff]  ;;  %s12750_s1 = smov 17   ;;  %s10222_s14 = smov 16   ;;  %vm1868_vm0 = vcmask 138240  }
 0x4df   : > { %10108 = vsyncadd (%p12918_p4), [#allocation66], 4294967232  ;;  %1864 = vrot.lane.b32.xlu0 %v11311_v3, %s12750_s1  ;;  %v11323_v7 = vcombine.high %v11311_v3, %v11311_v3  ;;  %s10223_s13 = smov 2   ;;  %s10224_s2 = smov 18   ;;  %v7110_v18 = vld [vmem:[#allocation5 + $0x10] ss:$0 sm:$0xff] }
 0x4e0   : > { %v11305_v1 = vshrl.u32 %v1875_v0, 7  ;;  %s10225_s15 = smov 32   ;;  %v7111_v19 = vld [vmem:[#allocation5 + $0x18] ss:$0 sm:$0xff]  ;;  %s10226_s3 = smov 34   ;;  %vm1921_vm1 = vcmask 130048  }
 0x4e1   : > { %s10227_s11 = smov 127   ;;  %vm1899_vm2 = vcmask 15360   ;;  %s10228_s12 = smov 126   ;;  %vm1943_vm3 = vcmask 146432   ;;  %vm1965_vm4 = vcmask 261120   ;;  %vm1987_vm5 = vcmask 277504  }
 0x4e2   : > { %v11308_v2 = vsub.s32 3, %v11305_v1  ;;  %v11326_v8 = vsub.s32 2, %v11305_v1  ;;  %v11336_v11 = vsub.s32 5, %v11305_v1  ;;  %v11345_v14 = vsub.s32 6, %v11305_v1  ;;  %s12746_s7 = smov 95   ;;  %s12767_s6 = smov 112  }
 0x4e3   : > { %1866 = vrot.lane.b32.xlu0 %v11323_v7, %s12750_s1  ;;  %s12744_s8 = smov 94   ;;  %vm2006_vm6 = vcmask 1039360   ;;  %vm2037_vm7 = vcmask 916480   ;;  %vm2020_vm8 = vcmask 1031168   ;;  %vm12772_vm9 = vcmask 1043456  }
 0x4e4   : > { %v1910_v6 = vrot.slane %v11313_v4, %v11308_v2  ;;  %v1914_v9 = vrot.slane %v11315_v5, %v11308_v2  ;;  %v1888_v10 = vrot.slane %v11313_v4, %v11326_v8  ;;  %v1892_v12 = vrot.slane %v11315_v5, %v11326_v8 }
 0x4e5   : > { %v1932_v13 = vrot.slane %v11313_v4, %v11336_v11  ;;  %v1936_v15 = vrot.slane %v11315_v5, %v11336_v11  ;;  %v1954_v16 = vrot.slane %v11313_v4, %v11345_v14  ;;  %v1958_v17 = vrot.slane %v11315_v5, %v11345_v14 }
 0x4e6   : > { %1917 = vrot.lane.b32.xlu1 %v1910_v6, %s10222_s14  ;;  %vm12776_vm10 = vcmask 785408   ;;  %vm12774_vm11 = vcmask 777216   ;;  %vm2055_vm12 = vcmask 900096   ;;  %vm12773_vm13 = vcmask 769024  }
 0x4e7   : > { %1895 = vrot.lane.b32.xlu0 %v1888_v10, %s10223_s13  ;;  %vm2123_vm14 = vcmask 1041408   ;;  %vm2119_vm15 = vcmask 293888  }
 0x4ea   : > { %1919 = vrot.lane.b32.xlu1 %v1914_v9, %s10222_s14 }
 0x4eb   : > { %1939 = vrot.lane.b32.xlu0 %v1932_v13, %s10224_s2 }
 0x4ee   : > { %1897 = vrot.lane.b32.xlu1 %v1892_v12, %s10223_s13  ;;  %v12754_v12 = vmov 0  }
 0x4ef   : > { %1961 = vrot.lane.b32.xlu0 %v1954_v16, %s10225_s15  ;;  %2162 = vmatprep.mubr.bf16.mxu1 %v12754_v12 }
 0x4f0   : > { %8040 = vset.pattern.permute.xlu0 %v12754_v12  ;;  %2536 = vmatprep.mubr.bf16.mxu0 %v12754_v12 }
 0x4f1   : > { %8111 = vset.pattern.permute.xlu1 %v12754_v12 }
 0x4f2   : > { %1941 = vrot.lane.b32.xlu1 %v1936_v15, %s10224_s2  ;;  %v1861_v15 = vld [vmem:[#allocation17] sm:$0xff] }
 0x4f3   : > { %1983 = vrot.lane.b32.xlu0 %v7110_v18, %s10226_s3  ;;  %v11463_v18 = vsub.s32 0, %v11305_v1 }
 0x4f6   : > { %1963 = vrot.lane.b32.xlu1 %v1958_v17, %s10225_s15  ;;  %s12748_s15 = smov 96  }
 0x4fa   : > { %1985 = vrot.lane.b32.xlu1 %v7111_v19, %s10226_s3  ;;  %s12763_s3 = smov 110  }
 0x551   : > { %v1865_v20 = vpop.permute.xlu0 %1864 }
 0x552   : > { %v11357_v21 = vsel %vm1868_vm0, 0.0, %v1865_v20 }
 0x553   : > { %v1997_v23 = vrot.slane %v11357_v21, 4 }
 0x555   : > { %v1867_v24 = vpop.permute.xlu0 %1866  ;;  %2000 = vrot.lane.b32.xlu1 %v1997_v23, %s10227_s11 }
 0x556   : > { %v11366_v25 = vsel %vm1868_vm0, %v1865_v20, %v1867_v24  ;;  %v11369_v26 = vsel %vm1868_vm0, %v1867_v24, 0.0  ;;  %v11467_v24 = vrot.slane %v11313_v4, %v11463_v18 }
 0x557   : > { %v1998_v30 = vrot.slane %v11366_v25, 4  ;;  %v1999_v31 = vrot.slane %v11369_v26, 4 }
 0x558   : > { %v11359_v22 = vpop.permute.xlu1 %1917  ;;  %v1883_v1 = vmul.f32 %v11467_v24, %v11357_v21 }
 0x559   : > { %v11373_v28 = vpop.permute.xlu0 %1895  ;;  %v8005_v38 = vpack.i.bf16 %v1999_v31, %v1998_v30  ;;  %v1926_v57 = vmul.f32 %v11359_v22, %v11357_v21 }
 0x55a   : > { %v1904_v29 = vmul.f32 %v11373_v28, %v11357_v21 }
 0x55b   : > { %v2028_v61 = vrot.slane %v1926_v57, 4 }
 0x55c   : > { %v11371_v27 = vpop.permute.xlu1 %1919  ;;  %2014 = vrot.lane.b32.xlu0 %v1904_v29, %s10228_s12 }
 0x55d   : > { %v11384_v33 = vsel %vm1921_vm1, %v11359_v22, %v11371_v27  ;;  %v11393_v36 = vpop.permute.xlu0 %1939  ;;  %v1928_v40 = vmul.f32 %v11371_v27, %v11369_v26 }
 0x55e   : > { %v1927_v39 = vmul.f32 %v11384_v33, %v11366_v25  ;;  %v1948_v62 = vmul.f32 %v11393_v36, %v11357_v21 }
 0x55f   : > { %v2030_v45 = vrot.slane %v1928_v40, 4 }
 0x560   : > { %v11379_v32 = vpop.permute.xlu1 %1897  ;;  %8006 = vrot.lane.b32.xlu0 %v8005_v38, %s10227_s11  ;;  %v2029_v44 = vrot.slane %v1927_v39, 4  ;;  %v2046_v9 = vrot.slane %v1948_v62, 4 }
 0x561   : > { %v11389_v34 = vsel %vm1899_vm2, %v11373_v28, %v11379_v32  ;;  %v1906_v35 = vmul.f32 %v11379_v32, %v11369_v26  ;;  %v11413_v48 = vpop.permute.xlu0 %1961 }
 0x562   : > { %v1905_v37 = vmul.f32 %v11389_v34, %v11366_v25  ;;  %v8025_v53 = vpack.i.bf16 %v2030_v45, %v2029_v44  ;;  %v1970_v0 = vmul.f32 %v11413_v48, %v11357_v21 }
 0x564   : > { %v11401_v41 = vpop.permute.xlu1 %1941  ;;  %v8010_v42 = vpack.i.bf16 %v1906_v35, %v1905_v37  ;;  %8021 = vrot.lane.b32.xlu0 %v8005_v38, %s12746_s7 }
 0x565   : > { %v11406_v43 = vsel %vm1943_vm3, %v11393_v36, %v11401_v41  ;;  %v1950_v47 = vmul.f32 %v11401_v41, %v11369_v26  ;;  %v11433_v59 = vpop.permute.xlu0 %1983 }
 0x566   : > { %8011 = vrot.lane.b32.xlu1 %v8010_v42, %s10228_s12  ;;  %v1949_v46 = vmul.f32 %v11406_v43, %v11366_v25  ;;  %v1992_v10 = vmul.f32 %v11433_v59, %v11357_v21 }
 0x567   : > { %v2048_v55 = vrot.slane %v1950_v47, 4 }
 0x568   : > { %v11415_v49 = vpop.permute.xlu1 %1963  ;;  %v2047_v54 = vrot.slane %v1949_v46, 4  ;;  %8026 = vrot.lane.b32.xlu0 %v8025_v53, %s12767_s6 }
 0x569   : > { %v11421_v50 = vsel %vm1965_vm4, %v11413_v48, %v11415_v49  ;;  %v1972_v51 = vmul.f32 %v11415_v49, %v11369_v26 }
 0x56a   : > { %v1971_v52 = vmul.f32 %v11421_v50, %v11366_v25  ;;  %v8030_v60 = vpack.i.bf16 %v2048_v55, %v2047_v54 }
 0x56c   : > { %v8015_v56 = vpack.i.bf16 %v1972_v51, %v1971_v52  ;;  %v11429_v58 = vpop.permute.xlu1 %1985  ;;  %8031 = vrot.lane.b32.xlu0 %v8030_v60, %s12763_s3 }
 0x56d   : > { %v11439_v63 = vsel %vm1987_vm5, %v11433_v59, %v11429_v58  ;;  %v1994_v16 = vmul.f32 %v11429_v58, %v11369_v26  ;;  %vm12761_vm5 = vcmask 588800  }
 0x56e   : > { %8016 = vrot.lane.b32.xlu1 %v8015_v56, %s12748_s15  ;;  %v1993_v6 = vmul.f32 %v11439_v63, %v11366_v25 }
 0x570   : > { %2063 = vrot.lane.b32.xlu0 %v1970_v0, %s12748_s15  ;;  %v8035_v13 = vpack.i.bf16 %v1993_v6, %v1992_v10 }
 0x572   : > { %2031 = vrot.lane.b32.xlu1 %v2028_v61, %s12767_s6 }
 0x574   : > { %8036 = vrot.lane.b32.xlu0 %v8035_v13, %s12744_s8 }
 0x576   : > { %2049 = vrot.lane.b32.xlu1 %v2046_v9, %s12763_s3 }
 0x578   : > { %2116 = vperm.xlu0 %8040, %v1861_v15  }
 0x57a   : > { %2074 = vrot.lane.b32.xlu1 %v1997_v23, %s12746_s7  ;;  %v11471_v23 = vrot.slane %v11315_v5, %v11463_v18 }
 0x57c   : > { %v1884_v42 = vmul.f32 %v11471_v23, %v11366_v25 }
 0x57e   : > { %2092 = vrot.lane.b32.xlu1 %v1994_v16, %s12744_s8 }
 0x5c7   : > { %v2001_v19 = vpop.permute.xlu1 %2000 }
 0x5ce   : > { %v2015_v17 = vpop.permute.xlu0 %2014 }
 0x5d2   : > { %v8007_v20 = vpop.permute.xlu0 %8006 }
 0x5d3   : > { %v8009_v26 = vunpack.i.h.bf16 %v8007_v20  ;;  %v8008_v31 = vunpack.i.l.bf16 %v8007_v20 }
 0x5d5   : > { %v2008_v5 = vsel %vm2006_vm6, %v8008_v31, %v8009_v26  ;;  %v2007_v25 = vsel %vm2006_vm6, %v2001_v19, %v8008_v31 }
 0x5d6   : > { %v8022_v30 = vpop.permute.xlu0 %8021  ;;  %v2101_v21 = vsel %vm12772_vm9, %v1884_v42, %v2008_v5  ;;  %v2100_v6 = vsel %vm12772_vm9, %v1883_v1, %v2007_v25 }
 0x5d7   : > { %v8024_v46 = vunpack.i.h.bf16 %v8022_v30  ;;  %v8023_v47 = vunpack.i.l.bf16 %v8022_v30 }
 0x5d8   : > { %v8012_v29 = vpop.permute.xlu1 %8011 }
 0x5d9   : > { %v8014_v35 = vunpack.i.h.bf16 %v8012_v29  ;;  %v8013_v37 = vunpack.i.l.bf16 %v8012_v29  ;;  %v2082_v13 = vsel %vm12774_vm11, %v8023_v47, %v8024_v46 }
 0x5da   : > { %v8027_v38 = vpop.permute.xlu0 %8026 }
 0x5db   : > { %v8029_v4 = vunpack.i.h.bf16 %v8027_v38  ;;  %v8028_v39 = vunpack.i.l.bf16 %v8027_v38  ;;  %v2022_v51 = vsel %vm2020_vm8, %v8013_v37, %v8014_v35  ;;  %v2021_v0 = vsel %vm2020_vm8, %v2015_v17, %v8013_v37 }
 0x5dd   : > { %v2039_v52 = vsel %vm2037_vm7, %v8028_v39, %v8029_v4 }
 0x5de   : > { %v8032_v53 = vpop.permute.xlu0 %8031  ;;  %v2103_v54 = vsel %vm12772_vm9, %v2022_v51, %v2039_v52 }
 0x5df   : > { %v8034_v55 = vunpack.i.h.bf16 %v8032_v53  ;;  %v8033_v56 = vunpack.i.l.bf16 %v8032_v53  ;;  %v2109_v60 = vpack.c.bf16 %v2103_v54, %v2101_v21 }
 0x5e0   : > { %v8017_v40 = vpop.permute.xlu1 %8016 }
 0x5e1   : > { %v8019_v44 = vunpack.i.h.bf16 %v8017_v40  ;;  %v8018_v45 = vunpack.i.l.bf16 %v8017_v40  ;;  %2130 = vmatprep.subr.bf16.mxu1 %v2109_v60  ;;  %v2057_v10 = vsel %vm2055_vm12, %v8033_v56, %v8034_v55 }
 0x5e2   : > { %v2064_v15 = vpop.permute.xlu0 %2063  ;;  %v2105_v19 = vsel %vm12772_vm9, %v11323_v7, %v2057_v10 }
 0x5e3   : > { %v2071_v61 = vsel %vm12776_vm10, %v8018_v45, %v8019_v44  ;;  %v2070_v38 = vsel %vm12776_vm10, %v2064_v15, %v8018_v45  ;;  %v1860_v45 = vld [vmem:[#allocation16] sm:$0xf] }
 0x5e4   : > { %v2032_v57 = vpop.permute.xlu1 %2031  ;;  %v2107_v20 = vsel %vm12772_vm9, %v2071_v61, %v2082_v13 }
 0x5e5   : > { %v2038_v62 = vsel %vm2037_vm7, %v2032_v57, %v8028_v39  ;;  %v2111_v30 = vpack.c.bf16 %v2107_v20, %v2105_v19 }
 0x5e6   : > { %v2102_v9 = vsel %vm12772_vm9, %v2021_v0, %v2038_v62  ;;  %v8037_v26 = vpop.permute.xlu0 %8036 }
 0x5e7   : > { %v2108_v16 = vpack.c.bf16 %v2102_v9, %v2100_v6  ;;  %v8039_v31 = vunpack.i.h.bf16 %v8037_v26  ;;  %v8038_v35 = vunpack.i.l.bf16 %v8037_v26 }
 0x5e8   : > { %v2050_v29 = vpop.permute.xlu1 %2049 }
 0x5e9   : > { %2131 = vmatpush1.bf16.msra.mxu1 %v2108_v16  ;;  %v2056_v17 = vsel %vm2055_vm12, %v2050_v29, %v8033_v56  ;;  %v2095_v39 = vsel %vm12773_vm13, %v8038_v35, %v8039_v31 }
 0x5ea   : > { %2132 = vmatprep.subr.bf16.mxu1 %v2111_v30  ;;  %v2104_v7 = vsel %vm12772_vm9, %v11311_v3, %v2056_v17  ;;  %v2112_v5 = vpack.c.bf16 %v2095_v39, %v2095_v39 }
 0x5ec   : > { %v2075_v37 = vpop.permute.xlu1 %2074  ;;  %v2125_v51 = vsel %vm2123_vm14, %v2112_v5, 0 }
 0x5ed   : > { %v2081_v1 = vsel %vm12774_vm11, %v2075_v37, %v8023_v47 }
 0x5ee   : > { %v2106_v4 = vsel %vm12772_vm9, %v2070_v38, %v2081_v1 }
 0x5ef   : > { %v2110_v40 = vpack.c.bf16 %v2106_v4, %v2104_v7 }
 0x5f0   : > { %v2093_v42 = vpop.permute.xlu1 %2092 }
 0x5f1   : > { %v2096_v44 = vsel %vm12773_vm13, %v8039_v31, %v2093_v42  ;;  %2133 = vmatpush1.bf16.msra.mxu1 %v2110_v40 }
 0x5f2   : > { %v2113_v46 = vpack.c.bf16 %v2096_v44, %v2096_v44  ;;  %v2178_v44 = vld [vmem:[#allocation20] sm:$0xff] }
 0x5f4   : > { %7112 = vmatprep.subr.msk.bf16.mxu1 %vm2123_vm14, %v2113_v46 }
 0x5f5   : > { %2135 = vmatpush1.bf16.msra.mxu1 %v2125_v51 }
 0x5f7   : > { %v2117_v3 = vpop.permute.xlu0 %2116 }
 0x5f8   : > { %7113 = vmatmul.mubr.msk.bf16.vlgmr.msra.gmra.mrb[0].mxu1 %vm2119_vm15, %v1860_v45 }
 0x5f9   : > { %2352 = vmatprep.mubr.bf16.mxu1 %v12754_v12 }
 0x6cb   : > { %v2164_v47 = vpop.f32.mrb[0].mxu1 }
 0x6cc   : > { %v2165_v52 = vadd.f32 %v2164_v47, %v2117_v3  ;;  %v2166_v53 = vpop.f32.mrb[1].mxu1 }
 0x6cd   : > { %v2167_v21 = vadd.f32 %v2166_v53, %v2117_v3  ;;  %v2168_v54 = vpop.f32.mrb[2].mxu1 }
 0x6ce   : > { %v2173_v25 = vmul.f32 0.01, %v2165_v52  ;;  %v2169_v55 = vpop.f32.mrb[3].mxu1  ;;  %vm2171_vm2 = vcmp.ge.f32.partialorder %v2165_v52, 0.0 }
 0x6cf   : > { %v2174_v56 = vmul.f32 0.01, %v2167_v21  ;;  %vm2172_vm3 = vcmp.ge.f32.partialorder %v2167_v21, 0.0 }
 0x6d0   : > { %v11502_v57 = vsel %vm2171_vm2, %v2165_v52, %v2173_v25 }
 0x6d1   : > { %2181 = vrot.lane.b32.xlu1 %v11502_v57, %s12750_s1  ;;  %v11506_v60 = vsel %vm2172_vm3, %v2167_v21, %v2174_v56  ;;  %vm2665_vm3 = vcmask 72704  }
 0x6d5   : > { %2183 = vrot.lane.b32.xlu1 %v11506_v60, %s12750_s1 }
 0x743   : > { %v2182_v61 = vpop.permute.xlu1 %2181 }
 0x744   : > { %v2189_v62 = vsel %vm1868_vm0, 0.0, %v2182_v61 }
 0x745   : > { %2210 = vrot.lane.b32.xlu1 %v2189_v62, %s10227_s11  ;;  %v2196_v6 = vmul.f32 %v2189_v62, %v11359_v22  ;;  %v2199_v15 = vmul.f32 %v2189_v62, %v11393_v36  ;;  %v2193_v20 = vmul.f32 %v2189_v62, %v11373_v28  ;;  %v2202_v31 = vmul.f32 %v2189_v62, %v11413_v48 }
 0x746   : > { %v2205_v42 = vmul.f32 %v2189_v62, %v11433_v59  ;;  %v2191_v21 = vmul.f32 %v2189_v62, %v11467_v24 }
 0x747   : > { %v2184_v0 = vpop.permute.xlu1 %2183 }
 0x748   : > { %v2185_v9 = vsel %vm1868_vm0, %v2182_v61, %v2184_v0  ;;  %v2190_v10 = vsel %vm1868_vm0, %v2184_v0, 0.0 }
 0x749   : > { %2236 = vrot.lane.b32.xlu1 %v2196_v6, %s12767_s6  ;;  %v8041_v13 = vpack.i.bf16 %v2190_v10, %v2185_v9  ;;  %v2197_v16 = vmul.f32 %v2185_v9, %v11384_v33  ;;  %v2198_v19 = vmul.f32 %v2190_v10, %v11371_v27  ;;  %v2194_v29 = vmul.f32 %v2185_v9, %v11389_v34 }
 0x74a   : > { %v2195_v30 = vmul.f32 %v2190_v10, %v11379_v32  ;;  %v2200_v35 = vmul.f32 %v2185_v9, %v11406_v43  ;;  %v2201_v37 = vmul.f32 %v2190_v10, %v11401_v41  ;;  %v2203_v1 = vmul.f32 %v2185_v9, %v11421_v50 }
 0x74b   : > { %8042 = vrot.lane.b32.xlu0 %v8041_v13, %s10227_s11  ;;  %v8051_v17 = vpack.i.bf16 %v2198_v19, %v2197_v16  ;;  %v2204_v7 = vmul.f32 %v2190_v10, %v11415_v49  ;;  %v2207_v4 = vmul.f32 %v2190_v10, %v11429_v58  ;;  %v2206_v40 = vmul.f32 %v2185_v9, %v11439_v63 }
 0x74c   : > { %v8046_v26 = vpack.i.bf16 %v2195_v30, %v2194_v29  ;;  %v8061_v38 = vpack.i.bf16 %v2201_v37, %v2200_v35  ;;  %v2192_v53 = vmul.f32 %v2185_v9, %v11471_v23 }
 0x74d   : > { %2249 = vrot.lane.b32.xlu1 %v2199_v15, %s12763_s3  ;;  %v8066_v39 = vpack.i.bf16 %v2204_v7, %v2203_v1  ;;  %v8071_v5 = vpack.i.bf16 %v2206_v40, %v2205_v42 }
 0x74f   : > { %2223 = vrot.lane.b32.xlu0 %v2193_v20, %s10228_s12 }
 0x751   : > { %8052 = vrot.lane.b32.xlu1 %v8051_v17, %s12767_s6 }
 0x753   : > { %8047 = vrot.lane.b32.xlu0 %v8046_v26, %s10228_s12 }
 0x755   : > { %8057 = vrot.lane.b32.xlu1 %v8041_v13, %s12746_s7 }
 0x757   : > { %2262 = vrot.lane.b32.xlu0 %v2202_v31, %s12748_s15 }
 0x759   : > { %2272 = vrot.lane.b32.xlu1 %v2189_v62, %s12746_s7 }
 0x75b   : > { %8062 = vrot.lane.b32.xlu0 %v8061_v38, %s12763_s3 }
 0x75d   : > { %2289 = vrot.lane.b32.xlu1 %v2207_v4, %s12744_s8 }
 0x75f   : > { %8067 = vrot.lane.b32.xlu0 %v8066_v39, %s12748_s15 }
 0x763   : > { %8072 = vrot.lane.b32.xlu0 %v8071_v5, %s12744_s8 }
 0x767   : > { %2307 = vperm.xlu0 %8040, %v2178_v44  }
 0x7b7   : > { %v2211_v46 = vpop.permute.xlu1 %2210 }
 0x7bb   : > { %v2237_v51 = vpop.permute.xlu1 %2236 }
 0x7bd   : > { %v8043_v45 = vpop.permute.xlu0 %8042 }
 0x7be   : > { %v8045_v3 = vunpack.i.h.bf16 %v8043_v45  ;;  %v8044_v47 = vunpack.i.l.bf16 %v8043_v45 }
 0x7bf   : > { %v2250_v52 = vpop.permute.xlu1 %2249 }
 0x7c0   : > { %v2216_v54 = vsel %vm2006_vm6, %v2211_v46, %v8044_v47  ;;  %v2217_v25 = vsel %vm2006_vm6, %v8044_v47, %v8045_v3 }
 0x7c1   : > { %v2224_v55 = vpop.permute.xlu0 %2223  ;;  %v2296_v56 = vpack.c.bf16 %v2217_v25, %v2192_v53  ;;  %v2295_v61 = vpack.c.bf16 %v2216_v54, %v2191_v21 }
 0x7c3   : > { %2320 = vmatprep.subr.bf16.mxu1 %v2296_v56  ;;  %v8053_v0 = vpop.permute.xlu1 %8052 }
 0x7c4   : > { %v8055_v6 = vunpack.i.h.bf16 %v8053_v0  ;;  %v8054_v10 = vunpack.i.l.bf16 %v8053_v0  ;;  %2321 = vmatpush1.bf16.msra.mxu1 %v2295_v61 }
 0x7c5   : > { %v8048_v13 = vpop.permute.xlu0 %8047 }
 0x7c6   : > { %v8050_v15 = vunpack.i.h.bf16 %v8048_v13  ;;  %v8049_v16 = vunpack.i.l.bf16 %v8048_v13  ;;  %v2242_v19 = vsel %vm2037_vm7, %v2237_v51, %v8054_v10  ;;  %v2243_v20 = vsel %vm2037_vm7, %v8054_v10, %v8055_v6  ;;  %v2177_v6 = vld [vmem:[#allocation19] sm:$0xf] }
 0x7c7   : > { %v8058_v26 = vpop.permute.xlu1 %8057 }
 0x7c8   : > { %v2229_v9 = vsel %vm2020_vm8, %v2224_v55, %v8049_v16  ;;  %v2230_v62 = vsel %vm2020_vm8, %v8049_v16, %v8050_v15  ;;  %v8060_v38 = vunpack.i.h.bf16 %v8058_v26  ;;  %v8059_v1 = vunpack.i.l.bf16 %v8058_v26 }
 0x7c9   : > { %v2263_v29 = vpop.permute.xlu0 %2262  ;;  %v2298_v30 = vpack.c.bf16 %v2243_v20, %v2230_v62  ;;  %v2297_v17 = vpack.c.bf16 %v2242_v19, %v2229_v9 }
 0x7ca   : > { %v2279_v47 = vsel %vm12774_vm11, %v8059_v1, %v8060_v38 }
 0x7cb   : > { %2322 = vmatprep.subr.bf16.mxu1 %v2298_v30  ;;  %v2273_v39 = vpop.permute.xlu1 %2272 }
 0x7cc   : > { %2323 = vmatpush1.bf16.msra.mxu1 %v2297_v17  ;;  %v2278_v51 = vsel %vm12774_vm11, %v2273_v39, %v8059_v1 }
 0x7cd   : > { %v8063_v31 = vpop.permute.xlu0 %8062 }
 0x7ce   : > { %v8065_v35 = vunpack.i.h.bf16 %v8063_v31  ;;  %v8064_v37 = vunpack.i.l.bf16 %v8063_v31 }
 0x7d0   : > { %v2255_v7 = vsel %vm2055_vm12, %v2250_v52, %v8064_v37  ;;  %v2256_v4 = vsel %vm2055_vm12, %v8064_v37, %v8065_v35 }
 0x7d1   : > { %v8068_v40 = vpop.permute.xlu0 %8067  ;;  %v2300_v42 = vpack.c.bf16 %v2256_v4, %v11506_v60  ;;  %v2299_v5 = vpack.c.bf16 %v2255_v7, %v11502_v57  ;;  %v2290_v60 = vpop.permute.xlu1 %2289 }
 0x7d2   : > { %v8070_v44 = vunpack.i.h.bf16 %v8068_v40  ;;  %v8069_v46 = vunpack.i.l.bf16 %v8068_v40 }
 0x7d3   : > { %2324 = vmatprep.subr.bf16.mxu1 %v2300_v42 }
 0x7d4   : > { %v2268_v45 = vsel %vm12776_vm10, %v2263_v29, %v8069_v46  ;;  %2325 = vmatpush1.bf16.msra.mxu1 %v2299_v5  ;;  %v2269_v3 = vsel %vm12776_vm10, %v8069_v46, %v8070_v44 }
 0x7d5   : > { %v8073_v52 = vpop.permute.xlu0 %8072  ;;  %v2302_v53 = vpack.c.bf16 %v2279_v47, %v2269_v3  ;;  %v2301_v21 = vpack.c.bf16 %v2278_v51, %v2268_v45 }
 0x7d6   : > { %v8075_v54 = vunpack.i.h.bf16 %v8073_v52  ;;  %v8074_v25 = vunpack.i.l.bf16 %v8073_v52 }
 0x7d7   : > { %2326 = vmatprep.subr.bf16.mxu1 %v2302_v53 }
 0x7d8   : > { %2327 = vmatpush1.bf16.msra.mxu1 %v2301_v21  ;;  %v2292_v57 = vsel %vm12773_vm13, %v8075_v54, %v2290_v60  ;;  %v2291_v55 = vsel %vm12773_vm13, %v8074_v25, %v8075_v54 }
 0x7d9   : > { %v2304_v56 = vpack.c.bf16 %v2292_v57, %v2292_v57  ;;  %v2303_v61 = vpack.c.bf16 %v2291_v55, %v2291_v55  ;;  %v2561_v55 = vld [vmem:[#allocation10 + $0x80] sm:$0xff] }
 0x7db   : > { %7114 = vmatprep.subr.msk.bf16.mxu1 %vm12772_vm9, %v2304_v56  ;;  %v2315_v0 = vsel %vm12772_vm9, %v2303_v61, 0  ;;  %v2562_v56 = vld [vmem:[#allocation10 + $0x88] sm:$0xff]  ;;  %v2545_v61 = vld [vmem:[#allocation10] sm:$0xff] }
 0x7dc   : > { %2329 = vmatpush1.bf16.msra.mxu1 %v2315_v0  ;;  %v7526_v0 = vpack.c.bf16 %v2562_v56, %v2561_v55  ;;  %v2574_v55 = vld [vmem:[#allocation10 + $0xe8] sm:$0xff] }
 0x7de   : > { %7527 = vmatprep.subr.bf16.mxu1 %v7526_v0  ;;  %v2557_v0 = vld [vmem:[#allocation10 + $0x60] sm:$0xff] }
 0x7df   : > { %7115 = vmatmul.mubr.msk.bf16.vlgmr.msra.gmra.mrb[4].mxu1 %vm12761_vm5, %v2177_v6  ;;  %v2546_v6 = vld [vmem:[#allocation10 + $0x8] sm:$0xff] }
 0x7e6   : > { %v2308_v10 = vpop.permute.xlu0 %2307 }
 0x8b2   : > { %v2354_v13 = vpop.f32.mrb[4].mxu1 }
 0x8b3   : > { %v2355_v15 = vadd.f32 %v2354_v13, %v2308_v10  ;;  %v2356_v16 = vpop.f32.mrb[5].mxu1  ;;  %v2564_v13 = vld [vmem:[#allocation10 + $0x98] sm:$0xff] }
 0x8b4   : > { %v2357_v19 = vadd.f32 %v2356_v16, %v2308_v10  ;;  %v2358_v9 = vpop.f32.mrb[6].mxu1  ;;  %v2563_v10 = vld [vmem:[#allocation10 + $0x90] sm:$0xff]  ;;  %v7528_v16 = vpack.c.bf16 %v2546_v6, %v2545_v61  ;;  %v2558_v6 = vld [vmem:[#allocation10 + $0x68] sm:$0xff] }
 0x8b5   : > { %v2363_v62 = vmul.f32 0.01, %v2355_v15  ;;  %v2359_v20 = vpop.f32.mrb[7].mxu1  ;;  %vm2361_vm14 = vcmp.ge.f32.partialorder %v2355_v15, 0.0  ;;  %v2547_v9 = vld [vmem:[#allocation10 + $0x10] sm:$0xff] }
 0x8b6   : > { %v2364_v29 = vmul.f32 0.01, %v2357_v19  ;;  %vm2362_vm15 = vcmp.ge.f32.partialorder %v2357_v19, 0.0  ;;  %v2565_v20 = vld [vmem:[#allocation10 + $0xa0] sm:$0xff]  ;;  %7529 = vmatpush3.bf16.msra.mxu1 %v7528_v16 }
 0x8b7   : > { %v11563_v30 = vsel %vm2361_vm14, %v2355_v15, %v2363_v62  ;;  %v2548_v62 = vld [vmem:[#allocation10 + $0x18] sm:$0xff]  ;;  %vm2667_vm14 = vcmask 596992  }
 0x8b8   : > { %12919 = vst [vmem:[#allocation132_spill] sm:$0xff] %v11563_v30  ;;  %2371 = vrot.lane.b32.xlu1 %v11563_v30, %s12750_s1  ;;  %v11567_v17 = vsel %vm2362_vm15, %v2357_v19, %v2364_v29  ;;  %v7530_v19 = vpack.c.bf16 %v2564_v13, %v2563_v10  ;;  %v2566_v29 = vld [vmem:[#allocation10 + $0xa8] sm:$0xff]  ;;  %v2575_v10 = vld [vmem:[#allocation10 + $0xf0] sm:$0xff]  ;;  %v2576_v13 = vld [vmem:[#allocation10 + $0xf8] sm:$0xff]  ;;  %vm10241_vm15 = vmmov 0  }
 0x8b9   : > { %12920 = vst [vmem:[#allocation133_spill] sm:$0xff] %v11567_v17  ;;  %2373 = vrot.lane.b32.xlu0 %v11567_v17, %s12750_s1  ;;  %v7554_v16 = vpack.c.bf16 %v2576_v13, %v2575_v10  ;;  %s12765_s1 = smov 111  }
 0x8ba   : > { %7531 = vmatprep.subr.bf16.mxu1 %v7530_v19 }
 0x92a   : > { %v2372_v26 = vpop.permute.xlu1 %2371 }
 0x92b   : > { %v11572_v31 = vsel %vm1868_vm0, 0.0, %v2372_v26  ;;  %v2374_v35 = vpop.permute.xlu0 %2373 }
 0x92c   : > { %v11575_v37 = vsel %vm1868_vm0, %v2372_v26, %v2374_v35  ;;  %v2380_v38 = vsel %vm1868_vm0, %v2374_v35, 0.0  ;;  %2400 = vrot.lane.b32.xlu0 %v11572_v31, %s10227_s11  ;;  %v2386_v7 = vmul.f32 %v11572_v31, %v11359_v22  ;;  %v2383_v4 = vmul.f32 %v11572_v31, %v11373_v28 }
 0x92d   : > { %v8076_v1 = vpack.i.bf16 %v2380_v38, %v11575_v37  ;;  %v2384_v39 = vmul.f32 %v11575_v37, %v11389_v34  ;;  %v2385_v40 = vmul.f32 %v2380_v38, %v11379_v32  ;;  %v2389_v42 = vmul.f32 %v11572_v31, %v11393_v36 }
 0x92e   : > { %v2387_v5 = vmul.f32 %v11575_v37, %v11384_v33  ;;  %v2388_v44 = vmul.f32 %v2380_v38, %v11371_v27  ;;  %v2392_v45 = vmul.f32 %v11572_v31, %v11413_v48  ;;  %v2390_v3 = vmul.f32 %v11575_v37, %v11406_v43 }
 0x92f   : > { %8077 = vrot.lane.b32.xlu1 %v8076_v1, %s10227_s11  ;;  %v8081_v46 = vpack.i.bf16 %v2385_v40, %v2384_v39  ;;  %v2391_v47 = vmul.f32 %v2380_v38, %v11401_v41  ;;  %v2393_v53 = vmul.f32 %v11575_v37, %v11421_v50  ;;  %v2394_v21 = vmul.f32 %v2380_v38, %v11415_v49 }
 0x930   : > { %2426 = vrot.lane.b32.xlu0 %v2386_v7, %s12767_s6  ;;  %v8086_v51 = vpack.i.bf16 %v2388_v44, %v2387_v5  ;;  %v2395_v25 = vmul.f32 %v11572_v31, %v11433_v59  ;;  %v2396_v60 = vmul.f32 %v11575_v37, %v11439_v63  ;;  %v2397_v57 = vmul.f32 %v2380_v38, %v11429_v58  ;;  %v2549_v38 = vld [vmem:[#allocation10 + $0x20] sm:$0xff]  ;;  %v2567_v7 = vld [vmem:[#allocation10 + $0xb0] sm:$0xff]  ;;  %v2552_v5 = vld [vmem:[#allocation10 + $0x38] sm:$0xff] }
 0x931   : > { %v8096_v52 = vpack.i.bf16 %v2391_v47, %v2390_v3  ;;  %v8101_v54 = vpack.i.bf16 %v2394_v21, %v2393_v53  ;;  %v7532_v26 = vpack.c.bf16 %v2548_v62, %v2547_v9  ;;  %v7534_v35 = vpack.c.bf16 %v2566_v29, %v2565_v20  ;;  %v2569_v44 = vld [vmem:[#allocation10 + $0xc0] sm:$0xff]  ;;  %v2554_v47 = vld [vmem:[#allocation10 + $0x48] sm:$0xff]  ;;  %v2572_v53 = vld [vmem:[#allocation10 + $0xd8] sm:$0xff] }
 0x932   : > { %v8106_v15 = vpack.i.bf16 %v2396_v60, %v2395_v25  ;;  %v2553_v3 = vld [vmem:[#allocation10 + $0x40] sm:$0xff]  ;;  %v2555_v25 = vld [vmem:[#allocation10 + $0x50] sm:$0xff]  ;;  %v2556_v60 = vld [vmem:[#allocation10 + $0x58] sm:$0xff] }
 0x933   : > { %2413 = vrot.lane.b32.xlu1 %v2383_v4, %s10228_s12  ;;  %v2568_v4 = vld [vmem:[#allocation10 + $0xb8] sm:$0xff]  ;;  %7533 = vmatpush3.bf16.msra.mxu1 %v7532_v26  ;;  %v7544_v21 = vpack.c.bf16 %v2554_v47, %v2553_v3  ;;  %v7548_v56 = vpack.c.bf16 %v2556_v60, %v2555_v25  ;;  %v11622_v26 = vmul.f32 %v11575_v37, %v11471_v23 }
 0x934   : > { %2439 = vrot.lane.b32.xlu0 %v2389_v42, %s12763_s3  ;;  %7535 = vmatprep.subr.bf16.mxu1 %v7534_v35  ;;  %v7538_v40 = vpack.c.bf16 %v2568_v4, %v2567_v7  ;;  %v2551_v42 = vld [vmem:[#allocation10 + $0x30] sm:$0xff]  ;;  %v11626_v35 = vmul.f32 %v11572_v31, %v11467_v24 }
 0x935   : > { %12921 = vst [vmem:[#allocation134_spill] sm:$0xff] %v11622_v26 }
 0x936   : > { %12922 = vst [vmem:[#allocation135_spill] sm:$0xff] %v11626_v35 }
 0x937   : > { %8082 = vrot.lane.b32.xlu1 %v8081_v46, %s10228_s12  ;;  %v2570_v46 = vld [vmem:[#allocation10 + $0xc8] sm:$0xff] }
 0x938   : > { %8087 = vrot.lane.b32.xlu0 %v8086_v51, %s12767_s6  ;;  %v7540_v51 = vpack.c.bf16 %v2552_v5, %v2551_v42 }
 0x93b   : > { %2452 = vrot.lane.b32.xlu1 %v2392_v45, %s12748_s15  ;;  %v7542_v45 = vpack.c.bf16 %v2570_v46, %v2569_v44 }
 0x93c   : > { %8092 = vrot.lane.b32.xlu0 %v8076_v1, %s12746_s7  ;;  %v2550_v1 = vld [vmem:[#allocation10 + $0x28] sm:$0xff] }
 0x93d   : > { %v7536_v39 = vpack.c.bf16 %v2550_v1, %v2549_v38 }
 0x93f   : > { %8097 = vrot.lane.b32.xlu1 %v8096_v52, %s12763_s3  ;;  %7537 = vmatpush3.bf16.msra.mxu1 %v7536_v39  ;;  %v2571_v52 = vld [vmem:[#allocation10 + $0xd0] sm:$0xff] }
 0x940   : > { %2462 = vrot.lane.b32.xlu0 %v11572_v31, %s12746_s7  ;;  %7539 = vmatprep.subr.bf16.mxu1 %v7538_v40  ;;  %s10236_s7 = smov 9  }
 0x943   : > { %8102 = vrot.lane.b32.xlu1 %v8101_v54, %s12748_s15  ;;  %7541 = vmatpush3.bf16.msra.mxu1 %v7540_v51  ;;  %v7546_v54 = vpack.c.bf16 %v2572_v53, %v2571_v52  ;;  %s10237_s15 = smov 8  }
 0x944   : > { %2479 = vrot.lane.b32.xlu0 %v2397_v57, %s12744_s8  ;;  %7543 = vmatprep.subr.bf16.mxu1 %v7542_v45  ;;  %v2573_v57 = vld [vmem:[#allocation10 + $0xe0] sm:$0xff] }
 0x945   : > { %v7550_v61 = vpack.c.bf16 %v2574_v55, %v2573_v57 }
 0x947   : > { %8107 = vrot.lane.b32.xlu1 %v8106_v15, %s12744_s8  ;;  %7545 = vmatpush3.bf16.msra.mxu1 %v7544_v21  ;;  %v7552_v15 = vpack.c.bf16 %v2558_v6, %v2557_v0  ;;  %s10235_s8 = smov 10  }
 0x948   : > { %7547 = vmatprep.subr.bf16.mxu1 %v7546_v54 }
 0x94b   : > { %7549 = vmatpush3.bf16.msra.mxu1 %v7548_v56 }
 0x94c   : > { %7551 = vmatprep.subr.bf16.mxu1 %v7550_v61 }
 0x94f   : > { %7553 = vmatpush3.bf16.msra.mxu1 %v7552_v15 }
 0x950   : > { %7555 = vmatprep.subr.bf16.mxu1 %v7554_v16 }
 0x99e   : > { %v2401_v19 = vpop.permute.xlu0 %2400 }
 0x9a1   : > { %v8078_v9 = vpop.permute.xlu1 %8077 }
 0x9a2   : > { %v8080_v62 = vunpack.i.h.bf16 %v8078_v9  ;;  %v8079_v20 = vunpack.i.l.bf16 %v8078_v9  ;;  %v2427_v29 = vpop.permute.xlu0 %2426 }
 0x9a4   : > { %v11629_v38 = vsel %vm2006_vm6, %v8079_v20, %v8080_v62  ;;  %v11632_v1 = vsel %vm2006_vm6, %v2401_v19, %v8079_v20 }
 0x9a5   : > { %12923 = vst [vmem:[#allocation136_spill] sm:$0xff] %v11629_v38  ;;  %12924 = vst [vmem:[#allocation137_spill] sm:$0xff] %v11632_v1  ;;  %v2414_v7 = vpop.permute.xlu1 %2413  ;;  %v2486_v4 = vpack.c.bf16 %v11629_v38, %v11622_v26  ;;  %v2485_v39 = vpack.c.bf16 %v11632_v1, %v11626_v35 }
 0x9a6   : > { %v2440_v40 = vpop.permute.xlu0 %2439 }
 0x9a7   : > { %2504 = vmatprep.subr.bf16.mxu0 %v2486_v4 }
 0x9a8   : > { %2505 = vmatpush1.bf16.msra.mxu0 %v2485_v39 }
 0x9a9   : > { %v8083_v37 = vpop.permute.xlu1 %8082 }
 0x9aa   : > { %v8085_v42 = vunpack.i.h.bf16 %v8083_v37  ;;  %v8084_v31 = vunpack.i.l.bf16 %v8083_v37  ;;  %v8088_v5 = vpop.permute.xlu0 %8087 }
 0x9ab   : > { %v8090_v44 = vunpack.i.h.bf16 %v8088_v5  ;;  %v8089_v46 = vunpack.i.l.bf16 %v8088_v5 }
 0x9ac   : > { %v11639_v51 = vsel %vm2020_vm8, %v8084_v31, %v8085_v42  ;;  %v11642_v45 = vsel %vm2020_vm8, %v2414_v7, %v8084_v31 }
 0x9ad   : > { %12925 = vst [vmem:[#allocation138_spill] sm:$0xff] %v11639_v51  ;;  %12926 = vst [vmem:[#allocation139_spill] sm:$0xff] %v11642_v45  ;;  %v2453_v3 = vpop.permute.xlu1 %2452  ;;  %v11645_v47 = vsel %vm2037_vm7, %v8089_v46, %v8090_v44  ;;  %v11648_v52 = vsel %vm2037_vm7, %v2427_v29, %v8089_v46 }
 0x9ae   : > { %12927 = vst [vmem:[#allocation140_spill] sm:$0xff] %v11645_v47  ;;  %12928 = vst [vmem:[#allocation141_spill] sm:$0xff] %v11648_v52  ;;  %v2488_v53 = vpack.c.bf16 %v11645_v47, %v11639_v51  ;;  %v2487_v21 = vpack.c.bf16 %v11648_v52, %v11642_v45  ;;  %v8093_v54 = vpop.permute.xlu0 %8092 }
 0x9af   : > { %v8095_v55 = vunpack.i.h.bf16 %v8093_v54  ;;  %v8094_v56 = vunpack.i.l.bf16 %v8093_v54  ;;  %v2560_v54 = vld [vmem:[#allocation10 + $0x78] sm:$0xff] }
 0x9b0   : > { %2506 = vmatprep.subr.bf16.mxu0 %v2488_v53  ;;  %v2367_v53 = vld [vmem:[#allocation22] sm:$0xf] }
 0x9b1   : > { %v8098_v25 = vpop.permute.xlu1 %8097  ;;  %2507 = vmatpush1.bf16.msra.mxu0 %v2487_v21  ;;  %v11671_v20 = vsel %vm12774_vm11, %v8094_v56, %v8095_v55  ;;  %v2559_v21 = vld [vmem:[#allocation10 + $0x70] sm:$0xff] }
 0x9b2   : > { %v8100_v60 = vunpack.i.h.bf16 %v8098_v25  ;;  %v8099_v57 = vunpack.i.l.bf16 %v8098_v25  ;;  %v2463_v6 = vpop.permute.xlu0 %2462  ;;  %12933 = vst [vmem:[#allocation146_spill] sm:$0xff] %v11671_v20  ;;  %v7556_v25 = vpack.c.bf16 %v2560_v54, %v2559_v21 }
 0x9b3   : > { %v11665_v9 = vsel %vm12774_vm11, %v2463_v6, %v8094_v56 }
 0x9b4   : > { %v11655_v61 = vsel %vm2055_vm12, %v8099_v57, %v8100_v60  ;;  %v11658_v0 = vsel %vm2055_vm12, %v2440_v40, %v8099_v57  ;;  %12931 = vst [vmem:[#allocation144_spill] sm:$0xff] %v11665_v9  ;;  %7557 = vmatpush3.bf16.msra.mxu1 %v7556_v25  ;;  %v2368_v60 = vld [vmem:[#allocation23] sm:$0xff] }
 0x9b5   : > { %12929 = vst [vmem:[#allocation142_spill] sm:$0xff] %v11655_v61  ;;  %12930 = vst [vmem:[#allocation143_spill] sm:$0xff] %v11658_v0  ;;  %v8103_v10 = vpop.permute.xlu1 %8102  ;;  %v2490_v13 = vpack.c.bf16 %v11655_v61, %v11567_v17  ;;  %v2489_v15 = vpack.c.bf16 %v11658_v0, %v11563_v30  ;;  %2579 = vperm.xlu1 %8111, %v2368_v60   ;;  %3082 = vmatprep.subr.bf16.mxu1 %v12754_v12 }
 0x9b6   : > { %v8105_v16 = vunpack.i.h.bf16 %v8103_v10  ;;  %v8104_v19 = vunpack.i.l.bf16 %v8103_v10  ;;  %v2480_v42 = vpop.permute.xlu0 %2479  ;;  %v2655_v10 = vld [vmem:[#allocation7] sm:$0xff] }
 0x9b7   : > { %2508 = vmatprep.subr.bf16.mxu0 %v2490_v13  ;;  %v2677_v13 = vrot.slane %v2655_v10, %v11326_v8 }
 0x9b8   : > { %2509 = vmatpush1.bf16.msra.mxu0 %v2489_v15  ;;  %v11668_v62 = vsel %vm12776_vm10, %v8104_v19, %v8105_v16  ;;  %v11674_v29 = vsel %vm12776_vm10, %v2453_v3, %v8104_v19  ;;  %v2695_v15 = vrot.slane %v2655_v10, %v11336_v11  ;;  %v7118_v16 = vld [vmem:[#allocation7 + $0x8] ss:$0 sm:$0xff] }
 0x9b9   : > { %12932 = vst [vmem:[#allocation145_spill] sm:$0xff] %v11668_v62  ;;  %12934 = vst [vmem:[#allocation147_spill] sm:$0xff] %v11674_v29  ;;  %v8108_v7 = vpop.permute.xlu1 %8107  ;;  %v2492_v4 = vpack.c.bf16 %v11671_v20, %v11668_v62  ;;  %v2491_v39 = vpack.c.bf16 %v11665_v9, %v11674_v29  ;;  %2679 = vrot.lane.b32.xlu1 %v2677_v13, %s10223_s13  ;;  %v3229_v29 = vld [vmem:[#allocation8] sm:$0xff] }
 0x9ba   : > { %v8110_v40 = vunpack.i.h.bf16 %v8108_v7  ;;  %v8109_v37 = vunpack.i.l.bf16 %v8108_v7 }
 0x9bb   : > { %2510 = vmatprep.subr.bf16.mxu0 %v2492_v4 }
 0x9bc   : > { %2511 = vmatpush1.bf16.msra.mxu0 %v2491_v39  ;;  %v2482_v31 = vsel %vm12773_vm13, %v8110_v40, %v2480_v42  ;;  %v2481_v5 = vsel %vm12773_vm13, %v8109_v37, %v8110_v40 }
 0x9bd   : > { %v11682_v44 = vpack.c.bf16 %v2482_v31, %v2482_v31  ;;  %v2493_v46 = vpack.c.bf16 %v2481_v5, %v2481_v5  ;;  %2697 = vrot.lane.b32.xlu1 %v2695_v15, %s10235_s8  ;;  %v2686_v31 = vrot.slane %v2655_v10, %v11308_v2  ;;  %v2704_v5 = vrot.slane %v2655_v10, %v11345_v14 }
 0x9bf   : > { %12935 = vst [vmem:[#allocation148_spill] sm:$0xff] %v11682_v44  ;;  %7116 = vmatprep.subr.msk.bf16.mxu0 %vm12772_vm9, %v11682_v44  ;;  %v11687_v3 = vsel %vm12772_vm9, %v2493_v46, 0  ;;  %v12752_v46 = vmov 0.0  }
 0x9c0   : > { %12936 = vst [vmem:[#allocation149_spill] sm:$0xff] %v11687_v3  ;;  %2513 = vmatpush1.bf16.msra.mxu0 %v11687_v3  ;;  %v8819_v3 = vld [vmem:[#allocation31] ss:$8 sps:$4 sm:$0xff]  }
 0x9c1   : > { %2715 = vrot.lane.b32.xlu1 %v7118_v16, %s10224_s2  ;;  %7443 = vmatprep.subr.bf16.mxu0 %v12752_v46  ;;  %s10240_s2 = smov 118  }
 0x9c3   : > { %7117 = vmatmul.mubr.msk.bf16.vlgmr.msra.gmra.mrb[0].mxu0 %vm12761_vm5, %v2367_v53 }
 0x9c4   : > { %7453 = vmatprep.mubr.msk.bf16.mxu0 %vm10241_vm15, %v12752_v46 }
 0xa34   : > { %v2580_v4 = vpop.permute.xlu1 %2579 }
 0xa38   : > { %v11703_v53 = vpop.permute.xlu1 %2679 }
 0xa96   : > { %v2538_v57 = vpop.f32.mrb[0].mxu0 }
 0xa97   : > { %v2540_v55 = vpop.f32.mrb[1].mxu0 }
 0xa98   : > { %v2542_v56 = vpop.f32.mrb[2].mxu0  ;;  %2646 = vmatprep.mubr.f32.mxu1 %v2540_v55 }
 0xa99   : > { %v2543_v6 = vpop.f32.mrb[3].mxu0  ;;  %2647 = vmatmul.mubr.f32.vlgmr.msra.gmra.mrb[8].mxu1 %v2538_v57  ;;  %v11709_v57 = vpop.permute.xlu1 %2697 }
 0xa9d   : > { %v11722_v16 = vpop.permute.xlu1 %2715 }
 0xb6c   : > { %v7236_v19 = vpop.f32.mrb[8].mxu1 }
 0xb6d   : > { %v7237_v7 = vpop.f32.mrb[9].mxu1 }
 0xb6e   : > { %v7238_v39 = vadd.f32 %v7237_v7, %v7236_v19  ;;  %v2659_v7 = vld [vmem:[#allocation26] sm:$0xff] }
 0xb70   : > { %v2649_v40 = vadd.f32 %v7238_v39, %v2580_v4  ;;  %v2660_v4 = vld [vmem:[#allocation26 + $0x8] sm:$0xff]  ;;  %v11729_v39 = vrot.slane %v2655_v10, %v11463_v18 }
 0xb72   : > { %vm2652_vm2 = vcmp.ge.f32.partialorder %v2649_v40, 0.0  ;;  %v2653_v37 = vmul.f32 0.01, %v2649_v40 }
 0xb74   : > { %v2654_v42 = vsel %vm2652_vm2, %v2649_v40, %v2653_v37 }
 0xb75   : > { %2662 = vrot.lane.b32.xlu0 %v2654_v42, %s10236_s7 }
 0xb79   : > { %2688 = vrot.lane.b32.xlu0 %v2686_v31, %s10237_s15 }
 0xb7d   : > { %2706 = vrot.lane.b32.xlu0 %v2704_v5, %s10222_s14  ;;  %s10239_s14 = smov 120  }
 0xbe7   : > { %v2663_v21 = vpop.permute.xlu0 %2662 }
 0xbe8   : > { %v2666_v54 = vsel %vm2665_vm3, 0.0, %v2663_v21 }
 0xbe9   : > { %v2668_v25 = vsel %vm2667_vm14, %v2666_v54, 0.0 }
 0xbea   : > { %2720 = vrot.lane.b32.xlu0 %v2668_v25, %s10227_s11  ;;  %v2682_v60 = vmul.f32 %v11703_v53, %v2668_v25  ;;  %v2700_v6 = vmul.f32 %v11709_v57, %v2668_v25  ;;  %v2718_v19 = vmul.f32 %v11722_v16, %v2668_v25  ;;  %v2673_v40 = vmul.f32 %v11729_v39, %v2668_v25 }
 0xbeb   : > { %v11711_v55 = vpop.permute.xlu0 %2688 }
 0xbec   : > { %2724 = vrot.lane.b32.xlu1 %v2682_v60, %s10228_s12  ;;  %v2691_v56 = vmul.f32 %v11711_v55, %v2668_v25 }
 0xbee   : > { %2728 = vrot.lane.b32.xlu0 %v2691_v56, %s10239_s14 }
 0xbef   : > { %v11717_v13 = vpop.permute.xlu0 %2706 }
 0xbf0   : > { %2732 = vrot.lane.b32.xlu1 %v2700_v6, %s10240_s2  ;;  %v2709_v15 = vmul.f32 %v11717_v13, %v2668_v25 }
 0xbf2   : > { %2736 = vrot.lane.b32.xlu0 %v2709_v15, %s12767_s6 }
 0xbf4   : > { %2739 = vrot.lane.b32.xlu1 %v2668_v25, %s12765_s1 }
 0xbf6   : > { %2743 = vrot.lane.b32.xlu0 %v2718_v19, %s12763_s3 }
 0xbf8   : > { %2753 = vperm.xlu1 %8111, %v2659_v7  }
 0xbfa   : > { %2758 = vperm.xlu0 %8040, %v2660_v4   ;;  %v8813_v4 = vld [vmem:[#allocation25] sm:$0xff]  }
 0xc5c   : > { %v2721_v37 = vpop.permute.xlu0 %2720 }
 0xc5d   : > { %v2746_v31 = vpack.c.bf16 %v2721_v37, %v2673_v40 }
 0xc5e   : > { %v2725_v5 = vpop.permute.xlu1 %2724 }
 0xc5f   : > { %7444 = vmatpush3.bf16.msra.mxu0 %v2746_v31 }
 0xc60   : > { %v2729_v21 = vpop.permute.xlu0 %2728  ;;  %7445 = vmatprep.subr.bf16.mxu0 %v12752_v46 }
 0xc61   : > { %v2747_v54 = vpack.c.bf16 %v2729_v21, %v2725_v5 }
 0xc62   : > { %v2733_v60 = vpop.permute.xlu1 %2732 }
 0xc63   : > { %7446 = vmatpush3.bf16.msra.mxu0 %v2747_v54  ;;  %v2748_v6 = vpack.c.bf16 %v2733_v60, %v2654_v42 }
 0xc64   : > { %v2737_v56 = vpop.permute.xlu0 %2736  ;;  %7447 = vmatprep.subr.bf16.mxu0 %v12752_v46 }
 0xc66   : > { %v2740_v15 = vpop.permute.xlu1 %2739 }
 0xc67   : > { %7448 = vmatpush3.bf16.msra.mxu0 %v2748_v6  ;;  %v2749_v25 = vpack.c.bf16 %v2740_v15, %v2737_v56 }
 0xc68   : > { %v2744_v10 = vpop.permute.xlu0 %2743  ;;  %7449 = vmatprep.subr.bf16.mxu0 %v12752_v46 }
 0xc69   : > { %v2750_v19 = vpack.c.bf16 %v2744_v10, %v2744_v10 }
 0xc6b   : > { %7450 = vmatpush3.bf16.msra.mxu0 %v2749_v25  ;;  %v2770_v7 = vsel %vm12772_vm9, %v2750_v19, 0 }
 0xc6c   : > { %7451 = vmatprep.subr.bf16.mxu0 %v12752_v46 }
 0xc6f   : > { %7452 = vmatpush3.bf16.msra.mxu0 %v2770_v7 }
 0xc70   : > { %2932 = vmatprep.subr.bf16.mxu0 %v12754_v12 }
 0xc72   : > { %7454 = vmatmul.mubr.msk.bf16.vlgmr.msra.gmra.mrb[4].mxu0 %vm12761_vm5, %v8813_v4 }
 0xc77   : > { %v2754_v40 = vpop.permute.xlu1 %2753 }
 0xc79   : > { %v2759_v5 = vpop.permute.xlu0 %2758 }
 0xd45   : > { %v2806_v42 = vpop.f32.mrb[4].mxu0 }
 0xd46   : > { %v2807_v37 = vadd.f32 %v2806_v42, %v2754_v40  ;;  %v7455_v31 = vpop.f32.mrb[5].mxu0 }
 0xd47   : > { %v2809_v21 = vpop.f32.mrb[6].mxu0 }
 0xd48   : > { %v2815_v54 = vmul.f32 0.01, %v2807_v37  ;;  %v2810_v60 = vadd.f32 %v2809_v21, %v2759_v5  ;;  %v7456_v56 = vpop.f32.mrb[7].mxu0  ;;  %vm2813_vm2 = vcmp.ge.f32.partialorder %v2807_v37, 0.0 }
 0xd4a   : > { %v2816_v6 = vmul.f32 0.01, %v2810_v60  ;;  %v11739_v15 = vsel %vm2813_vm2, %v2807_v37, %v2815_v54  ;;  %vm2814_vm15 = vcmp.ge.f32.partialorder %v2810_v60, 0.0 }
 0xd4b   : > { %2825 = vrot.lane.b32.xlu1 %v11739_v15, %s10236_s7 }
 0xd4c   : > { %v11743_v10 = vsel %vm2814_vm15, %v2810_v60, %v2816_v6 }
 0xd4d   : > { %2827 = vrot.lane.b32.xlu0 %v11743_v10, %s10236_s7  ;;  %v2905_v25 = vpack.c.bf16 %v11743_v10, %v11739_v15 }
 0xdbd   : > { %v2826_v19 = vpop.permute.xlu1 %2825 }
 0xdbe   : > { %v2831_v7 = vsel %vm2665_vm3, 0.0, %v2826_v19 }
 0xdbf   : > { %v2833_v4 = vsel %vm2667_vm14, %v2831_v7, 0.0  ;;  %v2828_v40 = vpop.permute.xlu0 %2827 }
 0xdc0   : > { %v2832_v42 = vsel %vm2665_vm3, 0.0, %v2828_v40  ;;  %v2837_v31 = vmul.f32 %v2833_v4, %v11703_v53  ;;  %v2835_v5 = vmul.f32 %v2833_v4, %v11729_v39  ;;  %v2839_v10 = vmul.f32 %v2833_v4, %v11711_v55 }
 0xdc1   : > { %v2834_v37 = vsel %vm2667_vm14, %v2832_v42, 0.0  ;;  %v2841_v40 = vmul.f32 %v2833_v4, %v11709_v57 }
 0xdc2   : > { %v8112_v21 = vpack.i.bf16 %v2834_v37, %v2833_v4  ;;  %v2838_v54 = vmul.f32 %v2834_v37, %v11703_v53  ;;  %v2836_v60 = vmul.f32 %v2834_v37, %v11729_v39  ;;  %v2840_v56 = vmul.f32 %v2834_v37, %v11711_v55 }
 0xdc3   : > { %v2842_v19 = vmul.f32 %v2834_v37, %v11709_v57  ;;  %v2844_v42 = vmul.f32 %v2834_v37, %v11717_v13 }
 0xdc4   : > { %8113 = vrot.lane.b32.xlu1 %v8112_v21, %s10227_s11  ;;  %v8117_v6 = vpack.i.bf16 %v2838_v54, %v2837_v31  ;;  %v2901_v15 = vpack.c.bf16 %v2836_v60, %v2835_v5  ;;  %v8122_v7 = vpack.i.bf16 %v2840_v56, %v2839_v10  ;;  %v2843_v31 = vmul.f32 %v2833_v4, %v11717_v13  ;;  %v8814_v10 = vld [vmem:[#allocation28 + $0x4] ss:$8 sps:$4 sm:$0xff]  }
 0xdc5   : > { %v8127_v46 = vpack.i.bf16 %v2842_v19, %v2841_v40  ;;  %v2846_v54 = vmul.f32 %v2834_v37, %v11722_v16  ;;  %v2845_v60 = vmul.f32 %v2833_v4, %v11722_v16  ;;  %7123 = vmatprep.mubr.msk.bf16.mxu0 %vm1921_vm1, %v8814_v10 }
 0xdc6   : > { %8118 = vrot.lane.b32.xlu0 %v8117_v6, %s10228_s12  ;;  %2933 = vmatpush1.bf16.msra.mxu0 %v2901_v15  ;;  %v8132_v5 = vpack.i.bf16 %v2844_v42, %v2843_v31  ;;  %v2821_v6 = vld [vmem:[#allocation29] sm:$0xff]  ;;  %v2822_v15 = vld [vmem:[#allocation29 + $0x8] sm:$0xff] }
 0xdc7   : > { %2934 = vmatprep.subr.bf16.mxu0 %v12754_v12  ;;  %v8142_v56 = vpack.i.bf16 %v2846_v54, %v2845_v60 }
 0xdc8   : > { %8123 = vrot.lane.b32.xlu1 %v8122_v7, %s10239_s14 }
 0xdca   : > { %8128 = vrot.lane.b32.xlu0 %v8127_v46, %s10240_s2 }
 0xdcc   : > { %8133 = vrot.lane.b32.xlu1 %v8132_v5, %s12767_s6 }
 0xdce   : > { %8138 = vrot.lane.b32.xlu0 %v8112_v21, %s12765_s1 }
 0xdd0   : > { %8143 = vrot.lane.b32.xlu1 %v8142_v56, %s12763_s3 }
 0xdd2   : > { %2912 = vperm.xlu0 %8040, %v2821_v6  }
 0xdd4   : > { %2917 = vperm.xlu1 %8111, %v2822_v15  }
 0xe36   : > { %v8114_v46 = vpop.permute.xlu1 %8113 }
 0xe37   : > { %v8116_v19 = vunpack.i.h.bf16 %v8114_v46  ;;  %v8115_v7 = vunpack.i.l.bf16 %v8114_v46 }
 0xe38   : > { %v8119_v37 = vpop.permute.xlu0 %8118 }
 0xe39   : > { %v2902_v40 = vpack.c.bf16 %v8116_v19, %v8115_v7  ;;  %v8121_v42 = vunpack.i.h.bf16 %v8119_v37  ;;  %v8120_v31 = vunpack.i.l.bf16 %v8119_v37 }
 0xe3a   : > { %v8124_v4 = vpop.permute.xlu1 %8123 }
 0xe3b   : > { %2935 = vmatpush1.bf16.msra.mxu0 %v2902_v40  ;;  %v2903_v21 = vpack.c.bf16 %v8121_v42, %v8120_v31  ;;  %v8126_v5 = vunpack.i.h.bf16 %v8124_v4  ;;  %v8125_v54 = vunpack.i.l.bf16 %v8124_v4 }
 0xe3c   : > { %2936 = vmatprep.subr.bf16.mxu0 %v12754_v12  ;;  %v8129_v56 = vpop.permute.xlu0 %8128 }
 0xe3d   : > { %v2904_v60 = vpack.c.bf16 %v8126_v5, %v8125_v54  ;;  %v8131_v6 = vunpack.i.h.bf16 %v8129_v56  ;;  %v8130_v15 = vunpack.i.l.bf16 %v8129_v56 }
 0xe3e   : > { %v8134_v10 = vpop.permute.xlu1 %8133 }
 0xe3f   : > { %2937 = vmatpush1.bf16.msra.mxu0 %v2903_v21  ;;  %v2906_v46 = vpack.c.bf16 %v8131_v6, %v8130_v15  ;;  %v8136_v19 = vunpack.i.h.bf16 %v8134_v10  ;;  %v8135_v7 = vunpack.i.l.bf16 %v8134_v10 }
 0xe40   : > { %2938 = vmatprep.subr.bf16.mxu0 %v12754_v12  ;;  %v8139_v37 = vpop.permute.xlu0 %8138 }
 0xe41   : > { %v2907_v40 = vpack.c.bf16 %v8136_v19, %v8135_v7  ;;  %v8141_v42 = vunpack.i.h.bf16 %v8139_v37  ;;  %v8140_v31 = vunpack.i.l.bf16 %v8139_v37 }
 0xe42   : > { %v8144_v4 = vpop.permute.xlu1 %8143 }
 0xe43   : > { %2939 = vmatpush1.bf16.msra.mxu0 %v2904_v60  ;;  %v2908_v21 = vpack.c.bf16 %v8141_v42, %v8140_v31  ;;  %v8146_v5 = vunpack.i.h.bf16 %v8144_v4  ;;  %v8145_v54 = vunpack.i.l.bf16 %v8144_v4  ;;  %v8816_v60 = vld [vmem:[#allocation28] ss:$8 sps:$4 sm:$0xff]  }
 0xe44   : > { %2940 = vmatprep.subr.bf16.mxu0 %v12754_v12 }
 0xe47   : > { %2941 = vmatpush1.bf16.msra.mxu0 %v2905_v25  ;;  %v2909_v25 = vpack.c.bf16 %v8146_v5, %v8145_v54 }
 0xe48   : > { %2942 = vmatprep.subr.bf16.mxu0 %v12754_v12 }
 0xe4b   : > { %2943 = vmatpush1.bf16.msra.mxu0 %v2906_v46 }
 0xe4c   : > { %2944 = vmatprep.subr.bf16.mxu0 %v12754_v12 }
 0xe4f   : > { %2945 = vmatpush1.bf16.msra.mxu0 %v2907_v40 }
 0xe50   : > { %2946 = vmatprep.subr.bf16.mxu0 %v12754_v12 }
 0xe51   : > { %v2913_v56 = vpop.permute.xlu0 %2912 }
 0xe53   : > { %2947 = vmatpush1.bf16.msra.mxu0 %v2908_v21  ;;  %v2918_v46 = vpop.permute.xlu1 %2917 }
 0xe54   : > { %2948 = vmatprep.subr.bf16.mxu0 %v12754_v12 }
 0xe57   : > { %2949 = vmatpush1.bf16.msra.mxu0 %v2909_v25 }
 0xe5a   : > { %2965 = vmatmul.mubr.bf16.vlgmr.msra.gmra.mrb[8].mxu0 %v8816_v60 }
 0xf2d   : > { %v2966_v6 = vpop.f32.mrb[8].mxu0 }
 0xf2e   : > { %v2967_v15 = vadd.f32 %v2966_v6, %v2913_v56  ;;  %v2968_v10 = vpop.f32.mrb[9].mxu0 }
 0xf2f   : > { %v2969_v19 = vpop.f32.mrb[10].mxu0 }
 0xf30   : > { %v2975_v7 = vmul.f32 0.01, %v2967_v15  ;;  %v2970_v37 = vadd.f32 %v2969_v19, %v2918_v46  ;;  %v2971_v40 = vpop.f32.mrb[11].mxu0  ;;  %vm2973_vm2 = vcmp.ge.f32.partialorder %v2967_v15, 0.0 }
 0xf32   : > { %v2976_v42 = vmul.f32 0.01, %v2970_v37  ;;  %v2977_v31 = vsel %vm2973_vm2, %v2967_v15, %v2975_v7  ;;  %vm2974_vm15 = vcmp.ge.f32.partialorder %v2970_v37, 0.0  ;;  %vm3141_vm2 = vcmask 523264  }
 0xf33   : > { %2985 = vrot.lane.b32.xlu0 %v2977_v31, %s10236_s7 }
 0xf34   : > { %v2978_v4 = vsel %vm2974_vm15, %v2970_v37, %v2976_v42 }
 0xf35   : > { %2987 = vrot.lane.b32.xlu1 %v2978_v4, %s10236_s7  ;;  %v11783_v21 = vpack.c.bf16 %v2978_v4, %v2977_v31 }
 0xfa5   : > { %v2986_v5 = vpop.permute.xlu0 %2985 }
 0xfa6   : > { %v2991_v54 = vsel %vm2665_vm3, 0.0, %v2986_v5 }
 0xfa7   : > { %v2993_v25 = vsel %vm2667_vm14, %v2991_v54, 0.0  ;;  %v2988_v60 = vpop.permute.xlu1 %2987 }
 0xfa8   : > { %v2992_v56 = vsel %vm2665_vm3, 0.0, %v2988_v60  ;;  %v2997_v15 = vmul.f32 %v2993_v25, %v11703_v53  ;;  %v2995_v10 = vmul.f32 %v2993_v25, %v11729_v39  ;;  %v2999_v31 = vmul.f32 %v2993_v25, %v11711_v55 }
 0xfa9   : > { %v2994_v6 = vsel %vm2667_vm14, %v2992_v56, 0.0  ;;  %v3001_v54 = vmul.f32 %v2993_v25, %v11709_v57 }
 0xfaa   : > { %v8147_v46 = vpack.i.bf16 %v2994_v6, %v2993_v25  ;;  %v2998_v19 = vmul.f32 %v2994_v6, %v11703_v53  ;;  %v2996_v7 = vmul.f32 %v2994_v6, %v11729_v39  ;;  %v3000_v37 = vmul.f32 %v2994_v6, %v11711_v55 }
 0xfab   : > { %v3002_v4 = vmul.f32 %v2994_v6, %v11709_v57  ;;  %v3004_v60 = vmul.f32 %v2994_v6, %v11717_v13 }
 0xfac   : > { %8148 = vrot.lane.b32.xlu0 %v8147_v46, %s10227_s11  ;;  %v8152_v40 = vpack.i.bf16 %v2998_v19, %v2997_v15  ;;  %v11795_v42 = vpack.c.bf16 %v2996_v7, %v2995_v10  ;;  %v8157_v5 = vpack.i.bf16 %v3000_v37, %v2999_v31  ;;  %v3003_v15 = vmul.f32 %v2993_v25, %v11717_v13  ;;  %v2982_v31 = vld [vmem:[#allocation32 + $0x8] sm:$0xff] }
 0xfad   : > { %v8162_v56 = vpack.i.bf16 %v3002_v4, %v3001_v54  ;;  %v3006_v19 = vmul.f32 %v2994_v6, %v11722_v16  ;;  %v3005_v7 = vmul.f32 %v2993_v25, %v11722_v16  ;;  %v8817_v4 = vld [vmem:[#allocation31 + $0x4] ss:$8 sps:$4 sm:$0xff]   ;;  %v3124_v54 = vld [vmem:[#allocation11 + $0x8] sm:$0xff] }
 0xfae   : > { %8153 = vrot.lane.b32.xlu1 %v8152_v40, %s10228_s12  ;;  %3083 = vmatpush1.bf16.msra.mxu1 %v11795_v42  ;;  %v8167_v10 = vpack.i.bf16 %v3004_v60, %v3003_v15  ;;  %v2981_v40 = vld [vmem:[#allocation32] sm:$0xff]  ;;  %v3125_v60 = vld [vmem:[#allocation11 + $0x10] sm:$0xff]  ;;  %v3128_v25 = vld [vmem:[#allocation11 + $0x28] sm:$0xff] }
 0xfaf   : > { %3084 = vmatprep.subr.bf16.mxu1 %v12754_v12  ;;  %v8177_v37 = vpack.i.bf16 %v3006_v19, %v3005_v7  ;;  %7126 = vmatprep.mubr.msk.bf16.mxu1 %vm1921_vm1, %v8817_v4  ;;  %v3129_v19 = vld [vmem:[#allocation11 + $0x30] sm:$0xff]  ;;  %v3130_v7 = vld [vmem:[#allocation11 + $0x38] sm:$0xff] }
 0xfb0   : > { %8158 = vrot.lane.b32.xlu0 %v8157_v5, %s10239_s14  ;;  %v3123_v5 = vld [vmem:[#allocation11] sm:$0xff] }
 0xfb1   : > { %v7558_v6 = vpack.c.bf16 %v3124_v54, %v3123_v5 }
 0xfb2   : > { %8163 = vrot.lane.b32.xlu1 %v8162_v56, %s10240_s2  ;;  %v3126_v56 = vld [vmem:[#allocation11 + $0x18] sm:$0xff] }
 0xfb3   : > { %v7562_v15 = vpack.c.bf16 %v3126_v56, %v3125_v60  ;;  %7559 = vmatprep.subr.bf16.mxu0 %v7558_v6 }
 0xfb4   : > { %8168 = vrot.lane.b32.xlu0 %v8167_v10, %s12767_s6  ;;  %v3127_v10 = vld [vmem:[#allocation11 + $0x20] sm:$0xff]  ;;  %7561 = vmatpush3.bf16.msra.mxu0 %v7558_v6  ;;  %v12937_v6 = vmov 0   ;;  %s10245_s6 = smov 6  }
 0xfb5   : > { %7563 = vmatprep.subr.bf16.mxu0 %v7562_v15 }
 0xfb6   : > { %8173 = vrot.lane.b32.xlu1 %v8147_v46, %s12765_s1  ;;  %v7566_v46 = vpack.c.bf16 %v3128_v25, %v3127_v10  ;;  %s10244_s1 = smov 4  }
 0xfb8   : > { %8178 = vrot.lane.b32.xlu0 %v8177_v37, %s12763_s3  ;;  %7565 = vmatpush3.bf16.msra.mxu0 %v7562_v15  ;;  %v7570_v37 = vpack.c.bf16 %v3130_v7, %v3129_v19  ;;  %s10243_s3 = smov 5  }
 0xfb9   : > { %7567 = vmatprep.subr.bf16.mxu0 %v7566_v46 }
 0xfba   : > { %3133 = vperm.xlu1 %8111, %v2981_v40  }
 0xfbc   : > { %3138 = vperm.xlu0 %8040, %v2982_v31   ;;  %7569 = vmatpush3.bf16.msra.mxu0 %v7566_v46 }
 0xfbd   : > { %7571 = vmatprep.subr.bf16.mxu0 %v7570_v37 }
 0xfc0   : > { %7573 = vmatpush3.bf16.msra.mxu0 %v7570_v37 }
0x101e   : > { %v8149_v40 = vpop.permute.xlu0 %8148 }
0x101f   : > { %v8151_v31 = vunpack.i.h.bf16 %v8149_v40  ;;  %v8150_v4 = vunpack.i.l.bf16 %v8149_v40 }
0x1020   : > { %v8154_v5 = vpop.permute.xlu1 %8153 }
0x1021   : > { %v11813_v54 = vpack.c.bf16 %v8151_v31, %v8150_v4  ;;  %v8156_v60 = vunpack.i.h.bf16 %v8154_v5  ;;  %v8155_v56 = vunpack.i.l.bf16 %v8154_v5 }
0x1022   : > { %v8159_v12 = vpop.permute.xlu0 %8158 }
0x1023   : > { %3085 = vmatpush1.bf16.msra.mxu1 %v11813_v54  ;;  %v11817_v10 = vpack.c.bf16 %v8156_v60, %v8155_v56  ;;  %v8161_v15 = vunpack.i.h.bf16 %v8159_v12  ;;  %v8160_v25 = vunpack.i.l.bf16 %v8159_v12 }
0x1024   : > { %3086 = vmatprep.subr.bf16.mxu1 %v12937_v6  ;;  %v8164_v19 = vpop.permute.xlu1 %8163 }
0x1025   : > { %v11821_v46 = vpack.c.bf16 %v8161_v15, %v8160_v25  ;;  %v8166_v7 = vunpack.i.h.bf16 %v8164_v19  ;;  %v8165_v37 = vunpack.i.l.bf16 %v8164_v19 }
0x1026   : > { %v8169_v40 = vpop.permute.xlu0 %8168 }
0x1027   : > { %3087 = vmatpush1.bf16.msra.mxu1 %v11817_v10  ;;  %v11827_v31 = vpack.c.bf16 %v8166_v7, %v8165_v37  ;;  %v8171_v12 = vunpack.i.h.bf16 %v8169_v40  ;;  %v8170_v4 = vunpack.i.l.bf16 %v8169_v40 }
0x1028   : > { %3088 = vmatprep.subr.bf16.mxu1 %v12937_v6  ;;  %v8174_v5 = vpop.permute.xlu1 %8173 }
0x1029   : > { %v11831_v60 = vpack.c.bf16 %v8171_v12, %v8170_v4  ;;  %v8176_v56 = vunpack.i.h.bf16 %v8174_v5  ;;  %v8175_v15 = vunpack.i.l.bf16 %v8174_v5 }
0x102a   : > { %v8179_v25 = vpop.permute.xlu0 %8178 }
0x102b   : > { %3089 = vmatpush1.bf16.msra.mxu1 %v11821_v46  ;;  %v11835_v19 = vpack.c.bf16 %v8176_v56, %v8175_v15  ;;  %v8181_v7 = vunpack.i.h.bf16 %v8179_v25  ;;  %v8180_v37 = vunpack.i.l.bf16 %v8179_v25 }
0x102c   : > { %3090 = vmatprep.subr.bf16.mxu1 %v12937_v6 }
0x102d   : > { %v11839_v40 = vpack.c.bf16 %v8181_v7, %v8180_v37 }
0x102f   : > { %3091 = vmatpush1.bf16.msra.mxu1 %v11783_v21 }
0x1030   : > { %3092 = vmatprep.subr.bf16.mxu1 %v12937_v6 }
0x1033   : > { %3093 = vmatpush1.bf16.msra.mxu1 %v11827_v31 }
0x1034   : > { %3094 = vmatprep.subr.bf16.mxu1 %v12937_v6 }
0x1037   : > { %3095 = vmatpush1.bf16.msra.mxu1 %v11831_v60 }
0x1038   : > { %3096 = vmatprep.subr.bf16.mxu1 %v12937_v6 }
0x1039   : > { %v3134_v44 = vpop.permute.xlu1 %3133 }
0x103b   : > { %3097 = vmatpush1.bf16.msra.mxu1 %v11835_v19  ;;  %v3139_v15 = vpop.permute.xlu0 %3138 }
0x103c   : > { %3098 = vmatprep.subr.bf16.mxu1 %v12937_v6 }
0x103f   : > { %3099 = vmatpush1.bf16.msra.mxu1 %v11839_v40 }
0x1040   : > { %3416 = vmatprep.subr.bf16.mxu1 %v12937_v6 }
0x1042   : > { %3115 = vmatmul.mubr.bf16.vlgmr.msra.gmra.mrb[12].mxu1 %v8819_v3 }
0x1115   : > { %v3116_v12 = vpop.f32.mrb[12].mxu1 }
0x1116   : > { %v3118_v4 = vpop.f32.mrb[13].mxu1  ;;  %7473 = vmatprep.mubr.msk.f32.mxu0 %vm3141_vm2, %v3116_v12 }
0x1117   : > { %v3119_v5 = vpop.f32.mrb[14].mxu1  ;;  %v3272_v4 = vrot.slane %v3229_v29, %v11308_v2  ;;  %v7129_v2 = vld [vmem:[#allocation8 + $0x8] ss:$0 sm:$0xff] }
0x1118   : > { %v3121_v56 = vpop.f32.mrb[15].mxu1  ;;  %7474 = vmatmul.mubr.msk.f32.vlgmr.msra.gmra.mrb[12].mxu0 %vm3141_vm2, %v3119_v5  ;;  %v3262_v5 = vrot.slane %v3229_v29, %v11326_v8 }
0x1119   : > { %v3282_v56 = vrot.slane %v3229_v29, %v11336_v11 }
0x11eb   : > { %v7475_v25 = vpop.f32.mrb[12].mxu0 }
0x11ec   : > { %v3220_v7 = vadd.f32 %v7475_v25, %v3139_v15  ;;  %v3214_v37 = vpop.f32.mrb[13].mxu0 }
0x11ed   : > { %v3215_v9 = vadd.f32 %v3214_v37, %v3134_v44 }
0x11ee   : > { %vm3224_vm15 = vcmp.ge.f32.partialorder %v3220_v7, 0.0  ;;  %v3226_v20 = vmul.f32 0.01, %v3220_v7 }
0x11ef   : > { %vm3223_vm5 = vcmp.ge.f32.partialorder %v3215_v9, 0.0  ;;  %v3225_v3 = vmul.f32 0.01, %v3215_v9 }
0x11f0   : > { %v11845_v62 = vsel %vm3224_vm15, %v3220_v7, %v3226_v20  ;;  %v3292_v20 = vrot.slane %v3229_v29, %v11345_v14  ;;  %vm3250_vm15 = vcmask 171008  }
0x11f1   : > { %3243 = vrot.lane.b32.xlu0 %v11845_v62, %s10243_s3  ;;  %v11849_v12 = vsel %vm3223_vm5, %v3215_v9, %v3225_v3  ;;  %vm3247_vm5 = vcmask 39936   ;;  %v11863_v9 = vrot.slane %v3229_v29, %v11463_v18 }
0x11f2   : > { %3241 = vrot.lane.b32.xlu1 %v11849_v12, %s10243_s3 }
0x11f5   : > { %3274 = vrot.lane.b32.xlu0 %v3272_v4, %s10244_s1  ;;  %s10247_s1 = smov 122  }
0x11f6   : > { %3264 = vrot.lane.b32.xlu1 %v3262_v5, %s10223_s13  ;;  %s10248_s13 = smov 119  }
0x11f9   : > { %3294 = vrot.lane.b32.xlu0 %v3292_v20, %s10237_s15  ;;  %s12940_s15 = smov 111  }
0x11fa   : > { %3284 = vrot.lane.b32.xlu1 %v3282_v56, %s10245_s6  ;;  %s12939_s6 = smov 112  }
0x11fe   : > { %3304 = vrot.lane.b32.xlu1 %v7129_v2, %s10235_s8  ;;  %s10246_s8 = smov 124  }
0x1263   : > { %v3244_v8 = vpop.permute.xlu0 %3243 }
0x1264   : > { %v3249_v15 = vsel %vm3247_vm5, 0.0, %v3244_v8  ;;  %v3242_v14 = vpop.permute.xlu1 %3241 }
0x1265   : > { %v3252_v25 = vsel %vm3250_vm15, %v3249_v15, 0.0  ;;  %v3248_v11 = vsel %vm3247_vm5, 0.0, %v3242_v14 }
0x1266   : > { %v3251_v7 = vsel %vm3250_vm15, %v3248_v11, 0.0  ;;  %v3258_v37 = vmul.f32 %v11863_v9, %v3252_v25 }
0x1267   : > { %v11870_v3 = vpop.permute.xlu0 %3274  ;;  %v8182_v4 = vpack.i.bf16 %v3252_v25, %v3251_v7  ;;  %v3257_v5 = vmul.f32 %v11863_v9, %v3251_v7 }
0x1268   : > { %v11873_v18 = vpop.permute.xlu1 %3264  ;;  %v3277_v29 = vmul.f32 %v11870_v3, %v3251_v7  ;;  %v3278_v20 = vmul.f32 %v11870_v3, %v3252_v25 }
0x1269   : > { %8183 = vrot.lane.b32.xlu0 %v8182_v4, %s10227_s11  ;;  %v3363_v56 = vpack.c.bf16 %v3258_v37, %v3257_v5  ;;  %v3267_v2 = vmul.f32 %v11873_v18, %v3251_v7  ;;  %v3268_v8 = vmul.f32 %v11873_v18, %v3252_v25 }
0x126a   : > { %v8192_v15 = vpack.i.bf16 %v3278_v20, %v3277_v29 }
0x126b   : > { %v11880_v14 = vpop.permute.xlu0 %3294  ;;  %3417 = vmatpush1.bf16.msra.mxu1 %v3363_v56  ;;  %v8187_v11 = vpack.i.bf16 %v3268_v8, %v3267_v2 }
0x126c   : > { %v11882_v44 = vpop.permute.xlu1 %3284  ;;  %v3297_v0 = vmul.f32 %v11880_v14, %v3251_v7  ;;  %v3298_v61 = vmul.f32 %v11880_v14, %v3252_v25  ;;  %3418 = vmatprep.subr.bf16.mxu1 %v12937_v6 }
0x126d   : > { %8193 = vrot.lane.b32.xlu0 %v8192_v15, %s10246_s8  ;;  %8188 = vrot.lane.b32.xlu1 %v8187_v11, %s10228_s12  ;;  %v3287_v37 = vmul.f32 %v11882_v44, %v3251_v7  ;;  %v3288_v5 = vmul.f32 %v11882_v44, %v3252_v25  ;;  %v3235_v11 = vld [vmem:[#allocation35] sm:$0xff] }
0x126e   : > { %v8202_v29 = vpack.i.bf16 %v3298_v61, %v3297_v0  ;;  %v3236_v61 = vld [vmem:[#allocation35 + $0x8] sm:$0xff]  ;;  %v3237_v0 = vld [vmem:[#allocation35 + $0x10] sm:$0xff] }
0x126f   : > { %v8197_v20 = vpack.i.bf16 %v3288_v5, %v3287_v37  ;;  %v3238_v37 = vld [vmem:[#allocation35 + $0x18] sm:$0xff]  ;;  %v8820_v5 = vld [vmem:[#allocation34 + $0x4] ss:$8 sps:$4 sm:$0xff]  }
0x1270   : > { %v11891_v56 = vpop.permute.xlu1 %3304  ;;  %7134 = vmatprep.mubr.msk.bf16.mxu1 %vm1921_vm1, %v8820_v5 }
0x1271   : > { %8203 = vrot.lane.b32.xlu0 %v8202_v29, %s10239_s14  ;;  %8198 = vrot.lane.b32.xlu1 %v8197_v20, %s10247_s1  ;;  %v3307_v2 = vmul.f32 %v11891_v56, %v3251_v7  ;;  %v3308_v8 = vmul.f32 %v11891_v56, %v3252_v25 }
0x1273   : > { %v8212_v15 = vpack.i.bf16 %v3308_v8, %v3307_v2 }
0x1275   : > { %8208 = vrot.lane.b32.xlu1 %v8182_v4, %s10248_s13  ;;  %8213 = vrot.lane.b32.xlu0 %v8212_v15, %s10240_s2 }
0x1279   : > { %3374 = vperm.xlu1 %8111, %v3235_v11   ;;  %3379 = vperm.xlu0 %8040, %v3236_v61  }
0x127d   : > { %3384 = vperm.xlu1 %8111, %v3237_v0   ;;  %3389 = vperm.xlu0 %8040, %v3238_v37  }
0x12db   : > { %v8184_v7 = vpop.permute.xlu0 %8183 }
0x12dc   : > { %v8186_v29 = vunpack.i.h.bf16 %v8184_v7  ;;  %v8185_v25 = vunpack.i.l.bf16 %v8184_v7 }
0x12de   : > { %v3364_v20 = vpack.c.bf16 %v8186_v29, %v8185_v25  ;;  %v12938_v25 = vpack.c.bf16 %v11845_v62, %v11849_v12 }
0x12df   : > { %v8194_v2 = vpop.permute.xlu0 %8193  ;;  %v8189_v8 = vpop.permute.xlu1 %8188 }
0x12e0   : > { %v8191_v4 = vunpack.i.h.bf16 %v8189_v8  ;;  %v8190_v30 = vunpack.i.l.bf16 %v8189_v8  ;;  %3419 = vmatpush1.bf16.msra.mxu1 %v3364_v20  ;;  %v8196_v15 = vunpack.i.h.bf16 %v8194_v2  ;;  %v8195_v11 = vunpack.i.l.bf16 %v8194_v2 }
0x12e1   : > { %3420 = vmatprep.subr.bf16.mxu1 %v12937_v6 }
0x12e2   : > { %v3365_v61 = vpack.c.bf16 %v8191_v4, %v8190_v30  ;;  %v3366_v0 = vpack.c.bf16 %v8196_v15, %v8195_v11 }
0x12e3   : > { %v8199_v37 = vpop.permute.xlu1 %8198  ;;  %v8204_v29 = vpop.permute.xlu0 %8203 }
0x12e4   : > { %3421 = vmatpush1.bf16.msra.mxu1 %v3365_v61  ;;  %v8201_v5 = vunpack.i.h.bf16 %v8199_v37  ;;  %v8200_v7 = vunpack.i.l.bf16 %v8199_v37  ;;  %v8206_v20 = vunpack.i.h.bf16 %v8204_v29  ;;  %v8205_v2 = vunpack.i.l.bf16 %v8204_v29  ;;  %v8822_v29 = vld [vmem:[#allocation34] ss:$8 sps:$4 sm:$0xff]  }
0x12e5   : > { %3422 = vmatprep.subr.bf16.mxu1 %v12937_v6 }
0x12e6   : > { %v3368_v30 = vpack.c.bf16 %v8201_v5, %v8200_v7  ;;  %v3369_v4 = vpack.c.bf16 %v8206_v20, %v8205_v2  ;;  %v8823_v5 = vld [vmem:[#allocation34 + $0x14] ss:$8 sps:$4 sm:$0xff]   ;;  %v8825_v7 = vld [vmem:[#allocation34 + $0x10] ss:$8 sps:$4 sm:$0xff]  }
0x12e7   : > { %v8209_v8 = vpop.permute.xlu1 %8208  ;;  %v8214_v61 = vpop.permute.xlu0 %8213 }
0x12e8   : > { %3423 = vmatpush1.bf16.msra.mxu1 %v3366_v0  ;;  %v8211_v15 = vunpack.i.h.bf16 %v8209_v8  ;;  %v8210_v11 = vunpack.i.l.bf16 %v8209_v8  ;;  %v8216_v0 = vunpack.i.h.bf16 %v8214_v61  ;;  %v8215_v37 = vunpack.i.l.bf16 %v8214_v61 }
0x12e9   : > { %3424 = vmatprep.subr.bf16.mxu1 %v12937_v6 }
0x12ea   : > { %v3370_v62 = vpack.c.bf16 %v8211_v15, %v8210_v11  ;;  %v3371_v12 = vpack.c.bf16 %v8216_v0, %v8215_v37 }
0x12ec   : > { %3425 = vmatpush1.bf16.msra.mxu1 %v12938_v25 }
0x12ed   : > { %3426 = vmatprep.subr.bf16.mxu1 %v12937_v6 }
0x12f0   : > { %3427 = vmatpush1.bf16.msra.mxu1 %v3368_v30 }
0x12f1   : > { %3428 = vmatprep.subr.bf16.mxu1 %v12937_v6 }
0x12f4   : > { %3429 = vmatpush1.bf16.msra.mxu1 %v3369_v4 }
0x12f5   : > { %3430 = vmatprep.subr.bf16.mxu1 %v12937_v6 }
0x12f8   : > { %3431 = vmatpush1.bf16.msra.mxu1 %v3370_v62  ;;  %v3375_v25 = vpop.permute.xlu1 %3374  ;;  %v3380_v8 = vpop.permute.xlu0 %3379 }
0x12f9   : > { %3432 = vmatprep.subr.bf16.mxu1 %v12937_v6 }
0x12fc   : > { %3433 = vmatpush1.bf16.msra.mxu1 %v3371_v12  ;;  %v3385_v12 = vpop.permute.xlu1 %3384 }
0x12ff   : > { %3449 = vmatmul.mubr.bf16.vlgmr.msra.gmra.mrb[16].mxu1 %v8822_v29 }
0x1300   : > { %7135 = vmatprep.mubr.msk.bf16.mxu1 %vm1921_vm1, %v8823_v5 }
0x1307   : > { %3457 = vmatmul.mubr.bf16.gmra.mrb[20].mxu1 %v8825_v7 }
0x13d2   : > { %v3450_v20 = vpop.f32.mrb[16].mxu1 }
0x13d3   : > { %v3451_v2 = vadd.f32 %v3450_v20, %v3375_v25  ;;  %v3452_v30 = vpop.f32.mrb[17].mxu1  ;;  %v3390_v20 = vpop.permute.xlu0 %3389 }
0x13d4   : > { %v3453_v4 = vpop.f32.mrb[18].mxu1 }
0x13d5   : > { %vm3465_vm9 = vcmp.ge.f32.partialorder %v3451_v2, 0.0  ;;  %v3469_v15 = vmul.f32 0.01, %v3451_v2  ;;  %v3454_v11 = vadd.f32 %v3453_v4, %v3380_v8  ;;  %v3455_v61 = vpop.f32.mrb[19].mxu1 }
0x13d7   : > { %vm3466_vm13 = vcmp.ge.f32.partialorder %v3454_v11, 0.0  ;;  %v3470_v0 = vmul.f32 0.01, %v3454_v11  ;;  %v3473_v37 = vsel %vm3465_vm9, %v3451_v2, %v3469_v15 }
0x13d8   : > { %3493 = vrot.lane.b32.xlu1 %v3473_v37, %s10243_s3 }
0x13d9   : > { %v3474_v62 = vsel %vm3466_vm13, %v3454_v11, %v3470_v0 }
0x13da   : > { %v3458_v29 = vpop.f32.mrb[20].mxu1  ;;  %3495 = vrot.lane.b32.xlu0 %v3474_v62, %s10243_s3  ;;  %v3653_v5 = vpack.c.bf16 %v3474_v62, %v3473_v37 }
0x13db   : > { %v3459_v7 = vadd.f32 %v3458_v29, %v3385_v12  ;;  %v3460_v25 = vpop.f32.mrb[21].mxu1 }
0x13dc   : > { %v3461_v30 = vpop.f32.mrb[22].mxu1  ;;  %7255 = vmatprep.subr.bf16.mxu0 %v3653_v5 }
0x13dd   : > { %vm3467_vm11 = vcmp.ge.f32.partialorder %v3459_v7, 0.0  ;;  %v3471_v17 = vmul.f32 0.01, %v3459_v7  ;;  %v3462_v8 = vadd.f32 %v3461_v30, %v3390_v20  ;;  %v3463_v4 = vpop.f32.mrb[23].mxu1 }
0x13df   : > { %vm3468_vm10 = vcmp.ge.f32.partialorder %v3462_v8, 0.0  ;;  %v3472_v61 = vmul.f32 0.01, %v3462_v8  ;;  %v3475_v2 = vsel %vm3467_vm11, %v3459_v7, %v3471_v17 }
0x13e0   : > { %3497 = vrot.lane.b32.xlu1 %v3475_v2, %s10243_s3 }
0x13e1   : > { %v3476_v15 = vsel %vm3468_vm10, %v3462_v8, %v3472_v61 }
0x13e2   : > { %3499 = vrot.lane.b32.xlu0 %v3476_v15, %s10243_s3  ;;  %v3654_v11 = vpack.c.bf16 %v3476_v15, %v3475_v2 }
0x144a   : > { %v3494_v0 = vpop.permute.xlu1 %3493 }
0x144b   : > { %v3505_v37 = vsel %vm3247_vm5, 0.0, %v3494_v0 }
0x144c   : > { %v11917_v62 = vsel %vm3250_vm15, %v3505_v37, 0.0  ;;  %v3496_v12 = vpop.permute.xlu0 %3495 }
0x144d   : > { %v3506_v29 = vsel %vm3247_vm5, 0.0, %v3496_v12  ;;  %v3525_v17 = vmul.f32 %v11917_v62, %v11882_v44  ;;  %v3513_v20 = vmul.f32 %v11917_v62, %v11863_v9 }
0x144e   : > { %v3510_v5 = vsel %vm3250_vm15, %v3506_v29, 0.0 }
0x144f   : > { %v8217_v7 = vpack.i.bf16 %v3510_v5, %v11917_v62  ;;  %v3526_v25 = vmul.f32 %v3510_v5, %v11882_v44  ;;  %v3514_v30 = vmul.f32 %v3510_v5, %v11863_v9  ;;  %v3518_v52 = vmul.f32 %v3510_v5, %v11873_v18 }
0x1451   : > { %8218 = vrot.lane.b32.xlu0 %v8217_v7, %s10227_s11  ;;  %v8222_v8 = vpack.i.bf16 %v3526_v25, %v3525_v17  ;;  %v3645_v4 = vpack.c.bf16 %v3514_v30, %v3513_v20 }
0x1452   : > { %v3498_v61 = vpop.permute.xlu1 %3497 }
0x1453   : > { %v3507_v2 = vsel %vm3247_vm5, 0.0, %v3498_v61  ;;  %8223 = vrot.lane.b32.xlu1 %v8222_v8, %s10247_s1  ;;  %7256 = vmatpush3.bf16.msra.mxu0 %v3645_v4  ;;  %v3530_v61 = vmul.f32 %v3510_v5, %v11880_v14 }
0x1454   : > { %v3511_v15 = vsel %vm3250_vm15, %v3507_v2, 0.0  ;;  %v3500_v0 = vpop.permute.xlu0 %3499  ;;  %7257 = vmatprep.subr.bf16.mxu0 %v3654_v11  ;;  %v3517_v11 = vmul.f32 %v11917_v62, %v11873_v18 }
0x1455   : > { %v3508_v37 = vsel %vm3247_vm5, 0.0, %v3500_v0  ;;  %v3527_v29 = vmul.f32 %v3511_v15, %v11882_v44  ;;  %v3515_v20 = vmul.f32 %v3511_v15, %v11863_v9  ;;  %v3529_v0 = vmul.f32 %v11917_v62, %v11880_v14 }
0x1456   : > { %v3512_v12 = vsel %vm3250_vm15, %v3508_v37, 0.0  ;;  %v8242_v2 = vpack.i.bf16 %v3518_v52, %v3517_v11 }
0x1457   : > { %v8227_v17 = vpack.i.bf16 %v3512_v12, %v3511_v15  ;;  %v3528_v25 = vmul.f32 %v3512_v12, %v11882_v44  ;;  %v3516_v30 = vmul.f32 %v3512_v12, %v11863_v9  ;;  %v3520_v37 = vmul.f32 %v3512_v12, %v11873_v18 }
0x1458   : > { %v8237_v47 = vpack.i.bf16 %v3530_v61, %v3529_v0  ;;  %v3524_v61 = vmul.f32 %v3512_v12, %v11870_v3 }
0x1459   : > { %8228 = vrot.lane.b32.xlu0 %v8227_v17, %s10227_s11  ;;  %v8232_v8 = vpack.i.bf16 %v3528_v25, %v3527_v29  ;;  %v3646_v4 = vpack.c.bf16 %v3516_v30, %v3515_v20  ;;  %v3519_v29 = vmul.f32 %v3511_v15, %v11873_v18  ;;  %v3532_v25 = vmul.f32 %v3512_v12, %v11880_v14 }
0x145a   : > { %v3531_v30 = vmul.f32 %v3511_v15, %v11880_v14 }
0x145b   : > { %8233 = vrot.lane.b32.xlu1 %v8232_v8, %s10247_s1  ;;  %7258 = vmatpush3.bf16.msra.mxu0 %v3646_v4  ;;  %v8257_v20 = vpack.i.bf16 %v3520_v37, %v3519_v29  ;;  %v3522_v8 = vmul.f32 %v3510_v5, %v11870_v3  ;;  %v3521_v4 = vmul.f32 %v11917_v62, %v11870_v3 }
0x145c   : > { %v8247_v52 = vpack.i.bf16 %v3532_v25, %v3531_v30  ;;  %v3536_v37 = vmul.f32 %v3512_v12, %v11891_v56  ;;  %v3535_v29 = vmul.f32 %v3511_v15, %v11891_v56  ;;  %v3534_v25 = vmul.f32 %v3510_v5, %v11891_v56  ;;  %v3485_v12 = vld [vmem:[#allocation38] sm:$0xff]  ;;  %v3487_v5 = vld [vmem:[#allocation38 + $0x10] sm:$0xff] }
0x145d   : > { %8243 = vrot.lane.b32.xlu0 %v8242_v2, %s10228_s12  ;;  %v8262_v11 = vpack.i.bf16 %v3522_v8, %v3521_v4  ;;  %v8828_v2 = vld [vmem:[#allocation37 + $0x4] ss:$12 sps:$4 sm:$0xff]   ;;  %v3533_v30 = vmul.f32 %v11917_v62, %v11891_v56  ;;  %v8831_v8 = vld [vmem:[#allocation37 + $0x8] ss:$12 sps:$4 sm:$0xff]  }
0x145e   : > { %3751 = vmatprep.mubr.bf16.mxu0 %v8828_v2  ;;  %7480 = vmatprep.mubr.msk.bf16.mxu1 %vm1965_vm4, %v8831_v8 }
0x145f   : > { %8238 = vrot.lane.b32.xlu1 %v8237_v47, %s10239_s14  ;;  %v3523_v47 = vmul.f32 %v3511_v15, %v11870_v3  ;;  %v3488_v15 = vld [vmem:[#allocation38 + $0x18] sm:$0xff] }
0x1461   : > { %8258 = vrot.lane.b32.xlu0 %v8257_v20, %s10228_s12  ;;  %v8272_v0 = vpack.i.bf16 %v3524_v61, %v3523_v47  ;;  %v8282_v20 = vpack.i.bf16 %v3536_v37, %v3535_v29 }
0x1463   : > { %8248 = vrot.lane.b32.xlu1 %v8247_v52, %s10239_s14  ;;  %v8277_v52 = vpack.i.bf16 %v3534_v25, %v3533_v30 }
0x1465   : > { %8263 = vrot.lane.b32.xlu0 %v8262_v11, %s10246_s8 }
0x1467   : > { %8253 = vrot.lane.b32.xlu1 %v8217_v7, %s10248_s13  ;;  %v3486_v7 = vld [vmem:[#allocation38 + $0x8] sm:$0xff] }
0x1469   : > { %8273 = vrot.lane.b32.xlu0 %v8272_v0, %s10246_s8 }
0x146b   : > { %8268 = vrot.lane.b32.xlu1 %v8227_v17, %s10248_s13 }
0x146d   : > { %8283 = vrot.lane.b32.xlu0 %v8282_v20, %s10240_s2 }
0x146f   : > { %8278 = vrot.lane.b32.xlu1 %v8277_v52, %s10240_s2 }
0x1471   : > { %3670 = vperm.xlu0 %8040, %v3486_v7  }
0x1473   : > { %3665 = vperm.xlu1 %8111, %v3485_v12  }
0x1475   : > { %3680 = vperm.xlu0 %8040, %v3488_v15  }
0x1477   : > { %3675 = vperm.xlu1 %8111, %v3487_v5  }
0x14c3   : > { %v8219_v17 = vpop.permute.xlu0 %8218 }
0x14c4   : > { %v8221_v4 = vunpack.i.h.bf16 %v8219_v17  ;;  %v8220_v11 = vunpack.i.l.bf16 %v8219_v17 }
0x14c5   : > { %v8224_v62 = vpop.permute.xlu1 %8223 }
0x14c6   : > { %v8226_v61 = vunpack.i.h.bf16 %v8224_v62  ;;  %v8225_v2 = vunpack.i.l.bf16 %v8224_v62  ;;  %v3647_v0 = vpack.c.bf16 %v8221_v4, %v8220_v11 }
0x14c8   : > { %v3655_v47 = vpack.c.bf16 %v8226_v61, %v8225_v2 }
0x14ca   : > { %7259 = vmatprep.subr.bf16.mxu0 %v3655_v47 }
0x14cb   : > { %v8229_v37 = vpop.permute.xlu0 %8228  ;;  %7260 = vmatpush3.bf16.msra.mxu0 %v3647_v0 }
0x14cc   : > { %v8231_v29 = vunpack.i.h.bf16 %v8229_v37  ;;  %v8230_v25 = vunpack.i.l.bf16 %v8229_v37 }
0x14cd   : > { %v8234_v20 = vpop.permute.xlu1 %8233 }
0x14ce   : > { %v8236_v30 = vunpack.i.h.bf16 %v8234_v20  ;;  %v8235_v8 = vunpack.i.l.bf16 %v8234_v20  ;;  %v3648_v12 = vpack.c.bf16 %v8231_v29, %v8230_v25 }
0x14cf   : > { %v8244_v52 = vpop.permute.xlu0 %8243 }
0x14d0   : > { %v3656_v7 = vpack.c.bf16 %v8236_v30, %v8235_v8  ;;  %v8246_v15 = vunpack.i.h.bf16 %v8244_v52  ;;  %v8245_v5 = vunpack.i.l.bf16 %v8244_v52 }
0x14d1   : > { %v8239_v45 = vpop.permute.xlu1 %8238 }
0x14d2   : > { %v8241_v17 = vunpack.i.h.bf16 %v8239_v45  ;;  %v8240_v51 = vunpack.i.l.bf16 %v8239_v45  ;;  %7261 = vmatprep.subr.bf16.mxu0 %v3656_v7  ;;  %v3649_v11 = vpack.c.bf16 %v8246_v15, %v8245_v5 }
0x14d3   : > { %v8259_v62 = vpop.permute.xlu0 %8258  ;;  %7262 = vmatpush3.bf16.msra.mxu0 %v3648_v12 }
0x14d4   : > { %v3657_v4 = vpack.c.bf16 %v8241_v17, %v8240_v51  ;;  %v8261_v61 = vunpack.i.h.bf16 %v8259_v62  ;;  %v8260_v2 = vunpack.i.l.bf16 %v8259_v62 }
0x14d5   : > { %v8249_v47 = vpop.permute.xlu1 %8248 }
0x14d6   : > { %v8251_v0 = vunpack.i.h.bf16 %v8249_v47  ;;  %v8250_v37 = vunpack.i.l.bf16 %v8249_v47  ;;  %7263 = vmatprep.subr.bf16.mxu0 %v3657_v4  ;;  %v3650_v29 = vpack.c.bf16 %v8261_v61, %v8260_v2 }
0x14d7   : > { %v8264_v20 = vpop.permute.xlu0 %8263  ;;  %7264 = vmatpush3.bf16.msra.mxu0 %v3649_v11 }
0x14d8   : > { %v3658_v30 = vpack.c.bf16 %v8251_v0, %v8250_v37  ;;  %v8266_v25 = vunpack.i.h.bf16 %v8264_v20  ;;  %v8265_v8 = vunpack.i.l.bf16 %v8264_v20 }
0x14d9   : > { %v8254_v52 = vpop.permute.xlu1 %8253 }
0x14da   : > { %v8256_v1 = vunpack.i.h.bf16 %v8254_v52  ;;  %v8255_v45 = vunpack.i.l.bf16 %v8254_v52  ;;  %7265 = vmatprep.subr.bf16.mxu0 %v3658_v30  ;;  %v3651_v12 = vpack.c.bf16 %v8266_v25, %v8265_v8  ;;  %v8826_v30 = vld [vmem:[#allocation37] ss:$12 sps:$4 sm:$0xff]   ;;  %v8832_v8 = vld [vmem:[#allocation37 + $0x18] ss:$12 sps:$4 sm:$0xff]  }
0x14db   : > { %v8274_v7 = vpop.permute.xlu0 %8273  ;;  %7266 = vmatpush3.bf16.msra.mxu0 %v3650_v29 }
0x14dc   : > { %v3659_v51 = vpack.c.bf16 %v8256_v1, %v8255_v45  ;;  %v8276_v15 = vunpack.i.h.bf16 %v8274_v7  ;;  %v8275_v5 = vunpack.i.l.bf16 %v8274_v7  ;;  %v8829_v1 = vld [vmem:[#allocation37 + $0x1c] ss:$12 sps:$4 sm:$0xff]   ;;  %v8833_v45 = vld [vmem:[#allocation37 + $0x20] ss:$12 sps:$4 sm:$0xff]  }
0x14dd   : > { %v8269_v17 = vpop.permute.xlu1 %8268 }
0x14de   : > { %v8271_v62 = vunpack.i.h.bf16 %v8269_v17  ;;  %v8270_v47 = vunpack.i.l.bf16 %v8269_v17  ;;  %7267 = vmatprep.subr.bf16.mxu0 %v3659_v51  ;;  %v3652_v61 = vpack.c.bf16 %v8276_v15, %v8275_v5 }
0x14df   : > { %v8284_v4 = vpop.permute.xlu0 %8283  ;;  %7268 = vmatpush3.bf16.msra.mxu0 %v3651_v12 }
0x14e0   : > { %v3660_v11 = vpack.c.bf16 %v8271_v62, %v8270_v47  ;;  %v8286_v0 = vunpack.i.h.bf16 %v8284_v4  ;;  %v8285_v37 = vunpack.i.l.bf16 %v8284_v4 }
0x14e1   : > { %v8279_v2 = vpop.permute.xlu1 %8278 }
0x14e2   : > { %v8281_v20 = vunpack.i.h.bf16 %v8279_v2  ;;  %v8280_v52 = vunpack.i.l.bf16 %v8279_v2  ;;  %7269 = vmatprep.subr.bf16.mxu0 %v3660_v11  ;;  %v3662_v25 = vpack.c.bf16 %v8286_v0, %v8285_v37 }
0x14e3   : > { %7270 = vmatpush3.bf16.msra.mxu0 %v3652_v61 }
0x14e4   : > { %v3661_v29 = vpack.c.bf16 %v8281_v20, %v8280_v52 }
0x14e6   : > { %3752 = vmatmul.mubr.bf16.vlgmr.msra.gmra.mrb[16].mxu0 %v8826_v30  ;;  %7476 = vmatprep.subr.bf16.mxu1 %v3661_v29 }
0x14e7   : > { %7477 = vmatpush3.bf16.msra.mxu1 %v3661_v29  ;;  %3759 = vmatprep.mubr.bf16.mxu0 %v8829_v1 }
0x14e8   : > { %7478 = vmatprep.subr.bf16.mxu1 %v3662_v25 }
0x14eb   : > { %7479 = vmatpush3.bf16.msra.mxu1 %v3662_v25 }
0x14ee   : > { %3760 = vmatmul.mubr.bf16.gmra.mrb[20].mxu0 %v8832_v8  ;;  %7481 = vmatmul.mubr.msk.bf16.vlgmr.msra.gmra.mrb[24].mxu1 %vm1965_vm4, %v8833_v45 }
0x14f0   : > { %v3671_v47 = vpop.permute.xlu0 %3670 }
0x14f2   : > { %v3666_v51 = vpop.permute.xlu1 %3665 }
0x14f4   : > { %v3681_v38 = vpop.permute.xlu0 %3680 }
0x14f6   : > { %v3676_v4 = vpop.permute.xlu1 %3675 }
0x15b9   : > { %v7271_v7 = vpop.f32.mrb[16].mxu0 }
0x15ba   : > { %v7272_v12 = vpop.f32.mrb[17].mxu0 }
0x15bb   : > { %v7273_v15 = vadd.f32 %v7272_v12, %v7271_v7  ;;  %v7274_v5 = vpop.f32.mrb[18].mxu0 }
0x15bc   : > { %v7275_v17 = vpop.f32.mrb[19].mxu0 }
0x15bd   : > { %v7276_v62 = vadd.f32 %v7275_v17, %v7274_v5  ;;  %v3754_v2 = vadd.f32 %v7273_v15, %v3666_v51 }
0x15bf   : > { %v3757_v25 = vadd.f32 %v7276_v62, %v3671_v47 }
0x15c1   : > { %v7277_v11 = vpop.f32.mrb[20].mxu0  ;;  %v7482_v61 = vpop.f32.mrb[24].mxu1 }
0x15c2   : > { %v7278_v0 = vpop.f32.mrb[21].mxu0  ;;  %v3802_v37 = vpop.f32.mrb[25].mxu1 }
0x15c3   : > { %v7279_v20 = vadd.f32 %v7278_v0, %v7277_v11  ;;  %v3803_v52 = vadd.f32 %v3802_v37, %v3754_v2  ;;  %v7280_v30 = vpop.f32.mrb[22].mxu0  ;;  %v7483_v1 = vpop.f32.mrb[26].mxu1 }
0x15c4   : > { %v7281_v29 = vpop.f32.mrb[23].mxu0  ;;  %v3805_v8 = vpop.f32.mrb[27].mxu1 }
0x15c5   : > { %v3762_v45 = vadd.f32 %v7279_v20, %v3676_v4  ;;  %vm3817_vm9 = vcmp.ge.f32.partialorder %v3803_v52, 0.0  ;;  %v3821_v7 = vmul.f32 0.01, %v3803_v52  ;;  %v7282_v12 = vadd.f32 %v7281_v29, %v7280_v30 }
0x15c6   : > { %v3806_v5 = vadd.f32 %v3805_v8, %v3757_v25 }
0x15c7   : > { %v3811_v17 = vadd.f32 %v7482_v61, %v3762_v45  ;;  %v3765_v35 = vadd.f32 %v7282_v12, %v3681_v38  ;;  %v3825_v26 = vsel %vm3817_vm9, %v3803_v52, %v3821_v7 }
0x15c8   : > { %vm3818_vm10 = vcmp.ge.f32.partialorder %v3806_v5, 0.0  ;;  %v3822_v51 = vmul.f32 0.01, %v3806_v5  ;;  %3845 = vrot.lane.b32.xlu1 %v3825_v26, %s10243_s3 }
0x15c9   : > { %v3814_v15 = vadd.f32 %v7483_v1, %v3765_v35  ;;  %vm3819_vm11 = vcmp.ge.f32.partialorder %v3811_v17, 0.0  ;;  %v3823_v11 = vmul.f32 0.01, %v3811_v17 }
0x15ca   : > { %v3826_v2 = vsel %vm3818_vm10, %v3806_v5, %v3822_v51 }
0x15cb   : > { %3847 = vrot.lane.b32.xlu0 %v3826_v2, %s10243_s3  ;;  %v3827_v62 = vsel %vm3819_vm11, %v3811_v17, %v3823_v11  ;;  %v4005_v47 = vpack.c.bf16 %v3826_v2, %v3825_v26  ;;  %vm3820_vm13 = vcmp.ge.f32.partialorder %v3814_v15, 0.0  ;;  %v3824_v4 = vmul.f32 0.01, %v3814_v15 }
0x15cc   : > { %3849 = vrot.lane.b32.xlu1 %v3827_v62, %s10243_s3 }
0x15cd   : > { %7287 = vmatprep.subr.bf16.mxu0 %v4005_v47  ;;  %v3828_v61 = vsel %vm3820_vm13, %v3814_v15, %v3824_v4 }
0x15ce   : > { %v4006_v38 = vpack.c.bf16 %v3828_v61, %v3827_v62 }
0x15cf   : > { %3851 = vrot.lane.b32.xlu0 %v3828_v61, %s10243_s3 }
0x163a   : > { %v3846_v0 = vpop.permute.xlu1 %3845 }
0x163b   : > { %v3857_v37 = vsel %vm3247_vm5, 0.0, %v3846_v0 }
0x163c   : > { %v11978_v35 = vsel %vm3250_vm15, %v3857_v37, 0.0 }
0x163d   : > { %v3848_v20 = vpop.permute.xlu0 %3847  ;;  %v3877_v29 = vmul.f32 %v11978_v35, %v11882_v44  ;;  %v3865_v25 = vmul.f32 %v11978_v35, %v11863_v9 }
0x163e   : > { %v3858_v52 = vsel %vm3247_vm5, 0.0, %v3848_v20  ;;  %v3850_v30 = vpop.permute.xlu1 %3849 }
0x163f   : > { %v3862_v26 = vsel %vm3250_vm15, %v3858_v52, 0.0  ;;  %v3859_v1 = vsel %vm3247_vm5, 0.0, %v3850_v30  ;;  %v3869_v52 = vmul.f32 %v11978_v35, %v11873_v18 }
0x1640   : > { %v3863_v8 = vsel %vm3250_vm15, %v3859_v1, 0.0  ;;  %v8287_v45 = vpack.i.bf16 %v3862_v26, %v11978_v35  ;;  %v3878_v7 = vmul.f32 %v3862_v26, %v11882_v44  ;;  %v3866_v12 = vmul.f32 %v3862_v26, %v11863_v9 }
0x1641   : > { %v3852_v5 = vpop.permute.xlu0 %3851  ;;  %v3879_v2 = vmul.f32 %v3863_v8, %v11882_v44  ;;  %v3867_v62 = vmul.f32 %v3863_v8, %v11863_v9  ;;  %v3870_v47 = vmul.f32 %v3862_v26, %v11873_v18  ;;  %v3882_v30 = vmul.f32 %v3862_v26, %v11880_v14 }
0x1642   : > { %v3860_v17 = vsel %vm3247_vm5, 0.0, %v3852_v5  ;;  %8288 = vrot.lane.b32.xlu0 %v8287_v45, %s10227_s11  ;;  %v8292_v51 = vpack.i.bf16 %v3878_v7, %v3877_v29  ;;  %v3997_v15 = vpack.c.bf16 %v3866_v12, %v3865_v25  ;;  %v3881_v29 = vmul.f32 %v11978_v35, %v11880_v14 }
0x1643   : > { %v3864_v11 = vsel %vm3250_vm15, %v3860_v17, 0.0  ;;  %v8312_v1 = vpack.i.bf16 %v3870_v47, %v3869_v52  ;;  %v3871_v7 = vmul.f32 %v3863_v8, %v11873_v18  ;;  %v3883_v17 = vmul.f32 %v3863_v8, %v11880_v14 }
0x1644   : > { %8293 = vrot.lane.b32.xlu1 %v8292_v51, %s10247_s1  ;;  %7288 = vmatpush3.bf16.msra.mxu0 %v3997_v15  ;;  %v8297_v4 = vpack.i.bf16 %v3864_v11, %v3863_v8  ;;  %v3880_v61 = vmul.f32 %v3864_v11, %v11882_v44  ;;  %v3868_v0 = vmul.f32 %v3864_v11, %v11863_v9 }
0x1645   : > { %7289 = vmatprep.subr.bf16.mxu0 %v4006_v38  ;;  %v3872_v25 = vmul.f32 %v3864_v11, %v11873_v18  ;;  %v8307_v38 = vpack.i.bf16 %v3882_v30, %v3881_v29  ;;  %v3884_v12 = vmul.f32 %v3864_v11, %v11880_v14  ;;  %v3874_v51 = vmul.f32 %v3862_v26, %v11870_v3 }
0x1646   : > { %8298 = vrot.lane.b32.xlu0 %v8297_v4, %s10227_s11  ;;  %v8302_v37 = vpack.i.bf16 %v3880_v61, %v3879_v2  ;;  %v3998_v20 = vpack.c.bf16 %v3868_v0, %v3867_v62  ;;  %v3873_v2 = vmul.f32 %v11978_v35, %v11870_v3  ;;  %v3876_v47 = vmul.f32 %v3864_v11, %v11870_v3  ;;  %v8836_v61 = vld [vmem:[#allocation40 + $0x4] ss:$12 sps:$4 sm:$0xff]  }
0x1647   : > { %v8327_v5 = vpack.i.bf16 %v3872_v25, %v3871_v7  ;;  %v8317_v15 = vpack.i.bf16 %v3884_v12, %v3883_v17  ;;  %v3875_v0 = vmul.f32 %v3863_v8, %v11870_v3  ;;  %4103 = vmatprep.mubr.bf16.mxu0 %v8836_v61  ;;  %v3887_v52 = vmul.f32 %v3863_v8, %v11891_v56  ;;  %v8839_v25 = vld [vmem:[#allocation40 + $0x8] ss:$12 sps:$4 sm:$0xff]  }
0x1648   : > { %8303 = vrot.lane.b32.xlu1 %v8302_v37, %s10247_s1  ;;  %7290 = vmatpush3.bf16.msra.mxu0 %v3998_v20  ;;  %v8332_v62 = vpack.i.bf16 %v3874_v51, %v3873_v2  ;;  %v3888_v20 = vmul.f32 %v3864_v11, %v11891_v56  ;;  %v3886_v30 = vmul.f32 %v3862_v26, %v11891_v56  ;;  %v3837_v11 = vld [vmem:[#allocation41] sm:$0xff]  ;;  %v3840_v8 = vld [vmem:[#allocation41 + $0x18] sm:$0xff]  ;;  %v3839_v26 = vld [vmem:[#allocation41 + $0x10] sm:$0xff] }
0x1649   : > { %v8342_v37 = vpack.i.bf16 %v3876_v47, %v3875_v0  ;;  %v3885_v29 = vmul.f32 %v11978_v35, %v11891_v56  ;;  %7488 = vmatprep.mubr.msk.bf16.mxu1 %vm1965_vm4, %v8839_v25 }
0x164a   : > { %8313 = vrot.lane.b32.xlu0 %v8312_v1, %s10228_s12  ;;  %v8352_v1 = vpack.i.bf16 %v3888_v20, %v3887_v52 }
0x164c   : > { %8308 = vrot.lane.b32.xlu1 %v8307_v38, %s10239_s14  ;;  %v8347_v38 = vpack.i.bf16 %v3886_v30, %v3885_v29 }
0x164e   : > { %8328 = vrot.lane.b32.xlu0 %v8327_v5, %s10228_s12 }
0x1650   : > { %8318 = vrot.lane.b32.xlu1 %v8317_v15, %s10239_s14 }
0x1652   : > { %8333 = vrot.lane.b32.xlu0 %v8332_v62, %s10246_s8 }
0x1654   : > { %8323 = vrot.lane.b32.xlu1 %v8287_v45, %s10248_s13  ;;  %v3838_v45 = vld [vmem:[#allocation41 + $0x8] sm:$0xff] }
0x1656   : > { %8343 = vrot.lane.b32.xlu0 %v8342_v37, %s10246_s8 }
0x1658   : > { %8338 = vrot.lane.b32.xlu1 %v8297_v4, %s10248_s13 }
0x165a   : > { %8353 = vrot.lane.b32.xlu0 %v8352_v1, %s10240_s2 }
0x165c   : > { %8348 = vrot.lane.b32.xlu1 %v8347_v38, %s10240_s2 }
0x165e   : > { %4022 = vperm.xlu0 %8040, %v3838_v45  }
0x1660   : > { %4017 = vperm.xlu1 %8111, %v3837_v11  }
0x1662   : > { %4032 = vperm.xlu0 %8040, %v3840_v8  }
0x1664   : > { %4027 = vperm.xlu1 %8111, %v3839_v26  }
0x16b4   : > { %v8289_v4 = vpop.permute.xlu0 %8288 }
0x16b5   : > { %v8291_v7 = vunpack.i.h.bf16 %v8289_v4  ;;  %v8290_v12 = vunpack.i.l.bf16 %v8289_v4 }
0x16b6   : > { %v8294_v35 = vpop.permute.xlu1 %8293 }
0x16b7   : > { %v8296_v5 = vunpack.i.h.bf16 %v8294_v35  ;;  %v8295_v17 = vunpack.i.l.bf16 %v8294_v35  ;;  %v3999_v2 = vpack.c.bf16 %v8291_v7, %v8290_v12 }
0x16b8   : > { %v8299_v51 = vpop.permute.xlu0 %8298 }
0x16b9   : > { %v4007_v15 = vpack.c.bf16 %v8296_v5, %v8295_v17  ;;  %v8301_v62 = vunpack.i.h.bf16 %v8299_v51  ;;  %v8300_v47 = vunpack.i.l.bf16 %v8299_v51 }
0x16ba   : > { %v8304_v61 = vpop.permute.xlu1 %8303 }
0x16bb   : > { %v8306_v0 = vunpack.i.h.bf16 %v8304_v61  ;;  %v8305_v37 = vunpack.i.l.bf16 %v8304_v61  ;;  %7291 = vmatprep.subr.bf16.mxu0 %v4007_v15  ;;  %v4000_v30 = vpack.c.bf16 %v8301_v62, %v8300_v47 }
0x16bc   : > { %v8314_v20 = vpop.permute.xlu0 %8313  ;;  %7292 = vmatpush3.bf16.msra.mxu0 %v3999_v2 }
0x16bd   : > { %v4008_v52 = vpack.c.bf16 %v8306_v0, %v8305_v37  ;;  %v8316_v1 = vunpack.i.h.bf16 %v8314_v20  ;;  %v8315_v29 = vunpack.i.l.bf16 %v8314_v20 }
0x16be   : > { %v8309_v25 = vpop.permute.xlu1 %8308 }
0x16bf   : > { %v8311_v38 = vunpack.i.h.bf16 %v8309_v25  ;;  %v8310_v45 = vunpack.i.l.bf16 %v8309_v25  ;;  %7293 = vmatprep.subr.bf16.mxu0 %v4008_v52  ;;  %v4001_v26 = vpack.c.bf16 %v8316_v1, %v8315_v29 }
0x16c0   : > { %v8329_v11 = vpop.permute.xlu0 %8328  ;;  %7294 = vmatpush3.bf16.msra.mxu0 %v4000_v30 }
0x16c1   : > { %v4009_v8 = vpack.c.bf16 %v8311_v38, %v8310_v45  ;;  %v8331_v4 = vunpack.i.h.bf16 %v8329_v11  ;;  %v8330_v7 = vunpack.i.l.bf16 %v8329_v11 }
0x16c2   : > { %v8319_v12 = vpop.permute.xlu1 %8318 }
0x16c3   : > { %v8321_v35 = vunpack.i.h.bf16 %v8319_v12  ;;  %v8320_v5 = vunpack.i.l.bf16 %v8319_v12  ;;  %7295 = vmatprep.subr.bf16.mxu0 %v4009_v8  ;;  %v4002_v15 = vpack.c.bf16 %v8331_v4, %v8330_v7 }
0x16c4   : > { %v8334_v17 = vpop.permute.xlu0 %8333  ;;  %7296 = vmatpush3.bf16.msra.mxu0 %v4001_v26 }
0x16c5   : > { %v4010_v51 = vpack.c.bf16 %v8321_v35, %v8320_v5  ;;  %v8336_v2 = vunpack.i.h.bf16 %v8334_v17  ;;  %v8335_v62 = vunpack.i.l.bf16 %v8334_v17  ;;  %v8834_v5 = vld [vmem:[#allocation40] ss:$12 sps:$4 sm:$0xff]   ;;  %v8837_v17 = vld [vmem:[#allocation40 + $0x1c] ss:$12 sps:$4 sm:$0xff]  }
0x16c6   : > { %v8324_v47 = vpop.permute.xlu1 %8323 }
0x16c7   : > { %v8326_v61 = vunpack.i.h.bf16 %v8324_v47  ;;  %v8325_v0 = vunpack.i.l.bf16 %v8324_v47  ;;  %7297 = vmatprep.subr.bf16.mxu0 %v4010_v51  ;;  %v4003_v52 = vpack.c.bf16 %v8336_v2, %v8335_v62  ;;  %v8840_v2 = vld [vmem:[#allocation40 + $0x18] ss:$12 sps:$4 sm:$0xff]   ;;  %v8841_v62 = vld [vmem:[#allocation40 + $0x20] ss:$12 sps:$4 sm:$0xff]  }
0x16c8   : > { %v8344_v37 = vpop.permute.xlu0 %8343  ;;  %7298 = vmatpush3.bf16.msra.mxu0 %v4002_v15 }
0x16c9   : > { %v4011_v20 = vpack.c.bf16 %v8326_v61, %v8325_v0  ;;  %v8346_v30 = vunpack.i.h.bf16 %v8344_v37  ;;  %v8345_v1 = vunpack.i.l.bf16 %v8344_v37 }
0x16ca   : > { %v8339_v29 = vpop.permute.xlu1 %8338 }
0x16cb   : > { %v8341_v25 = vunpack.i.h.bf16 %v8339_v29  ;;  %v8340_v38 = vunpack.i.l.bf16 %v8339_v29  ;;  %7299 = vmatprep.subr.bf16.mxu0 %v4011_v20  ;;  %v4004_v8 = vpack.c.bf16 %v8346_v30, %v8345_v1 }
0x16cc   : > { %v8354_v45 = vpop.permute.xlu0 %8353  ;;  %7300 = vmatpush3.bf16.msra.mxu0 %v4003_v52 }
0x16cd   : > { %v4012_v11 = vpack.c.bf16 %v8341_v25, %v8340_v38  ;;  %v8356_v4 = vunpack.i.h.bf16 %v8354_v45  ;;  %v8355_v7 = vunpack.i.l.bf16 %v8354_v45 }
0x16ce   : > { %v8349_v26 = vpop.permute.xlu1 %8348 }
0x16cf   : > { %v8351_v12 = vunpack.i.h.bf16 %v8349_v26  ;;  %v8350_v35 = vunpack.i.l.bf16 %v8349_v26  ;;  %7301 = vmatprep.subr.bf16.mxu0 %v4012_v11  ;;  %v4014_v15 = vpack.c.bf16 %v8356_v4, %v8355_v7 }
0x16d0   : > { %7302 = vmatpush3.bf16.msra.mxu0 %v4004_v8 }
0x16d1   : > { %v4013_v51 = vpack.c.bf16 %v8351_v12, %v8350_v35 }
0x16d3   : > { %4104 = vmatmul.mubr.bf16.vlgmr.msra.gmra.mrb[24].mxu0 %v8834_v5  ;;  %7484 = vmatprep.subr.bf16.mxu1 %v4013_v51 }
0x16d4   : > { %7485 = vmatpush3.bf16.msra.mxu1 %v4013_v51  ;;  %4111 = vmatprep.mubr.bf16.mxu0 %v8837_v17 }
0x16d5   : > { %7486 = vmatprep.subr.bf16.mxu1 %v4014_v15 }
0x16d8   : > { %7487 = vmatpush3.bf16.msra.mxu1 %v4014_v15 }
0x16db   : > { %4112 = vmatmul.mubr.bf16.gmra.mrb[28].mxu0 %v8840_v2  ;;  %7489 = vmatmul.mubr.msk.bf16.vlgmr.msra.gmra.mrb[28].mxu1 %vm1965_vm4, %v8841_v62 }
0x16dd   : > { %v4023_v1 = vpop.permute.xlu0 %4022 }
0x16df   : > { %v4018_v61 = vpop.permute.xlu1 %4017 }
0x16e1   : > { %v4033_v62 = vpop.permute.xlu0 %4032 }
0x16e3   : > { %v4028_v29 = vpop.permute.xlu1 %4027 }
0x17a6   : > { %v7303_v47 = vpop.f32.mrb[24].mxu0 }
0x17a7   : > { %v7304_v0 = vpop.f32.mrb[25].mxu0 }
0x17a8   : > { %v7305_v37 = vadd.f32 %v7304_v0, %v7303_v47  ;;  %v7306_v20 = vpop.f32.mrb[26].mxu0 }
0x17a9   : > { %v7307_v52 = vpop.f32.mrb[27].mxu0 }
0x17aa   : > { %v7308_v30 = vadd.f32 %v7307_v52, %v7306_v20  ;;  %v4106_v45 = vadd.f32 %v7305_v37, %v4018_v61 }
0x17ac   : > { %v4109_v5 = vadd.f32 %v7308_v30, %v4023_v1 }
0x17ae   : > { %v7309_v25 = vpop.f32.mrb[28].mxu0  ;;  %v7490_v38 = vpop.f32.mrb[28].mxu1 }
0x17af   : > { %v7310_v11 = vpop.f32.mrb[29].mxu0  ;;  %v4154_v8 = vpop.f32.mrb[29].mxu1 }
0x17b0   : > { %v7311_v26 = vadd.f32 %v7310_v11, %v7309_v25  ;;  %v4155_v4 = vadd.f32 %v4154_v8, %v4106_v45  ;;  %v7312_v7 = vpop.f32.mrb[30].mxu0  ;;  %v7491_v12 = vpop.f32.mrb[30].mxu1 }
0x17b1   : > { %v7313_v35 = vpop.f32.mrb[31].mxu0  ;;  %v4157_v17 = vpop.f32.mrb[31].mxu1 }
0x17b2   : > { %v4114_v51 = vadd.f32 %v7311_v26, %v4028_v29  ;;  %vm4169_vm9 = vcmp.ge.f32.partialorder %v4155_v4, 0.0  ;;  %v4173_v15 = vmul.f32 0.01, %v4155_v4  ;;  %v7314_v2 = vadd.f32 %v7313_v35, %v7312_v7 }
0x17b3   : > { %v4158_v47 = vadd.f32 %v4157_v17, %v4109_v5 }
0x17b4   : > { %v4163_v0 = vadd.f32 %v7490_v38, %v4114_v51  ;;  %v4117_v20 = vadd.f32 %v7314_v2, %v4033_v62  ;;  %v4177_v52 = vsel %vm4169_vm9, %v4155_v4, %v4173_v15 }
0x17b5   : > { %vm4170_vm10 = vcmp.ge.f32.partialorder %v4158_v47, 0.0  ;;  %v4174_v61 = vmul.f32 0.01, %v4158_v47  ;;  %4197 = vrot.lane.b32.xlu1 %v4177_v52, %s10243_s3 }
0x17b6   : > { %v4166_v37 = vadd.f32 %v7491_v12, %v4117_v20  ;;  %vm4171_vm11 = vcmp.ge.f32.partialorder %v4163_v0, 0.0  ;;  %v4175_v25 = vmul.f32 0.01, %v4163_v0 }
0x17b7   : > { %v4178_v45 = vsel %vm4170_vm10, %v4158_v47, %v4174_v61 }
0x17b8   : > { %4199 = vrot.lane.b32.xlu0 %v4178_v45, %s10243_s3  ;;  %v4179_v30 = vsel %vm4171_vm11, %v4163_v0, %v4175_v25  ;;  %v4357_v1 = vpack.c.bf16 %v4178_v45, %v4177_v52  ;;  %vm4172_vm13 = vcmp.ge.f32.partialorder %v4166_v37, 0.0  ;;  %v4176_v29 = vmul.f32 0.01, %v4166_v37 }
0x17b9   : > { %4201 = vrot.lane.b32.xlu1 %v4179_v30, %s10243_s3 }
0x17ba   : > { %7319 = vmatprep.subr.bf16.mxu1 %v4357_v1  ;;  %v4180_v38 = vsel %vm4172_vm13, %v4166_v37, %v4176_v29 }
0x17bb   : > { %v4358_v11 = vpack.c.bf16 %v4180_v38, %v4179_v30 }
0x17bc   : > { %4203 = vrot.lane.b32.xlu0 %v4180_v38, %s10243_s3 }
0x1827   : > { %v4198_v8 = vpop.permute.xlu1 %4197 }
0x1828   : > { %v4209_v26 = vsel %vm3247_vm5, 0.0, %v4198_v8 }
0x1829   : > { %v12039_v4 = vsel %vm3250_vm15, %v4209_v26, 0.0 }
0x182a   : > { %v4200_v7 = vpop.permute.xlu0 %4199  ;;  %v4229_v51 = vmul.f32 %v12039_v4, %v11882_v44  ;;  %v4217_v15 = vmul.f32 %v12039_v4, %v11863_v9 }
0x182b   : > { %v4210_v12 = vsel %vm3247_vm5, 0.0, %v4200_v7  ;;  %v4202_v35 = vpop.permute.xlu1 %4201 }
0x182c   : > { %v4214_v5 = vsel %vm3250_vm15, %v4210_v12, 0.0  ;;  %v4211_v17 = vsel %vm3247_vm5, 0.0, %v4202_v35  ;;  %v4221_v12 = vmul.f32 %v12039_v4, %v11873_v18 }
0x182d   : > { %v4215_v2 = vsel %vm3250_vm15, %v4211_v17, 0.0  ;;  %v8357_v62 = vpack.i.bf16 %v4214_v5, %v12039_v4  ;;  %v4230_v47 = vmul.f32 %v4214_v5, %v11882_v44  ;;  %v4218_v0 = vmul.f32 %v4214_v5, %v11863_v9 }
0x182e   : > { %v4204_v20 = vpop.permute.xlu0 %4203  ;;  %v4231_v45 = vmul.f32 %v4215_v2, %v11882_v44  ;;  %v4219_v30 = vmul.f32 %v4215_v2, %v11863_v9  ;;  %v4222_v1 = vmul.f32 %v4214_v5, %v11873_v18  ;;  %v4234_v35 = vmul.f32 %v4214_v5, %v11880_v14 }
0x182f   : > { %v4212_v52 = vsel %vm3247_vm5, 0.0, %v4204_v20  ;;  %8358 = vrot.lane.b32.xlu0 %v8357_v62, %s10227_s11  ;;  %v8362_v61 = vpack.i.bf16 %v4230_v47, %v4229_v51  ;;  %v4349_v37 = vpack.c.bf16 %v4218_v0, %v4217_v15  ;;  %v4233_v51 = vmul.f32 %v12039_v4, %v11880_v14 }
0x1830   : > { %v4216_v25 = vsel %vm3250_vm15, %v4212_v52, 0.0  ;;  %v8382_v17 = vpack.i.bf16 %v4222_v1, %v4221_v12  ;;  %v4223_v47 = vmul.f32 %v4215_v2, %v11873_v18  ;;  %v4235_v52 = vmul.f32 %v4215_v2, %v11880_v14 }
0x1831   : > { %8363 = vrot.lane.b32.xlu1 %v8362_v61, %s10247_s1  ;;  %7320 = vmatpush3.bf16.msra.mxu1 %v4349_v37  ;;  %v8367_v29 = vpack.i.bf16 %v4216_v25, %v4215_v2  ;;  %v4232_v38 = vmul.f32 %v4216_v25, %v11882_v44  ;;  %v4220_v8 = vmul.f32 %v4216_v25, %v11863_v9 }
0x1832   : > { %7321 = vmatprep.subr.bf16.mxu1 %v4358_v11  ;;  %v4224_v15 = vmul.f32 %v4216_v25, %v11873_v18  ;;  %v8377_v11 = vpack.i.bf16 %v4234_v35, %v4233_v51  ;;  %v4236_v0 = vmul.f32 %v4216_v25, %v11880_v14  ;;  %v4226_v61 = vmul.f32 %v4214_v5, %v11870_v3 }
0x1833   : > { %8368 = vrot.lane.b32.xlu0 %v8367_v29, %s10227_s11  ;;  %v8372_v26 = vpack.i.bf16 %v4232_v38, %v4231_v45  ;;  %v4350_v7 = vpack.c.bf16 %v4220_v8, %v4219_v30  ;;  %v4225_v45 = vmul.f32 %v12039_v4, %v11870_v3  ;;  %v4228_v1 = vmul.f32 %v4216_v25, %v11870_v3  ;;  %v8844_v38 = vld [vmem:[#allocation43 + $0x4] ss:$12 sps:$4 sm:$0xff]  }
0x1834   : > { %v8397_v20 = vpack.i.bf16 %v4224_v15, %v4223_v47  ;;  %v8387_v37 = vpack.i.bf16 %v4236_v0, %v4235_v52  ;;  %v4227_v8 = vmul.f32 %v4215_v2, %v11870_v3  ;;  %4455 = vmatprep.mubr.bf16.mxu1 %v8844_v38  ;;  %v4239_v12 = vmul.f32 %v4215_v2, %v11891_v56  ;;  %v8847_v15 = vld [vmem:[#allocation43 + $0x8] ss:$12 sps:$4 sm:$0xff]  }
0x1835   : > { %8373 = vrot.lane.b32.xlu1 %v8372_v26, %s10247_s1  ;;  %7322 = vmatpush3.bf16.msra.mxu1 %v4350_v7  ;;  %v8402_v30 = vpack.i.bf16 %v4226_v61, %v4225_v45  ;;  %v4240_v7 = vmul.f32 %v4216_v25, %v11891_v56  ;;  %v4238_v35 = vmul.f32 %v4214_v5, %v11891_v56  ;;  %v4189_v25 = vld [vmem:[#allocation44] sm:$0xff]  ;;  %v4192_v2 = vld [vmem:[#allocation44 + $0x18] sm:$0xff]  ;;  %v4191_v5 = vld [vmem:[#allocation44 + $0x10] sm:$0xff] }
0x1836   : > { %v8412_v26 = vpack.i.bf16 %v4228_v1, %v4227_v8  ;;  %v4237_v51 = vmul.f32 %v12039_v4, %v11891_v56  ;;  %7496 = vmatprep.mubr.msk.bf16.mxu0 %vm1965_vm4, %v8847_v15 }
0x1837   : > { %8383 = vrot.lane.b32.xlu0 %v8382_v17, %s10228_s12  ;;  %v8422_v17 = vpack.i.bf16 %v4240_v7, %v4239_v12 }
0x1839   : > { %8378 = vrot.lane.b32.xlu1 %v8377_v11, %s10239_s14  ;;  %v8417_v11 = vpack.i.bf16 %v4238_v35, %v4237_v51 }
0x183b   : > { %8398 = vrot.lane.b32.xlu0 %v8397_v20, %s10228_s12 }
0x183d   : > { %8388 = vrot.lane.b32.xlu1 %v8387_v37, %s10239_s14 }
0x183f   : > { %8403 = vrot.lane.b32.xlu0 %v8402_v30, %s10246_s8 }
0x1841   : > { %8393 = vrot.lane.b32.xlu1 %v8357_v62, %s10248_s13  ;;  %v4190_v62 = vld [vmem:[#allocation44 + $0x8] sm:$0xff] }
0x1843   : > { %8413 = vrot.lane.b32.xlu0 %v8412_v26, %s10246_s8 }
0x1845   : > { %8408 = vrot.lane.b32.xlu1 %v8367_v29, %s10248_s13 }
0x1847   : > { %8423 = vrot.lane.b32.xlu0 %v8422_v17, %s10240_s2 }
0x1849   : > { %8418 = vrot.lane.b32.xlu1 %v8417_v11, %s10240_s2 }
0x184b   : > { %4374 = vperm.xlu0 %8040, %v4190_v62  }
0x184d   : > { %4369 = vperm.xlu1 %8111, %v4189_v25  }
0x184f   : > { %4384 = vperm.xlu0 %8040, %v4192_v2  }
0x1851   : > { %4379 = vperm.xlu1 %8111, %v4191_v5  }
0x18a1   : > { %v8359_v29 = vpop.permute.xlu0 %8358 }
0x18a2   : > { %v8361_v47 = vunpack.i.h.bf16 %v8359_v29  ;;  %v8360_v0 = vunpack.i.l.bf16 %v8359_v29 }
0x18a3   : > { %v8364_v4 = vpop.permute.xlu1 %8363 }
0x18a4   : > { %v8366_v20 = vunpack.i.h.bf16 %v8364_v4  ;;  %v8365_v52 = vunpack.i.l.bf16 %v8364_v4  ;;  %v4351_v45 = vpack.c.bf16 %v8361_v47, %v8360_v0 }
0x18a5   : > { %v8369_v61 = vpop.permute.xlu0 %8368 }
0x18a6   : > { %v4359_v37 = vpack.c.bf16 %v8366_v20, %v8365_v52  ;;  %v8371_v30 = vunpack.i.h.bf16 %v8369_v61  ;;  %v8370_v1 = vunpack.i.l.bf16 %v8369_v61 }
0x18a7   : > { %v8374_v38 = vpop.permute.xlu1 %8373 }
0x18a8   : > { %v8376_v8 = vunpack.i.h.bf16 %v8374_v38  ;;  %v8375_v26 = vunpack.i.l.bf16 %v8374_v38  ;;  %7323 = vmatprep.subr.bf16.mxu1 %v4359_v37  ;;  %v4352_v35 = vpack.c.bf16 %v8371_v30, %v8370_v1 }
0x18a9   : > { %v8384_v7 = vpop.permute.xlu0 %8383  ;;  %7324 = vmatpush3.bf16.msra.mxu1 %v4351_v45 }
0x18aa   : > { %v4360_v12 = vpack.c.bf16 %v8376_v8, %v8375_v26  ;;  %v8386_v17 = vunpack.i.h.bf16 %v8384_v7  ;;  %v8385_v51 = vunpack.i.l.bf16 %v8384_v7 }
0x18ab   : > { %v8379_v15 = vpop.permute.xlu1 %8378 }
0x18ac   : > { %v8381_v11 = vunpack.i.h.bf16 %v8379_v15  ;;  %v8380_v62 = vunpack.i.l.bf16 %v8379_v15  ;;  %7325 = vmatprep.subr.bf16.mxu1 %v4360_v12  ;;  %v4353_v5 = vpack.c.bf16 %v8386_v17, %v8385_v51 }
0x18ad   : > { %v8399_v25 = vpop.permute.xlu0 %8398  ;;  %7326 = vmatpush3.bf16.msra.mxu1 %v4352_v35 }
0x18ae   : > { %v4361_v2 = vpack.c.bf16 %v8381_v11, %v8380_v62  ;;  %v8401_v29 = vunpack.i.h.bf16 %v8399_v25  ;;  %v8400_v47 = vunpack.i.l.bf16 %v8399_v25 }
0x18af   : > { %v8389_v0 = vpop.permute.xlu1 %8388 }
0x18b0   : > { %v8391_v4 = vunpack.i.h.bf16 %v8389_v0  ;;  %v8390_v20 = vunpack.i.l.bf16 %v8389_v0  ;;  %7327 = vmatprep.subr.bf16.mxu1 %v4361_v2  ;;  %v4354_v37 = vpack.c.bf16 %v8401_v29, %v8400_v47 }
0x18b1   : > { %v8404_v52 = vpop.permute.xlu0 %8403  ;;  %7328 = vmatpush3.bf16.msra.mxu1 %v4353_v5 }
0x18b2   : > { %v4362_v61 = vpack.c.bf16 %v8391_v4, %v8390_v20  ;;  %v8406_v45 = vunpack.i.h.bf16 %v8404_v52  ;;  %v8405_v30 = vunpack.i.l.bf16 %v8404_v52  ;;  %v8842_v20 = vld [vmem:[#allocation43] ss:$12 sps:$4 sm:$0xff]   ;;  %v8845_v52 = vld [vmem:[#allocation43 + $0x1c] ss:$12 sps:$4 sm:$0xff]  }
0x18b3   : > { %v8394_v1 = vpop.permute.xlu1 %8393 }
0x18b4   : > { %v8396_v38 = vunpack.i.h.bf16 %v8394_v1  ;;  %v8395_v8 = vunpack.i.l.bf16 %v8394_v1  ;;  %7329 = vmatprep.subr.bf16.mxu1 %v4362_v61  ;;  %v4355_v12 = vpack.c.bf16 %v8406_v45, %v8405_v30  ;;  %v8848_v45 = vld [vmem:[#allocation43 + $0x18] ss:$12 sps:$4 sm:$0xff]   ;;  %v8849_v30 = vld [vmem:[#allocation43 + $0x20] ss:$12 sps:$4 sm:$0xff]  }
0x18b5   : > { %v8414_v26 = vpop.permute.xlu0 %8413  ;;  %7330 = vmatpush3.bf16.msra.mxu1 %v4354_v37 }
0x18b6   : > { %v4363_v7 = vpack.c.bf16 %v8396_v38, %v8395_v8  ;;  %v8416_v35 = vunpack.i.h.bf16 %v8414_v26  ;;  %v8415_v17 = vunpack.i.l.bf16 %v8414_v26 }
0x18b7   : > { %v8409_v51 = vpop.permute.xlu1 %8408 }
0x18b8   : > { %v8411_v15 = vunpack.i.h.bf16 %v8409_v51  ;;  %v8410_v11 = vunpack.i.l.bf16 %v8409_v51  ;;  %7331 = vmatprep.subr.bf16.mxu1 %v4363_v7  ;;  %v4356_v2 = vpack.c.bf16 %v8416_v35, %v8415_v17 }
0x18b9   : > { %v8424_v62 = vpop.permute.xlu0 %8423  ;;  %7332 = vmatpush3.bf16.msra.mxu1 %v4355_v12 }
0x18ba   : > { %v4364_v25 = vpack.c.bf16 %v8411_v15, %v8410_v11  ;;  %v8426_v29 = vunpack.i.h.bf16 %v8424_v62  ;;  %v8425_v47 = vunpack.i.l.bf16 %v8424_v62 }
0x18bb   : > { %v8419_v5 = vpop.permute.xlu1 %8418 }
0x18bc   : > { %v8421_v0 = vunpack.i.h.bf16 %v8419_v5  ;;  %v8420_v4 = vunpack.i.l.bf16 %v8419_v5  ;;  %7333 = vmatprep.subr.bf16.mxu1 %v4364_v25  ;;  %v4366_v37 = vpack.c.bf16 %v8426_v29, %v8425_v47 }
0x18bd   : > { %7334 = vmatpush3.bf16.msra.mxu1 %v4356_v2 }
0x18be   : > { %v4365_v61 = vpack.c.bf16 %v8421_v0, %v8420_v4 }
0x18c0   : > { %4456 = vmatmul.mubr.bf16.vlgmr.msra.gmra.mrb[32].mxu1 %v8842_v20  ;;  %7492 = vmatprep.subr.bf16.mxu0 %v4365_v61 }
0x18c1   : > { %7493 = vmatpush3.bf16.msra.mxu0 %v4365_v61  ;;  %4463 = vmatprep.mubr.bf16.mxu1 %v8845_v52 }
0x18c2   : > { %7494 = vmatprep.subr.bf16.mxu0 %v4366_v37 }
0x18c5   : > { %7495 = vmatpush3.bf16.msra.mxu0 %v4366_v37 }
0x18c8   : > { %4464 = vmatmul.mubr.bf16.gmra.mrb[36].mxu1 %v8848_v45  ;;  %7497 = vmatmul.mubr.msk.bf16.vlgmr.msra.gmra.mrb[32].mxu0 %vm1965_vm4, %v8849_v30 }
0x18ca   : > { %v4375_v17 = vpop.permute.xlu0 %4374 }
0x18cc   : > { %v4370_v38 = vpop.permute.xlu1 %4369 }
0x18ce   : > { %v4385_v30 = vpop.permute.xlu0 %4384 }
0x18d0   : > { %v4380_v51 = vpop.permute.xlu1 %4379 }
0x1993   : > { %v7335_v1 = vpop.f32.mrb[32].mxu1 }
0x1994   : > { %v7336_v8 = vpop.f32.mrb[33].mxu1 }
0x1995   : > { %v7337_v26 = vadd.f32 %v7336_v8, %v7335_v1  ;;  %v7338_v7 = vpop.f32.mrb[34].mxu1 }
0x1996   : > { %v7339_v12 = vpop.f32.mrb[35].mxu1 }
0x1997   : > { %v7340_v35 = vadd.f32 %v7339_v12, %v7338_v7  ;;  %v4458_v62 = vadd.f32 %v7337_v26, %v4370_v38 }
0x1999   : > { %v4461_v20 = vadd.f32 %v7340_v35, %v4375_v17 }
0x199b   : > { %v7341_v15 = vpop.f32.mrb[36].mxu1  ;;  %v7498_v11 = vpop.f32.mrb[32].mxu0 }
0x199c   : > { %v7342_v25 = vpop.f32.mrb[37].mxu1  ;;  %v4506_v2 = vpop.f32.mrb[33].mxu0 }
0x199d   : > { %v7343_v5 = vadd.f32 %v7342_v25, %v7341_v15  ;;  %v4507_v29 = vadd.f32 %v4506_v2, %v4458_v62  ;;  %v7344_v47 = vpop.f32.mrb[38].mxu1  ;;  %v7499_v0 = vpop.f32.mrb[34].mxu0 }
0x199e   : > { %v7345_v4 = vpop.f32.mrb[39].mxu1  ;;  %v4509_v52 = vpop.f32.mrb[35].mxu0 }
0x199f   : > { %v4466_v61 = vadd.f32 %v7343_v5, %v4380_v51  ;;  %vm4521_vm9 = vcmp.ge.f32.partialorder %v4507_v29, 0.0  ;;  %v4525_v37 = vmul.f32 0.01, %v4507_v29  ;;  %v7346_v45 = vadd.f32 %v7345_v4, %v7344_v47 }
0x19a0   : > { %v4510_v1 = vadd.f32 %v4509_v52, %v4461_v20 }
0x19a1   : > { %v4515_v8 = vadd.f32 %v7498_v11, %v4466_v61  ;;  %v4469_v7 = vadd.f32 %v7346_v45, %v4385_v30  ;;  %v4529_v12 = vsel %vm4521_vm9, %v4507_v29, %v4525_v37 }
0x19a2   : > { %vm4522_vm10 = vcmp.ge.f32.partialorder %v4510_v1, 0.0  ;;  %v4526_v38 = vmul.f32 0.01, %v4510_v1  ;;  %4549 = vrot.lane.b32.xlu1 %v4529_v12, %s10243_s3 }
0x19a3   : > { %v4518_v26 = vadd.f32 %v7499_v0, %v4469_v7  ;;  %vm4523_vm11 = vcmp.ge.f32.partialorder %v4515_v8, 0.0  ;;  %v4527_v15 = vmul.f32 0.01, %v4515_v8 }
0x19a4   : > { %v4530_v62 = vsel %vm4522_vm10, %v4510_v1, %v4526_v38 }
0x19a5   : > { %4551 = vrot.lane.b32.xlu0 %v4530_v62, %s10243_s3  ;;  %v4531_v35 = vsel %vm4523_vm11, %v4515_v8, %v4527_v15  ;;  %v4709_v17 = vpack.c.bf16 %v4530_v62, %v4529_v12  ;;  %vm4524_vm13 = vcmp.ge.f32.partialorder %v4518_v26, 0.0  ;;  %v4528_v51 = vmul.f32 0.01, %v4518_v26 }
0x19a6   : > { %4553 = vrot.lane.b32.xlu1 %v4531_v35, %s10243_s3 }
0x19a7   : > { %7351 = vmatprep.subr.bf16.mxu1 %v4709_v17  ;;  %v4532_v11 = vsel %vm4524_vm13, %v4518_v26, %v4528_v51 }
0x19a8   : > { %v4710_v25 = vpack.c.bf16 %v4532_v11, %v4531_v35 }
0x19a9   : > { %4555 = vrot.lane.b32.xlu0 %v4532_v11, %s10243_s3 }
0x1a14   : > { %v4550_v2 = vpop.permute.xlu1 %4549 }
0x1a15   : > { %v4561_v5 = vsel %vm3247_vm5, 0.0, %v4550_v2 }
0x1a16   : > { %v12100_v29 = vsel %vm3250_vm15, %v4561_v5, 0.0 }
0x1a17   : > { %v4552_v47 = vpop.permute.xlu0 %4551  ;;  %v4581_v61 = vmul.f32 %v12100_v29, %v11882_v44  ;;  %v4569_v37 = vmul.f32 %v12100_v29, %v11863_v9 }
0x1a18   : > { %v4562_v0 = vsel %vm3247_vm5, 0.0, %v4552_v47  ;;  %v4554_v4 = vpop.permute.xlu1 %4553 }
0x1a19   : > { %v4566_v20 = vsel %vm3250_vm15, %v4562_v0, 0.0  ;;  %v4563_v52 = vsel %vm3247_vm5, 0.0, %v4554_v4  ;;  %v4573_v0 = vmul.f32 %v12100_v29, %v11873_v18 }
0x1a1a   : > { %v4567_v45 = vsel %vm3250_vm15, %v4563_v52, 0.0  ;;  %v8427_v30 = vpack.i.bf16 %v4566_v20, %v12100_v29  ;;  %v4582_v1 = vmul.f32 %v4566_v20, %v11882_v44  ;;  %v4570_v8 = vmul.f32 %v4566_v20, %v11863_v9 }
0x1a1b   : > { %v4556_v7 = vpop.permute.xlu0 %4555  ;;  %v4583_v62 = vmul.f32 %v4567_v45, %v11882_v44  ;;  %v4571_v35 = vmul.f32 %v4567_v45, %v11863_v9  ;;  %v4574_v17 = vmul.f32 %v4566_v20, %v11873_v18  ;;  %v4586_v4 = vmul.f32 %v4566_v20, %v11880_v14 }
0x1a1c   : > { %v4564_v12 = vsel %vm3247_vm5, 0.0, %v4556_v7  ;;  %8428 = vrot.lane.b32.xlu0 %v8427_v30, %s10227_s11  ;;  %v8432_v38 = vpack.i.bf16 %v4582_v1, %v4581_v61  ;;  %v4701_v26 = vpack.c.bf16 %v4570_v8, %v4569_v37  ;;  %v4585_v61 = vmul.f32 %v12100_v29, %v11880_v14 }
0x1a1d   : > { %v4568_v15 = vsel %vm3250_vm15, %v4564_v12, 0.0  ;;  %v8452_v52 = vpack.i.bf16 %v4574_v17, %v4573_v0  ;;  %v4575_v1 = vmul.f32 %v4567_v45, %v11873_v18  ;;  %v4587_v12 = vmul.f32 %v4567_v45, %v11880_v14 }
0x1a1e   : > { %8433 = vrot.lane.b32.xlu1 %v8432_v38, %s10247_s1  ;;  %7352 = vmatpush3.bf16.msra.mxu1 %v4701_v26  ;;  %v8437_v51 = vpack.i.bf16 %v4568_v15, %v4567_v45  ;;  %v4584_v11 = vmul.f32 %v4568_v15, %v11882_v44  ;;  %v4572_v2 = vmul.f32 %v4568_v15, %v11863_v9 }
0x1a1f   : > { %7353 = vmatprep.subr.bf16.mxu1 %v4710_v25  ;;  %v4576_v37 = vmul.f32 %v4568_v15, %v11873_v18  ;;  %v8447_v25 = vpack.i.bf16 %v4586_v4, %v4585_v61  ;;  %v4588_v8 = vmul.f32 %v4568_v15, %v11880_v14  ;;  %v4578_v38 = vmul.f32 %v4566_v20, %v11870_v3 }
0x1a20   : > { %8438 = vrot.lane.b32.xlu0 %v8437_v51, %s10227_s11  ;;  %v8442_v5 = vpack.i.bf16 %v4584_v11, %v4583_v62  ;;  %v4702_v47 = vpack.c.bf16 %v4572_v2, %v4571_v35  ;;  %v4577_v62 = vmul.f32 %v12100_v29, %v11870_v3  ;;  %v4580_v17 = vmul.f32 %v4568_v15, %v11870_v3  ;;  %v8852_v11 = vld [vmem:[#allocation46 + $0x4] ss:$12 sps:$4 sm:$0xff]  }
0x1a21   : > { %v8467_v7 = vpack.i.bf16 %v4576_v37, %v4575_v1  ;;  %v8457_v26 = vpack.i.bf16 %v4588_v8, %v4587_v12  ;;  %v4579_v2 = vmul.f32 %v4567_v45, %v11870_v3  ;;  %4807 = vmatprep.mubr.bf16.mxu1 %v8852_v11  ;;  %v4591_v0 = vmul.f32 %v4567_v45, %v11891_v56  ;;  %v8855_v37 = vld [vmem:[#allocation46 + $0x8] ss:$12 sps:$4 sm:$0xff]  }
0x1a22   : > { %8443 = vrot.lane.b32.xlu1 %v8442_v5, %s10247_s1  ;;  %7354 = vmatpush3.bf16.msra.mxu1 %v4702_v47  ;;  %v8472_v35 = vpack.i.bf16 %v4578_v38, %v4577_v62  ;;  %v4592_v47 = vmul.f32 %v4568_v15, %v11891_v56  ;;  %v4590_v4 = vmul.f32 %v4566_v20, %v11891_v56  ;;  %v4541_v15 = vld [vmem:[#allocation47] sm:$0xff]  ;;  %v4544_v45 = vld [vmem:[#allocation47 + $0x18] sm:$0xff]  ;;  %v4543_v20 = vld [vmem:[#allocation47 + $0x10] sm:$0xff] }
0x1a23   : > { %v8482_v5 = vpack.i.bf16 %v4580_v17, %v4579_v2  ;;  %v4589_v61 = vmul.f32 %v12100_v29, %v11891_v56  ;;  %7504 = vmatprep.mubr.msk.bf16.mxu0 %vm1965_vm4, %v8855_v37 }
0x1a24   : > { %8453 = vrot.lane.b32.xlu0 %v8452_v52, %s10228_s12  ;;  %v8492_v52 = vpack.i.bf16 %v4592_v47, %v4591_v0 }
0x1a26   : > { %8448 = vrot.lane.b32.xlu1 %v8447_v25, %s10239_s14  ;;  %v8487_v25 = vpack.i.bf16 %v4590_v4, %v4589_v61 }
0x1a28   : > { %8468 = vrot.lane.b32.xlu0 %v8467_v7, %s10228_s12 }
0x1a2a   : > { %8458 = vrot.lane.b32.xlu1 %v8457_v26, %s10239_s14 }
0x1a2c   : > { %8473 = vrot.lane.b32.xlu0 %v8472_v35, %s10246_s8 }
0x1a2e   : > { %8463 = vrot.lane.b32.xlu1 %v8427_v30, %s10248_s13  ;;  %v4542_v30 = vld [vmem:[#allocation47 + $0x8] sm:$0xff] }
0x1a30   : > { %8483 = vrot.lane.b32.xlu0 %v8482_v5, %s10246_s8 }
0x1a32   : > { %8478 = vrot.lane.b32.xlu1 %v8437_v51, %s10248_s13 }
0x1a34   : > { %8493 = vrot.lane.b32.xlu0 %v8492_v52, %s10240_s2 }
0x1a36   : > { %8488 = vrot.lane.b32.xlu1 %v8487_v25, %s10240_s2 }
0x1a38   : > { %4726 = vperm.xlu0 %8040, %v4542_v30  }
0x1a3a   : > { %4721 = vperm.xlu1 %8111, %v4541_v15  }
0x1a3c   : > { %4736 = vperm.xlu0 %8040, %v4544_v45  }
0x1a3e   : > { %4731 = vperm.xlu1 %8111, %v4543_v20  }
0x1a8e   : > { %v8429_v51 = vpop.permute.xlu0 %8428 }
0x1a8f   : > { %v8431_v1 = vunpack.i.h.bf16 %v8429_v51  ;;  %v8430_v8 = vunpack.i.l.bf16 %v8429_v51 }
0x1a90   : > { %v8434_v29 = vpop.permute.xlu1 %8433 }
0x1a91   : > { %v8436_v7 = vunpack.i.h.bf16 %v8434_v29  ;;  %v8435_v12 = vunpack.i.l.bf16 %v8434_v29  ;;  %v4703_v62 = vpack.c.bf16 %v8431_v1, %v8430_v8 }
0x1a92   : > { %v8439_v38 = vpop.permute.xlu0 %8438 }
0x1a93   : > { %v4711_v26 = vpack.c.bf16 %v8436_v7, %v8435_v12  ;;  %v8441_v35 = vunpack.i.h.bf16 %v8439_v38  ;;  %v8440_v17 = vunpack.i.l.bf16 %v8439_v38 }
0x1a94   : > { %v8444_v11 = vpop.permute.xlu1 %8443 }
0x1a95   : > { %v8446_v2 = vunpack.i.h.bf16 %v8444_v11  ;;  %v8445_v5 = vunpack.i.l.bf16 %v8444_v11  ;;  %7355 = vmatprep.subr.bf16.mxu1 %v4711_v26  ;;  %v4704_v4 = vpack.c.bf16 %v8441_v35, %v8440_v17 }
0x1a96   : > { %v8454_v47 = vpop.permute.xlu0 %8453  ;;  %7356 = vmatpush3.bf16.msra.mxu1 %v4703_v62 }
0x1a97   : > { %v4712_v0 = vpack.c.bf16 %v8446_v2, %v8445_v5  ;;  %v8456_v52 = vunpack.i.h.bf16 %v8454_v47  ;;  %v8455_v61 = vunpack.i.l.bf16 %v8454_v47 }
0x1a98   : > { %v8449_v37 = vpop.permute.xlu1 %8448 }
0x1a99   : > { %v8451_v25 = vunpack.i.h.bf16 %v8449_v37  ;;  %v8450_v30 = vunpack.i.l.bf16 %v8449_v37  ;;  %7357 = vmatprep.subr.bf16.mxu1 %v4712_v0  ;;  %v4705_v20 = vpack.c.bf16 %v8456_v52, %v8455_v61 }
0x1a9a   : > { %v8469_v15 = vpop.permute.xlu0 %8468  ;;  %7358 = vmatpush3.bf16.msra.mxu1 %v4704_v4 }
0x1a9b   : > { %v4713_v45 = vpack.c.bf16 %v8451_v25, %v8450_v30  ;;  %v8471_v51 = vunpack.i.h.bf16 %v8469_v15  ;;  %v8470_v1 = vunpack.i.l.bf16 %v8469_v15 }
0x1a9c   : > { %v8459_v8 = vpop.permute.xlu1 %8458 }
0x1a9d   : > { %v8461_v29 = vunpack.i.h.bf16 %v8459_v8  ;;  %v8460_v7 = vunpack.i.l.bf16 %v8459_v8  ;;  %7359 = vmatprep.subr.bf16.mxu1 %v4713_v45  ;;  %v4706_v26 = vpack.c.bf16 %v8471_v51, %v8470_v1 }
0x1a9e   : > { %v8474_v12 = vpop.permute.xlu0 %8473  ;;  %7360 = vmatpush3.bf16.msra.mxu1 %v4705_v20 }
0x1a9f   : > { %v4714_v38 = vpack.c.bf16 %v8461_v29, %v8460_v7  ;;  %v8476_v62 = vunpack.i.h.bf16 %v8474_v12  ;;  %v8475_v35 = vunpack.i.l.bf16 %v8474_v12  ;;  %v8850_v7 = vld [vmem:[#allocation46] ss:$12 sps:$4 sm:$0xff]   ;;  %v8853_v12 = vld [vmem:[#allocation46 + $0x1c] ss:$12 sps:$4 sm:$0xff]  }
0x1aa0   : > { %v8464_v17 = vpop.permute.xlu1 %8463 }
0x1aa1   : > { %v8466_v11 = vunpack.i.h.bf16 %v8464_v17  ;;  %v8465_v2 = vunpack.i.l.bf16 %v8464_v17  ;;  %7361 = vmatprep.subr.bf16.mxu1 %v4714_v38  ;;  %v4707_v0 = vpack.c.bf16 %v8476_v62, %v8475_v35  ;;  %v8856_v62 = vld [vmem:[#allocation46 + $0x18] ss:$12 sps:$4 sm:$0xff]   ;;  %v8857_v35 = vld [vmem:[#allocation46 + $0x20] ss:$12 sps:$4 sm:$0xff]  }
0x1aa2   : > { %v8484_v5 = vpop.permute.xlu0 %8483  ;;  %7362 = vmatpush3.bf16.msra.mxu1 %v4706_v26 }
0x1aa3   : > { %v4715_v47 = vpack.c.bf16 %v8466_v11, %v8465_v2  ;;  %v8486_v4 = vunpack.i.h.bf16 %v8484_v5  ;;  %v8485_v52 = vunpack.i.l.bf16 %v8484_v5 }
0x1aa4   : > { %v8479_v61 = vpop.permute.xlu1 %8478 }
0x1aa5   : > { %v8481_v37 = vunpack.i.h.bf16 %v8479_v61  ;;  %v8480_v25 = vunpack.i.l.bf16 %v8479_v61  ;;  %7363 = vmatprep.subr.bf16.mxu1 %v4715_v47  ;;  %v4708_v45 = vpack.c.bf16 %v8486_v4, %v8485_v52 }
0x1aa6   : > { %v8494_v30 = vpop.permute.xlu0 %8493  ;;  %7364 = vmatpush3.bf16.msra.mxu1 %v4707_v0 }
0x1aa7   : > { %v4716_v15 = vpack.c.bf16 %v8481_v37, %v8480_v25  ;;  %v8496_v51 = vunpack.i.h.bf16 %v8494_v30  ;;  %v8495_v1 = vunpack.i.l.bf16 %v8494_v30 }
0x1aa8   : > { %v8489_v20 = vpop.permute.xlu1 %8488 }
0x1aa9   : > { %v8491_v8 = vunpack.i.h.bf16 %v8489_v20  ;;  %v8490_v29 = vunpack.i.l.bf16 %v8489_v20  ;;  %7365 = vmatprep.subr.bf16.mxu1 %v4716_v15  ;;  %v4718_v26 = vpack.c.bf16 %v8496_v51, %v8495_v1 }
0x1aaa   : > { %7366 = vmatpush3.bf16.msra.mxu1 %v4708_v45 }
0x1aab   : > { %v4717_v38 = vpack.c.bf16 %v8491_v8, %v8490_v29 }
0x1aad   : > { %4808 = vmatmul.mubr.bf16.vlgmr.msra.gmra.mrb[40].mxu1 %v8850_v7  ;;  %7500 = vmatprep.subr.bf16.mxu0 %v4717_v38 }
0x1aae   : > { %7501 = vmatpush3.bf16.msra.mxu0 %v4717_v38  ;;  %4815 = vmatprep.mubr.bf16.mxu1 %v8853_v12 }
0x1aaf   : > { %7502 = vmatprep.subr.bf16.mxu0 %v4718_v26 }
0x1ab2   : > { %7503 = vmatpush3.bf16.msra.mxu0 %v4718_v26 }
0x1ab5   : > { %4816 = vmatmul.mubr.bf16.gmra.mrb[44].mxu1 %v8856_v62  ;;  %7505 = vmatmul.mubr.msk.bf16.vlgmr.msra.gmra.mrb[36].mxu0 %vm1965_vm4, %v8857_v35 }
0x1ab7   : > { %v4727_v52 = vpop.permute.xlu0 %4726 }
0x1ab9   : > { %v4722_v11 = vpop.permute.xlu1 %4721 }
0x1abb   : > { %v4737_v35 = vpop.permute.xlu0 %4736 }
0x1abd   : > { %v4732_v61 = vpop.permute.xlu1 %4731 }
0x1b80   : > { %v7367_v17 = vpop.f32.mrb[40].mxu1 }
0x1b81   : > { %v7368_v2 = vpop.f32.mrb[41].mxu1 }
0x1b82   : > { %v7369_v5 = vadd.f32 %v7368_v2, %v7367_v17  ;;  %v7370_v47 = vpop.f32.mrb[42].mxu1 }
0x1b83   : > { %v7371_v0 = vpop.f32.mrb[43].mxu1 }
0x1b84   : > { %v7372_v4 = vadd.f32 %v7371_v0, %v7370_v47  ;;  %v4810_v30 = vadd.f32 %v7369_v5, %v4722_v11 }
0x1b86   : > { %v4813_v7 = vadd.f32 %v7372_v4, %v4727_v52 }
0x1b88   : > { %v7373_v37 = vpop.f32.mrb[44].mxu1  ;;  %v7506_v25 = vpop.f32.mrb[36].mxu0 }
0x1b89   : > { %v7374_v15 = vpop.f32.mrb[45].mxu1  ;;  %v4858_v45 = vpop.f32.mrb[37].mxu0 }
0x1b8a   : > { %v7375_v20 = vadd.f32 %v7374_v15, %v7373_v37  ;;  %v4859_v51 = vadd.f32 %v4858_v45, %v4810_v30  ;;  %v7376_v1 = vpop.f32.mrb[46].mxu1  ;;  %v7507_v8 = vpop.f32.mrb[38].mxu0 }
0x1b8b   : > { %v7377_v29 = vpop.f32.mrb[47].mxu1  ;;  %v4861_v12 = vpop.f32.mrb[39].mxu0 }
0x1b8c   : > { %v4818_v38 = vadd.f32 %v7375_v20, %v4732_v61  ;;  %vm4873_vm9 = vcmp.ge.f32.partialorder %v4859_v51, 0.0  ;;  %v4877_v26 = vmul.f32 0.01, %v4859_v51  ;;  %v7378_v62 = vadd.f32 %v7377_v29, %v7376_v1 }
0x1b8d   : > { %v4862_v17 = vadd.f32 %v4861_v12, %v4813_v7 }
0x1b8e   : > { %v4867_v2 = vadd.f32 %v7506_v25, %v4818_v38  ;;  %v4821_v47 = vadd.f32 %v7378_v62, %v4737_v35  ;;  %v4881_v0 = vsel %vm4873_vm9, %v4859_v51, %v4877_v26 }
0x1b8f   : > { %vm4874_vm10 = vcmp.ge.f32.partialorder %v4862_v17, 0.0  ;;  %v4878_v11 = vmul.f32 0.01, %v4862_v17  ;;  %4901 = vrot.lane.b32.xlu1 %v4881_v0, %s10243_s3 }
0x1b90   : > { %v4870_v5 = vadd.f32 %v7507_v8, %v4821_v47  ;;  %vm4875_vm11 = vcmp.ge.f32.partialorder %v4867_v2, 0.0  ;;  %v4879_v37 = vmul.f32 0.01, %v4867_v2 }
0x1b91   : > { %v4882_v30 = vsel %vm4874_vm10, %v4862_v17, %v4878_v11  ;;  %vm5545_vm10 = vcmask 392192  }
0x1b92   : > { %4903 = vrot.lane.b32.xlu0 %v4882_v30, %s10243_s3  ;;  %v4883_v4 = vsel %vm4875_vm11, %v4867_v2, %v4879_v37  ;;  %v5061_v52 = vpack.c.bf16 %v4882_v30, %v4881_v0  ;;  %vm4876_vm13 = vcmp.ge.f32.partialorder %v4870_v5, 0.0  ;;  %v4880_v61 = vmul.f32 0.01, %v4870_v5 }
0x1b93   : > { %4905 = vrot.lane.b32.xlu1 %v4883_v4, %s10243_s3 }
0x1b94   : > { %7383 = vmatprep.subr.bf16.mxu0 %v5061_v52  ;;  %v4884_v25 = vsel %vm4876_vm13, %v4870_v5, %v4880_v61 }
0x1b95   : > { %v5062_v15 = vpack.c.bf16 %v4884_v25, %v4883_v4 }
0x1b96   : > { %4907 = vrot.lane.b32.xlu0 %v4884_v25, %s10243_s3  ;;  %s12941_s3 = smov 110  }
0x1c01   : > { %v4902_v45 = vpop.permute.xlu1 %4901 }
0x1c02   : > { %v4913_v20 = vsel %vm3247_vm5, 0.0, %v4902_v45 }
0x1c03   : > { %v12161_v51 = vsel %vm3250_vm15, %v4913_v20, 0.0 }
0x1c04   : > { %v4904_v1 = vpop.permute.xlu0 %4903  ;;  %v4933_v38 = vmul.f32 %v12161_v51, %v11882_v44  ;;  %v4921_v26 = vmul.f32 %v12161_v51, %v11863_v9 }
0x1c05   : > { %v4914_v8 = vsel %vm3247_vm5, 0.0, %v4904_v1  ;;  %v4906_v29 = vpop.permute.xlu1 %4905 }
0x1c06   : > { %v4918_v7 = vsel %vm3250_vm15, %v4914_v8, 0.0  ;;  %v4915_v12 = vsel %vm3247_vm5, 0.0, %v4906_v29  ;;  %v4925_v8 = vmul.f32 %v12161_v51, %v11873_v18 }
0x1c07   : > { %v4919_v62 = vsel %vm3250_vm15, %v4915_v12, 0.0  ;;  %v8497_v35 = vpack.i.bf16 %v4918_v7, %v12161_v51  ;;  %v4934_v17 = vmul.f32 %v4918_v7, %v11882_v44  ;;  %v4922_v2 = vmul.f32 %v4918_v7, %v11863_v9 }
0x1c08   : > { %v4908_v47 = vpop.permute.xlu0 %4907  ;;  %v4935_v30 = vmul.f32 %v4919_v62, %v11882_v44  ;;  %v4923_v4 = vmul.f32 %v4919_v62, %v11863_v9  ;;  %v4926_v52 = vmul.f32 %v4918_v7, %v11873_v18  ;;  %v4938_v29 = vmul.f32 %v4918_v7, %v11880_v14 }
0x1c09   : > { %v4916_v0 = vsel %vm3247_vm5, 0.0, %v4908_v47  ;;  %8498 = vrot.lane.b32.xlu0 %v8497_v35, %s10227_s11  ;;  %v8502_v11 = vpack.i.bf16 %v4934_v17, %v4933_v38  ;;  %v5053_v5 = vpack.c.bf16 %v4922_v2, %v4921_v26  ;;  %v4937_v38 = vmul.f32 %v12161_v51, %v11880_v14 }
0x1c0a   : > { %v4920_v37 = vsel %vm3250_vm15, %v4916_v0, 0.0  ;;  %v8522_v12 = vpack.i.bf16 %v4926_v52, %v4925_v8  ;;  %v4939_v2 = vmul.f32 %v4919_v62, %v11880_v14  ;;  %v4930_v47 = vmul.f32 %v4918_v7, %v11870_v3  ;;  %v8863_v8 = vld [vmem:[#allocation49 + $0x8] ss:$12 sps:$4 sm:$0xff]  }
0x1c0b   : > { %8503 = vrot.lane.b32.xlu1 %v8502_v11, %s10247_s1  ;;  %7384 = vmatpush3.bf16.msra.mxu0 %v5053_v5  ;;  %v8507_v61 = vpack.i.bf16 %v4920_v37, %v4919_v62  ;;  %v4936_v25 = vmul.f32 %v4920_v37, %v11882_v44  ;;  %v4924_v45 = vmul.f32 %v4920_v37, %v11863_v9 }
0x1c0c   : > { %7385 = vmatprep.subr.bf16.mxu0 %v5062_v15  ;;  %v4928_v44 = vmul.f32 %v4920_v37, %v11873_v18  ;;  %v8517_v9 = vpack.i.bf16 %v4938_v29, %v4937_v38  ;;  %v4927_v15 = vmul.f32 %v4919_v62, %v11873_v18  ;;  %v4940_v26 = vmul.f32 %v4920_v37, %v11880_v14 }
0x1c0d   : > { %8508 = vrot.lane.b32.xlu0 %v8507_v61, %s10227_s11  ;;  %v8512_v20 = vpack.i.bf16 %v4936_v25, %v4935_v30  ;;  %v5054_v1 = vpack.c.bf16 %v4924_v45, %v4923_v4  ;;  %v4929_v11 = vmul.f32 %v12161_v51, %v11870_v3  ;;  %v4932_v18 = vmul.f32 %v4920_v37, %v11870_v3  ;;  %v8860_v30 = vld [vmem:[#allocation49 + $0x4] ss:$12 sps:$4 sm:$0xff]  }
0x1c0e   : > { %v8537_v17 = vpack.i.bf16 %v4928_v44, %v4927_v15  ;;  %v8527_v0 = vpack.i.bf16 %v4940_v26, %v4939_v2  ;;  %v4931_v4 = vmul.f32 %v4919_v62, %v11870_v3  ;;  %5159 = vmatprep.mubr.bf16.mxu0 %v8860_v30  ;;  %v4944_v52 = vmul.f32 %v4920_v37, %v11891_v56  ;;  %v4893_v37 = vld [vmem:[#allocation50] sm:$0xff] }
0x1c0f   : > { %8513 = vrot.lane.b32.xlu1 %v8512_v20, %s10247_s1  ;;  %7386 = vmatpush3.bf16.msra.mxu0 %v5054_v1  ;;  %v8542_v5 = vpack.i.bf16 %v4930_v47, %v4929_v11  ;;  %v4943_v25 = vmul.f32 %v4919_v62, %v11891_v56  ;;  %v4942_v45 = vmul.f32 %v4918_v7, %v11891_v56  ;;  %v4896_v62 = vld [vmem:[#allocation50 + $0x18] sm:$0xff]  ;;  %v4895_v7 = vld [vmem:[#allocation50 + $0x10] sm:$0xff]  ;;  %s7203_s1 = sshll.u32 %s10491_s22, 7  ;;  %s10249_s22 = smov [#allocation67]  }
0x1c10   : > { %v8552_v14 = vpack.i.bf16 %v4932_v18, %v4931_v4  ;;  %v4941_v1 = vmul.f32 %v12161_v51, %v11891_v56  ;;  %7512 = vmatprep.mubr.msk.bf16.mxu1 %vm1965_vm4, %v8863_v8 }
0x1c11   : > { %8523 = vrot.lane.b32.xlu0 %v8522_v12, %s10228_s12  ;;  %v8562_v20 = vpack.i.bf16 %v4944_v52, %v4943_v25 }
0x1c12   : > { %v8557_v3 = vpack.i.bf16 %v4942_v45, %v4941_v1 }
0x1c13   : > { %8518 = vrot.lane.b32.xlu1 %v8517_v9, %s10239_s14 }
0x1c15   : > { %8538 = vrot.lane.b32.xlu0 %v8537_v17, %s10228_s12 }
0x1c17   : > { %8528 = vrot.lane.b32.xlu1 %v8527_v0, %s10239_s14 }
0x1c19   : > { %8543 = vrot.lane.b32.xlu0 %v8542_v5, %s10246_s8 }
0x1c1b   : > { %8533 = vrot.lane.b32.xlu1 %v8497_v35, %s10248_s13  ;;  %v4894_v35 = vld [vmem:[#allocation50 + $0x8] sm:$0xff] }
0x1c1d   : > { %8553 = vrot.lane.b32.xlu0 %v8552_v14, %s10246_s8  ;;  %s12946_s8 = smov 94  }
0x1c1f   : > { %8548 = vrot.lane.b32.xlu1 %v8507_v61, %s10248_s13  ;;  %s12989_s13 = sshll.u32 %s11209_s0, 3 }
0x1c21   : > { %8563 = vrot.lane.b32.xlu0 %v8562_v20, %s10240_s2 }
0x1c23   : > { %8558 = vrot.lane.b32.xlu1 %v8557_v3, %s10240_s2 }
0x1c25   : > { %5078 = vperm.xlu0 %8040, %v4894_v35  }
0x1c27   : > { %5073 = vperm.xlu1 %8111, %v4893_v37  }
0x1c29   : > { %5088 = vperm.xlu0 %8040, %v4896_v62  }
0x1c2b   : > { %5083 = vperm.xlu1 %8111, %v4895_v7  }
0x1c7b   : > { %v8499_v61 = vpop.permute.xlu0 %8498 }
0x1c7c   : > { %v8501_v29 = vunpack.i.h.bf16 %v8499_v61  ;;  %v8500_v12 = vunpack.i.l.bf16 %v8499_v61 }
0x1c7d   : > { %v8504_v56 = vpop.permute.xlu1 %8503 }
0x1c7e   : > { %v8506_v51 = vunpack.i.h.bf16 %v8504_v56  ;;  %v8505_v38 = vunpack.i.l.bf16 %v8504_v56  ;;  %v5055_v15 = vpack.c.bf16 %v8501_v29, %v8500_v12 }
0x1c7f   : > { %v8509_v44 = vpop.permute.xlu0 %8508 }
0x1c80   : > { %v5063_v9 = vpack.c.bf16 %v8506_v51, %v8505_v38  ;;  %v8511_v26 = vunpack.i.h.bf16 %v8509_v44  ;;  %v8510_v17 = vunpack.i.l.bf16 %v8509_v44 }
0x1c81   : > { %v8514_v2 = vpop.permute.xlu1 %8513 }
0x1c82   : > { %v8516_v47 = vunpack.i.h.bf16 %v8514_v2  ;;  %v8515_v0 = vunpack.i.l.bf16 %v8514_v2  ;;  %7387 = vmatprep.subr.bf16.mxu0 %v5063_v9  ;;  %v5056_v18 = vpack.c.bf16 %v8511_v26, %v8510_v17 }
0x1c83   : > { %v8524_v11 = vpop.permute.xlu0 %8523  ;;  %7388 = vmatpush3.bf16.msra.mxu0 %v5055_v15 }
0x1c84   : > { %v5064_v5 = vpack.c.bf16 %v8516_v47, %v8515_v0  ;;  %v8526_v30 = vunpack.i.h.bf16 %v8524_v11  ;;  %v8525_v4 = vunpack.i.l.bf16 %v8524_v11 }
0x1c85   : > { %v8519_v14 = vpop.permute.xlu1 %8518 }
0x1c86   : > { %v8521_v52 = vunpack.i.h.bf16 %v8519_v14  ;;  %v8520_v25 = vunpack.i.l.bf16 %v8519_v14  ;;  %7389 = vmatprep.subr.bf16.mxu0 %v5064_v5  ;;  %v5057_v1 = vpack.c.bf16 %v8526_v30, %v8525_v4 }
0x1c87   : > { %v8539_v45 = vpop.permute.xlu0 %8538  ;;  %7390 = vmatpush3.bf16.msra.mxu0 %v5056_v18 }
0x1c88   : > { %v5065_v20 = vpack.c.bf16 %v8521_v52, %v8520_v25  ;;  %v8541_v8 = vunpack.i.h.bf16 %v8539_v45  ;;  %v8540_v3 = vunpack.i.l.bf16 %v8539_v45 }
0x1c89   : > { %v8529_v35 = vpop.permute.xlu1 %8528 }
0x1c8a   : > { %v8531_v37 = vunpack.i.h.bf16 %v8529_v35  ;;  %v8530_v62 = vunpack.i.l.bf16 %v8529_v35  ;;  %7391 = vmatprep.subr.bf16.mxu0 %v5065_v20  ;;  %v5058_v29 = vpack.c.bf16 %v8541_v8, %v8540_v3  ;;  %v8858_v20 = vld [vmem:[#allocation49] ss:$12 sps:$4 sm:$0xff]   ;;  %v8864_v35 = vld [vmem:[#allocation49 + $0x18] ss:$12 sps:$4 sm:$0xff]  }
0x1c8b   : > { %v8544_v7 = vpop.permute.xlu0 %8543  ;;  %7392 = vmatpush3.bf16.msra.mxu0 %v5057_v1  ;;  %v8861_v1 = vld [vmem:[#allocation49 + $0x1c] ss:$12 sps:$4 sm:$0xff]  }
0x1c8c   : > { %v5066_v61 = vpack.c.bf16 %v8531_v37, %v8530_v62  ;;  %v8546_v12 = vunpack.i.h.bf16 %v8544_v7  ;;  %v8545_v56 = vunpack.i.l.bf16 %v8544_v7  ;;  %v8865_v37 = vld [vmem:[#allocation49 + $0x20] ss:$12 sps:$4 sm:$0xff]   ;;  %v5237_v62 = vld [vmem:[#allocation13] sm:$0xff] }
0x1c8d   : > { %v8534_v51 = vpop.permute.xlu1 %8533  ;;  %v5238_v7 = vld [vmem:[#allocation13 + $0x8] sm:$0xff] }
0x1c8e   : > { %v8536_v38 = vunpack.i.h.bf16 %v8534_v51  ;;  %v8535_v44 = vunpack.i.l.bf16 %v8534_v51  ;;  %7393 = vmatprep.subr.bf16.mxu0 %v5066_v61  ;;  %v5059_v26 = vpack.c.bf16 %v8546_v12, %v8545_v56  ;;  %v7574_v61 = vpack.c.bf16 %v5238_v7, %v5237_v62 }
0x1c8f   : > { %v8554_v9 = vpop.permute.xlu0 %8553  ;;  %7394 = vmatpush3.bf16.msra.mxu0 %v5058_v29 }
0x1c90   : > { %v5067_v15 = vpack.c.bf16 %v8536_v38, %v8535_v44  ;;  %v8556_v17 = vunpack.i.h.bf16 %v8554_v9  ;;  %v8555_v2 = vunpack.i.l.bf16 %v8554_v9 }
0x1c91   : > { %v8549_v47 = vpop.permute.xlu1 %8548 }
0x1c92   : > { %v8551_v0 = vunpack.i.h.bf16 %v8549_v47  ;;  %v8550_v11 = vunpack.i.l.bf16 %v8549_v47  ;;  %7395 = vmatprep.subr.bf16.mxu0 %v5067_v15  ;;  %v5060_v30 = vpack.c.bf16 %v8556_v17, %v8555_v2 }
0x1c93   : > { %v8564_v5 = vpop.permute.xlu0 %8563  ;;  %7396 = vmatpush3.bf16.msra.mxu0 %v5059_v26 }
0x1c94   : > { %v5068_v18 = vpack.c.bf16 %v8551_v0, %v8550_v11  ;;  %v8566_v14 = vunpack.i.h.bf16 %v8564_v5  ;;  %v8565_v52 = vunpack.i.l.bf16 %v8564_v5 }
0x1c95   : > { %v8559_v4 = vpop.permute.xlu1 %8558 }
0x1c96   : > { %v8561_v25 = vunpack.i.h.bf16 %v8559_v4  ;;  %v8560_v45 = vunpack.i.l.bf16 %v8559_v4  ;;  %7397 = vmatprep.subr.bf16.mxu0 %v5068_v18  ;;  %v5070_v3 = vpack.c.bf16 %v8566_v14, %v8565_v52 }
0x1c97   : > { %7398 = vmatpush3.bf16.msra.mxu0 %v5060_v30 }
0x1c98   : > { %v5069_v8 = vpack.c.bf16 %v8561_v25, %v8560_v45  ;;  %7421 = vmatprep.subr.bf16.mxu0 %v11817_v10 }
0x1c9a   : > { %5160 = vmatmul.mubr.bf16.vlgmr.msra.gmra.mrb[40].mxu0 %v8858_v20  ;;  %7508 = vmatprep.subr.bf16.mxu1 %v5069_v8 }
0x1c9b   : > { %7509 = vmatpush3.bf16.msra.mxu1 %v5069_v8  ;;  %5167 = vmatprep.mubr.bf16.mxu0 %v8861_v1 }
0x1c9c   : > { %7510 = vmatprep.subr.bf16.mxu1 %v5070_v3 }
0x1c9f   : > { %7511 = vmatpush3.bf16.msra.mxu1 %v5070_v3 }
0x1ca0   : > { %7575 = vmatprep.subr.bf16.mxu1 %v7574_v61 }
0x1ca2   : > { %5168 = vmatmul.mubr.bf16.gmra.mrb[44].mxu0 %v8864_v35  ;;  %7513 = vmatmul.mubr.msk.bf16.vlgmr.msra.gmra.mrb[48].mxu1 %vm1965_vm4, %v8865_v37 }
0x1ca3   : > { %7577 = vmatpush3.bf16.msra.mxu1 %v7574_v61 }
0x1ca4   : > { %5590 = vmatprep.subr.bf16.mxu1 %v12937_v6  ;;  %v5079_v9 = vpop.permute.xlu0 %5078 }
0x1ca6   : > { %v5074_v29 = vpop.permute.xlu1 %5073 }
0x1ca8   : > { %v5089_v1 = vpop.permute.xlu0 %5088 }
0x1caa   : > { %v5084_v15 = vpop.permute.xlu1 %5083 }
0x1d6d   : > { %v7399_v10 = vpop.f32.mrb[40].mxu0 }
0x1d6e   : > { %v7400_v12 = vpop.f32.mrb[41].mxu0 }
0x1d6f   : > { %v7401_v56 = vadd.f32 %v7400_v12, %v7399_v10  ;;  %v7402_v51 = vpop.f32.mrb[42].mxu0 }
0x1d70   : > { %v7403_v38 = vpop.f32.mrb[43].mxu0 }
0x1d71   : > { %v7404_v44 = vadd.f32 %v7403_v38, %v7402_v51  ;;  %v5162_v2 = vadd.f32 %v7401_v56, %v5074_v29 }
0x1d73   : > { %v5165_v14 = vadd.f32 %v7404_v44, %v5079_v9 }
0x1d75   : > { %v7405_v26 = vpop.f32.mrb[44].mxu0  ;;  %v7514_v17 = vpop.f32.mrb[48].mxu1 }
0x1d76   : > { %v7406_v47 = vpop.f32.mrb[45].mxu0  ;;  %v5210_v0 = vpop.f32.mrb[49].mxu1 }
0x1d77   : > { %v7407_v11 = vadd.f32 %v7406_v47, %v7405_v26  ;;  %v5211_v5 = vadd.f32 %v5210_v0, %v5162_v2  ;;  %v7408_v18 = vpop.f32.mrb[46].mxu0  ;;  %v7515_v30 = vpop.f32.mrb[50].mxu1 }
0x1d78   : > { %v7409_v4 = vpop.f32.mrb[47].mxu0  ;;  %v5213_v52 = vpop.f32.mrb[51].mxu1 }
0x1d79   : > { %v5170_v25 = vadd.f32 %v7407_v11, %v5084_v15  ;;  %vm5225_vm4 = vcmp.ge.f32.partialorder %v5211_v5, 0.0  ;;  %v5229_v45 = vmul.f32 0.01, %v5211_v5  ;;  %v7410_v20 = vadd.f32 %v7409_v4, %v7408_v18 }
0x1d7a   : > { %v5214_v8 = vadd.f32 %v5213_v52, %v5165_v14 }
0x1d7b   : > { %v5219_v3 = vadd.f32 %v7514_v17, %v5170_v25  ;;  %v5173_v35 = vadd.f32 %v7410_v20, %v5089_v1  ;;  %v5233_v37 = vsel %vm5225_vm4, %v5211_v5, %v5229_v45 }
0x1d7c   : > { %vm5226_vm5 = vcmp.ge.f32.partialorder %v5214_v8, 0.0  ;;  %v5230_v62 = vmul.f32 0.01, %v5214_v8  ;;  %7520 = vmatprep.mubr.msk.f32.mxu1 %vm1921_vm1, %v5233_v37 }
0x1d7d   : > { %v5222_v7 = vadd.f32 %v7515_v30, %v5173_v35  ;;  %vm5227_vm15 = vcmp.ge.f32.partialorder %v5219_v3, 0.0  ;;  %v5231_v61 = vmul.f32 0.01, %v5219_v3 }
0x1d7e   : > { %v5234_v10 = vsel %vm5226_vm5, %v5214_v8, %v5230_v62 }
0x1d7f   : > { %7521 = vmatmul.mubr.msk.f32.vlgmr.msra.gmra.mrb[10].mxu1 %vm1921_vm1, %v5234_v10  ;;  %v5235_v29 = vsel %vm5227_vm15, %v5219_v3, %v5231_v61  ;;  %vm5228_vm9 = vcmp.ge.f32.partialorder %v5222_v7, 0.0  ;;  %v5232_v12 = vmul.f32 0.01, %v5222_v7 }
0x1d80   : > { %7523 = vmatprep.mubr.msk.f32.mxu1 %vm1921_vm1, %v5235_v29 }
0x1d81   : > { %v5236_v56 = vsel %vm5228_vm9, %v5222_v7, %v5232_v12  ;;  %vm12963_vm9 = vcmask 777216  }
0x1d83   : > { %7524 = vmatmul.mubr.msk.f32.gmra.mrb[52].mxu1 %vm1921_vm1, %v5236_v56 }
0x1e52   : > { %v12222_v51 = vpop.f32.mrb[10].mxu1 }
0x1e53   : > { %v12224_v38 = vpop.f32.mrb[11].mxu1 }
0x1e54   : > { %v5506_v44 = vpack.c.bf16 %v12222_v51, %v12224_v38 }
0x1e56   : > { %v12228_v9 = vpop.f32.mrb[52].mxu1 }
0x1e57   : > { %5352 = vrot.lane.b32.xlu0 %v12228_v9, %s10236_s7  ;;  %v12232_v15 = vpop.f32.mrb[53].mxu1 }
0x1e58   : > { %v5507_v26 = vpack.c.bf16 %v12228_v9, %v12232_v15  ;;  %5350 = vrot.lane.b32.xlu1 %v12232_v15, %s10236_s7 }
0x1e5b   : > { %5348 = vrot.lane.b32.xlu0 %v12222_v51, %s10236_s7 }
0x1e5c   : > { %5346 = vrot.lane.b32.xlu1 %v12224_v38, %s10236_s7 }
0x1ec9   : > { %v5353_v17 = vpop.permute.xlu0 %5352 }
0x1eca   : > { %v5361_v2 = vsel %vm2665_vm3, 0.0, %v5353_v17  ;;  %v5351_v47 = vpop.permute.xlu1 %5350 }
0x1ecb   : > { %v5365_v0 = vsel %vm2667_vm14, %v5361_v2, 0.0  ;;  %v5360_v11 = vsel %vm2665_vm3, 0.0, %v5351_v47 }
0x1ecc   : > { %v5364_v5 = vsel %vm2667_vm14, %v5360_v11, 0.0  ;;  %v5381_v18 = vmul.f32 %v5365_v0, %v11709_v57  ;;  %v5385_v10 = vmul.f32 %v5365_v0, %v11717_v13  ;;  %v5377_v29 = vmul.f32 %v5365_v0, %v11711_v55 }
0x1ecd   : > { %v5349_v30 = vpop.permute.xlu0 %5348  ;;  %v5380_v4 = vmul.f32 %v5364_v5, %v11709_v57  ;;  %v5384_v61 = vmul.f32 %v5364_v5, %v11717_v13  ;;  %v5376_v2 = vmul.f32 %v5364_v5, %v11711_v55  ;;  %v5368_v47 = vmul.f32 %v5364_v5, %v11729_v39 }
0x1ece   : > { %v5359_v14 = vsel %vm2665_vm3, 0.0, %v5349_v30  ;;  %v5347_v52 = vpop.permute.xlu1 %5346  ;;  %v5369_v11 = vmul.f32 %v5365_v0, %v11729_v39 }
0x1ecf   : > { %v5363_v25 = vsel %vm2667_vm14, %v5359_v14, 0.0  ;;  %v5358_v45 = vsel %vm2665_vm3, 0.0, %v5347_v52  ;;  %v8567_v20 = vpack.i.bf16 %v5381_v18, %v5380_v4  ;;  %v8582_v18 = vpack.i.bf16 %v5385_v10, %v5384_v61 }
0x1ed0   : > { %v5362_v1 = vsel %vm2667_vm14, %v5358_v45, 0.0  ;;  %v5383_v8 = vmul.f32 %v5363_v25, %v11717_v13  ;;  %v5375_v3 = vmul.f32 %v5363_v25, %v11711_v55  ;;  %v5367_v35 = vmul.f32 %v5363_v25, %v11729_v39 }
0x1ed1   : > { %8568 = vrot.lane.b32.xlu1 %v8567_v20, %s10240_s2  ;;  %v5382_v37 = vmul.f32 %v5362_v1, %v11717_v13  ;;  %v5374_v62 = vmul.f32 %v5362_v1, %v11711_v55  ;;  %v5366_v7 = vmul.f32 %v5362_v1, %v11729_v39  ;;  %v8587_v30 = vpack.i.bf16 %v5377_v29, %v5376_v2  ;;  %v8868_v29 = vld [vmem:[#allocation52 + $0x4] ss:$16 sps:$4 sm:$0xff]  }
0x1ed2   : > { %v5499_v4 = vpack.c.bf16 %v5369_v11, %v5368_v47  ;;  %v8592_v14 = vpack.i.bf16 %v5363_v25, %v5362_v1  ;;  %v8602_v52 = vpack.i.bf16 %v5365_v0, %v5364_v5  ;;  %v5386_v45 = vmul.f32 %v5362_v1, %v11722_v16  ;;  %5581 = vmatprep.mubr.bf16.mxu0 %v8868_v29  ;;  %v5340_v47 = vld [vmem:[#allocation53] sm:$0xff]  ;;  %v8871_v11 = vld [vmem:[#allocation52 + $0xc] ss:$16 sps:$4 sm:$0xff]  }
0x1ed3   : > { %v8572_v12 = vpack.i.bf16 %v5383_v8, %v5382_v37  ;;  %v8577_v56 = vpack.i.bf16 %v5375_v3, %v5374_v62  ;;  %v5498_v17 = vpack.c.bf16 %v5367_v35, %v5366_v7  ;;  %v5387_v20 = vmul.f32 %v5363_v25, %v11722_v16  ;;  %7184 = vmatprep.mubr.msk.bf16.mxu1 %vm5545_vm10, %v8871_v11  ;;  %vm12964_vm10 = vmmov %vm12963_vm9 }
0x1ed4   : > { %v5370_v8 = vmul.f32 %v5362_v1, %v11703_v53  ;;  %v5371_v3 = vmul.f32 %v5363_v25, %v11703_v53  ;;  %v5372_v35 = vmul.f32 %v5364_v5, %v11703_v53  ;;  %v5373_v37 = vmul.f32 %v5365_v0, %v11703_v53 }
0x1ed5   : > { %8573 = vrot.lane.b32.xlu0 %v8572_v12, %s12939_s6  ;;  %8578 = vrot.lane.b32.xlu1 %v8577_v56, %s10239_s14  ;;  %v8617_v62 = vpack.i.bf16 %v5387_v20, %v5386_v45  ;;  %v5378_v61 = vmul.f32 %v5362_v1, %v11709_v57  ;;  %v5379_v10 = vmul.f32 %v5363_v25, %v11709_v57  ;;  %v5341_v25 = vld [vmem:[#allocation53 + $0x8] sm:$0xff] }
0x1ed6   : > { %7422 = vmatpush3.bf16.msra.mxu0 %v5498_v17  ;;  %v8612_v7 = vpack.i.bf16 %v5371_v3, %v5370_v8  ;;  %v8627_v12 = vpack.i.bf16 %v5373_v37, %v5372_v35  ;;  %v5388_v17 = vmul.f32 %v5364_v5, %v11722_v16  ;;  %v5389_v2 = vmul.f32 %v5365_v0, %v11722_v16 }
0x1ed7   : > { %v8622_v56 = vpack.i.bf16 %v5379_v10, %v5378_v61 }
0x1ed8   : > { %v8632_v1 = vpack.i.bf16 %v5389_v2, %v5388_v17 }
0x1ed9   : > { %8583 = vrot.lane.b32.xlu0 %v8582_v18, %s12939_s6  ;;  %8588 = vrot.lane.b32.xlu1 %v8587_v30, %s10239_s14 }
0x1edd   : > { %8593 = vrot.lane.b32.xlu0 %v8592_v14, %s10227_s11  ;;  %8598 = vrot.lane.b32.xlu1 %v8592_v14, %s12940_s15 }
0x1ee1   : > { %8603 = vrot.lane.b32.xlu0 %v8602_v52, %s10227_s11  ;;  %8608 = vrot.lane.b32.xlu1 %v8602_v52, %s12940_s15 }
0x1ee5   : > { %8618 = vrot.lane.b32.xlu1 %v8617_v62, %s12941_s3  ;;  %8613 = vrot.lane.b32.xlu0 %v8612_v7, %s10228_s12 }
0x1ee9   : > { %8628 = vrot.lane.b32.xlu1 %v8627_v12, %s10228_s12  ;;  %8623 = vrot.lane.b32.xlu0 %v8622_v56, %s10240_s2 }
0x1eed   : > { %5518 = vperm.xlu1 %8111, %v5340_v47   ;;  %8633 = vrot.lane.b32.xlu0 %v8632_v1, %s12941_s3 }
0x1ef1   : > { %5523 = vperm.xlu0 %8040, %v5341_v25  }
0x1f43   : > { %v8569_v18 = vpop.permute.xlu1 %8568 }
0x1f44   : > { %v8571_v30 = vunpack.i.h.bf16 %v8569_v18  ;;  %v8570_v5 = vunpack.i.l.bf16 %v8569_v18 }
0x1f46   : > { %v5509_v14 = vpack.c.bf16 %v8571_v30, %v8570_v5 }
0x1f47   : > { %v8574_v0 = vpop.permute.xlu0 %8573  ;;  %v8579_v52 = vpop.permute.xlu1 %8578 }
0x1f48   : > { %v8581_v45 = vunpack.i.h.bf16 %v8579_v52  ;;  %v8580_v20 = vunpack.i.l.bf16 %v8579_v52  ;;  %5591 = vmatpush1.bf16.msra.mxu1 %v5509_v14  ;;  %v8576_v8 = vunpack.i.h.bf16 %v8574_v0  ;;  %v8575_v3 = vunpack.i.l.bf16 %v8574_v0 }
0x1f49   : > { %5592 = vmatprep.subr.bf16.mxu1 %v12937_v6 }
0x1f4a   : > { %v5504_v35 = vpack.c.bf16 %v8581_v45, %v8580_v20  ;;  %v5510_v10 = vpack.c.bf16 %v8576_v8, %v8575_v3 }
0x1f4b   : > { %v8584_v37 = vpop.permute.xlu0 %8583  ;;  %v8589_v62 = vpop.permute.xlu1 %8588 }
0x1f4c   : > { %v8591_v7 = vunpack.i.h.bf16 %v8589_v62  ;;  %v8590_v61 = vunpack.i.l.bf16 %v8589_v62  ;;  %7423 = vmatprep.subr.bf16.mxu0 %v5504_v35  ;;  %5593 = vmatpush1.bf16.msra.mxu1 %v11827_v31  ;;  %v8586_v29 = vunpack.i.h.bf16 %v8584_v37  ;;  %v8585_v12 = vunpack.i.l.bf16 %v8584_v37 }
0x1f4d   : > { %7424 = vmatpush3.bf16.msra.mxu0 %v5499_v4  ;;  %5594 = vmatprep.subr.bf16.mxu1 %v12937_v6 }
0x1f4e   : > { %v5505_v56 = vpack.c.bf16 %v8591_v7, %v8590_v61  ;;  %v5511_v25 = vpack.c.bf16 %v8586_v29, %v8585_v12 }
0x1f4f   : > { %v8594_v17 = vpop.permute.xlu0 %8593  ;;  %v8599_v2 = vpop.permute.xlu1 %8598 }
0x1f50   : > { %v8596_v47 = vunpack.i.h.bf16 %v8594_v17  ;;  %v8595_v1 = vunpack.i.l.bf16 %v8594_v17  ;;  %7425 = vmatprep.subr.bf16.mxu0 %v5505_v56  ;;  %5595 = vmatpush1.bf16.msra.mxu1 %v5510_v10  ;;  %v8601_v5 = vunpack.i.h.bf16 %v8599_v2  ;;  %v8600_v14 = vunpack.i.l.bf16 %v8599_v2  ;;  %v8869_v17 = vld [vmem:[#allocation52 + $0x8] ss:$16 sps:$4 sm:$0xff]  }
0x1f51   : > { %7426 = vmatpush3.bf16.msra.mxu0 %v11795_v42  ;;  %5596 = vmatprep.subr.bf16.mxu1 %v12937_v6 }
0x1f52   : > { %v5500_v11 = vpack.c.bf16 %v8596_v47, %v8595_v1  ;;  %7427 = vmatprep.subr.bf16.mxu0 %v11821_v46  ;;  %v5512_v46 = vpack.c.bf16 %v8601_v5, %v8600_v14 }
0x1f53   : > { %v8604_v31 = vpop.permute.xlu0 %8603  ;;  %v8609_v4 = vpop.permute.xlu1 %8608 }
0x1f54   : > { %v8606_v18 = vunpack.i.h.bf16 %v8604_v31  ;;  %v8605_v30 = vunpack.i.l.bf16 %v8604_v31  ;;  %5597 = vmatpush1.bf16.msra.mxu1 %v5511_v25  ;;  %v8611_v45 = vunpack.i.h.bf16 %v8609_v4  ;;  %v8610_v20 = vunpack.i.l.bf16 %v8609_v4 }
0x1f55   : > { %7428 = vmatpush3.bf16.msra.mxu0 %v5500_v11  ;;  %5598 = vmatprep.subr.bf16.mxu1 %v12937_v6 }
0x1f56   : > { %v5501_v0 = vpack.c.bf16 %v8606_v18, %v8605_v30  ;;  %7429 = vmatprep.subr.bf16.mxu0 %v5506_v44 }
0x1f57   : > { %v8614_v42 = vpop.permute.xlu0 %8613  ;;  %v8619_v52 = vpop.permute.xlu1 %8618 }
0x1f58   : > { %5599 = vmatpush1.bf16.msra.mxu1 %v11831_v60  ;;  %v8616_v8 = vunpack.i.h.bf16 %v8614_v42  ;;  %v8615_v3 = vunpack.i.l.bf16 %v8614_v42  ;;  %v5513_v60 = vpack.c.bf16 %v8611_v45, %v8610_v20  ;;  %v8621_v9 = vunpack.i.h.bf16 %v8619_v52 }
0x1f59   : > { %7430 = vmatpush3.bf16.msra.mxu0 %v5501_v0  ;;  %5600 = vmatprep.subr.bf16.mxu1 %v12937_v6  ;;  %v8620_v15 = vunpack.i.l.bf16 %v8619_v52 }
0x1f5a   : > { %7431 = vmatprep.subr.bf16.mxu0 %v5507_v26  ;;  %v5502_v44 = vpack.c.bf16 %v8616_v8, %v8615_v3 }
0x1f5b   : > { %v8624_v35 = vpop.permute.xlu0 %8623  ;;  %v8629_v38 = vpop.permute.xlu1 %8628 }
0x1f5c   : > { %v8626_v37 = vunpack.i.h.bf16 %v8624_v35  ;;  %v8625_v51 = vunpack.i.l.bf16 %v8624_v35  ;;  %5601 = vmatpush1.bf16.msra.mxu1 %v5512_v46  ;;  %v8631_v62 = vunpack.i.h.bf16 %v8629_v38  ;;  %v8630_v7 = vunpack.i.l.bf16 %v8629_v38 }
0x1f5d   : > { %7432 = vmatpush3.bf16.msra.mxu0 %v11813_v54  ;;  %5602 = vmatprep.subr.bf16.mxu1 %v12937_v6  ;;  %v8866_v54 = vld [vmem:[#allocation52] ss:$16 sps:$4 sm:$0xff]  }
0x1f5e   : > { %7433 = vmatprep.subr.bf16.mxu0 %v11783_v21  ;;  %v5508_v61 = vpack.c.bf16 %v8626_v37, %v8625_v51  ;;  %v5503_v26 = vpack.c.bf16 %v8631_v62, %v8630_v7  ;;  %v5514_v21 = vpack.c.bf16 %v8621_v9, %v8620_v15 }
0x1f5f   : > { %v8634_v10 = vpop.permute.xlu0 %8633 }
0x1f60   : > { %5603 = vmatpush1.bf16.msra.mxu1 %v5513_v60  ;;  %v8636_v29 = vunpack.i.h.bf16 %v8634_v10  ;;  %v8635_v12 = vunpack.i.l.bf16 %v8634_v10 }
0x1f61   : > { %7434 = vmatpush3.bf16.msra.mxu0 %v5502_v44  ;;  %5604 = vmatprep.subr.bf16.mxu1 %v12937_v6 }
0x1f62   : > { %7435 = vmatprep.subr.bf16.mxu0 %v5508_v61  ;;  %v5515_v56 = vpack.c.bf16 %v8636_v29, %v8635_v12 }
0x1f64   : > { %5605 = vmatpush1.bf16.msra.mxu1 %v11835_v19  ;;  %v12942_v19 = vmov 0.0  }
0x1f65   : > { %7436 = vmatpush3.bf16.msra.mxu0 %v5503_v26  ;;  %5606 = vmatprep.subr.bf16.mxu1 %v12937_v6 }
0x1f66   : > { %5750 = vmatprep.subr.bf16.mxu0 %v12937_v6 }
0x1f68   : > { %5582 = vmatmul.mubr.bf16.vlgmr.msra.gmra.mrb[48].mxu0 %v8866_v54  ;;  %5607 = vmatpush1.bf16.msra.mxu1 %v5514_v21 }
0x1f69   : > { %5608 = vmatprep.subr.bf16.mxu1 %v12937_v6 }
0x1f6c   : > { %5609 = vmatpush1.bf16.msra.mxu1 %v5515_v56  ;;  %v5519_v4 = vpop.permute.xlu1 %5518 }
0x1f6d   : > { %5610 = vmatprep.subr.bf16.mxu1 %v12937_v6 }
0x1f70   : > { %5611 = vmatpush1.bf16.msra.mxu1 %v11839_v40  ;;  %v5524_v30 = vpop.permute.xlu0 %5523 }
0x1f73   : > { %5623 = vmatmul.mubr.bf16.vlgmr.msra.gmra.mrb[56].mxu1 %v8869_v17 }
0x1f74   : > { %5883 = vmatprep.mubr.f32.mxu1 %v12942_v19 }
0x203b   : > { %v7437_v2 = vpop.f32.mrb[48].mxu0 }
0x203c   : > { %v7438_v47 = vpop.f32.mrb[49].mxu0 }
0x203d   : > { %v7439_v1 = vadd.f32 %v7438_v47, %v7437_v2  ;;  %v7440_v25 = vpop.f32.mrb[50].mxu0 }
0x203e   : > { %v7441_v11 = vpop.f32.mrb[51].mxu0 }
0x203f   : > { %v7442_v31 = vadd.f32 %v7441_v11, %v7440_v25  ;;  %v5584_v18 = vadd.f32 %v7439_v1, %v5519_v4  ;;  %v5639_v25 = vld [vmem:[#allocation56] sm:$0xff]  ;;  %v5640_v11 = vld [vmem:[#allocation56 + $0x8] sm:$0xff] }
0x2040   : > { %v5800_v4 = vld [vmem:[#allocation14 + $0x18] sm:$0xff] }
0x2041   : > { %v5587_v42 = vadd.f32 %v7442_v31, %v5524_v30  ;;  %v8872_v31 = vld [vmem:[#allocation55 + $0x4] ss:$8 sps:$4 sm:$0xff]  }
0x2042   : > { %7187 = vmatprep.mubr.msk.bf16.mxu0 %vm1921_vm1, %v8872_v31 }
0x2046   : > { %v5624_v5 = vpop.f32.mrb[56].mxu1 }
0x2047   : > { %v5625_v14 = vadd.f32 %v5624_v5, %v5584_v18  ;;  %v5626_v0 = vpop.f32.mrb[57].mxu1  ;;  %v5797_v18 = vld [vmem:[#allocation14] sm:$0xff]  ;;  %v5799_v5 = vld [vmem:[#allocation14 + $0x10] sm:$0xff] }
0x2048   : > { %v5627_v52 = vpop.f32.mrb[58].mxu1  ;;  %v5804_v0 = vld [vmem:[#allocation14 + $0x38] sm:$0xff] }
0x2049   : > { %vm5631_vm11 = vcmp.ge.f32.partialorder %v5625_v14, 0.0  ;;  %v5633_v46 = vmul.f32 0.01, %v5625_v14  ;;  %v5628_v40 = vadd.f32 %v5627_v52, %v5587_v42  ;;  %v5629_v45 = vpop.f32.mrb[59].mxu1  ;;  %v5801_v52 = vld [vmem:[#allocation14 + $0x20] sm:$0xff] }
0x204a   : > { %v5808_v45 = vld [vmem:[#allocation14 + $0x58] sm:$0xff] }
0x204b   : > { %vm5632_vm13 = vcmp.ge.f32.partialorder %v5628_v40, 0.0  ;;  %v5634_v20 = vmul.f32 0.01, %v5628_v40  ;;  %v12314_v8 = vsel %vm5631_vm11, %v5625_v14, %v5633_v46  ;;  %v5802_v14 = vld [vmem:[#allocation14 + $0x28] sm:$0xff]  ;;  %v5803_v46 = vld [vmem:[#allocation14 + $0x30] sm:$0xff]  ;;  %vm12966_vm11 = vmmov %vm12963_vm9 }
0x204c   : > { %5643 = vrot.lane.b32.xlu1 %v12314_v8, %s10236_s7  ;;  %v7582_v42 = vpack.c.bf16 %v5804_v0, %v5802_v14  ;;  %v5811_v0 = vld [vmem:[#allocation14 + $0x70] sm:$0xff] }
0x204d   : > { %v12318_v3 = vsel %vm5632_vm13, %v5628_v40, %v5634_v20  ;;  %v5806_v40 = vld [vmem:[#allocation14 + $0x48] sm:$0xff]  ;;  %v7584_v20 = vpack.c.bf16 %v5803_v46, %v5801_v52  ;;  %vm12968_vm13 = vmmov %vm12963_vm9 }
0x204e   : > { %5645 = vrot.lane.b32.xlu0 %v12318_v3, %s10236_s7  ;;  %v5723_v35 = vpack.c.bf16 %v12318_v3, %v12314_v8  ;;  %s12943_s7 = smov 17  }
0x20be   : > { %v5644_v37 = vpop.permute.xlu1 %5643 }
0x20bf   : > { %v5649_v51 = vsel %vm2665_vm3, 0.0, %v5644_v37  ;;  %v7586_v37 = vpack.c.bf16 %v5808_v45, %v5806_v40 }
0x20c0   : > { %v5651_v38 = vsel %vm2667_vm14, %v5649_v51, 0.0  ;;  %v5646_v60 = vpop.permute.xlu0 %5645  ;;  %v5805_v51 = vld [vmem:[#allocation14 + $0x40] sm:$0xff] }
0x20c1   : > { %v5650_v44 = vsel %vm2665_vm3, 0.0, %v5646_v60  ;;  %v5655_v7 = vmul.f32 %v5651_v38, %v11703_v53  ;;  %v5653_v61 = vmul.f32 %v5651_v38, %v11729_v39  ;;  %v5657_v29 = vmul.f32 %v5651_v38, %v11711_v55 }
0x20c2   : > { %v5652_v62 = vsel %vm2667_vm14, %v5650_v44, 0.0  ;;  %v5659_v17 = vmul.f32 %v5651_v38, %v11709_v57  ;;  %v5661_v2 = vmul.f32 %v5651_v38, %v11717_v13  ;;  %v5663_v1 = vmul.f32 %v5651_v38, %v11722_v16 }
0x20c3   : > { %v8637_v9 = vpack.i.bf16 %v5652_v62, %v5651_v38  ;;  %v5656_v15 = vmul.f32 %v5652_v62, %v11703_v53  ;;  %v5654_v26 = vmul.f32 %v5652_v62, %v11729_v39  ;;  %v5658_v10 = vmul.f32 %v5652_v62, %v11711_v55  ;;  %v5807_v38 = vld [vmem:[#allocation14 + $0x50] sm:$0xff] }
0x20c4   : > { %v5660_v12 = vmul.f32 %v5652_v62, %v11709_v57  ;;  %v5662_v53 = vmul.f32 %v5652_v62, %v11717_v13  ;;  %v5664_v47 = vmul.f32 %v5652_v62, %v11722_v16  ;;  %v5798_v13 = vld [vmem:[#allocation14 + $0x8] sm:$0xff]  ;;  %v7580_v16 = vpack.c.bf16 %v5799_v5, %v5797_v18  ;;  %v5809_v5 = vld [vmem:[#allocation14 + $0x60] sm:$0xff] }
0x20c5   : > { %8638 = vrot.lane.b32.xlu1 %v8637_v9, %s10227_s11  ;;  %v8642_v54 = vpack.i.bf16 %v5656_v15, %v5655_v7  ;;  %v5719_v21 = vpack.c.bf16 %v5654_v26, %v5653_v61  ;;  %v8647_v56 = vpack.i.bf16 %v5658_v10, %v5657_v29  ;;  %v7578_v30 = vpack.c.bf16 %v5800_v4, %v5798_v13  ;;  %v5810_v18 = vld [vmem:[#allocation14 + $0x68] sm:$0xff] }
0x20c6   : > { %v8652_v39 = vpack.i.bf16 %v5660_v12, %v5659_v17  ;;  %v8657_v55 = vpack.i.bf16 %v5662_v53, %v5661_v2  ;;  %v8667_v57 = vpack.i.bf16 %v5664_v47, %v5663_v1  ;;  %v7588_v60 = vpack.c.bf16 %v5807_v38, %v5805_v51 }
0x20c7   : > { %8643 = vrot.lane.b32.xlu0 %v8642_v54, %s10228_s12  ;;  %5751 = vmatpush1.bf16.msra.mxu0 %v5719_v21  ;;  %vm6167_vm14 = vcmask 719872  }
0x20c8   : > { %5752 = vmatprep.subr.bf16.mxu0 %v12937_v6  ;;  %7579 = vmatprep.subr.bf16.mxu1 %v7578_v30  ;;  %v5812_v30 = vld [vmem:[#allocation14 + $0x78] sm:$0xff] }
0x20c9   : > { %8648 = vrot.lane.b32.xlu1 %v8647_v56, %s10239_s14  ;;  %7581 = vmatpush1.bf16.msra.mxu1 %v7580_v16  ;;  %v7590_v14 = vpack.c.bf16 %v5812_v30, %v5810_v18  ;;  %v7592_v16 = vpack.c.bf16 %v5811_v0, %v5809_v5  ;;  %s12944_s14 = smov 96  }
0x20ca   : > { %7583 = vmatprep.subr.bf16.mxu1 %v7582_v42 }
0x20cb   : > { %8653 = vrot.lane.b32.xlu0 %v8652_v39, %s10240_s2  ;;  %s12945_s2 = smov 95  }
0x20cd   : > { %8658 = vrot.lane.b32.xlu1 %v8657_v55, %s12939_s6  ;;  %7585 = vmatpush1.bf16.msra.mxu1 %v7584_v20 }
0x20ce   : > { %7587 = vmatprep.subr.bf16.mxu1 %v7586_v37 }
0x20cf   : > { %8663 = vrot.lane.b32.xlu0 %v8637_v9, %s12940_s15 }
0x20d1   : > { %8668 = vrot.lane.b32.xlu1 %v8667_v57, %s12941_s3  ;;  %7589 = vmatpush1.bf16.msra.mxu1 %v7588_v60 }
0x20d2   : > { %7591 = vmatprep.subr.bf16.mxu1 %v7590_v14 }
0x20d3   : > { %5730 = vperm.xlu0 %8040, %v5639_v25  }
0x20d5   : > { %5735 = vperm.xlu1 %8111, %v5640_v11   ;;  %7593 = vmatpush1.bf16.msra.mxu1 %v7592_v16 }
0x2137   : > { %v8639_v44 = vpop.permute.xlu1 %8638 }
0x2138   : > { %v8641_v62 = vunpack.i.h.bf16 %v8639_v44  ;;  %v8640_v7 = vunpack.i.l.bf16 %v8639_v44 }
0x2139   : > { %v8644_v61 = vpop.permute.xlu0 %8643 }
0x213a   : > { %v5720_v9 = vpack.c.bf16 %v8641_v62, %v8640_v7  ;;  %v8646_v15 = vunpack.i.h.bf16 %v8644_v61  ;;  %v8645_v26 = vunpack.i.l.bf16 %v8644_v61 }
0x213b   : > { %v8649_v10 = vpop.permute.xlu1 %8648 }
0x213c   : > { %5753 = vmatpush1.bf16.msra.mxu0 %v5720_v9  ;;  %v5721_v54 = vpack.c.bf16 %v8646_v15, %v8645_v26  ;;  %v8651_v21 = vunpack.i.h.bf16 %v8649_v10  ;;  %v8650_v29 = vunpack.i.l.bf16 %v8649_v10 }
0x213d   : > { %5754 = vmatprep.subr.bf16.mxu0 %v12937_v6  ;;  %v8654_v56 = vpop.permute.xlu0 %8653 }
0x213e   : > { %v5722_v12 = vpack.c.bf16 %v8651_v21, %v8650_v29  ;;  %v8656_v17 = vunpack.i.h.bf16 %v8654_v56  ;;  %v8655_v53 = vunpack.i.l.bf16 %v8654_v56 }
0x213f   : > { %v8659_v39 = vpop.permute.xlu1 %8658 }
0x2140   : > { %5755 = vmatpush1.bf16.msra.mxu0 %v5721_v54  ;;  %v5724_v2 = vpack.c.bf16 %v8656_v17, %v8655_v53  ;;  %v8661_v55 = vunpack.i.h.bf16 %v8659_v39  ;;  %v8660_v47 = vunpack.i.l.bf16 %v8659_v39 }
0x2141   : > { %5756 = vmatprep.subr.bf16.mxu0 %v12937_v6  ;;  %v8664_v1 = vpop.permute.xlu0 %8663 }
0x2142   : > { %v5725_v57 = vpack.c.bf16 %v8661_v55, %v8660_v47  ;;  %v8666_v25 = vunpack.i.h.bf16 %v8664_v1  ;;  %v8665_v11 = vunpack.i.l.bf16 %v8664_v1 }
0x2143   : > { %v8669_v31 = vpop.permute.xlu1 %8668 }
0x2144   : > { %5757 = vmatpush1.bf16.msra.mxu0 %v5722_v12  ;;  %v5726_v13 = vpack.c.bf16 %v8666_v25, %v8665_v11  ;;  %v8671_v4 = vunpack.i.h.bf16 %v8669_v31  ;;  %v8670_v8 = vunpack.i.l.bf16 %v8669_v31 }
0x2145   : > { %5758 = vmatprep.subr.bf16.mxu0 %v12937_v6 }
0x2146   : > { %v5727_v3 = vpack.c.bf16 %v8671_v4, %v8670_v8 }
0x2148   : > { %5759 = vmatpush1.bf16.msra.mxu0 %v5723_v35  ;;  %v8874_v35 = vld [vmem:[#allocation55] ss:$8 sps:$4 sm:$0xff]  }
0x2149   : > { %5760 = vmatprep.subr.bf16.mxu0 %v12937_v6 }
0x214c   : > { %5761 = vmatpush1.bf16.msra.mxu0 %v5724_v2 }
0x214d   : > { %5762 = vmatprep.subr.bf16.mxu0 %v12937_v6 }
0x2150   : > { %5763 = vmatpush1.bf16.msra.mxu0 %v5725_v57 }
0x2151   : > { %5764 = vmatprep.subr.bf16.mxu0 %v12937_v6 }
0x2152   : > { %v5731_v42 = vpop.permute.xlu0 %5730 }
0x2154   : > { %5765 = vmatpush1.bf16.msra.mxu0 %v5726_v13  ;;  %v5736_v45 = vpop.permute.xlu1 %5735 }
0x2155   : > { %5766 = vmatprep.subr.bf16.mxu0 %v12937_v6 }
0x2158   : > { %5767 = vmatpush1.bf16.msra.mxu0 %v5727_v3 }
0x215b   : > { %5783 = vmatmul.mubr.bf16.vlgmr.msra.gmra.mrb[52].mxu0 %v8874_v35 }
0x222e   : > { %v5784_v52 = vpop.f32.mrb[52].mxu0 }
0x222f   : > { %v5785_v46 = vadd.f32 %v5784_v52, %v5731_v42  ;;  %v5786_v40 = vpop.f32.mrb[53].mxu0 }
0x2230   : > { %v5787_v20 = vpop.f32.mrb[54].mxu0 }
0x2231   : > { %vm5791_vm1 = vcmp.ge.f32.partialorder %v5785_v46, 0.0  ;;  %v5793_v37 = vmul.f32 0.01, %v5785_v46  ;;  %v5788_v51 = vadd.f32 %v5787_v20, %v5736_v45  ;;  %v5789_v38 = vpop.f32.mrb[55].mxu0 }
0x2233   : > { %v5795_v60 = vsel %vm5791_vm1, %v5785_v46, %v5793_v37  ;;  %v5794_v44 = vmul.f32 0.01, %v5788_v51  ;;  %vm5792_vm3 = vcmp.ge.f32.partialorder %v5788_v51, 0.0  ;;  %vm12970_vm1 = vcmask 769024  }
0x2234   : > { %7188 = vmatmul.mubr.msk.f32.vlgmr.msra.gmra.mrb[54].mxu1 %vm3141_vm2, %v5795_v60 }
0x2235   : > { %5889 = vmatprep.mubr.f32.mxu1 %v12942_v19  ;;  %v5796_v62 = vsel %vm5792_vm3, %v5788_v51, %v5794_v44  ;;  %vm12972_vm3 = vmmov %vm12970_vm1 }
0x2238   : > { %7189 = vmatmul.mubr.msk.f32.gmra.mrb[60].mxu1 %vm3141_vm2, %v5796_v62  ;;  %vm12958_vm2 = vcmask 785408  }
0x2239   : > { %6392 = vmatprep.mubr.bf16.mxu1 %v12937_v6  ;;  %vm12960_vm4 = vmmov %vm12958_vm2 }
0x223a   : > { %vm12961_vm5 = vmmov %vm12958_vm2 }
0x223b   : > { %vm12962_vm15 = vmmov %vm12958_vm2 }
0x2307   : > { %v12363_v7 = vpop.f32.mrb[54].mxu1 }
0x2308   : > { %5902 = vrot.lane.b32.xlu0 %v12363_v7, %s12943_s7  ;;  %v12367_v61 = vpop.f32.mrb[55].mxu1 }
0x2309   : > { %5904 = vrot.lane.b32.xlu1 %v12367_v61, %s12943_s7 }
0x230b   : > { %v12371_v9 = vpop.f32.mrb[60].mxu1 }
0x230c   : > { %v6142_v15 = vpack.c.bf16 %v12371_v9, %v12363_v7  ;;  %5906 = vrot.lane.b32.xlu0 %v12371_v9, %s12943_s7  ;;  %v12377_v26 = vpop.f32.mrb[61].mxu1  ;;  %v12959_v9 = vld [vmem:[#allocation143_spill] sm:$0xff] }
0x230d   : > { %v6143_v6 = vpack.c.bf16 %v12377_v26, %v12367_v61  ;;  %5908 = vrot.lane.b32.xlu1 %v12377_v26, %s12943_s7 }
0x237a   : > { %v5903_v10 = vpop.permute.xlu0 %5902 }
0x237b   : > { %v5905_v54 = vpop.permute.xlu1 %5904  ;;  %v12394_v17 = vsel %vm1868_vm0, 0.0, %v5903_v10 }
0x237c   : > { %v12384_v21 = vsel %vm1868_vm0, %v5903_v10, %v5905_v54  ;;  %v12387_v29 = vsel %vm1868_vm0, %v5905_v54, 0.0  ;;  %v5922_v8 = vmul.f32 %v12394_v17, %v11467_v24  ;;  %v5926_v42 = vmul.f32 %v12394_v17, %v11373_v28 }
0x237d   : > { %v12391_v12 = vpack.i.bf16 %v12387_v29, %v12384_v21  ;;  %v5923_v2 = vmul.f32 %v12384_v21, %v11471_v23  ;;  %v5927_v55 = vmul.f32 %v12384_v21, %v11389_v34  ;;  %v5928_v25 = vmul.f32 %v12387_v29, %v11379_v32 }
0x237e   : > { %v5907_v56 = vpop.permute.xlu0 %5906  ;;  %v5933_v0 = vmul.f32 %v12384_v21, %v11384_v33  ;;  %v5934_v16 = vmul.f32 %v12387_v29, %v11371_v27  ;;  %v5932_v37 = vmul.f32 %v12394_v17, %v11359_v22  ;;  %v5939_v51 = vmul.f32 %v12384_v21, %v11406_v43 }
0x237f   : > { %v12397_v53 = vsel %vm1868_vm0, 0.0, %v5907_v56  ;;  %8673 = vrot.lane.b32.xlu0 %v12391_v12, %s10227_s11  ;;  %v5909_v39 = vpop.permute.xlu1 %5908  ;;  %v8682_v5 = vpack.i.bf16 %v5928_v25, %v5927_v55  ;;  %v5940_v38 = vmul.f32 %v12387_v29, %v11401_v41  ;;  %v5938_v10 = vmul.f32 %v12394_v17, %v11393_v36 }
0x2380   : > { %v12406_v47 = vsel %vm1868_vm0, %v5907_v56, %v5909_v39  ;;  %v12409_v1 = vsel %vm1868_vm0, %v5909_v39, 0.0  ;;  %v5924_v57 = vmul.f32 %v12397_v53, %v11467_v24  ;;  %v5929_v30 = vmul.f32 %v12397_v53, %v11373_v28 }
0x2381   : > { %v12417_v11 = vpack.i.bf16 %v12397_v53, %v12409_v1  ;;  %v8677_v31 = vpack.i.bf16 %v12406_v47, %v12394_v17  ;;  %v5925_v13 = vmul.f32 %v12406_v47, %v11471_v23  ;;  %v5930_v4 = vmul.f32 %v12406_v47, %v11389_v34 }
0x2382   : > { %v5931_v3 = vmul.f32 %v12409_v1, %v11379_v32  ;;  %v6130_v18 = vpack.c.bf16 %v5924_v57, %v5922_v8  ;;  %v8692_v52 = vpack.i.bf16 %v5929_v30, %v5926_v42  ;;  %v8702_v46 = vpack.i.bf16 %v5934_v16, %v5933_v0 }
0x2383   : > { %8688 = vrot.lane.b32.xlu0 %v12417_v11, %s10227_s11  ;;  %8678 = vrot.lane.b32.xlu1 %v8677_v31, %s10227_s11  ;;  %v6131_v35 = vpack.c.bf16 %v5925_v13, %v5923_v2  ;;  %v5936_v40 = vmul.f32 %v12406_v47, %v11384_v33  ;;  %v5935_v45 = vmul.f32 %v12397_v53, %v11359_v22 }
0x2384   : > { %v8697_v14 = vpack.i.bf16 %v5931_v3, %v5930_v4  ;;  %v5937_v20 = vmul.f32 %v12409_v1, %v11371_v27  ;;  %v5942_v62 = vmul.f32 %v12406_v47, %v11406_v43  ;;  %v8717_v54 = vpack.i.bf16 %v5940_v38, %v5939_v51 }
0x2385   : > { %6171 = vmatprep.subr.bf16.mxu0 %v6131_v35  ;;  %v8707_v60 = vpack.i.bf16 %v5936_v40, %v5932_v37  ;;  %v5941_v56 = vmul.f32 %v12397_v53, %v11393_v36  ;;  %v5943_v2 = vmul.f32 %v12409_v1, %v11401_v41  ;;  %v5945_v55 = vmul.f32 %v12384_v21, %v11421_v50 }
0x2386   : > { %6172 = vmatpush1.bf16.msra.mxu0 %v6130_v18  ;;  %v8712_v44 = vpack.i.bf16 %v5935_v45, %v5937_v20  ;;  %v8722_v39 = vpack.i.bf16 %v5942_v62, %v5938_v10  ;;  %v5946_v57 = vmul.f32 %v12387_v29, %v11415_v49  ;;  %v5948_v25 = vmul.f32 %v12406_v47, %v11421_v50  ;;  %v12947_v20 = vld [vmem:[#allocation134_spill] sm:$0xff] }
0x2387   : > { %8683 = vrot.lane.b32.xlu1 %v8682_v5, %s10228_s12  ;;  %8698 = vrot.lane.b32.xlu0 %v8697_v14, %s10228_s12  ;;  %v8737_v13 = vpack.i.bf16 %v5941_v56, %v5943_v2  ;;  %v5949_v8 = vmul.f32 %v12409_v1, %v11415_v49  ;;  %v5947_v3 = vmul.f32 %v12397_v53, %v11413_v48  ;;  %v12948_v56 = vld [vmem:[#allocation135_spill] sm:$0xff] }
0x2388   : > { %v8727_v4 = vpack.i.bf16 %v5946_v57, %v5945_v55  ;;  %v5944_v35 = vmul.f32 %v12394_v17, %v11413_v48  ;;  %v5951_v5 = vmul.f32 %v12384_v21, %v11439_v63  ;;  %v5952_v14 = vmul.f32 %v12387_v29, %v11429_v58  ;;  %v12949_v57 = vld [vmem:[#allocation136_spill] sm:$0xff] }
0x2389   : > { %v8742_v18 = vpack.i.bf16 %v5949_v8, %v5948_v25  ;;  %v5954_v16 = vmul.f32 %v12406_v47, %v11439_v63  ;;  %v5955_v42 = vmul.f32 %v12409_v1, %v11429_v58  ;;  %v5950_v21 = vmul.f32 %v12394_v17, %v11433_v59  ;;  %v5897_v47 = vld [vmem:[#allocation59] sm:$0xff]  ;;  %v12504_v1 = vld [vmem:[#allocation58] sm:$0xff] }
0x238a   : > { %v8732_v30 = vpack.i.bf16 %v5947_v3, %v5944_v35  ;;  %v8762_v0 = vpack.i.bf16 %v5952_v14, %v5951_v5 }
0x238b   : > { %8693 = vrot.lane.b32.xlu1 %v8692_v52, %s10228_s12  ;;  %8703 = vrot.lane.b32.xlu0 %v8702_v46, %s12939_s6  ;;  %v5953_v52 = vmul.f32 %v12397_v53, %v11433_v59  ;;  %v8767_v29 = vpack.i.bf16 %v5955_v42, %v5954_v16  ;;  %v7191_v53 = vcombine.high %v12504_v1, %v12504_v1 }
0x238d   : > { %7193 = vmatprep.mubr.msk.bf16.mxu0 %vm6167_vm14, %v7191_v53  ;;  %vm12973_vm14 = vmmov %vm12970_vm1 }
0x238f   : > { %8708 = vrot.lane.b32.xlu1 %v8707_v60, %s12939_s6  ;;  %8713 = vrot.lane.b32.xlu0 %v8712_v44, %s12939_s6 }
0x2393   : > { %8718 = vrot.lane.b32.xlu1 %v8717_v54, %s12941_s3  ;;  %8723 = vrot.lane.b32.xlu0 %v8722_v39, %s12941_s3 }
0x2397   : > { %8738 = vrot.lane.b32.xlu1 %v8737_v13, %s12941_s3  ;;  %8728 = vrot.lane.b32.xlu0 %v8727_v4, %s12944_s14 }
0x239b   : > { %8743 = vrot.lane.b32.xlu1 %v8742_v18, %s12944_s14  ;;  %8733 = vrot.lane.b32.xlu0 %v8732_v30, %s12944_s14  ;;  %v12950_v30 = vld [vmem:[#allocation137_spill] sm:$0xff] }
0x239f   : > { %8748 = vrot.lane.b32.xlu1 %v12391_v12, %s12945_s2  ;;  %8753 = vrot.lane.b32.xlu0 %v8677_v31, %s12945_s2  ;;  %v8772_v12 = vpack.i.bf16 %v5953_v52, %v5950_v21 }
0x23a3   : > { %8758 = vrot.lane.b32.xlu1 %v12417_v11, %s12945_s2  ;;  %8763 = vrot.lane.b32.xlu0 %v8762_v0, %s12946_s8 }
0x23a7   : > { %8768 = vrot.lane.b32.xlu1 %v8767_v29, %s12946_s8  ;;  %8773 = vrot.lane.b32.xlu0 %v8772_v12, %s12946_s8 }
0x23ab   : > { %6158 = vperm.xlu1 %8111, %v5897_v47  }
0x23f1   : > { %v8674_v11 = vpop.permute.xlu0 %8673 }
0x23f2   : > { %v8676_v31 = vunpack.i.h.bf16 %v8674_v11  ;;  %v8675_v46 = vunpack.i.l.bf16 %v8674_v11 }
0x23f4   : > { %v5973_v17 = vsel %vm2006_vm6, %v8675_v46, %v8676_v31 }
0x23f5   : > { %v8689_v40 = vpop.permute.xlu0 %8688  ;;  %v8679_v45 = vpop.permute.xlu1 %8678  ;;  %v6133_v37 = vpack.c.bf16 %v5973_v17, %v12947_v20  ;;  %v12951_v17 = vld [vmem:[#allocation138_spill] sm:$0xff] }
0x23f6   : > { %v8691_v51 = vunpack.i.h.bf16 %v8689_v40  ;;  %v8690_v38 = vunpack.i.l.bf16 %v8689_v40  ;;  %v8681_v60 = vunpack.i.h.bf16 %v8679_v45  ;;  %v8680_v44 = vunpack.i.l.bf16 %v8679_v45 }
0x23f7   : > { %6173 = vmatprep.subr.bf16.mxu0 %v6133_v37 }
0x23f8   : > { %v5972_v62 = vsel %vm2006_vm6, %v8680_v44, %v8675_v46  ;;  %v5975_v10 = vsel %vm2006_vm6, %v8681_v60, %v8690_v38  ;;  %v5974_v54 = vsel %vm2006_vm6, %v8691_v51, %v8681_v60  ;;  %v12952_v44 = vld [vmem:[#allocation139_spill] sm:$0xff] }
0x23f9   : > { %v6132_v39 = vpack.c.bf16 %v5972_v62, %v12948_v56  ;;  %v8684_v2 = vpop.permute.xlu1 %8683  ;;  %v8699_v55 = vpop.permute.xlu0 %8698  ;;  %v6135_v25 = vpack.c.bf16 %v12949_v57, %v5975_v10  ;;  %v6134_v5 = vpack.c.bf16 %v12950_v30, %v5974_v54  ;;  %v12953_v56 = vld [vmem:[#allocation140_spill] sm:$0xff] }
0x23fa   : > { %v8686_v13 = vunpack.i.h.bf16 %v8684_v2  ;;  %v8685_v4 = vunpack.i.l.bf16 %v8684_v2  ;;  %v8701_v8 = vunpack.i.h.bf16 %v8699_v55  ;;  %v8700_v3 = vunpack.i.l.bf16 %v8699_v55 }
0x23fb   : > { %6174 = vmatpush1.bf16.msra.mxu0 %v6132_v39 }
0x23fc   : > { %6175 = vmatprep.subr.bf16.mxu0 %v6135_v25  ;;  %v5999_v35 = vsel %vm2020_vm8, %v8685_v4, %v8686_v13  ;;  %v6001_v18 = vsel %vm2020_vm8, %v8700_v3, %v8701_v8  ;;  %v12954_v25 = vld [vmem:[#allocation141_spill] sm:$0xff] }
0x23fd   : > { %v8694_v14 = vpop.permute.xlu1 %8693  ;;  %v8704_v0 = vpop.permute.xlu0 %8703  ;;  %v6137_v16 = vpack.c.bf16 %v6001_v18, %v5999_v35 }
0x23fe   : > { %v8696_v42 = vunpack.i.h.bf16 %v8694_v14  ;;  %v8695_v52 = vunpack.i.l.bf16 %v8694_v14  ;;  %v8706_v21 = vunpack.i.h.bf16 %v8704_v0  ;;  %v8705_v29 = vunpack.i.l.bf16 %v8704_v0 }
0x23ff   : > { %6176 = vmatpush1.bf16.msra.mxu0 %v6134_v5 }
0x2400   : > { %v5998_v12 = vsel %vm2020_vm8, %v8695_v52, %v8685_v4  ;;  %v6000_v47 = vsel %vm2020_vm8, %v8696_v42, %v8700_v3  ;;  %6177 = vmatprep.subr.bf16.mxu0 %v6137_v16  ;;  %v6025_v53 = vsel %vm2037_vm7, %v8705_v29, %v8706_v21  ;;  %v12955_v42 = vld [vmem:[#allocation133_spill] sm:$0xff] }
0x2401   : > { %v6136_v11 = vpack.c.bf16 %v6000_v47, %v5998_v12  ;;  %v8709_v31 = vpop.permute.xlu1 %8708  ;;  %v8714_v46 = vpop.permute.xlu0 %8713  ;;  %v6139_v40 = vpack.c.bf16 %v6025_v53, %v12951_v17  ;;  %v12956_v47 = vld [vmem:[#allocation132_spill] sm:$0xff] }
0x2402   : > { %v8711_v45 = vunpack.i.h.bf16 %v8709_v31  ;;  %v8710_v20 = vunpack.i.l.bf16 %v8709_v31  ;;  %v8716_v37 = vunpack.i.h.bf16 %v8714_v46  ;;  %v8715_v51 = vunpack.i.l.bf16 %v8714_v46 }
0x2403   : > { %6178 = vmatpush1.bf16.msra.mxu0 %v6136_v11 }
0x2404   : > { %v6024_v38 = vsel %vm2037_vm7, %v8710_v20, %v8705_v29  ;;  %6179 = vmatprep.subr.bf16.mxu0 %v6139_v40  ;;  %v6027_v60 = vsel %vm2037_vm7, %v8711_v45, %v8715_v51  ;;  %v6026_v2 = vsel %vm2037_vm7, %v8716_v37, %v8711_v45  ;;  %v12957_v40 = vld [vmem:[#allocation142_spill] sm:$0xff] }
0x2405   : > { %v6138_v62 = vpack.c.bf16 %v6024_v38, %v12952_v44  ;;  %v8719_v10 = vpop.permute.xlu1 %8718  ;;  %v8724_v54 = vpop.permute.xlu0 %8723  ;;  %v6141_v39 = vpack.c.bf16 %v12953_v56, %v6027_v60  ;;  %v6140_v13 = vpack.c.bf16 %v12954_v25, %v6026_v2 }
0x2406   : > { %v8721_v55 = vunpack.i.h.bf16 %v8719_v10  ;;  %v8720_v57 = vunpack.i.l.bf16 %v8719_v10  ;;  %v8725_v3 = vunpack.i.l.bf16 %v8724_v54  ;;  %v8726_v30 = vunpack.i.h.bf16 %v8724_v54 }
0x2407   : > { %6180 = vmatpush1.bf16.msra.mxu0 %v6138_v62 }
0x2408   : > { %6181 = vmatprep.subr.bf16.mxu0 %v6141_v39  ;;  %v6051_v18 = vsel %vm2055_vm12, %v8720_v57, %v8721_v55  ;;  %v6050_v0 = vsel %vm2055_vm12, %v8725_v3, %v8720_v57 }
0x2409   : > { %v8739_v4 = vpop.permute.xlu1 %8738  ;;  %v8729_v8 = vpop.permute.xlu0 %8728  ;;  %v6145_v52 = vpack.c.bf16 %v6051_v18, %v12955_v42  ;;  %v6144_v61 = vpack.c.bf16 %v6050_v0, %v12956_v47 }
0x240a   : > { %v8740_v35 = vunpack.i.l.bf16 %v8739_v4  ;;  %v8741_v16 = vunpack.i.h.bf16 %v8739_v4  ;;  %v8731_v26 = vunpack.i.h.bf16 %v8729_v8  ;;  %v12965_v4 = vld [vmem:[#allocation145_spill] sm:$0xff] }
0x240b   : > { %6182 = vmatpush1.bf16.msra.mxu0 %v6140_v13 }
0x240c   : > { %6183 = vmatprep.subr.bf16.mxu0 %v6143_v6  ;;  %v6053_v12 = vsel %vm2055_vm12, %v8726_v30, %v8740_v35  ;;  %v8730_v6 = vunpack.i.l.bf16 %v8729_v8  ;;  %v6052_v31 = vsel %vm2055_vm12, %v8741_v16, %v8726_v30 }
0x240d   : > { %v8744_v5 = vpop.permute.xlu1 %8743  ;;  %v8734_v14 = vpop.permute.xlu0 %8733  ;;  %v6147_v45 = vpack.c.bf16 %v12957_v40, %v6053_v12  ;;  %v7190_v40 = vcombine.low %v12504_v1, %v12504_v1 }
0x240e   : > { %v8746_v21 = vunpack.i.h.bf16 %v8744_v5  ;;  %v8745_v29 = vunpack.i.l.bf16 %v8744_v5  ;;  %v8736_v46 = vunpack.i.h.bf16 %v8734_v14  ;;  %v8735_v17 = vunpack.i.l.bf16 %v8734_v14  ;;  %v12967_v5 = vld [vmem:[#allocation147_spill] sm:$0xff] }
0x240f   : > { %6184 = vmatpush1.bf16.msra.mxu0 %v6142_v15  ;;  %v6146_v15 = vpack.c.bf16 %v12959_v9, %v6052_v31  ;;  %v6077_v60 = vsel %vm12960_vm4, %v8730_v6, %v8731_v26  ;;  %vm12976_vm4 = vcmask 1043456  }
0x2410   : > { %6185 = vmatprep.subr.bf16.mxu0 %v6145_v52  ;;  %v6079_v7 = vsel %vm12958_vm2, %v8745_v29, %v8746_v21  ;;  %v6078_v44 = vsel %vm12961_vm5, %v8736_v46, %v8745_v29  ;;  %v6076_v62 = vsel %vm12962_vm15, %v8735_v17, %v8730_v6  ;;  %v12969_v29 = vld [vmem:[#allocation146_spill] sm:$0xff]  ;;  %vm12974_vm2 = vmmov %vm12970_vm1  ;;  %v12975_v17 = vld [vmem:[#allocation148_spill] sm:$0xff] }
0x2411   : > { %v8749_v53 = vpop.permute.xlu1 %8748  ;;  %v8754_v11 = vpop.permute.xlu0 %8753  ;;  %v6149_v54 = vpack.c.bf16 %v6079_v7, %v6077_v60  ;;  %v6148_v2 = vpack.c.bf16 %v6078_v44, %v6076_v62 }
0x2412   : > { %v8751_v20 = vunpack.i.h.bf16 %v8749_v53  ;;  %v8750_v37 = vunpack.i.l.bf16 %v8749_v53  ;;  %v8755_v10 = vunpack.i.l.bf16 %v8754_v11  ;;  %v8756_v55 = vunpack.i.h.bf16 %v8754_v11 }
0x2413   : > { %6186 = vmatpush1.bf16.msra.mxu0 %v6144_v61  ;;  %v12971_v61 = vld [vmem:[#allocation144_spill] sm:$0xff] }
0x2414   : > { %6187 = vmatprep.subr.bf16.mxu0 %v6147_v45  ;;  %v6097_v39 = vsel %vm12963_vm9, %v8750_v37, %v8751_v20  ;;  %v6096_v25 = vsel %vm12964_vm10, %v8755_v10, %v8750_v37  ;;  %v12977_v45 = vld [vmem:[#allocation149_spill] sm:$0xff]  ;;  %vm12984_vm10 = vmmov %vm12976_vm4 }
0x2415   : > { %v8759_v51 = vpop.permute.xlu1 %8758  ;;  %v8764_v38 = vpop.permute.xlu0 %8763  ;;  %v6151_v8 = vpack.c.bf16 %v6097_v39, %v12965_v4  ;;  %v6150_v14 = vpack.c.bf16 %v6096_v25, %v12967_v5 }
0x2416   : > { %v8760_v56 = vunpack.i.l.bf16 %v8759_v51  ;;  %v8761_v13 = vunpack.i.h.bf16 %v8759_v51  ;;  %v8766_v0 = vunpack.i.h.bf16 %v8764_v38  ;;  %v8765_v16 = vunpack.i.l.bf16 %v8764_v38 }
0x2417   : > { %6188 = vmatpush1.bf16.msra.mxu0 %v6146_v15 }
0x2418   : > { %6189 = vmatprep.subr.bf16.mxu0 %v6149_v54  ;;  %v6099_v30 = vsel %vm12966_vm11, %v8756_v55, %v8760_v56  ;;  %v6098_v42 = vsel %vm12968_vm13, %v8761_v13, %v8756_v55  ;;  %v6123_v6 = vsel %vm12972_vm3, %v8765_v16, %v8766_v0  ;;  %vm12985_vm11 = vmmov %vm12976_vm4  ;;  %vm12986_vm13 = vcmask 588800  }
0x2419   : > { %v8769_v57 = vpop.permute.xlu1 %8768  ;;  %v8774_v18 = vpop.permute.xlu0 %8773  ;;  %v6153_v12 = vpack.c.bf16 %v12969_v29, %v6099_v30  ;;  %v6152_v26 = vpack.c.bf16 %v12971_v61, %v6098_v42 }
0x241a   : > { %v8771_v3 = vunpack.i.h.bf16 %v8769_v57  ;;  %v8770_v35 = vunpack.i.l.bf16 %v8769_v57  ;;  %v8776_v52 = vunpack.i.h.bf16 %v8774_v18  ;;  %v8775_v21 = vunpack.i.l.bf16 %v8774_v18 }
0x241b   : > { %6190 = vmatpush1.bf16.msra.mxu0 %v6148_v2 }
0x241c   : > { %6191 = vmatprep.subr.bf16.mxu0 %v6151_v8  ;;  %v6125_v47 = vsel %vm12970_vm1, %v8770_v35, %v8771_v3  ;;  %v6124_v53 = vsel %vm12973_vm14, %v8776_v52, %v8770_v35  ;;  %v6122_v11 = vsel %vm12974_vm2, %v8775_v21, %v8765_v16  ;;  %vm6414_vm14 = vcmask 64512  }
0x241d   : > { %v6155_v31 = vpack.c.bf16 %v6125_v47, %v6123_v6  ;;  %v6154_v46 = vpack.c.bf16 %v6124_v53, %v6122_v11 }
0x241f   : > { %6192 = vmatpush1.bf16.msra.mxu0 %v6150_v14  ;;  %v6408_v14 = vld [vmem:[#allocation65] sm:$0x7] }
0x2420   : > { %6193 = vmatprep.subr.bf16.mxu0 %v6153_v12 }
0x2423   : > { %6194 = vmatpush1.bf16.msra.mxu0 %v6152_v26 }
0x2424   : > { %6195 = vmatprep.subr.bf16.mxu0 %v6155_v31 }
0x2427   : > { %6196 = vmatpush1.bf16.msra.mxu0 %v6154_v46 }
0x2428   : > { %7192 = vmatprep.subr.msk.bf16.mxu0 %vm12976_vm4, %v12975_v17 }
0x242a   : > { %v6159_v20 = vpop.permute.xlu1 %6158 }
0x242b   : > { %6198 = vmatpush1.bf16.msra.mxu0 %v12977_v45 }
0x242e   : > { %6204 = vmatmul.mubr.bf16.vlgmr.msra.gmra.mrb[56].mxu0 %v7190_v40 }
0x2501   : > { %v6205_v37 = vpop.f32.mrb[56].mxu0 }
0x2502   : > { %v6206_v7 = vadd.f32 %v6205_v37, %v6159_v20  ;;  %v6207_v9 = vpop.f32.mrb[57].mxu0 }
0x2503   : > { %v6208_v15 = vadd.f32 %v6207_v9, %v6159_v20  ;;  %v6209_v51 = vpop.f32.mrb[58].mxu0 }
0x2504   : > { %vm6212_vm5 = vcmp.ge.f32.partialorder %v6206_v7, 0.0  ;;  %v6214_v38 = vmul.f32 0.01, %v6206_v7  ;;  %v6210_v60 = vpop.f32.mrb[59].mxu0 }
0x2505   : > { %vm6213_vm15 = vcmp.ge.f32.partialorder %v6208_v15, 0.0  ;;  %v6215_v44 = vmul.f32 0.01, %v6208_v15 }
0x2506   : > { %v12563_v62 = vsel %vm6212_vm5, %v6206_v7, %v6214_v38 }
0x2507   : > { %6222 = vrot.lane.b32.xlu0 %v12563_v62, %s12943_s7  ;;  %v12567_v1 = vsel %vm6213_vm15, %v6208_v15, %v6215_v44 }
0x2508   : > { %6224 = vrot.lane.b32.xlu1 %v12567_v1, %s12943_s7  ;;  %s6503_s7 = scalar_lea.sflag [#allocation4], %s11209_s0 }
0x2579   : > { %v6223_v10 = vpop.permute.xlu0 %6222 }
0x257a   : > { %v6230_v54 = vsel %vm1868_vm0, 0.0, %v6223_v10  ;;  %v6225_v56 = vpop.permute.xlu1 %6224 }
0x257b   : > { %v6226_v39 = vsel %vm1868_vm0, %v6223_v10, %v6225_v56  ;;  %v6231_v2 = vsel %vm1868_vm0, %v6225_v56, 0.0  ;;  %6251 = vrot.lane.b32.xlu1 %v6230_v54, %s10227_s11  ;;  %v6237_v57 = vmul.f32 %v6230_v54, %v11359_v22  ;;  %v6234_v25 = vmul.f32 %v6230_v54, %v11373_v28  ;;  %vm12978_vm0 = vmmov %vm12963_vm9 }
0x257c   : > { %v8777_v55 = vpack.i.bf16 %v6231_v2, %v6226_v39  ;;  %v6235_v13 = vmul.f32 %v6226_v39, %v11389_v34  ;;  %v6236_v4 = vmul.f32 %v6231_v2, %v11379_v32  ;;  %v6240_v8 = vmul.f32 %v6230_v54, %v11393_v36  ;;  %vm12983_vm9 = vmmov %vm12970_vm1 }
0x257d   : > { %v6238_v3 = vmul.f32 %v6226_v39, %v11384_v33  ;;  %v6239_v35 = vmul.f32 %v6231_v2, %v11371_v27  ;;  %v6243_v28 = vmul.f32 %v6230_v54, %v11413_v48  ;;  %v6241_v32 = vmul.f32 %v6226_v39, %v11406_v43 }
0x257e   : > { %8778 = vrot.lane.b32.xlu0 %v8777_v55, %s10227_s11  ;;  %v8782_v22 = vpack.i.bf16 %v6236_v4, %v6235_v13  ;;  %v6242_v34 = vmul.f32 %v6231_v2, %v11401_v41  ;;  %v6244_v33 = vmul.f32 %v6226_v39, %v11421_v50  ;;  %v6245_v36 = vmul.f32 %v6231_v2, %v11415_v49  ;;  %v6219_v49 = vld [vmem:[#allocation62] sm:$0xff]  ;;  %s12987_s11 = sld [smem:[#allocation124_spill]] }
0x257f   : > { %6277 = vrot.lane.b32.xlu1 %v6237_v57, %s12939_s6  ;;  %v8787_v18 = vpack.i.bf16 %v6239_v35, %v6238_v3  ;;  %v6246_v48 = vmul.f32 %v6230_v54, %v11433_v59  ;;  %v6247_v43 = vmul.f32 %v6226_v39, %v11439_v63  ;;  %v6248_v41 = vmul.f32 %v6231_v2, %v11429_v58 }
0x2580   : > { %v8797_v27 = vpack.i.bf16 %v6242_v34, %v6241_v32  ;;  %v8802_v30 = vpack.i.bf16 %v6245_v36, %v6244_v33  ;;  %v6232_v63 = vmul.f32 %v6230_v54, %v11467_v24  ;;  %v6233_v58 = vmul.f32 %v6226_v39, %v11471_v23  ;;  %v6218_v36 = vld [vmem:[#allocation61] sm:$0xf] }
0x2581   : > { %v8807_v5 = vpack.i.bf16 %v6247_v43, %v6246_v48 }
0x2582   : > { %6264 = vrot.lane.b32.xlu0 %v6234_v25, %s10228_s12 }
0x2583   : > { %6290 = vrot.lane.b32.xlu1 %v6240_v8, %s12941_s3 }
0x2586   : > { %8783 = vrot.lane.b32.xlu0 %v8782_v22, %s10228_s12  ;;  %s12988_s12 = sld [smem:[#allocation130_spill]] }
0x2587   : > { %8788 = vrot.lane.b32.xlu1 %v8787_v18, %s12939_s6  ;;  %s1853_s6 = scalar_lea.vmem [#allocation67], %s12989_s13 }
0x2588   : > { %s6517_s15 = sshll.u32 %s1853_s6, 4  ;;  %s12631_s15 = int_to_ptr.vmem [resolvable:$true] %s6517_s15 }
0x258a   : > { %6303 = vrot.lane.b32.xlu0 %v6243_v28, %s12944_s14 }
0x258b   : > { %8793 = vrot.lane.b32.xlu1 %v8777_v55, %s12945_s2 }
0x258c   : > { %p12990_p12 = scmp.ne.s32.totalorder %s12988_s12, 0 }
0x258e   : > { %8798 = vrot.lane.b32.xlu0 %v8797_v27, %s12941_s3  ;;  %s12629_s3 = scalar_lea.hbm %s12987_s11, %s7203_s1 }
0x258f   : > { %6313 = vrot.lane.b32.xlu1 %v6230_v54, %s12945_s2  ;;  %s9981_s2 = sshll.u32 %s10249_s22, 4  ;;  %s9982_s2 = int_to_ptr.vmem [resolvable:$false] %s9981_s2 }
0x2590   : > { %p9984_p8 = scmp.lt.s32.totalorder %s12631_s15, %s9982_s2 }
0x2592   : > { %8803 = vrot.lane.b32.xlu0 %v8802_v30, %s12944_s14  ;;  %s9977_s14 = scalar_lea.vmem %s12631_s15, 128 }
0x2593   : > { %6330 = vrot.lane.b32.xlu1 %v6248_v41, %s12946_s8  ;;  %p9978_p6 = scmp.ne.s32.totalorder %s12631_s15, %s9977_s14 }
0x2595   : > { %p9979_p0 = pnand %p9978_p6, %p12990_p12 }
0x2596   : > { %8808 = vrot.lane.b32.xlu0 %v8807_v5, %s12946_s8  ;;  %s9983_s8 = scalar_lea.vmem %s9982_s2, 256 }
0x2597   : > { %6411 = vperm.xlu1 %8111, %v6408_v14   ;;  %p9980_p5 = pneg %p9979_p0  ;;  %p9985_p9 = scmp.lt.s32.totalorder %s9983_s8, %s9977_s14 }
0x2599   : > { %p9986_p10 = por %p9985_p9, %p9984_p8 }
0x259a   : > { %6348 = vperm.xlu0 %8040, %v6219_v49  }
0x259b   : > { %p9987_p11 = pnand %p9986_p10, %p9980_p5 }
0x25ed   : > { %v6252_v50 = vpop.permute.xlu1 %6251 }
0x25f0   : > { %v8779_v0 = vpop.permute.xlu0 %8778 }
0x25f1   : > { %v8781_v16 = vunpack.i.h.bf16 %v8779_v0  ;;  %v8780_v42 = vunpack.i.l.bf16 %v8779_v0  ;;  %v6278_v59 = vpop.permute.xlu1 %6277 }
0x25f3   : > { %v6257_v52 = vsel %vm2006_vm6, %v6252_v50, %v8780_v42  ;;  %v6258_v21 = vsel %vm2006_vm6, %v8780_v42, %v8781_v16  ;;  %vm12979_vm6 = vcmask 785408   ;;  %v6407_v42 = vld [vmem:[#allocation64] sm:$0x7] }
0x25f4   : > { %v6336_v29 = vpack.c.bf16 %v6257_v52, %v6232_v63  ;;  %v6265_v12 = vpop.permute.xlu0 %6264  ;;  %v6337_v47 = vpack.c.bf16 %v6258_v21, %v6233_v58 }
0x25f5   : > { %v6291_v61 = vpop.permute.xlu1 %6290 }
0x25f6   : > { %6360 = vmatprep.subr.bf16.mxu1 %v6337_v47 }
0x25f7   : > { %6361 = vmatpush1.bf16.msra.mxu1 %v6336_v29 }
0x25f8   : > { %v8784_v26 = vpop.permute.xlu0 %8783 }
0x25f9   : > { %v8786_v6 = vunpack.i.h.bf16 %v8784_v26  ;;  %v8785_v53 = vunpack.i.l.bf16 %v8784_v26  ;;  %v8789_v11 = vpop.permute.xlu1 %8788 }
0x25fa   : > { %v8791_v31 = vunpack.i.h.bf16 %v8789_v11  ;;  %v8790_v46 = vunpack.i.l.bf16 %v8789_v11 }
0x25fb   : > { %v6270_v24 = vsel %vm2020_vm8, %v6265_v12, %v8785_v53  ;;  %v6271_v23 = vsel %vm2020_vm8, %v8785_v53, %v8786_v6  ;;  %vm12981_vm8 = vmmov %vm12978_vm0 }
0x25fc   : > { %v6283_v17 = vsel %vm2037_vm7, %v6278_v59, %v8790_v46  ;;  %v6304_v40 = vpop.permute.xlu0 %6303  ;;  %v6284_v45 = vsel %vm2037_vm7, %v8790_v46, %v8791_v31  ;;  %vm12980_vm7 = vmmov %vm12979_vm6 }
0x25fd   : > { %v6338_v20 = vpack.c.bf16 %v6283_v17, %v6270_v24  ;;  %v6339_v37 = vpack.c.bf16 %v6284_v45, %v6271_v23  ;;  %v8794_v7 = vpop.permute.xlu1 %8793 }
0x25fe   : > { %v8796_v38 = vunpack.i.h.bf16 %v8794_v7  ;;  %v8795_v60 = vunpack.i.l.bf16 %v8794_v7 }
0x25ff   : > { %6362 = vmatprep.subr.bf16.mxu1 %v6339_v37 }
0x2600   : > { %v8799_v9 = vpop.permute.xlu0 %8798  ;;  %6363 = vmatpush1.bf16.msra.mxu1 %v6338_v20  ;;  %v6320_v8 = vsel %vm12981_vm8, %v8795_v60, %v8796_v38 }
0x2601   : > { %v8801_v15 = vunpack.i.h.bf16 %v8799_v9  ;;  %v8800_v51 = vunpack.i.l.bf16 %v8799_v9  ;;  %v6314_v56 = vpop.permute.xlu1 %6313 }
0x2602   : > { %v6319_v25 = vsel %vm12978_vm0, %v6314_v56, %v8795_v60 }
0x2603   : > { %v6296_v44 = vsel %vm2055_vm12, %v6291_v61, %v8800_v51  ;;  %v6297_v10 = vsel %vm2055_vm12, %v8800_v51, %v8801_v15  ;;  %vm12982_vm12 = vmmov %vm12970_vm1 }
0x2604   : > { %v6340_v54 = vpack.c.bf16 %v6296_v44, %v12563_v62  ;;  %v8804_v39 = vpop.permute.xlu0 %8803  ;;  %v6341_v2 = vpack.c.bf16 %v6297_v10, %v12567_v1 }
0x2605   : > { %v8806_v55 = vunpack.i.h.bf16 %v8804_v39  ;;  %v8805_v57 = vunpack.i.l.bf16 %v8804_v39  ;;  %v6331_v28 = vpop.permute.xlu1 %6330 }
0x2606   : > { %6364 = vmatprep.subr.bf16.mxu1 %v6341_v2 }
0x2607   : > { %v6309_v13 = vsel %vm12979_vm6, %v6304_v40, %v8805_v57  ;;  %6365 = vmatpush1.bf16.msra.mxu1 %v6340_v54  ;;  %v6310_v4 = vsel %vm12980_vm7, %v8805_v57, %v8806_v55 }
0x2608   : > { %v6342_v3 = vpack.c.bf16 %v6319_v25, %v6309_v13  ;;  %v8809_v35 = vpop.permute.xlu0 %8808  ;;  %v6343_v22 = vpack.c.bf16 %v6320_v8, %v6310_v4 }
0x2609   : > { %v8811_v62 = vunpack.i.h.bf16 %v8809_v35  ;;  %v8810_v18 = vunpack.i.l.bf16 %v8809_v35 }
0x260a   : > { %6366 = vmatprep.subr.bf16.mxu1 %v6343_v22 }
0x260b   : > { %v6333_v1 = vsel %vm12982_vm12, %v8811_v62, %v6331_v28  ;;  %6367 = vmatpush1.bf16.msra.mxu1 %v6342_v3  ;;  %v6332_v32 = vsel %vm12983_vm9, %v8810_v18, %v8811_v62 }
0x260c   : > { %v6345_v34 = vpack.c.bf16 %v6333_v1, %v6333_v1  ;;  %v6344_v27 = vpack.c.bf16 %v6332_v32, %v6332_v32 }
0x260e   : > { %7194 = vmatprep.subr.msk.bf16.mxu1 %vm12984_vm10, %v6345_v34  ;;  %v6355_v33 = vsel %vm12985_vm11, %v6344_v27, 0 }
0x260f   : > { %6369 = vmatpush1.bf16.msra.mxu1 %v6355_v33 }
0x2612   : > { %7195 = vmatmul.mubr.msk.bf16.vlgmr.msra.gmra.mrb[64].mxu1 %vm12986_vm13, %v6218_v36 }
0x2613   : > { %6482 = vmatprep.mubr.f32.mxu1 %v12942_v19 }
0x2616   : > { %v6412_v19 = vpop.permute.xlu1 %6411 }
0x2619   : > { %v6349_v30 = vpop.permute.xlu0 %6348 }
0x26e5   : > { %v6394_v48 = vpop.f32.mrb[64].mxu1 }
0x26e6   : > { %v6395_v43 = vadd.f32 %v6394_v48, %v6349_v30  ;;  %v6396_v41 = vpop.f32.mrb[65].mxu1 }
0x26e7   : > { %v6397_v5 = vadd.f32 %v6396_v41, %v6349_v30  ;;  %v6398_v14 = vpop.f32.mrb[66].mxu1 }
0x26e8   : > { %v6403_v49 = vmul.f32 0.01, %v6395_v43  ;;  %v6399_v50 = vpop.f32.mrb[67].mxu1  ;;  %vm6401_vm1 = vcmp.ge.f32.partialorder %v6395_v43, 0.0 }
0x26e9   : > { %v6404_v0 = vmul.f32 0.01, %v6397_v5  ;;  %vm6402_vm3 = vcmp.ge.f32.partialorder %v6397_v5, 0.0 }
0x26ea   : > { %v6405_v59 = vsel %vm6401_vm1, %v6395_v43, %v6403_v49 }
0x26eb   : > { %v6406_v16 = vsel %vm6402_vm3, %v6397_v5, %v6404_v0 }
0x26ec   : > { %6418 = vmatprep.subr.mxu1 %v6406_v16 }
0x26ed   : > { %6419 = vmatpush1.msra.mxu1 %v6405_v59 }
0x26ee   : > { %7196 = vmatmul.mubr.msk.f32.vlgmr.msra.gmra.mrb[62].mxu1 %vm6414_vm14, %v6407_v42 }
0x27c1   : > { %v6484_v63 = vpop.f32.mrb[62].mxu1 }
0x27c2   : > { %v6485_v58 = vadd.f32 %v6484_v63, %v6412_v19  ;;  %v6486_v52 = vpop.f32.mrb[63].mxu1 }
0x27c3   : > { %v6487_v21 = vadd.f32 %v6486_v52, %v6412_v19 }
0x27c4   : > { %v6489_v29 = vmul.f32 0.5, %v6485_v58 }
0x27c5   : > { %v6490_v12 = vmul.f32 0.5, %v6487_v21 }
0x27c6   : > { %8877 = vtanh.f32 %v6489_v29 }
0x27c7   : > { %8879 = vtanh.f32 %v6490_v12 }
0x27d0   : > { %v8878_v47 = vpop.eup %8877 }
0x27d1   : > { %v8880_v61 = vpop.eup %8879  ;;  %v6493_v26 = vadd.f32 1.0, %v8878_v47 }
0x27d2   : > { %v6494_v6 = vadd.f32 1.0, %v8880_v61 }
0x27d3   : > { %v6495_v53 = vmul.f32 0.5, %v6493_v26 }
0x27d4   : > { %v6496_v11 = vmul.f32 0.5, %v6494_v6 }
0x27d6   : > { %v6499_v31 = vcombine.low %v6495_v53, %v6496_v11 }
0x27d8   : > { %6501 = vst [vmem:[%s1853_s6] sm:$0x77] %v6499_v31 }
0x27d9   : > { %9990 = shalt.err (!%p9987_p11)
}
0x27da   : > { %s9991_s0 = scalar_lea.hbm %s12629_s3, 128  ;;  %s9995_s1 = scalar_lea.hbm %s12987_s11, 256 }
0x27db   : > { %p9992_p13 = scmp.ne.s32.totalorder %s12629_s3, %s9991_s0  ;;  %p9996_p7 = scmp.lt.u32.totalorder %s12629_s3, %s12987_s11 }
0x27dc   : > { %p9997_p2 = scmp.lt.u32.totalorder %s9995_s1, %s9991_s0  ;;  %p9999_p6 = scmp.lt.u32.totalorder %s9991_s0, %s12629_s3 }
0x27dd   : > { %p9993_p1 = pnand %p9992_p13, %p12990_p12 }
0x27de   : > { %p9998_p4 = por %p9997_p2, %p9996_p7 }
0x27df   : > { %p9994_p3 = pneg %p9993_p1 }
0x27e0   : > { %p10000_p0 = por %p9999_p6, %p9998_p4 }
0x27e2   : > { %p10001_p5 = pnand %p10000_p0, %p9994_p3 }
0x27e4   : > { %10004 = shalt.err (!%p10001_p5)
}
0x27e5   : > { %7760 = dma.vmem_to_hbm [thread:$0]  (%p12990_p12), %s12631_s15, 128, %s12629_s3, %s6503_s7  }
0x27e6 PF: > { %s12991_s13 = sld [smem:[#allocation125_spill]]  ;;  %s12992_s6 = sld [smem:[#allocation131_spill]] }
0x27e7   : > { %p12994_p9 = scmp.ge.s32.totalorder %s10127_s18, 2 }
0x27ec   : > { %s6529_s14 = sand.u32 1, %s12991_s13   ;;  %p12993_p8 = scmp.ne.s32.totalorder %s12992_s6, 0 }
0x27ed   : > { %s6530_s22 = scalar_lea.sflag [#allocation4], %s6529_s14 }
0x27ee   : > { %p7767_p10 = pnand %p12994_p9, %p12993_p8 }
0x27f0   : > { %10110 = dma.done.wait (!%p7767_p10), %s6530_s22, 128  }
0x27f1   : > { %10112 = vsyncadd (!%p7767_p10), %s6530_s22, 4294967168  ;;  %s12995_s18 = sld [smem:[#allocation127_spill]]  ;;  %s12996_s0 = sld [smem:[#allocation126_spill]] }
0x27f2   : > { %s12997_s2 = sld [smem:[#allocation128_spill]]  ;;  %s12998_s15 = smov %s10123_s16 }
0x27f7   : > { %p119_p11 = scmp.ge.s32.totalorder %s12995_s18, 4  }
0x27f8   : > { %s12999_s16 = smov %s12997_s2 }
0x27f9   :  { %121 = sbr.rel (!%p119_p11) target bundleno = 109 (0x6d), region = 439 }
0x2800   :  { %6535 = vsyncpa [#allocation3], 1 }
0x2801   :  { %6537 = vsyncpa [#allocation3 + $0x1], 1 }
0x2802   :  { %6538 = vsyncpa [#allocation6], 1 }
0x2803   :  { %6539 = vsyncpa [#allocation9], 1 }
0x2804   :  { %6540 = vsyncpa [#allocation12], 1 }
0x2805   :  { %6541 = vsyncpa [#allocation15], 1 }
0x2806   :  { %6542 = vsyncpa [#allocation18], 1 }
0x2807   :  { %6543 = vsyncpa [#allocation21], 1 }
0x2808   :  { %6544 = vsyncpa [#allocation24], 1 }
0x2809   :  { %6545 = vsyncpa [#allocation27], 1 }
0x280a   :  { %6546 = vsyncpa [#allocation30], 1 }
0x280b   :  { %6547 = vsyncpa [#allocation33], 1 }
0x280c   :  { %6548 = vsyncpa [#allocation36], 1 }
0x280d   :  { %6549 = vsyncpa [#allocation39], 1 }
0x280e   :  { %6550 = vsyncpa [#allocation42], 1 }
0x280f   :  { %6551 = vsyncpa [#allocation45], 1 }
0x2810   :  { %6552 = vsyncpa [#allocation48], 1 }
0x2811   :  { %6553 = vsyncpa [#allocation51], 1 }
0x2812   :  { %6554 = vsyncpa [#allocation54], 1 }
0x2813   :  { %6555 = vsyncpa [#allocation57], 1 }
0x2814   :  { %6556 = vsyncpa [#allocation60], 1 }
0x2815   :  { %6557 = vsyncpa [#allocation63], 1 }
0x2816   :  { %6558 = vsyncpa [#allocation66], 1 }
0x2817   :  { %6559 = vsyncpa [#allocation4], 1 }
0x2818   :  { %6561 = vsyncpa [#allocation4 + $0x1], 1 }

</bundles_post_ra>
